<compile_context>
chip_gen: v5e
topology: v5e:2x2
jax: 0.10.0
libtpu: 0.0.40
codegen_flags: <defaults>
</compile_context>

<pallas_src>
import functools

import jax
import jax.numpy as jnp
from jax.experimental import pallas as pl
from jax.experimental.pallas import tpu as pltpu

EPS = 1e-5                       # PyTorch BatchNorm3d default eps
VMEM_LIMIT = 32 * 1024 * 1024    # explicit scoped-VMEM budget, safe on v5e/v6e/v7x


# ---------------------------------------------------------------------------
# helpers
# ---------------------------------------------------------------------------
def _row_tile(P, cap=512):
    for t in (512, 256, 128, 64, 32, 16, 8):
        if t <= cap and P % t == 0:
            return t
    return P


def _grid_split(P, tile):
    T = P // tile
    outer = 2 if T % 2 == 0 else 1     # outer "parallel" axis for megacore
    return outer, T // outer


def _bn_scale_shift(sum_p, ssq_p, count, gamma, beta):
    """Fold batch statistics + affine params into per-channel scale/shift."""
    s = jnp.sum(sum_p, axis=0)          # (1, C)
    ss = jnp.sum(ssq_p, axis=0)         # (1, C)
    mean = s / count
    # TODO(synk): E[y^2]-mean^2 can lose precision when |mean| >> std; fine at
    # these activation scales (Welford across tiles would need extra plumbing).
    var = jnp.maximum(ss / count - mean * mean, 0.0)
    scale = gamma.reshape(1, -1).astype(jnp.float32) * jax.lax.rsqrt(var + EPS)
    shift = beta.reshape(1, -1).astype(jnp.float32) - mean * scale
    return scale, shift


# ---------------------------------------------------------------------------
# kernel 1: y = x @ w                 (+ per-channel sum/sumsq for next BN)
# kernel 2: y = relu(x*s + t) @ w     (BN-apply of previous layer fused in)
# ---------------------------------------------------------------------------
def _mm_stats_kernel(x_ref, w_ref, y_ref, sum_ref, ssq_ref):
    @pl.when(pl.program_id(1) == 0)
    def _init():
        sum_ref[...] = jnp.zeros_like(sum_ref)
        ssq_ref[...] = jnp.zeros_like(ssq_ref)

    y = jnp.dot(x_ref[...].astype(jnp.bfloat16), w_ref[...],
                preferred_element_type=jnp.float32)
    y_ref[...] = y.astype(y_ref.dtype)
    sum_ref[...] += jnp.sum(y, axis=0, keepdims=True)[None]
    ssq_ref[...] += jnp.sum(y * y, axis=0, keepdims=True)[None]


def _act_mm_stats_kernel(x_ref, s_ref, t_ref, w_ref, y_ref, sum_ref, ssq_ref):
    @pl.when(pl.program_id(1) == 0)
    def _init():
        sum_ref[...] = jnp.zeros_like(sum_ref)
        ssq_ref[...] = jnp.zeros_like(ssq_ref)

    a = jnp.maximum(x_ref[...].astype(jnp.float32) * s_ref[...] + t_ref[...], 0.0)
    y = jnp.dot(a.astype(jnp.bfloat16), w_ref[...],
                preferred_element_type=jnp.float32)
    y_ref[...] = y.astype(y_ref.dtype)
    sum_ref[...] += jnp.sum(y, axis=0, keepdims=True)[None]
    ssq_ref[...] += jnp.sum(y * y, axis=0, keepdims=True)[None]


def matmul_stats(x, w, scale=None, shift=None, *, row_cap=512):
    """relu(x*scale+shift) @ w (or x @ w if scale is None) + BN partial stats."""
    P, Cin = x.shape
    Cout = w.shape[1]
    TP = _row_tile(P, row_cap)
    GO, GI = _grid_split(P, TP)

    row_map = lambda i, j: (i * GI + j, 0)
    full_map = lambda i, j: (0, 0)
    stat_map = lambda i, j: (i, 0, 0)

    if scale is None:
        kernel = _mm_stats_kernel
        operands = (x, w)
        in_specs = [pl.BlockSpec((TP, Cin), row_map),
                    pl.BlockSpec((Cin, Cout), full_map)]
    else:
        kernel = _act_mm_stats_kernel
        operands = (x, scale, shift, w)
        in_specs = [pl.BlockSpec((TP, Cin), row_map),
                    pl.BlockSpec((1, Cin), full_map),
                    pl.BlockSpec((1, Cin), full_map),
                    pl.BlockSpec((Cin, Cout), full_map)]

    return pl.pallas_call(
        kernel,
        out_shape=(jax.ShapeDtypeStruct((P, Cout), jnp.bfloat16),
                   jax.ShapeDtypeStruct((GO, 1, Cout), jnp.float32),
                   jax.ShapeDtypeStruct((GO, 1, Cout), jnp.float32)),
        grid=(GO, GI),
        in_specs=in_specs,
        out_specs=[pl.BlockSpec((TP, Cout), row_map),
                   pl.BlockSpec((1, 1, Cout), stat_map),
                   pl.BlockSpec((1, 1, Cout), stat_map)],
        compiler_params=pltpu.CompilerParams(
            dimension_semantics=("parallel", "arbitrary"),
            vmem_limit_bytes=VMEM_LIMIT),
    )(*operands)


# ---------------------------------------------------------------------------
# kernel 3: 3x3x3 conv with BN1+ReLU fused on the input, no im2col.
# Grid is (N, D); each step loads three haloed (Hp, Wp, C) planes of the
# zero-padded conv1 output and accumulates 27 shifted-window matmuls.
# ---------------------------------------------------------------------------
def _conv2_kernel(x0_ref, x1_ref, x2_ref, w_ref, s_ref, t_ref,
                  y_ref, sum_ref, ssq_ref, *, D, H, W, p):
    d = pl.program_id(1)

    @pl.when(d == 0)
    def _init():
        sum_ref[...] = jnp.zeros_like(sum_ref)
        ssq_ref[...] = jnp.zeros_like(ssq_ref)

    Hp, Wp = H + 2 * p, W + 2 * p
    C = w_ref.shape[1]
    Cout = w_ref.shape[2]

    # Halo mask: padded-with-zero positions must stay 0 *after* BN1+ReLU.
    hi = jax.lax.broadcasted_iota(jnp.int32, (Hp, Wp, C), 0)
    wi = jax.lax.broadcasted_iota(jnp.int32, (Hp, Wp, C), 1)
    interior = ((hi >= p) & (hi < p + H) &
                (wi >= p) & (wi < p + W)).astype(jnp.float32)

    x_refs = (x0_ref, x1_ref, x2_ref)
    acc = jnp.zeros((H * W, Cout), jnp.float32)
    for kd in range(3):
        din = d + kd * p                                   # index in padded D
        vf = jnp.logical_and(din >= p, din < p + D).astype(jnp.float32)
        xs = x_refs[kd][0, 0].astype(jnp.float32)          # (Hp, Wp, C)
        a = jnp.maximum(xs * s_ref[...] + t_ref[...], 0.0)  # fused BN1 + ReLU
        a = (a * interior * vf).astype(jnp.bfloat16)
        for kh in range(3):
            for kw in range(3):
                win = a[kh * p:kh * p + H, kw * p:kw * p + W, :].reshape(H * W, C)
                acc = acc + jnp.dot(win, w_ref[kd * 9 + kh * 3 + kw],
                                    preferred_element_type=jnp.float32)

    y_ref[...] = acc.reshape(1, 1, H, W, Cout).astype(y_ref.dtype)
    sum_ref[...] += jnp.sum(acc, axis=0, keepdims=True)[None]
    ssq_ref[...] += jnp.sum(acc * acc, axis=0, keepdims=True)[None]


def conv2_bn1_fused(y1p, w2, scale1, shift1, *, N, D, H, W, dilation):
    p = dilation
    Hp, Wp = H + 2 * p, W + 2 * p
    C = y1p.shape[-1]
    Cout = w2.shape[-1]

    kernel = functools.partial(_conv2_kernel, D=D, H=H, W=W, p=p)
    in_specs = [pl.BlockSpec((1, 1, Hp, Wp, C),
                             (lambda n, d, kd=kd, p=p: (n, d + kd * p, 0, 0, 0)))
                for kd in range(3)]
    in_specs += [pl.BlockSpec((27, C, Cout), lambda n, d: (0, 0, 0)),
                 pl.BlockSpec((1, C), lambda n, d: (0, 0)),
                 pl.BlockSpec((1, C), lambda n, d: (0, 0))]

    return pl.pallas_call(
        kernel,
        out_shape=(jax.ShapeDtypeStruct((N, D, H, W, Cout), jnp.bfloat16),
                   jax.ShapeDtypeStruct((N, 1, Cout), jnp.float32),
                   jax.ShapeDtypeStruct((N, 1, Cout), jnp.float32)),
        grid=(N, D),
        in_specs=in_specs,
        out_specs=[pl.BlockSpec((1, 1, H, W, Cout), lambda n, d: (n, d, 0, 0, 0)),
                   pl.BlockSpec((1, 1, Cout), lambda n, d: (n, 0, 0)),
                   pl.BlockSpec((1, 1, Cout), lambda n, d: (n, 0, 0))],
        compiler_params=pltpu.CompilerParams(
            dimension_semantics=("parallel", "arbitrary"),
            vmem_limit_bytes=VMEM_LIMIT),
    )(y1p, y1p, y1p, w2, scale1, shift1)


# ---------------------------------------------------------------------------
# kernel 4: out = relu(y*scale + shift + residual)   (BN3 apply + add + ReLU)
# ---------------------------------------------------------------------------
def _bn_add_relu_kernel(y_ref, s_ref, t_ref, r_ref, o_ref):
    y = y_ref[...].astype(jnp.float32)
    o_ref[...] = jnp.maximum(
        y * s_ref[...] + t_ref[...] + r_ref[...].astype(jnp.float32), 0.0)


def bn_add_relu(y, scale, shift, residual, *, row_cap=512):
    P, C = y.shape
    TP = _row_tile(P, row_cap)
    row_map = lambda i: (i, 0)
    full_map = lambda i: (0, 0)
    return pl.pallas_call(
        _bn_add_relu_kernel,
        out_shape=jax.ShapeDtypeStruct((P, C), jnp.float32),
        grid=(P // TP,),
        in_specs=[pl.BlockSpec((TP, C), row_map),
                  pl.BlockSpec((1, C), full_map),
                  pl.BlockSpec((1, C), full_map),
                  pl.BlockSpec((TP, C), row_map)],
        out_specs=pl.BlockSpec((TP, C), row_map),
        compiler_params=pltpu.CompilerParams(
            dimension_semantics=("parallel",),
            vmem_limit_bytes=VMEM_LIMIT),
    )(y, scale, shift, residual)


# ---------------------------------------------------------------------------
# Bottleneck forward
# ---------------------------------------------------------------------------
def bottleneck_forward(x_ncdhw, params, dilation=1):
    N, C4, D, H, W = x_ncdhw.shape
    planes = params["w1"].shape[1]
    assert C4 == planes * 4, "downsample is None -> inplanes must equal planes*4"
    p = dilation
    P = N * D * H * W

    # NCDHW -> channels-last (done once in XLA; module interface is NCDHW).
    x_cl = jnp.transpose(x_ncdhw, (0, 2, 3, 4, 1))
    x2d = x_cl.reshape(P, C4)

    w1 = params["w1"].astype(jnp.bfloat16)       # (C4, planes)
    w2 = params["w2"].astype(jnp.bfloat16)       # (27, planes, planes)
    w3 = params["w3"].astype(jnp.bfloat16)       # (planes, C4)

    # conv1 (1x1x1) + bn1 partial stats
    y1, s1, ss1 = matmul_stats(x2d, w1)
    scale1, shift1 = _bn_scale_shift(s1, ss1, P, params["g1"], params["b1"])

    # conv2 (3x3x3): zero-pad the *raw* conv1 output for the halo (BN1+ReLU is
    # applied inside the kernel; the halo mask keeps padded positions at 0).
    y1p = jnp.pad(y1.reshape(N, D, H, W, planes),
                  ((0, 0), (p, p), (p, p), (p, p), (0, 0)))
    y2, s2, ss2 = conv2_bn1_fused(y1p, w2, scale1, shift1,
                                  N=N, D=D, H=H, W=W, dilation=p)
    scale2, shift2 = _bn_scale_shift(s2, ss2, P, params["g2"], params["b2"])

    # bn2+relu fused into conv3 (1x1x1) + bn3 partial stats
    y3, s3, ss3 = matmul_stats(y2.reshape(P, planes), w3, scale2, shift2)
    scale3, shift3 = _bn_scale_shift(s3, ss3, P, params["g3"], params["b3"])

    # bn3 apply + residual add + relu
    out2d = bn_add_relu(y3, scale3, shift3, x2d)
    return out2d.reshape(N, D, H, W, C4).transpose(0, 4, 1, 2, 3)


# ---------------------------------------------------------------------------
# Pure-JAX f32 reference (PyTorch training-mode BN semantics).
# ---------------------------------------------------------------------------
def reference_forward(x_ncdhw, params, dilation=1):
    N, C4, D, H, W = x_ncdhw.shape
    planes = params["w1"].shape[1]
    p = dilation
    x = jnp.transpose(x_ncdhw, (0, 2, 3, 4, 1)).astype(jnp.float32)

    def bn_relu(y, g, b, add=None):
        m = jnp.mean(y, axis=(0, 1, 2, 3), keepdims=True)
        v = jnp.mean((y - m) ** 2, axis=(0, 1, 2, 3), keepdims=True)
        out = (y - m) * jax.lax.rsqrt(v + EPS) * g + b
        if add is not None:
            out = out + add
        return jnp.maximum(out, 0.0)

    y1 = jnp.einsum("ndhwc,ck->ndhwk", x, params["w1"])
    a1 = bn_relu(y1, params["g1"], params["b1"])
    a1p = jnp.pad(a1, ((0, 0), (p, p), (p, p), (p, p), (0, 0)))
    y2 = jnp.zeros((N, D, H, W, planes), jnp.float32)
    for kd in range(3):
        for kh in range(3):
            for kw in range(3):
                sl = a1p[:, kd * p:kd * p + D, kh * p:kh * p + H,
                         kw * p:kw * p + W, :]
                y2 = y2 + jnp.einsum("ndhwc,ck->ndhwk", sl,
                                     params["w2"][kd * 9 + kh * 3 + kw])
    a2 = bn_relu(y2, params["g2"], params["b2"])
    y3 = jnp.einsum("ndhwc,ck->ndhwk", a2, params["w3"])
    out = bn_relu(y3, params["g3"], params["b3"], add=x)
    return jnp.transpose(out, (0, 4, 1, 2, 3))


# ---------------------------------------------------------------------------
# Deterministic parameter init (shapes match the PyTorch module).  Weights are
# rounded through bf16 so the Pallas (bf16 MXU) path and the f32 reference see
# identical weight values.
# ---------------------------------------------------------------------------
def init_params(key, inplanes, planes):
    ks = jax.random.split(key, 9)

    def rnd(k, shape, scale=0.1):
        w = jax.random.normal(k, shape, jnp.float32) * scale
        return w.astype(jnp.bfloat16).astype(jnp.float32)

    # conv1: torch (planes, inplanes, 1,1,1) -> (inplanes, planes)
    w1 = rnd(ks[0], (planes, inplanes)).T
    # conv2: torch (planes, planes, 3,3,3) -> (27, Cin, Cout)
    w2_t = rnd(ks[1], (planes, planes, 3, 3, 3))
    w2 = jnp.transpose(w2_t, (2, 3, 4, 1, 0)).reshape(27, planes, planes)
    # conv3: torch (planes*4, planes, 1,1,1) -> (planes, planes*4)
    w3 = rnd(ks[2], (planes * 4, planes)).T

    g1 = 1.0 + 0.1 * jax.random.normal(ks[3], (planes,), jnp.float32)
    b1 = 0.1 * jax.random.normal(ks[4], (planes,), jnp.float32)
    g2 = 1.0 + 0.1 * jax.random.normal(ks[5], (planes,), jnp.float32)
    b2 = 0.1 * jax.random.normal(ks[6], (planes,), jnp.float32)
    g3 = 1.0 + 0.1 * jax.random.normal(ks[7], (planes * 4,), jnp.float32)
    b3 = 0.1 * jax.random.normal(ks[8], (planes * 4,), jnp.float32)
    return dict(w1=w1, w2=w2, w3=w3, g1=g1, b1=b1, g2=g2, b2=b2, g3=g3, b3=b3)


if __name__ == "__main__":
    key = jax.random.PRNGKey(0)
    k_x, k_p = jax.random.split(key)

    # Small shapes: batch=2, planes=32, inplanes=128 (=planes*4 so the
    # residual add is valid with downsample=None), spatial D=H=W=8.
    N, planes, D, H, W = 2, 32, 8, 8, 8
    inplanes = planes * 4
    x = jax.random.normal(k_x, (N, inplanes, D, H, W), jnp.float32)
    params = init_params(k_p, inplanes, planes)

    fwd = jax.jit(functools.partial(bottleneck_forward, dilation=1))
    out = jax.block_until_ready(fwd(x, params))
    assert out.shape == (N, inplanes, D, H, W)

    ref = jax.jit(functools.partial(reference_forward, dilation=1))(x, params)
    ref = jax.block_until_ready(ref)

    # bf16 MXU operands -> compare with norm-based tolerances.
    max_err = float(jnp.max(jnp.abs(out - ref)))
    max_ref = float(jnp.maximum(jnp.max(jnp.abs(ref)), 1.0))
    rel_l2 = float(jnp.linalg.norm(out - ref) /
                   jnp.maximum(jnp.linalg.norm(ref), 1e-6))
    assert max_err / max_ref < 5e-2, f"max-rel mismatch: {max_err / max_ref}"
    assert rel_l2 < 5e-2, f"l2-rel mismatch: {rel_l2}"

    print("KERNEL_OK")
</pallas_src>

<mosaic_0001>
module attributes {stable_mosaic.version = 11 : i64} {
  func.func @_mm_stats_kernel(%arg0: i32, %arg1: i32, %arg2: memref<512x128xf32, #tpu.memory_space<vmem>>, %arg3: memref<128x32xbf16, #tpu.memory_space<vmem>>, %arg4: memref<512x32xbf16, #tpu.memory_space<vmem>>, %arg5: memref<1x1x32xf32, #tpu.memory_space<vmem>>, %arg6: memref<1x1x32xf32, #tpu.memory_space<vmem>>) attributes {dimension_semantics = [#tpu.dimension_semantics<parallel>, #tpu.dimension_semantics<arbitrary>], iteration_bounds = array<i64: 2, 1>, scalar_prefetch = 0 : i64, scratch_operands = 0 : i64, tpu.core_type = #tpu.core_type<tc>, window_params = [{transform_indices = @transform_0, window_bounds = array<i64: 512, 128>}, {pipeline_mode = #tpu.pipeline_mode<synchronous>, transform_indices = @transform_1, window_bounds = array<i64: 128, 32>}, {transform_indices = @transform_2, window_bounds = array<i64: 512, 32>}, {transform_indices = @transform_3, window_bounds = array<i64: 1, 1, 32>}, {transform_indices = @transform_4, window_bounds = array<i64: 1, 1, 32>}]} {
    %c0_i32 = arith.constant 0 : i32
    %0 = arith.cmpi eq, %arg1, %c0_i32 : i32
    %1 = arith.extui %0 : i1 to i32
    %c0_i32_0 = arith.constant 0 : i32
    %2 = arith.cmpi ne, %1, %c0_i32_0 : i32
    scf.if %2 {
      %cst_20 = arith.constant 0.000000e+00 : f32
      %22 = vector.broadcast %cst_20 : f32 to vector<1x1x32xf32>
      %c0_21 = arith.constant 0 : index
      %c0_22 = arith.constant 0 : index
      %c0_23 = arith.constant 0 : index
      %23 = vector.load %arg5[%c0_21, %c0_22, %c0_23] : memref<1x1x32xf32, #tpu.memory_space<vmem>>, vector<1x1x32xf32>
      tpu.vector_store %arg5[%c0_21, %c0_22, %c0_23], %22 {strides = array<i32>} : memref<1x1x32xf32, #tpu.memory_space<vmem>>, vector<1x1x32xf32>,
      %cst_24 = arith.constant 0.000000e+00 : f32
      %24 = vector.broadcast %cst_24 : f32 to vector<1x1x32xf32>
      %c0_25 = arith.constant 0 : index
      %c0_26 = arith.constant 0 : index
      %c0_27 = arith.constant 0 : index
      %25 = vector.load %arg6[%c0_25, %c0_26, %c0_27] : memref<1x1x32xf32, #tpu.memory_space<vmem>>, vector<1x1x32xf32>
      tpu.vector_store %arg6[%c0_25, %c0_26, %c0_27], %24 {strides = array<i32>} : memref<1x1x32xf32, #tpu.memory_space<vmem>>, vector<1x1x32xf32>,
    } else {
    }
    %c0 = arith.constant 0 : index
    %c0_1 = arith.constant 0 : index
    %3 = vector.load %arg2[%c0, %c0_1] : memref<512x128xf32, #tpu.memory_space<vmem>>, vector<512x128xf32>
    %4 = arith.truncf %3 : vector<512x128xf32> to vector<512x128xbf16>
    %c0_2 = arith.constant 0 : index
    %c0_3 = arith.constant 0 : index
    %5 = vector.load %arg3[%c0_2, %c0_3] : memref<128x32xbf16, #tpu.memory_space<vmem>>, vector<128x32xbf16>
    %cst = arith.constant dense<0.000000e+00> : vector<512x32xf32>
    %6 = tpu.matmul %4, %5, %cst {dimension_numbers = #tpu.dot_dimension_numbers<[1], [0], [0], [1], [0, 0, 1, 1], [], []>} : vector<512x128xbf16>, vector<128x32xbf16>, vector<512x32xf32> -> vector<512x32xf32>
    %7 = arith.truncf %6 : vector<512x32xf32> to vector<512x32xbf16>
    %c0_4 = arith.constant 0 : index
    %c0_5 = arith.constant 0 : index
    %8 = vector.load %arg4[%c0_4, %c0_5] : memref<512x32xbf16, #tpu.memory_space<vmem>>, vector<512x32xbf16>
    tpu.vector_store %arg4[%c0_4, %c0_5], %7 {strides = array<i32>} : memref<512x32xbf16, #tpu.memory_space<vmem>>, vector<512x32xbf16>,
    %c0_6 = arith.constant 0 : index
    %c0_7 = arith.constant 0 : index
    %c0_8 = arith.constant 0 : index
    %9 = vector.load %arg5[%c0_6, %c0_7, %c0_8] : memref<1x1x32xf32, #tpu.memory_space<vmem>>, vector<1x1x32xf32>
    %cst_9 = arith.constant dense<0.000000e+00> : vector<32xf32>
    %10 = vector.multi_reduction <add>, %6, %cst_9 [0] : vector<512x32xf32> to vector<32xf32>
    %11 = vector.shape_cast %10 : vector<32xf32> to vector<1x32xf32>
    %12 = vector.shape_cast %11 : vector<1x32xf32> to vector<1x1x32xf32>
    %13 = arith.addf %9, %12 : vector<1x1x32xf32>
    %c0_10 = arith.constant 0 : index
    %c0_11 = arith.constant 0 : index
    %c0_12 = arith.constant 0 : index
    %14 = vector.load %arg5[%c0_10, %c0_11, %c0_12] : memref<1x1x32xf32, #tpu.memory_space<vmem>>, vector<1x1x32xf32>
    tpu.vector_store %arg5[%c0_10, %c0_11, %c0_12], %13 {strides = array<i32>} : memref<1x1x32xf32, #tpu.memory_space<vmem>>, vector<1x1x32xf32>,
    %c0_13 = arith.constant 0 : index
    %c0_14 = arith.constant 0 : index
    %c0_15 = arith.constant 0 : index
    %15 = vector.load %arg6[%c0_13, %c0_14, %c0_15] : memref<1x1x32xf32, #tpu.memory_space<vmem>>, vector<1x1x32xf32>
    %16 = arith.mulf %6, %6 : vector<512x32xf32>
    %cst_16 = arith.constant dense<0.000000e+00> : vector<32xf32>
    %17 = vector.multi_reduction <add>, %16, %cst_16 [0] : vector<512x32xf32> to vector<32xf32>
    %18 = vector.shape_cast %17 : vector<32xf32> to vector<1x32xf32>
    %19 = vector.shape_cast %18 : vector<1x32xf32> to vector<1x1x32xf32>
    %20 = arith.addf %15, %19 : vector<1x1x32xf32>
    %c0_17 = arith.constant 0 : index
    %c0_18 = arith.constant 0 : index
    %c0_19 = arith.constant 0 : index
    %21 = vector.load %arg6[%c0_17, %c0_18, %c0_19] : memref<1x1x32xf32, #tpu.memory_space<vmem>>, vector<1x1x32xf32>
    tpu.vector_store %arg6[%c0_17, %c0_18, %c0_19], %20 {strides = array<i32>} : memref<1x1x32xf32, #tpu.memory_space<vmem>>, vector<1x1x32xf32>,
    return
  }
  func.func @transform_0(%arg0: i32, %arg1: i32) -> (i32, i32) {
    %c1_i32 = arith.constant 1 : i32
    %0 = arith.muli %arg0, %c1_i32 : i32
    %1 = arith.addi %0, %arg1 : i32
    %c0_i32 = arith.constant 0 : i32
    %c0_i32_0 = arith.constant 0 : i32
    return %1, %c0_i32 : i32, i32
  }
  func.func @transform_1(%arg0: i32, %arg1: i32) -> (i32, i32) {
    %c0_i32 = arith.constant 0 : i32
    %c0_i32_0 = arith.constant 0 : i32
    %c0_i32_1 = arith.constant 0 : i32
    return %c0_i32, %c0_i32_0 : i32, i32
  }
  func.func @transform_2(%arg0: i32, %arg1: i32) -> (i32, i32) {
    %c1_i32 = arith.constant 1 : i32
    %0 = arith.muli %arg0, %c1_i32 : i32
    %1 = arith.addi %0, %arg1 : i32
    %c0_i32 = arith.constant 0 : i32
    %c0_i32_0 = arith.constant 0 : i32
    return %1, %c0_i32 : i32, i32
  }
  func.func @transform_3(%arg0: i32, %arg1: i32) -> (i32, i32, i32) {
    %c0_i32 = arith.constant 0 : i32
    %c0_i32_0 = arith.constant 0 : i32
    %c0_i32_1 = arith.constant 0 : i32
    return %arg0, %c0_i32, %c0_i32_0 : i32, i32, i32
  }
  func.func @transform_4(%arg0: i32, %arg1: i32) -> (i32, i32, i32) {
    %c0_i32 = arith.constant 0 : i32
    %c0_i32_0 = arith.constant 0 : i32
    %c0_i32_1 = arith.constant 0 : i32
    return %arg0, %c0_i32, %c0_i32_0 : i32, i32, i32
  }
}

module attributes {stable_mosaic.version = 11 : i64} {
  func.func @_conv2_kernel(%arg0: i32, %arg1: i32, %arg2: memref<1x1x10x10x32xbf16, #tpu.memory_space<vmem>>, %arg3: memref<1x1x10x10x32xbf16, #tpu.memory_space<vmem>>, %arg4: memref<1x1x10x10x32xbf16, #tpu.memory_space<vmem>>, %arg5: memref<27x32x32xbf16, #tpu.memory_space<vmem>>, %arg6: memref<1x32xf32, #tpu.memory_space<vmem>>, %arg7: memref<1x32xf32, #tpu.memory_space<vmem>>, %arg8: memref<1x1x8x8x32xbf16, #tpu.memory_space<vmem>>, %arg9: memref<1x1x32xf32, #tpu.memory_space<vmem>>, %arg10: memref<1x1x32xf32, #tpu.memory_space<vmem>>) attributes {dimension_semantics = [#tpu.dimension_semantics<parallel>, #tpu.dimension_semantics<arbitrary>], iteration_bounds = array<i64: 2, 8>, scalar_prefetch = 0 : i64, scratch_operands = 0 : i64, tpu.core_type = #tpu.core_type<tc>, window_params = [{transform_indices = @transform_0, window_bounds = array<i64: 1, 1, 10, 10, 32>}, {transform_indices = @transform_1, window_bounds = array<i64: 1, 1, 10, 10, 32>}, {transform_indices = @transform_2, window_bounds = array<i64: 1, 1, 10, 10, 32>}, {pipeline_mode = #tpu.pipeline_mode<synchronous>, transform_indices = @transform_3, window_bounds = array<i64: 27, 32, 32>}, {pipeline_mode = #tpu.pipeline_mode<synchronous>, transform_indices = @transform_4, window_bounds = array<i64: 1, 32>}, {pipeline_mode = #tpu.pipeline_mode<synchronous>, transform_indices = @transform_5, window_bounds = array<i64: 1, 32>}, {transform_indices = @transform_6, window_bounds = array<i64: 1, 1, 8, 8, 32>}, {transform_indices = @transform_7, window_bounds = array<i64: 1, 1, 32>}, {transform_indices = @transform_8, window_bounds = array<i64: 1, 1, 32>}]} {
    %c0_i32 = arith.constant 0 : i32
    %0 = arith.cmpi eq, %arg1, %c0_i32 : i32
    %1 = arith.extui %0 : i1 to i32
    %c0_i32_0 = arith.constant 0 : i32
    %2 = arith.cmpi ne, %1, %c0_i32_0 : i32
    scf.if %2 {
      %cst_141 = arith.constant 0.000000e+00 : f32
      %266 = vector.broadcast %cst_141 : f32 to vector<1x1x32xf32>
      %c0_142 = arith.constant 0 : index
      %c0_143 = arith.constant 0 : index
      %c0_144 = arith.constant 0 : index
      %267 = vector.load %arg9[%c0_142, %c0_143, %c0_144] : memref<1x1x32xf32, #tpu.memory_space<vmem>>, vector<1x1x32xf32>
      tpu.vector_store %arg9[%c0_142, %c0_143, %c0_144], %266 {strides = array<i32>} : memref<1x1x32xf32, #tpu.memory_space<vmem>>, vector<1x1x32xf32>,
      %cst_145 = arith.constant 0.000000e+00 : f32
      %268 = vector.broadcast %cst_145 : f32 to vector<1x1x32xf32>
      %c0_146 = arith.constant 0 : index
      %c0_147 = arith.constant 0 : index
      %c0_148 = arith.constant 0 : index
      %269 = vector.load %arg10[%c0_146, %c0_147, %c0_148] : memref<1x1x32xf32, #tpu.memory_space<vmem>>, vector<1x1x32xf32>
      tpu.vector_store %arg10[%c0_146, %c0_147, %c0_148], %268 {strides = array<i32>} : memref<1x1x32xf32, #tpu.memory_space<vmem>>, vector<1x1x32xf32>,
    } else {
    }
    %3 = tpu.iota {dimensions = array<i32: 0>} : vector<10x10x32xi32>
    %4 = tpu.iota {dimensions = array<i32: 1>} : vector<10x10x32xi32>
    %c1_i32 = arith.constant 1 : i32
    %5 = vector.broadcast %c1_i32 : i32 to vector<10x10x32xi32>
    %6 = arith.cmpi sge, %3, %5 : vector<10x10x32xi32>
    %c9_i32 = arith.constant 9 : i32
    %7 = vector.broadcast %c9_i32 : i32 to vector<10x10x32xi32>
    %8 = arith.cmpi slt, %3, %7 : vector<10x10x32xi32>
    %9 = arith.andi %6, %8 : vector<10x10x32xi1>
    %c1_i32_1 = arith.constant 1 : i32
    %10 = vector.broadcast %c1_i32_1 : i32 to vector<10x10x32xi32>
    %11 = arith.cmpi sge, %4, %10 : vector<10x10x32xi32>
    %12 = arith.andi %9, %11 : vector<10x10x32xi1>
    %c9_i32_2 = arith.constant 9 : i32
    %13 = vector.broadcast %c9_i32_2 : i32 to vector<10x10x32xi32>
    %14 = arith.cmpi slt, %4, %13 : vector<10x10x32xi32>
    %15 = arith.andi %12, %14 : vector<10x10x32xi1>
    %16 = arith.extui %15 : vector<10x10x32xi1> to vector<10x10x32xi32>
    %17 = arith.sitofp %16 : vector<10x10x32xi32> to vector<10x10x32xf32>
    %cst = arith.constant 0.000000e+00 : f32
    %18 = vector.broadcast %cst : f32 to vector<64x32xf32>
    %c0_i32_3 = arith.constant 0 : i32
    %19 = arith.addi %arg1, %c0_i32_3 : i32
    %c1_i32_4 = arith.constant 1 : i32
    %20 = arith.cmpi sge, %19, %c1_i32_4 : i32
    %c9_i32_5 = arith.constant 9 : i32
    %21 = arith.cmpi slt, %19, %c9_i32_5 : i32
    %22 = arith.andi %20, %21 : i1
    %23 = arith.extui %22 : i1 to i32
    %24 = arith.sitofp %23 : i32 to f32
    %c0 = arith.constant 0 : index
    %c0_6 = arith.constant 0 : index
    %c0_7 = arith.constant 0 : index
    %c0_8 = arith.constant 0 : index
    %c0_9 = arith.constant 0 : index
    %25 = vector.load %arg2[%c0, %c0_6, %c0_7, %c0_8, %c0_9] : memref<1x1x10x10x32xbf16, #tpu.memory_space<vmem>>, vector<1x1x10x10x32xbf16>
    %26 = vector.shape_cast %25 : vector<1x1x10x10x32xbf16> to vector<10x10x32xbf16>
    %27 = arith.extf %26 : vector<10x10x32xbf16> to vector<10x10x32xf32>
    %c0_10 = arith.constant 0 : index
    %c0_11 = arith.constant 0 : index
    %28 = vector.load %arg6[%c0_10, %c0_11] : memref<1x32xf32, #tpu.memory_space<vmem>>, vector<1x32xf32>
    %29 = vector.shape_cast %28 : vector<1x32xf32> to vector<1x1x32xf32>
    %30 = vector.broadcast %29 : vector<1x1x32xf32> to vector<10x10x32xf32>
    %31 = arith.mulf %27, %30 : vector<10x10x32xf32>
    %c0_12 = arith.constant 0 : index
    %c0_13 = arith.constant 0 : index
    %32 = vector.load %arg7[%c0_12, %c0_13] : memref<1x32xf32, #tpu.memory_space<vmem>>, vector<1x32xf32>
    %33 = vector.shape_cast %32 : vector<1x32xf32> to vector<1x1x32xf32>
    %34 = vector.broadcast %33 : vector<1x1x32xf32> to vector<10x10x32xf32>
    %35 = arith.addf %31, %34 : vector<10x10x32xf32>
    %cst_14 = arith.constant 0.000000e+00 : f32
    %36 = vector.broadcast %cst_14 : f32 to vector<10x10x32xf32>
    %37 = arith.maximumf %35, %36 : vector<10x10x32xf32>
    %38 = arith.mulf %37, %17 : vector<10x10x32xf32>
    %39 = vector.broadcast %24 : f32 to vector<10x10x32xf32>
    %40 = arith.mulf %38, %39 : vector<10x10x32xf32>
    %41 = arith.truncf %40 : vector<10x10x32xf32> to vector<10x10x32xbf16>
    %42 = vector.extract_strided_slice %41 {offsets = [0, 0, 0], sizes = [8, 8, 32], strides = [1, 1, 1]} : vector<10x10x32xbf16> to vector<8x8x32xbf16>
    %43 = vector.shape_cast %42 : vector<8x8x32xbf16> to vector<64x32xbf16>
    %c0_15 = arith.constant 0 : index
    %c0_16 = arith.constant 0 : index
    %c0_17 = arith.constant 0 : index
    %44 = vector.load %arg5[%c0_15, %c0_16, %c0_17] : memref<27x32x32xbf16, #tpu.memory_space<vmem>>, vector<1x32x32xbf16>
    %45 = vector.shape_cast %44 : vector<1x32x32xbf16> to vector<32x32xbf16>
    %cst_18 = arith.constant dense<0.000000e+00> : vector<64x32xf32>
    %46 = tpu.matmul %43, %45, %cst_18 {dimension_numbers = #tpu.dot_dimension_numbers<[1], [0], [0], [1], [0, 0, 1, 1], [], []>} : vector<64x32xbf16>, vector<32x32xbf16>, vector<64x32xf32> -> vector<64x32xf32>
    %47 = arith.addf %18, %46 : vector<64x32xf32>
    %48 = vector.extract_strided_slice %41 {offsets = [0, 1, 0], sizes = [8, 8, 32], strides = [1, 1, 1]} : vector<10x10x32xbf16> to vector<8x8x32xbf16>
    %49 = vector.shape_cast %48 : vector<8x8x32xbf16> to vector<64x32xbf16>
    %c1 = arith.constant 1 : index
    %c0_19 = arith.constant 0 : index
    %c0_20 = arith.constant 0 : index
    %50 = vector.load %arg5[%c1, %c0_19, %c0_20] : memref<27x32x32xbf16, #tpu.memory_space<vmem>>, vector<1x32x32xbf16>
    %51 = vector.shape_cast %50 : vector<1x32x32xbf16> to vector<32x32xbf16>
    %cst_21 = arith.constant dense<0.000000e+00> : vector<64x32xf32>
    %52 = tpu.matmul %49, %51, %cst_21 {dimension_numbers = #tpu.dot_dimension_numbers<[1], [0], [0], [1], [0, 0, 1, 1], [], []>} : vector<64x32xbf16>, vector<32x32xbf16>, vector<64x32xf32> -> vector<64x32xf32>
    %53 = arith.addf %47, %52 : vector<64x32xf32>
    %54 = vector.extract_strided_slice %41 {offsets = [0, 2, 0], sizes = [8, 8, 32], strides = [1, 1, 1]} : vector<10x10x32xbf16> to vector<8x8x32xbf16>
    %55 = vector.shape_cast %54 : vector<8x8x32xbf16> to vector<64x32xbf16>
    %c2 = arith.constant 2 : index
    %c0_22 = arith.constant 0 : index
    %c0_23 = arith.constant 0 : index
    %56 = vector.load %arg5[%c2, %c0_22, %c0_23] : memref<27x32x32xbf16, #tpu.memory_space<vmem>>, vector<1x32x32xbf16>
    %57 = vector.shape_cast %56 : vector<1x32x32xbf16> to vector<32x32xbf16>
    %cst_24 = arith.constant dense<0.000000e+00> : vector<64x32xf32>
    %58 = tpu.matmul %55, %57, %cst_24 {dimension_numbers = #tpu.dot_dimension_numbers<[1], [0], [0], [1], [0, 0, 1, 1], [], []>} : vector<64x32xbf16>, vector<32x32xbf16>, vector<64x32xf32> -> vector<64x32xf32>
    %59 = arith.addf %53, %58 : vector<64x32xf32>
    %60 = vector.extract_strided_slice %41 {offsets = [1, 0, 0], sizes = [8, 8, 32], strides = [1, 1, 1]} : vector<10x10x32xbf16> to vector<8x8x32xbf16>
    %61 = vector.shape_cast %60 : vector<8x8x32xbf16> to vector<64x32xbf16>
    %c3 = arith.constant 3 : index
    %c0_25 = arith.constant 0 : index
    %c0_26 = arith.constant 0 : index
    %62 = vector.load %arg5[%c3, %c0_25, %c0_26] : memref<27x32x32xbf16, #tpu.memory_space<vmem>>, vector<1x32x32xbf16>
    %63 = vector.shape_cast %62 : vector<1x32x32xbf16> to vector<32x32xbf16>
    %cst_27 = arith.constant dense<0.000000e+00> : vector<64x32xf32>
    %64 = tpu.matmul %61, %63, %cst_27 {dimension_numbers = #tpu.dot_dimension_numbers<[1], [0], [0], [1], [0, 0, 1, 1], [], []>} : vector<64x32xbf16>, vector<32x32xbf16>, vector<64x32xf32> -> vector<64x32xf32>
    %65 = arith.addf %59, %64 : vector<64x32xf32>
    %66 = vector.extract_strided_slice %41 {offsets = [1, 1, 0], sizes = [8, 8, 32], strides = [1, 1, 1]} : vector<10x10x32xbf16> to vector<8x8x32xbf16>
    %67 = vector.shape_cast %66 : vector<8x8x32xbf16> to vector<64x32xbf16>
    %c4 = arith.constant 4 : index
    %c0_28 = arith.constant 0 : index
    %c0_29 = arith.constant 0 : index
    %68 = vector.load %arg5[%c4, %c0_28, %c0_29] : memref<27x32x32xbf16, #tpu.memory_space<vmem>>, vector<1x32x32xbf16>
    %69 = vector.shape_cast %68 : vector<1x32x32xbf16> to vector<32x32xbf16>
    %cst_30 = arith.constant dense<0.000000e+00> : vector<64x32xf32>
    %70 = tpu.matmul %67, %69, %cst_30 {dimension_numbers = #tpu.dot_dimension_numbers<[1], [0], [0], [1], [0, 0, 1, 1], [], []>} : vector<64x32xbf16>, vector<32x32xbf16>, vector<64x32xf32> -> vector<64x32xf32>
    %71 = arith.addf %65, %70 : vector<64x32xf32>
    %72 = vector.extract_strided_slice %41 {offsets = [1, 2, 0], sizes = [8, 8, 32], strides = [1, 1, 1]} : vector<10x10x32xbf16> to vector<8x8x32xbf16>
    %73 = vector.shape_cast %72 : vector<8x8x32xbf16> to vector<64x32xbf16>
    %c5 = arith.constant 5 : index
    %c0_31 = arith.constant 0 : index
    %c0_32 = arith.constant 0 : index
    %74 = vector.load %arg5[%c5, %c0_31, %c0_32] : memref<27x32x32xbf16, #tpu.memory_space<vmem>>, vector<1x32x32xbf16>
    %75 = vector.shape_cast %74 : vector<1x32x32xbf16> to vector<32x32xbf16>
    %cst_33 = arith.constant dense<0.000000e+00> : vector<64x32xf32>
    %76 = tpu.matmul %73, %75, %cst_33 {dimension_numbers = #tpu.dot_dimension_numbers<[1], [0], [0], [1], [0, 0, 1, 1], [], []>} : vector<64x32xbf16>, vector<32x32xbf16>, vector<64x32xf32> -> vector<64x32xf32>
    %77 = arith.addf %71, %76 : vector<64x32xf32>
    %78 = vector.extract_strided_slice %41 {offsets = [2, 0, 0], sizes = [8, 8, 32], strides = [1, 1, 1]} : vector<10x10x32xbf16> to vector<8x8x32xbf16>
    %79 = vector.shape_cast %78 : vector<8x8x32xbf16> to vector<64x32xbf16>
    %c6 = arith.constant 6 : index
    %c0_34 = arith.constant 0 : index
    %c0_35 = arith.constant 0 : index
    %80 = vector.load %arg5[%c6, %c0_34, %c0_35] : memref<27x32x32xbf16, #tpu.memory_space<vmem>>, vector<1x32x32xbf16>
    %81 = vector.shape_cast %80 : vector<1x32x32xbf16> to vector<32x32xbf16>
    %cst_36 = arith.constant dense<0.000000e+00> : vector<64x32xf32>
    %82 = tpu.matmul %79, %81, %cst_36 {dimension_numbers = #tpu.dot_dimension_numbers<[1], [0], [0], [1], [0, 0, 1, 1], [], []>} : vector<64x32xbf16>, vector<32x32xbf16>, vector<64x32xf32> -> vector<64x32xf32>
    %83 = arith.addf %77, %82 : vector<64x32xf32>
    %84 = vector.extract_strided_slice %41 {offsets = [2, 1, 0], sizes = [8, 8, 32], strides = [1, 1, 1]} : vector<10x10x32xbf16> to vector<8x8x32xbf16>
    %85 = vector.shape_cast %84 : vector<8x8x32xbf16> to vector<64x32xbf16>
    %c7 = arith.constant 7 : index
    %c0_37 = arith.constant 0 : index
    %c0_38 = arith.constant 0 : index
    %86 = vector.load %arg5[%c7, %c0_37, %c0_38] : memref<27x32x32xbf16, #tpu.memory_space<vmem>>, vector<1x32x32xbf16>
    %87 = vector.shape_cast %86 : vector<1x32x32xbf16> to vector<32x32xbf16>
    %cst_39 = arith.constant dense<0.000000e+00> : vector<64x32xf32>
    %88 = tpu.matmul %85, %87, %cst_39 {dimension_numbers = #tpu.dot_dimension_numbers<[1], [0], [0], [1], [0, 0, 1, 1], [], []>} : vector<64x32xbf16>, vector<32x32xbf16>, vector<64x32xf32> -> vector<64x32xf32>
    %89 = arith.addf %83, %88 : vector<64x32xf32>
    %90 = vector.extract_strided_slice %41 {offsets = [2, 2, 0], sizes = [8, 8, 32], strides = [1, 1, 1]} : vector<10x10x32xbf16> to vector<8x8x32xbf16>
    %91 = vector.shape_cast %90 : vector<8x8x32xbf16> to vector<64x32xbf16>
    %c8 = arith.constant 8 : index
    %c0_40 = arith.constant 0 : index
    %c0_41 = arith.constant 0 : index
    %92 = vector.load %arg5[%c8, %c0_40, %c0_41] : memref<27x32x32xbf16, #tpu.memory_space<vmem>>, vector<1x32x32xbf16>
    %93 = vector.shape_cast %92 : vector<1x32x32xbf16> to vector<32x32xbf16>
    %cst_42 = arith.constant dense<0.000000e+00> : vector<64x32xf32>
    %94 = tpu.matmul %91, %93, %cst_42 {dimension_numbers = #tpu.dot_dimension_numbers<[1], [0], [0], [1], [0, 0, 1, 1], [], []>} : vector<64x32xbf16>, vector<32x32xbf16>, vector<64x32xf32> -> vector<64x32xf32>
    %95 = arith.addf %89, %94 : vector<64x32xf32>
    %c1_i32_43 = arith.constant 1 : i32
    %96 = arith.addi %arg1, %c1_i32_43 : i32
    %c1_i32_44 = arith.constant 1 : i32
    %97 = arith.cmpi sge, %96, %c1_i32_44 : i32
    %c9_i32_45 = arith.constant 9 : i32
    %98 = arith.cmpi slt, %96, %c9_i32_45 : i32
    %99 = arith.andi %97, %98 : i1
    %100 = arith.extui %99 : i1 to i32
    %101 = arith.sitofp %100 : i32 to f32
    %c0_46 = arith.constant 0 : index
    %c0_47 = arith.constant 0 : index
    %c0_48 = arith.constant 0 : index
    %c0_49 = arith.constant 0 : index
    %c0_50 = arith.constant 0 : index
    %102 = vector.load %arg3[%c0_46, %c0_47, %c0_48, %c0_49, %c0_50] : memref<1x1x10x10x32xbf16, #tpu.memory_space<vmem>>, vector<1x1x10x10x32xbf16>
    %103 = vector.shape_cast %102 : vector<1x1x10x10x32xbf16> to vector<10x10x32xbf16>
    %104 = arith.extf %103 : vector<10x10x32xbf16> to vector<10x10x32xf32>
    %c0_51 = arith.constant 0 : index
    %c0_52 = arith.constant 0 : index
    %105 = vector.load %arg6[%c0_51, %c0_52] : memref<1x32xf32, #tpu.memory_space<vmem>>, vector<1x32xf32>
    %106 = vector.shape_cast %105 : vector<1x32xf32> to vector<1x1x32xf32>
    %107 = vector.broadcast %106 : vector<1x1x32xf32> to vector<10x10x32xf32>
    %108 = arith.mulf %104, %107 : vector<10x10x32xf32>
    %c0_53 = arith.constant 0 : index
    %c0_54 = arith.constant 0 : index
    %109 = vector.load %arg7[%c0_53, %c0_54] : memref<1x32xf32, #tpu.memory_space<vmem>>, vector<1x32xf32>
    %110 = vector.shape_cast %109 : vector<1x32xf32> to vector<1x1x32xf32>
    %111 = vector.broadcast %110 : vector<1x1x32xf32> to vector<10x10x32xf32>
    %112 = arith.addf %108, %111 : vector<10x10x32xf32>
    %cst_55 = arith.constant 0.000000e+00 : f32
    %113 = vector.broadcast %cst_55 : f32 to vector<10x10x32xf32>
    %114 = arith.maximumf %112, %113 : vector<10x10x32xf32>
    %115 = arith.mulf %114, %17 : vector<10x10x32xf32>
    %116 = vector.broadcast %101 : f32 to vector<10x10x32xf32>
    %117 = arith.mulf %115, %116 : vector<10x10x32xf32>
    %118 = arith.truncf %117 : vector<10x10x32xf32> to vector<10x10x32xbf16>
    %119 = vector.extract_strided_slice %118 {offsets = [0, 0, 0], sizes = [8, 8, 32], strides = [1, 1, 1]} : vector<10x10x32xbf16> to vector<8x8x32xbf16>
    %120 = vector.shape_cast %119 : vector<8x8x32xbf16> to vector<64x32xbf16>
    %c9 = arith.constant 9 : index
    %c0_56 = arith.constant 0 : index
    %c0_57 = arith.constant 0 : index
    %121 = vector.load %arg5[%c9, %c0_56, %c0_57] : memref<27x32x32xbf16, #tpu.memory_space<vmem>>, vector<1x32x32xbf16>
    %122 = vector.shape_cast %121 : vector<1x32x32xbf16> to vector<32x32xbf16>
    %cst_58 = arith.constant dense<0.000000e+00> : vector<64x32xf32>
    %123 = tpu.matmul %120, %122, %cst_58 {dimension_numbers = #tpu.dot_dimension_numbers<[1], [0], [0], [1], [0, 0, 1, 1], [], []>} : vector<64x32xbf16>, vector<32x32xbf16>, vector<64x32xf32> -> vector<64x32xf32>
    %124 = arith.addf %95, %123 : vector<64x32xf32>
    %125 = vector.extract_strided_slice %118 {offsets = [0, 1, 0], sizes = [8, 8, 32], strides = [1, 1, 1]} : vector<10x10x32xbf16> to vector<8x8x32xbf16>
    %126 = vector.shape_cast %125 : vector<8x8x32xbf16> to vector<64x32xbf16>
    %c10 = arith.constant 10 : index
    %c0_59 = arith.constant 0 : index
    %c0_60 = arith.constant 0 : index
    %127 = vector.load %arg5[%c10, %c0_59, %c0_60] : memref<27x32x32xbf16, #tpu.memory_space<vmem>>, vector<1x32x32xbf16>
    %128 = vector.shape_cast %127 : vector<1x32x32xbf16> to vector<32x32xbf16>
    %cst_61 = arith.constant dense<0.000000e+00> : vector<64x32xf32>
    %129 = tpu.matmul %126, %128, %cst_61 {dimension_numbers = #tpu.dot_dimension_numbers<[1], [0], [0], [1], [0, 0, 1, 1], [], []>} : vector<64x32xbf16>, vector<32x32xbf16>, vector<64x32xf32> -> vector<64x32xf32>
    %130 = arith.addf %124, %129 : vector<64x32xf32>
    %131 = vector.extract_strided_slice %118 {offsets = [0, 2, 0], sizes = [8, 8, 32], strides = [1, 1, 1]} : vector<10x10x32xbf16> to vector<8x8x32xbf16>
    %132 = vector.shape_cast %131 : vector<8x8x32xbf16> to vector<64x32xbf16>
    %c11 = arith.constant 11 : index
    %c0_62 = arith.constant 0 : index
    %c0_63 = arith.constant 0 : index
    %133 = vector.load %arg5[%c11, %c0_62, %c0_63] : memref<27x32x32xbf16, #tpu.memory_space<vmem>>, vector<1x32x32xbf16>
    %134 = vector.shape_cast %133 : vector<1x32x32xbf16> to vector<32x32xbf16>
    %cst_64 = arith.constant dense<0.000000e+00> : vector<64x32xf32>
    %135 = tpu.matmul %132, %134, %cst_64 {dimension_numbers = #tpu.dot_dimension_numbers<[1], [0], [0], [1], [0, 0, 1, 1], [], []>} : vector<64x32xbf16>, vector<32x32xbf16>, vector<64x32xf32> -> vector<64x32xf32>
    %136 = arith.addf %130, %135 : vector<64x32xf32>
    %137 = vector.extract_strided_slice %118 {offsets = [1, 0, 0], sizes = [8, 8, 32], strides = [1, 1, 1]} : vector<10x10x32xbf16> to vector<8x8x32xbf16>
    %138 = vector.shape_cast %137 : vector<8x8x32xbf16> to vector<64x32xbf16>
    %c12 = arith.constant 12 : index
    %c0_65 = arith.constant 0 : index
    %c0_66 = arith.constant 0 : index
    %139 = vector.load %arg5[%c12, %c0_65, %c0_66] : memref<27x32x32xbf16, #tpu.memory_space<vmem>>, vector<1x32x32xbf16>
    %140 = vector.shape_cast %139 : vector<1x32x32xbf16> to vector<32x32xbf16>
    %cst_67 = arith.constant dense<0.000000e+00> : vector<64x32xf32>
    %141 = tpu.matmul %138, %140, %cst_67 {dimension_numbers = #tpu.dot_dimension_numbers<[1], [0], [0], [1], [0, 0, 1, 1], [], []>} : vector<64x32xbf16>, vector<32x32xbf16>, vector<64x32xf32> -> vector<64x32xf32>
    %142 = arith.addf %136, %141 : vector<64x32xf32>
    %143 = vector.extract_strided_slice %118 {offsets = [1, 1, 0], sizes = [8, 8, 32], strides = [1, 1, 1]} : vector<10x10x32xbf16> to vector<8x8x32xbf16>
    %144 = vector.shape_cast %143 : vector<8x8x32xbf16> to vector<64x32xbf16>
    %c13 = arith.constant 13 : index
    %c0_68 = arith.constant 0 : index
    %c0_69 = arith.constant 0 : index
    %145 = vector.load %arg5[%c13, %c0_68, %c0_69] : memref<27x32x32xbf16, #tpu.memory_space<vmem>>, vector<1x32x32xbf16>
    %146 = vector.shape_cast %145 : vector<1x32x32xbf16> to vector<32x32xbf16>
    %cst_70 = arith.constant dense<0.000000e+00> : vector<64x32xf32>
    %147 = tpu.matmul %144, %146, %cst_70 {dimension_numbers = #tpu.dot_dimension_numbers<[1], [0], [0], [1], [0, 0, 1, 1], [], []>} : vector<64x32xbf16>, vector<32x32xbf16>, vector<64x32xf32> -> vector<64x32xf32>
    %148 = arith.addf %142, %147 : vector<64x32xf32>
    %149 = vector.extract_strided_slice %118 {offsets = [1, 2, 0], sizes = [8, 8, 32], strides = [1, 1, 1]} : vector<10x10x32xbf16> to vector<8x8x32xbf16>
    %150 = vector.shape_cast %149 : vector<8x8x32xbf16> to vector<64x32xbf16>
    %c14 = arith.constant 14 : index
    %c0_71 = arith.constant 0 : index
    %c0_72 = arith.constant 0 : index
    %151 = vector.load %arg5[%c14, %c0_71, %c0_72] : memref<27x32x32xbf16, #tpu.memory_space<vmem>>, vector<1x32x32xbf16>
    %152 = vector.shape_cast %151 : vector<1x32x32xbf16> to vector<32x32xbf16>
    %cst_73 = arith.constant dense<0.000000e+00> : vector<64x32xf32>
    %153 = tpu.matmul %150, %152, %cst_73 {dimension_numbers = #tpu.dot_dimension_numbers<[1], [0], [0], [1], [0, 0, 1, 1], [], []>} : vector<64x32xbf16>, vector<32x32xbf16>, vector<64x32xf32> -> vector<64x32xf32>
    %154 = arith.addf %148, %153 : vector<64x32xf32>
    %155 = vector.extract_strided_slice %118 {offsets = [2, 0, 0], sizes = [8, 8, 32], strides = [1, 1, 1]} : vector<10x10x32xbf16> to vector<8x8x32xbf16>
    %156 = vector.shape_cast %155 : vector<8x8x32xbf16> to vector<64x32xbf16>
    %c15 = arith.constant 15 : index
    %c0_74 = arith.constant 0 : index
    %c0_75 = arith.constant 0 : index
    %157 = vector.load %arg5[%c15, %c0_74, %c0_75] : memref<27x32x32xbf16, #tpu.memory_space<vmem>>, vector<1x32x32xbf16>
    %158 = vector.shape_cast %157 : vector<1x32x32xbf16> to vector<32x32xbf16>
    %cst_76 = arith.constant dense<0.000000e+00> : vector<64x32xf32>
    %159 = tpu.matmul %156, %158, %cst_76 {dimension_numbers = #tpu.dot_dimension_numbers<[1], [0], [0], [1], [0, 0, 1, 1], [], []>} : vector<64x32xbf16>, vector<32x32xbf16>, vector<64x32xf32> -> vector<64x32xf32>
    %160 = arith.addf %154, %159 : vector<64x32xf32>
    %161 = vector.extract_strided_slice %118 {offsets = [2, 1, 0], sizes = [8, 8, 32], strides = [1, 1, 1]} : vector<10x10x32xbf16> to vector<8x8x32xbf16>
    %162 = vector.shape_cast %161 : vector<8x8x32xbf16> to vector<64x32xbf16>
    %c16 = arith.constant 16 : index
    %c0_77 = arith.constant 0 : index
    %c0_78 = arith.constant 0 : index
    %163 = vector.load %arg5[%c16, %c0_77, %c0_78] : memref<27x32x32xbf16, #tpu.memory_space<vmem>>, vector<1x32x32xbf16>
    %164 = vector.shape_cast %163 : vector<1x32x32xbf16> to vector<32x32xbf16>
    %cst_79 = arith.constant dense<0.000000e+00> : vector<64x32xf32>
    %165 = tpu.matmul %162, %164, %cst_79 {dimension_numbers = #tpu.dot_dimension_numbers<[1], [0], [0], [1], [0, 0, 1, 1], [], []>} : vector<64x32xbf16>, vector<32x32xbf16>, vector<64x32xf32> -> vector<64x32xf32>
    %166 = arith.addf %160, %165 : vector<64x32xf32>
    %167 = vector.extract_strided_slice %118 {offsets = [2, 2, 0], sizes = [8, 8, 32], strides = [1, 1, 1]} : vector<10x10x32xbf16> to vector<8x8x32xbf16>
    %168 = vector.shape_cast %167 : vector<8x8x32xbf16> to vector<64x32xbf16>
    %c17 = arith.constant 17 : index
    %c0_80 = arith.constant 0 : index
    %c0_81 = arith.constant 0 : index
    %169 = vector.load %arg5[%c17, %c0_80, %c0_81] : memref<27x32x32xbf16, #tpu.memory_space<vmem>>, vector<1x32x32xbf16>
    %170 = vector.shape_cast %169 : vector<1x32x32xbf16> to vector<32x32xbf16>
    %cst_82 = arith.constant dense<0.000000e+00> : vector<64x32xf32>
    %171 = tpu.matmul %168, %170, %cst_82 {dimension_numbers = #tpu.dot_dimension_numbers<[1], [0], [0], [1], [0, 0, 1, 1], [], []>} : vector<64x32xbf16>, vector<32x32xbf16>, vector<64x32xf32> -> vector<64x32xf32>
    %172 = arith.addf %166, %171 : vector<64x32xf32>
    %c2_i32 = arith.constant 2 : i32
    %173 = arith.addi %arg1, %c2_i32 : i32
    %c1_i32_83 = arith.constant 1 : i32
    %174 = arith.cmpi sge, %173, %c1_i32_83 : i32
    %c9_i32_84 = arith.constant 9 : i32
    %175 = arith.cmpi slt, %173, %c9_i32_84 : i32
    %176 = arith.andi %174, %175 : i1
    %177 = arith.extui %176 : i1 to i32
    %178 = arith.sitofp %177 : i32 to f32
    %c0_85 = arith.constant 0 : index
    %c0_86 = arith.constant 0 : index
    %c0_87 = arith.constant 0 : index
    %c0_88 = arith.constant 0 : index
    %c0_89 = arith.constant 0 : index
    %179 = vector.load %arg4[%c0_85, %c0_86, %c0_87, %c0_88, %c0_89] : memref<1x1x10x10x32xbf16, #tpu.memory_space<vmem>>, vector<1x1x10x10x32xbf16>
    %180 = vector.shape_cast %179 : vector<1x1x10x10x32xbf16> to vector<10x10x32xbf16>
    %181 = arith.extf %180 : vector<10x10x32xbf16> to vector<10x10x32xf32>
    %c0_90 = arith.constant 0 : index
    %c0_91 = arith.constant 0 : index
    %182 = vector.load %arg6[%c0_90, %c0_91] : memref<1x32xf32, #tpu.memory_space<vmem>>, vector<1x32xf32>
    %183 = vector.shape_cast %182 : vector<1x32xf32> to vector<1x1x32xf32>
    %184 = vector.broadcast %183 : vector<1x1x32xf32> to vector<10x10x32xf32>
    %185 = arith.mulf %181, %184 : vector<10x10x32xf32>
    %c0_92 = arith.constant 0 : index
    %c0_93 = arith.constant 0 : index
    %186 = vector.load %arg7[%c0_92, %c0_93] : memref<1x32xf32, #tpu.memory_space<vmem>>, vector<1x32xf32>
    %187 = vector.shape_cast %186 : vector<1x32xf32> to vector<1x1x32xf32>
    %188 = vector.broadcast %187 : vector<1x1x32xf32> to vector<10x10x32xf32>
    %189 = arith.addf %185, %188 : vector<10x10x32xf32>
    %cst_94 = arith.constant 0.000000e+00 : f32
    %190 = vector.broadcast %cst_94 : f32 to vector<10x10x32xf32>
    %191 = arith.maximumf %189, %190 : vector<10x10x32xf32>
    %192 = arith.mulf %191, %17 : vector<10x10x32xf32>
    %193 = vector.broadcast %178 : f32 to vector<10x10x32xf32>
    %194 = arith.mulf %192, %193 : vector<10x10x32xf32>
    %195 = arith.truncf %194 : vector<10x10x32xf32> to vector<10x10x32xbf16>
    %196 = vector.extract_strided_slice %195 {offsets = [0, 0, 0], sizes = [8, 8, 32], strides = [1, 1, 1]} : vector<10x10x32xbf16> to vector<8x8x32xbf16>
    %197 = vector.shape_cast %196 : vector<8x8x32xbf16> to vector<64x32xbf16>
    %c18 = arith.constant 18 : index
    %c0_95 = arith.constant 0 : index
    %c0_96 = arith.constant 0 : index
    %198 = vector.load %arg5[%c18, %c0_95, %c0_96] : memref<27x32x32xbf16, #tpu.memory_space<vmem>>, vector<1x32x32xbf16>
    %199 = vector.shape_cast %198 : vector<1x32x32xbf16> to vector<32x32xbf16>
    %cst_97 = arith.constant dense<0.000000e+00> : vector<64x32xf32>
    %200 = tpu.matmul %197, %199, %cst_97 {dimension_numbers = #tpu.dot_dimension_numbers<[1], [0], [0], [1], [0, 0, 1, 1], [], []>} : vector<64x32xbf16>, vector<32x32xbf16>, vector<64x32xf32> -> vector<64x32xf32>
    %201 = arith.addf %172, %200 : vector<64x32xf32>
    %202 = vector.extract_strided_slice %195 {offsets = [0, 1, 0], sizes = [8, 8, 32], strides = [1, 1, 1]} : vector<10x10x32xbf16> to vector<8x8x32xbf16>
    %203 = vector.shape_cast %202 : vector<8x8x32xbf16> to vector<64x32xbf16>
    %c19 = arith.constant 19 : index
    %c0_98 = arith.constant 0 : index
    %c0_99 = arith.constant 0 : index
    %204 = vector.load %arg5[%c19, %c0_98, %c0_99] : memref<27x32x32xbf16, #tpu.memory_space<vmem>>, vector<1x32x32xbf16>
    %205 = vector.shape_cast %204 : vector<1x32x32xbf16> to vector<32x32xbf16>
    %cst_100 = arith.constant dense<0.000000e+00> : vector<64x32xf32>
    %206 = tpu.matmul %203, %205, %cst_100 {dimension_numbers = #tpu.dot_dimension_numbers<[1], [0], [0], [1], [0, 0, 1, 1], [], []>} : vector<64x32xbf16>, vector<32x32xbf16>, vector<64x32xf32> -> vector<64x32xf32>
    %207 = arith.addf %201, %206 : vector<64x32xf32>
    %208 = vector.extract_strided_slice %195 {offsets = [0, 2, 0], sizes = [8, 8, 32], strides = [1, 1, 1]} : vector<10x10x32xbf16> to vector<8x8x32xbf16>
    %209 = vector.shape_cast %208 : vector<8x8x32xbf16> to vector<64x32xbf16>
    %c20 = arith.constant 20 : index
    %c0_101 = arith.constant 0 : index
    %c0_102 = arith.constant 0 : index
    %210 = vector.load %arg5[%c20, %c0_101, %c0_102] : memref<27x32x32xbf16, #tpu.memory_space<vmem>>, vector<1x32x32xbf16>
    %211 = vector.shape_cast %210 : vector<1x32x32xbf16> to vector<32x32xbf16>
    %cst_103 = arith.constant dense<0.000000e+00> : vector<64x32xf32>
    %212 = tpu.matmul %209, %211, %cst_103 {dimension_numbers = #tpu.dot_dimension_numbers<[1], [0], [0], [1], [0, 0, 1, 1], [], []>} : vector<64x32xbf16>, vector<32x32xbf16>, vector<64x32xf32> -> vector<64x32xf32>
    %213 = arith.addf %207, %212 : vector<64x32xf32>
    %214 = vector.extract_strided_slice %195 {offsets = [1, 0, 0], sizes = [8, 8, 32], strides = [1, 1, 1]} : vector<10x10x32xbf16> to vector<8x8x32xbf16>
    %215 = vector.shape_cast %214 : vector<8x8x32xbf16> to vector<64x32xbf16>
    %c21 = arith.constant 21 : index
    %c0_104 = arith.constant 0 : index
    %c0_105 = arith.constant 0 : index
    %216 = vector.load %arg5[%c21, %c0_104, %c0_105] : memref<27x32x32xbf16, #tpu.memory_space<vmem>>, vector<1x32x32xbf16>
    %217 = vector.shape_cast %216 : vector<1x32x32xbf16> to vector<32x32xbf16>
    %cst_106 = arith.constant dense<0.000000e+00> : vector<64x32xf32>
    %218 = tpu.matmul %215, %217, %cst_106 {dimension_numbers = #tpu.dot_dimension_numbers<[1], [0], [0], [1], [0, 0, 1, 1], [], []>} : vector<64x32xbf16>, vector<32x32xbf16>, vector<64x32xf32> -> vector<64x32xf32>
    %219 = arith.addf %213, %218 : vector<64x32xf32>
    %220 = vector.extract_strided_slice %195 {offsets = [1, 1, 0], sizes = [8, 8, 32], strides = [1, 1, 1]} : vector<10x10x32xbf16> to vector<8x8x32xbf16>
    %221 = vector.shape_cast %220 : vector<8x8x32xbf16> to vector<64x32xbf16>
    %c22 = arith.constant 22 : index
    %c0_107 = arith.constant 0 : index
    %c0_108 = arith.constant 0 : index
    %222 = vector.load %arg5[%c22, %c0_107, %c0_108] : memref<27x32x32xbf16, #tpu.memory_space<vmem>>, vector<1x32x32xbf16>
    %223 = vector.shape_cast %222 : vector<1x32x32xbf16> to vector<32x32xbf16>
    %cst_109 = arith.constant dense<0.000000e+00> : vector<64x32xf32>
    %224 = tpu.matmul %221, %223, %cst_109 {dimension_numbers = #tpu.dot_dimension_numbers<[1], [0], [0], [1], [0, 0, 1, 1], [], []>} : vector<64x32xbf16>, vector<32x32xbf16>, vector<64x32xf32> -> vector<64x32xf32>
    %225 = arith.addf %219, %224 : vector<64x32xf32>
    %226 = vector.extract_strided_slice %195 {offsets = [1, 2, 0], sizes = [8, 8, 32], strides = [1, 1, 1]} : vector<10x10x32xbf16> to vector<8x8x32xbf16>
    %227 = vector.shape_cast %226 : vector<8x8x32xbf16> to vector<64x32xbf16>
    %c23 = arith.constant 23 : index
    %c0_110 = arith.constant 0 : index
    %c0_111 = arith.constant 0 : index
    %228 = vector.load %arg5[%c23, %c0_110, %c0_111] : memref<27x32x32xbf16, #tpu.memory_space<vmem>>, vector<1x32x32xbf16>
    %229 = vector.shape_cast %228 : vector<1x32x32xbf16> to vector<32x32xbf16>
    %cst_112 = arith.constant dense<0.000000e+00> : vector<64x32xf32>
    %230 = tpu.matmul %227, %229, %cst_112 {dimension_numbers = #tpu.dot_dimension_numbers<[1], [0], [0], [1], [0, 0, 1, 1], [], []>} : vector<64x32xbf16>, vector<32x32xbf16>, vector<64x32xf32> -> vector<64x32xf32>
    %231 = arith.addf %225, %230 : vector<64x32xf32>
    %232 = vector.extract_strided_slice %195 {offsets = [2, 0, 0], sizes = [8, 8, 32], strides = [1, 1, 1]} : vector<10x10x32xbf16> to vector<8x8x32xbf16>
    %233 = vector.shape_cast %232 : vector<8x8x32xbf16> to vector<64x32xbf16>
    %c24 = arith.constant 24 : index
    %c0_113 = arith.constant 0 : index
    %c0_114 = arith.constant 0 : index
    %234 = vector.load %arg5[%c24, %c0_113, %c0_114] : memref<27x32x32xbf16, #tpu.memory_space<vmem>>, vector<1x32x32xbf16>
    %235 = vector.shape_cast %234 : vector<1x32x32xbf16> to vector<32x32xbf16>
    %cst_115 = arith.constant dense<0.000000e+00> : vector<64x32xf32>
    %236 = tpu.matmul %233, %235, %cst_115 {dimension_numbers = #tpu.dot_dimension_numbers<[1], [0], [0], [1], [0, 0, 1, 1], [], []>} : vector<64x32xbf16>, vector<32x32xbf16>, vector<64x32xf32> -> vector<64x32xf32>
    %237 = arith.addf %231, %236 : vector<64x32xf32>
    %238 = vector.extract_strided_slice %195 {offsets = [2, 1, 0], sizes = [8, 8, 32], strides = [1, 1, 1]} : vector<10x10x32xbf16> to vector<8x8x32xbf16>
    %239 = vector.shape_cast %238 : vector<8x8x32xbf16> to vector<64x32xbf16>
    %c25 = arith.constant 25 : index
    %c0_116 = arith.constant 0 : index
    %c0_117 = arith.constant 0 : index
    %240 = vector.load %arg5[%c25, %c0_116, %c0_117] : memref<27x32x32xbf16, #tpu.memory_space<vmem>>, vector<1x32x32xbf16>
    %241 = vector.shape_cast %240 : vector<1x32x32xbf16> to vector<32x32xbf16>
    %cst_118 = arith.constant dense<0.000000e+00> : vector<64x32xf32>
    %242 = tpu.matmul %239, %241, %cst_118 {dimension_numbers = #tpu.dot_dimension_numbers<[1], [0], [0], [1], [0, 0, 1, 1], [], []>} : vector<64x32xbf16>, vector<32x32xbf16>, vector<64x32xf32> -> vector<64x32xf32>
    %243 = arith.addf %237, %242 : vector<64x32xf32>
    %244 = vector.extract_strided_slice %195 {offsets = [2, 2, 0], sizes = [8, 8, 32], strides = [1, 1, 1]} : vector<10x10x32xbf16> to vector<8x8x32xbf16>
    %245 = vector.shape_cast %244 : vector<8x8x32xbf16> to vector<64x32xbf16>
    %c26 = arith.constant 26 : index
    %c0_119 = arith.constant 0 : index
    %c0_120 = arith.constant 0 : index
    %246 = vector.load %arg5[%c26, %c0_119, %c0_120] : memref<27x32x32xbf16, #tpu.memory_space<vmem>>, vector<1x32x32xbf16>
    %247 = vector.shape_cast %246 : vector<1x32x32xbf16> to vector<32x32xbf16>
    %cst_121 = arith.constant dense<0.000000e+00> : vector<64x32xf32>
    %248 = tpu.matmul %245, %247, %cst_121 {dimension_numbers = #tpu.dot_dimension_numbers<[1], [0], [0], [1], [0, 0, 1, 1], [], []>} : vector<64x32xbf16>, vector<32x32xbf16>, vector<64x32xf32> -> vector<64x32xf32>
    %249 = arith.addf %243, %248 : vector<64x32xf32>
    %250 = vector.shape_cast %249 : vector<64x32xf32> to vector<1x1x8x8x32xf32>
    %251 = arith.truncf %250 : vector<1x1x8x8x32xf32> to vector<1x1x8x8x32xbf16>
    %c0_122 = arith.constant 0 : index
    %c0_123 = arith.constant 0 : index
    %c0_124 = arith.constant 0 : index
    %c0_125 = arith.constant 0 : index
    %c0_126 = arith.constant 0 : index
    %252 = vector.load %arg8[%c0_122, %c0_123, %c0_124, %c0_125, %c0_126] : memref<1x1x8x8x32xbf16, #tpu.memory_space<vmem>>, vector<1x1x8x8x32xbf16>
    tpu.vector_store %arg8[%c0_122, %c0_123, %c0_124, %c0_125, %c0_126], %251 {strides = array<i32>} : memref<1x1x8x8x32xbf16, #tpu.memory_space<vmem>>, vector<1x1x8x8x32xbf16>,
    %c0_127 = arith.constant 0 : index
    %c0_128 = arith.constant 0 : index
    %c0_129 = arith.constant 0 : index
    %253 = vector.load %arg9[%c0_127, %c0_128, %c0_129] : memref<1x1x32xf32, #tpu.memory_space<vmem>>, vector<1x1x32xf32>
    %cst_130 = arith.constant dense<0.000000e+00> : vector<32xf32>
    %254 = vector.multi_reduction <add>, %249, %cst_130 [0] : vector<64x32xf32> to vector<32xf32>
    %255 = vector.shape_cast %254 : vector<32xf32> to vector<1x32xf32>
    %256 = vector.shape_cast %255 : vector<1x32xf32> to vector<1x1x32xf32>
    %257 = arith.addf %253, %256 : vector<1x1x32xf32>
    %c0_131 = arith.constant 0 : index
    %c0_132 = arith.constant 0 : index
    %c0_133 = arith.constant 0 : index
    %258 = vector.load %arg9[%c0_131, %c0_132, %c0_133] : memref<1x1x32xf32, #tpu.memory_space<vmem>>, vector<1x1x32xf32>
    tpu.vector_store %arg9[%c0_131, %c0_132, %c0_133], %257 {strides = array<i32>} : memref<1x1x32xf32, #tpu.memory_space<vmem>>, vector<1x1x32xf32>,
    %c0_134 = arith.constant 0 : index
    %c0_135 = arith.constant 0 : index
    %c0_136 = arith.constant 0 : index
    %259 = vector.load %arg10[%c0_134, %c0_135, %c0_136] : memref<1x1x32xf32, #tpu.memory_space<vmem>>, vector<1x1x32xf32>
    %260 = arith.mulf %249, %249 : vector<64x32xf32>
    %cst_137 = arith.constant dense<0.000000e+00> : vector<32xf32>
    %261 = vector.multi_reduction <add>, %260, %cst_137 [0] : vector<64x32xf32> to vector<32xf32>
    %262 = vector.shape_cast %261 : vector<32xf32> to vector<1x32xf32>
    %263 = vector.shape_cast %262 : vector<1x32xf32> to vector<1x1x32xf32>
    %264 = arith.addf %259, %263 : vector<1x1x32xf32>
    %c0_138 = arith.constant 0 : index
    %c0_139 = arith.constant 0 : index
    %c0_140 = arith.constant 0 : index
    %265 = vector.load %arg10[%c0_138, %c0_139, %c0_140] : memref<1x1x32xf32, #tpu.memory_space<vmem>>, vector<1x1x32xf32>
    tpu.vector_store %arg10[%c0_138, %c0_139, %c0_140], %264 {strides = array<i32>} : memref<1x1x32xf32, #tpu.memory_space<vmem>>, vector<1x1x32xf32>,
    return
  }
  func.func @transform_0(%arg0: i32, %arg1: i32) -> (i32, i32, i32, i32, i32) {
    %c0_i32 = arith.constant 0 : i32
    %0 = arith.addi %arg1, %c0_i32 : i32
    %c0_i32_0 = arith.constant 0 : i32
    %c0_i32_1 = arith.constant 0 : i32
    %c0_i32_2 = arith.constant 0 : i32
    %c0_i32_3 = arith.constant 0 : i32
    return %arg0, %0, %c0_i32_0, %c0_i32_1, %c0_i32_2 : i32, i32, i32, i32, i32
  }
  func.func @transform_1(%arg0: i32, %arg1: i32) -> (i32, i32, i32, i32, i32) {
    %c1_i32 = arith.constant 1 : i32
    %0 = arith.addi %arg1, %c1_i32 : i32
    %c0_i32 = arith.constant 0 : i32
    %c0_i32_0 = arith.constant 0 : i32
    %c0_i32_1 = arith.constant 0 : i32
    %c0_i32_2 = arith.constant 0 : i32
    return %arg0, %0, %c0_i32, %c0_i32_0, %c0_i32_1 : i32, i32, i32, i32, i32
  }
  func.func @transform_2(%arg0: i32, %arg1: i32) -> (i32, i32, i32, i32, i32) {
    %c2_i32 = arith.constant 2 : i32
    %0 = arith.addi %arg1, %c2_i32 : i32
    %c0_i32 = arith.constant 0 : i32
    %c0_i32_0 = arith.constant 0 : i32
    %c0_i32_1 = arith.constant 0 : i32
    %c0_i32_2 = arith.constant 0 : i32
    return %arg0, %0, %c0_i32, %c0_i32_0, %c0_i32_1 : i32, i32, i32, i32, i32
  }
  func.func @transform_3(%arg0: i32, %arg1: i32) -> (i32, i32, i32) {
    %c0_i32 = arith.constant 0 : i32
    %c0_i32_0 = arith.constant 0 : i32
    %c0_i32_1 = arith.constant 0 : i32
    %c0_i32_2 = arith.constant 0 : i32
    return %c0_i32, %c0_i32_0, %c0_i32_1 : i32, i32, i32
  }
  func.func @transform_4(%arg0: i32, %arg1: i32) -> (i32, i32) {
    %c0_i32 = arith.constant 0 : i32
    %c0_i32_0 = arith.constant 0 : i32
    %c0_i32_1 = arith.constant 0 : i32
    return %c0_i32, %c0_i32_0 : i32, i32
  }
  func.func @transform_5(%arg0: i32, %arg1: i32) -> (i32, i32) {
    %c0_i32 = arith.constant 0 : i32
    %c0_i32_0 = arith.constant 0 : i32
    %c0_i32_1 = arith.constant 0 : i32
    return %c0_i32, %c0_i32_0 : i32, i32
  }
  func.func @transform_6(%arg0: i32, %arg1: i32) -> (i32, i32, i32, i32, i32) {
    %c0_i32 = arith.constant 0 : i32
    %c0_i32_0 = arith.constant 0 : i32
    %c0_i32_1 = arith.constant 0 : i32
    %c0_i32_2 = arith.constant 0 : i32
    return %arg0, %arg1, %c0_i32, %c0_i32_0, %c0_i32_1 : i32, i32, i32, i32, i32
  }
  func.func @transform_7(%arg0: i32, %arg1: i32) -> (i32, i32, i32) {
    %c0_i32 = arith.constant 0 : i32
    %c0_i32_0 = arith.constant 0 : i32
    %c0_i32_1 = arith.constant 0 : i32
    return %arg0, %c0_i32, %c0_i32_0 : i32, i32, i32
  }
  func.func @transform_8(%arg0: i32, %arg1: i32) -> (i32, i32, i32) {
    %c0_i32 = arith.constant 0 : i32
    %c0_i32_0 = arith.constant 0 : i32
    %c0_i32_1 = arith.constant 0 : i32
    return %arg0, %c0_i32, %c0_i32_0 : i32, i32, i32
  }
}

module attributes {stable_mosaic.version = 11 : i64} {
  func.func @_act_mm_stats_kernel(%arg0: i32, %arg1: i32, %arg2: memref<512x32xbf16, #tpu.memory_space<vmem>>, %arg3: memref<1x32xf32, #tpu.memory_space<vmem>>, %arg4: memref<1x32xf32, #tpu.memory_space<vmem>>, %arg5: memref<32x128xbf16, #tpu.memory_space<vmem>>, %arg6: memref<512x128xbf16, #tpu.memory_space<vmem>>, %arg7: memref<1x1x128xf32, #tpu.memory_space<vmem>>, %arg8: memref<1x1x128xf32, #tpu.memory_space<vmem>>) attributes {dimension_semantics = [#tpu.dimension_semantics<parallel>, #tpu.dimension_semantics<arbitrary>], iteration_bounds = array<i64: 2, 1>, scalar_prefetch = 0 : i64, scratch_operands = 0 : i64, tpu.core_type = #tpu.core_type<tc>, window_params = [{transform_indices = @transform_0, window_bounds = array<i64: 512, 32>}, {pipeline_mode = #tpu.pipeline_mode<synchronous>, transform_indices = @transform_1, window_bounds = array<i64: 1, 32>}, {pipeline_mode = #tpu.pipeline_mode<synchronous>, transform_indices = @transform_2, window_bounds = array<i64: 1, 32>}, {pipeline_mode = #tpu.pipeline_mode<synchronous>, transform_indices = @transform_3, window_bounds = array<i64: 32, 128>}, {transform_indices = @transform_4, window_bounds = array<i64: 512, 128>}, {transform_indices = @transform_5, window_bounds = array<i64: 1, 1, 128>}, {transform_indices = @transform_6, window_bounds = array<i64: 1, 1, 128>}]} {
    %c0_i32 = arith.constant 0 : i32
    %0 = arith.cmpi eq, %arg1, %c0_i32 : i32
    %1 = arith.extui %0 : i1 to i32
    %c0_i32_0 = arith.constant 0 : i32
    %2 = arith.cmpi ne, %1, %c0_i32_0 : i32
    scf.if %2 {
      %cst_25 = arith.constant 0.000000e+00 : f32
      %31 = vector.broadcast %cst_25 : f32 to vector<1x1x128xf32>
      %c0_26 = arith.constant 0 : index
      %c0_27 = arith.constant 0 : index
      %c0_28 = arith.constant 0 : index
      %32 = vector.load %arg7[%c0_26, %c0_27, %c0_28] : memref<1x1x128xf32, #tpu.memory_space<vmem>>, vector<1x1x128xf32>
      tpu.vector_store %arg7[%c0_26, %c0_27, %c0_28], %31 {strides = array<i32>} : memref<1x1x128xf32, #tpu.memory_space<vmem>>, vector<1x1x128xf32>,
      %cst_29 = arith.constant 0.000000e+00 : f32
      %33 = vector.broadcast %cst_29 : f32 to vector<1x1x128xf32>
      %c0_30 = arith.constant 0 : index
      %c0_31 = arith.constant 0 : index
      %c0_32 = arith.constant 0 : index
      %34 = vector.load %arg8[%c0_30, %c0_31, %c0_32] : memref<1x1x128xf32, #tpu.memory_space<vmem>>, vector<1x1x128xf32>
      tpu.vector_store %arg8[%c0_30, %c0_31, %c0_32], %33 {strides = array<i32>} : memref<1x1x128xf32, #tpu.memory_space<vmem>>, vector<1x1x128xf32>,
    } else {
    }
    %c0 = arith.constant 0 : index
    %c0_1 = arith.constant 0 : index
    %3 = vector.load %arg2[%c0, %c0_1] : memref<512x32xbf16, #tpu.memory_space<vmem>>, vector<512x32xbf16>
    %4 = arith.extf %3 : vector<512x32xbf16> to vector<512x32xf32>
    %c0_2 = arith.constant 0 : index
    %c0_3 = arith.constant 0 : index
    %5 = vector.load %arg3[%c0_2, %c0_3] : memref<1x32xf32, #tpu.memory_space<vmem>>, vector<1x32xf32>
    %6 = vector.broadcast %5 : vector<1x32xf32> to vector<512x32xf32>
    %7 = arith.mulf %4, %6 : vector<512x32xf32>
    %c0_4 = arith.constant 0 : index
    %c0_5 = arith.constant 0 : index
    %8 = vector.load %arg4[%c0_4, %c0_5] : memref<1x32xf32, #tpu.memory_space<vmem>>, vector<1x32xf32>
    %9 = vector.broadcast %8 : vector<1x32xf32> to vector<512x32xf32>
    %10 = arith.addf %7, %9 : vector<512x32xf32>
    %cst = arith.constant 0.000000e+00 : f32
    %11 = vector.broadcast %cst : f32 to vector<512x32xf32>
    %12 = arith.maximumf %10, %11 : vector<512x32xf32>
    %13 = arith.truncf %12 : vector<512x32xf32> to vector<512x32xbf16>
    %c0_6 = arith.constant 0 : index
    %c0_7 = arith.constant 0 : index
    %14 = vector.load %arg5[%c0_6, %c0_7] : memref<32x128xbf16, #tpu.memory_space<vmem>>, vector<32x128xbf16>
    %cst_8 = arith.constant dense<0.000000e+00> : vector<512x128xf32>
    %15 = tpu.matmul %13, %14, %cst_8 {dimension_numbers = #tpu.dot_dimension_numbers<[1], [0], [0], [1], [0, 0, 1, 1], [], []>} : vector<512x32xbf16>, vector<32x128xbf16>, vector<512x128xf32> -> vector<512x128xf32>
    %16 = arith.truncf %15 : vector<512x128xf32> to vector<512x128xbf16>
    %c0_9 = arith.constant 0 : index
    %c0_10 = arith.constant 0 : index
    %17 = vector.load %arg6[%c0_9, %c0_10] : memref<512x128xbf16, #tpu.memory_space<vmem>>, vector<512x128xbf16>
    tpu.vector_store %arg6[%c0_9, %c0_10], %16 {strides = array<i32>} : memref<512x128xbf16, #tpu.memory_space<vmem>>, vector<512x128xbf16>,
    %c0_11 = arith.constant 0 : index
    %c0_12 = arith.constant 0 : index
    %c0_13 = arith.constant 0 : index
    %18 = vector.load %arg7[%c0_11, %c0_12, %c0_13] : memref<1x1x128xf32, #tpu.memory_space<vmem>>, vector<1x1x128xf32>
    %cst_14 = arith.constant dense<0.000000e+00> : vector<128xf32>
    %19 = vector.multi_reduction <add>, %15, %cst_14 [0] : vector<512x128xf32> to vector<128xf32>
    %20 = vector.shape_cast %19 : vector<128xf32> to vector<1x128xf32>
    %21 = vector.shape_cast %20 : vector<1x128xf32> to vector<1x1x128xf32>
    %22 = arith.addf %18, %21 : vector<1x1x128xf32>
    %c0_15 = arith.constant 0 : index
    %c0_16 = arith.constant 0 : index
    %c0_17 = arith.constant 0 : index
    %23 = vector.load %arg7[%c0_15, %c0_16, %c0_17] : memref<1x1x128xf32, #tpu.memory_space<vmem>>, vector<1x1x128xf32>
    tpu.vector_store %arg7[%c0_15, %c0_16, %c0_17], %22 {strides = array<i32>} : memref<1x1x128xf32, #tpu.memory_space<vmem>>, vector<1x1x128xf32>,
    %c0_18 = arith.constant 0 : index
    %c0_19 = arith.constant 0 : index
    %c0_20 = arith.constant 0 : index
    %24 = vector.load %arg8[%c0_18, %c0_19, %c0_20] : memref<1x1x128xf32, #tpu.memory_space<vmem>>, vector<1x1x128xf32>
    %25 = arith.mulf %15, %15 : vector<512x128xf32>
    %cst_21 = arith.constant dense<0.000000e+00> : vector<128xf32>
    %26 = vector.multi_reduction <add>, %25, %cst_21 [0] : vector<512x128xf32> to vector<128xf32>
    %27 = vector.shape_cast %26 : vector<128xf32> to vector<1x128xf32>
    %28 = vector.shape_cast %27 : vector<1x128xf32> to vector<1x1x128xf32>
    %29 = arith.addf %24, %28 : vector<1x1x128xf32>
    %c0_22 = arith.constant 0 : index
    %c0_23 = arith.constant 0 : index
    %c0_24 = arith.constant 0 : index
    %30 = vector.load %arg8[%c0_22, %c0_23, %c0_24] : memref<1x1x128xf32, #tpu.memory_space<vmem>>, vector<1x1x128xf32>
    tpu.vector_store %arg8[%c0_22, %c0_23, %c0_24], %29 {strides = array<i32>} : memref<1x1x128xf32, #tpu.memory_space<vmem>>, vector<1x1x128xf32>,
    return
  }
  func.func @transform_0(%arg0: i32, %arg1: i32) -> (i32, i32) {
    %c1_i32 = arith.constant 1 : i32
    %0 = arith.muli %arg0, %c1_i32 : i32
    %1 = arith.addi %0, %arg1 : i32
    %c0_i32 = arith.constant 0 : i32
    %c0_i32_0 = arith.constant 0 : i32
    return %1, %c0_i32 : i32, i32
  }
  func.func @transform_1(%arg0: i32, %arg1: i32) -> (i32, i32) {
    %c0_i32 = arith.constant 0 : i32
    %c0_i32_0 = arith.constant 0 : i32
    %c0_i32_1 = arith.constant 0 : i32
    return %c0_i32, %c0_i32_0 : i32, i32
  }
  func.func @transform_2(%arg0: i32, %arg1: i32) -> (i32, i32) {
    %c0_i32 = arith.constant 0 : i32
    %c0_i32_0 = arith.constant 0 : i32
    %c0_i32_1 = arith.constant 0 : i32
    return %c0_i32, %c0_i32_0 : i32, i32
  }
  func.func @transform_3(%arg0: i32, %arg1: i32) -> (i32, i32) {
    %c0_i32 = arith.constant 0 : i32
    %c0_i32_0 = arith.constant 0 : i32
    %c0_i32_1 = arith.constant 0 : i32
    return %c0_i32, %c0_i32_0 : i32, i32
  }
  func.func @transform_4(%arg0: i32, %arg1: i32) -> (i32, i32) {
    %c1_i32 = arith.constant 1 : i32
    %0 = arith.muli %arg0, %c1_i32 : i32
    %1 = arith.addi %0, %arg1 : i32
    %c0_i32 = arith.constant 0 : i32
    %c0_i32_0 = arith.constant 0 : i32
    return %1, %c0_i32 : i32, i32
  }
  func.func @transform_5(%arg0: i32, %arg1: i32) -> (i32, i32, i32) {
    %c0_i32 = arith.constant 0 : i32
    %c0_i32_0 = arith.constant 0 : i32
    %c0_i32_1 = arith.constant 0 : i32
    return %arg0, %c0_i32, %c0_i32_0 : i32, i32, i32
  }
  func.func @transform_6(%arg0: i32, %arg1: i32) -> (i32, i32, i32) {
    %c0_i32 = arith.constant 0 : i32
    %c0_i32_0 = arith.constant 0 : i32
    %c0_i32_1 = arith.constant 0 : i32
    return %arg0, %c0_i32, %c0_i32_0 : i32, i32, i32
  }
}

module attributes {stable_mosaic.version = 11 : i64} {
  func.func @_bn_add_relu_kernel(%arg0: i32, %arg1: memref<512x128xbf16, #tpu.memory_space<vmem>>, %arg2: memref<1x128xf32, #tpu.memory_space<vmem>>, %arg3: memref<1x128xf32, #tpu.memory_space<vmem>>, %arg4: memref<512x128xf32, #tpu.memory_space<vmem>>, %arg5: memref<512x128xf32, #tpu.memory_space<vmem>>) attributes {dimension_semantics = [#tpu.dimension_semantics<parallel>], iteration_bounds = array<i64: 2>, scalar_prefetch = 0 : i64, scratch_operands = 0 : i64, tpu.core_type = #tpu.core_type<tc>, window_params = [{transform_indices = @transform_0, window_bounds = array<i64: 512, 128>}, {pipeline_mode = #tpu.pipeline_mode<synchronous>, transform_indices = @transform_1, window_bounds = array<i64: 1, 128>}, {pipeline_mode = #tpu.pipeline_mode<synchronous>, transform_indices = @transform_2, window_bounds = array<i64: 1, 128>}, {transform_indices = @transform_3, window_bounds = array<i64: 512, 128>}, {transform_indices = @transform_4, window_bounds = array<i64: 512, 128>}]} {
    %c0 = arith.constant 0 : index
    %c0_0 = arith.constant 0 : index
    %0 = vector.load %arg1[%c0, %c0_0] : memref<512x128xbf16, #tpu.memory_space<vmem>>, vector<512x128xbf16>
    %1 = arith.extf %0 : vector<512x128xbf16> to vector<512x128xf32>
    %c0_1 = arith.constant 0 : index
    %c0_2 = arith.constant 0 : index
    %2 = vector.load %arg2[%c0_1, %c0_2] : memref<1x128xf32, #tpu.memory_space<vmem>>, vector<1x128xf32>
    %3 = vector.broadcast %2 : vector<1x128xf32> to vector<512x128xf32>
    %4 = arith.mulf %1, %3 : vector<512x128xf32>
    %c0_3 = arith.constant 0 : index
    %c0_4 = arith.constant 0 : index
    %5 = vector.load %arg3[%c0_3, %c0_4] : memref<1x128xf32, #tpu.memory_space<vmem>>, vector<1x128xf32>
    %6 = vector.broadcast %5 : vector<1x128xf32> to vector<512x128xf32>
    %7 = arith.addf %4, %6 : vector<512x128xf32>
    %c0_5 = arith.constant 0 : index
    %c0_6 = arith.constant 0 : index
    %8 = vector.load %arg4[%c0_5, %c0_6] : memref<512x128xf32, #tpu.memory_space<vmem>>, vector<512x128xf32>
    %9 = arith.addf %7, %8 : vector<512x128xf32>
    %cst = arith.constant 0.000000e+00 : f32
    %10 = vector.broadcast %cst : f32 to vector<512x128xf32>
    %11 = arith.maximumf %9, %10 : vector<512x128xf32>
    %c0_7 = arith.constant 0 : index
    %c0_8 = arith.constant 0 : index
    %12 = vector.load %arg5[%c0_7, %c0_8] : memref<512x128xf32, #tpu.memory_space<vmem>>, vector<512x128xf32>
    tpu.vector_store %arg5[%c0_7, %c0_8], %11 {strides = array<i32>} : memref<512x128xf32, #tpu.memory_space<vmem>>, vector<512x128xf32>,
    return
  }
  func.func @transform_0(%arg0: i32) -> (i32, i32) {
    %c0_i32 = arith.constant 0 : i32
    %c0_i32_0 = arith.constant 0 : i32
    return %arg0, %c0_i32 : i32, i32
  }
  func.func @transform_1(%arg0: i32) -> (i32, i32) {
    %c0_i32 = arith.constant 0 : i32
    %c0_i32_0 = arith.constant 0 : i32
    %c0_i32_1 = arith.constant 0 : i32
    return %c0_i32, %c0_i32_0 : i32, i32
  }
  func.func @transform_2(%arg0: i32) -> (i32, i32) {
    %c0_i32 = arith.constant 0 : i32
    %c0_i32_0 = arith.constant 0 : i32
    %c0_i32_1 = arith.constant 0 : i32
    return %c0_i32, %c0_i32_0 : i32, i32
  }
  func.func @transform_3(%arg0: i32) -> (i32, i32) {
    %c0_i32 = arith.constant 0 : i32
    %c0_i32_0 = arith.constant 0 : i32
    return %arg0, %c0_i32 : i32, i32
  }
  func.func @transform_4(%arg0: i32) -> (i32, i32) {
    %c0_i32 = arith.constant 0 : i32
    %c0_i32_0 = arith.constant 0 : i32
    return %arg0, %c0_i32 : i32, i32
  }
}

</mosaic_0001>

<bundles_post_ra>
// kernel: bottleneck_forward.4
= control target key start
LH: loop header
LB: loop body
LE: loop exit
PB: predicated region body
PF: predicated region fallthrough
CT: control target
= control target key end

     0   :  { %10 = vsyncpa [#allocation3], 0  ;;  %s2282_s0 = inlined_call_operand.hbm [shape: f32[1024,128], index: 0, kind: input, shape index: {}]   ;;  %s2283_s1 = inlined_call_operand.vmem [shape: bf16[128,32], index: 1, kind: input, shape index: {}]   ;;  %s2284_s2 = inlined_call_operand.vmem [shape: bf16[1024,32], index: 2, kind: output, shape index: {0}]   ;;  %s2285_s3 = inlined_call_operand.vmem [shape: f32[2,1,32], index: 3, kind: output, shape index: {1}]   ;;  %s2286_s4 = inlined_call_operand.vmem [shape: f32[2,1,32], index: 4, kind: output, shape index: {2}]  }
   0x1   :  { %12 = vsyncpa [#allocation3 + $0x1], 0  ;;  %s1439_s15 = smov 0   ;;  %s1441_s16 = smov 0  }
   0x2   :  { %s1443_s17 = smov 0   ;;  %s1445_s18 = smov 0  }
   0x3   :  { %s1447_s19 = smov 0   ;;  %s1449_s20 = smov 0  }
   0x4 LB: > { %s1193_s21 = sadd.s32 4294967295, %s1409_s20   ;;  %s30_s22 = sadd.s32 1, %s1405_s19  ;;  %s1409_s20 = sphi %s1449_s20, %s18_s20   ;;  %s1405_s19 = sphi %s1447_s19, %s2293_s19   ;;  %s1401_s18 = sphi %s1445_s18, %s2292_s18   ;;  %s1397_s17 = sphi %s1443_s17, %s2291_s17   ;;  %s1393_s16 = sphi %s1441_s16, %s2290_s16   ;;  %s1389_s15 = sphi %s1439_s15, %s2289_s15  }
   0x5   : > { %p32_p0 = scmp.ge.s32.totalorder %s30_s22, 2  ;;  %s39_s23 = sadd.s32 1, %s1397_s17 }
   0x6   : > { %p46_p1 = scmp.ne.s32.totalorder %s1397_s17, %s1393_s16  ;;  %p47_p2 = scmp.eq.s32.totalorder %s1409_s20, 0 }
   0x7   : > { %s2295_s22 = smov (%p32_p0, %s30_s22), 0  ;;  %p52_p4 = scmp.ne.s32.totalorder %s1393_s16, %s1389_s15 }
   0x8   : > { %p1475_p3 = por %p47_p2, %p46_p1  ;;  %s36_s25 = ssub.s32 %s1405_s19, %s2295_s22 }
   0x9   : > { %p53_p5 = scmp.eq.s32.totalorder %s1193_s21, 0  ;;  %p37_p6 = scmp.eq.s32.totalorder %s36_s25, 0 }
   0xa   : > { %p1277_p8 = scmp.lt.s32.totalorder %s1409_s20, 2  ;;  %s180_s28 = sand.u32 1, %s1397_s17  }
   0xb   : > { %p1482_p7 = por %p53_p5, %p52_p4  ;;  %s1238_s29 = sshll.u32 %s1405_s19, 9 }
   0xc   : > { %s1488_s27 = scalar_select %p37_p6, %s1397_s17, %s39_s23  }
   0xd   : > { %s1197_s30 = sshll.u32 %s180_s28, 9  ;;  %s190_s7 = scalar_lea.hbm %s2282_s0, %s1238_s29 }
   0xe   : > { %s191_s8 = sshll.u32 %s190_s7, 4  ;;  %s184_s9 = scalar_lea.vmem [#allocation2], %s1197_s30  ;;  %s192_s8 = int_to_ptr.hbm [resolvable:$true] %s191_s8 }
   0xf   : > { %s193_s10 = sshll.u32 %s184_s9, 4  ;;  %p1274_p9 = pnand %p1277_p8, %p1475_p3  ;;  %s194_s10 = int_to_ptr.vmem [resolvable:$true] %s193_s10 }
  0x10   : > { %p1200_p10 = scmp.ge.s32.totalorder %s1409_s20, 1  ;;  %p201_p11 = scmp.lt.s32.totalorder %s1409_s20, 3 }
  0x11   : > { %s181_s11 = scalar_lea.sflag [#allocation3], %s180_s28  ;;  %s1411_s12 = smov 128  }
  0x12   : > { %s1412_s13 = smov 8   ;;  %p202_p12 = pnand %p1200_p10, %p201_p11 }
  0x13   : > { %1276 = dma.hbm_to_vmem [thread:$0]  (!%p1274_p9), %s192_s8, 8192, %s194_s10, %s181_s11, %s1411_s12, %s1411_s12, %s1412_s13  }
  0x14   : > { %205 = sbr.rel (%p202_p12) target bundleno = 420 (0x1a4), region = 28  ;;  %s207_s14 = sand.u32 (!%p202_p12), 1, %s1393_s16  }
  0x15   : > { %s1201_s15 = sshll.u32 (!%p202_p12), %s207_s14, 9  ;;  %s208_s21 = scalar_lea.sflag (!%p202_p12), [#allocation3], %s207_s14 }
  0x16   : > { %s1500_s23 = scalar_lea.vmem (!%p202_p12), [#allocation2], %s1201_s15 }
  0x19   : > { %1384 = dma.done.wait (%p1482_p7), %s208_s21, 8192  }
  0x1a   : > { %1386 = vsyncadd (%p1482_p7), %s208_s21, 4294959104  ;;  %v1246_v0 = vld [vmem:[%s2283_s1 + $0x38] sm:$0xff]  ;;  %v1245_v1 = vld [vmem:[%s2283_s1 + $0x30] sm:$0xff]  ;;  %s1202_s15 = sshll.u32 %s1401_s18, 6  ;;  %vm660_vm0 = vcmask 257024   ;;  %vm726_vm1 = vcmask 261120  }
  0x1b   : > { %427 = vmatpush.bf16.msra.mxu0 %v1246_v0  ;;  %1247 = vmatpush.bf16.msra.mxu1 %v1246_v0  ;;  %v1244_v2 = vld [vmem:[%s2283_s1 + $0x28] sm:$0xff]  ;;  %v1243_v3 = vld [vmem:[%s2283_s1 + $0x20] sm:$0xff]  ;;  %v1242_v4 = vld [vmem:[%s2283_s1 + $0x18] sm:$0xff]  ;;  %p248_p13 = scmp.lt.s32.totalorder %s1202_s15, 127  ;;  %p254_p0 = scmp.lt.s32.totalorder %s1401_s18, 1  ;;  %vm264_vm2 = vcmask 253952  }
  0x1c   : > { %1248 = vmatpush.bf16.msra.mxu2 %v1246_v0  ;;  %1249 = vmatpush.bf16.msra.mxu3 %v1246_v0  ;;  %v1241_v5 = vld [vmem:[%s2283_s1 + $0x10] sm:$0xff]  ;;  %v1240_v6 = vld [vmem:[%s2283_s1 + $0x8] sm:$0xff]  ;;  %v1239_v7 = vld [vmem:[%s2283_s1] sm:$0xff] }
  0x1d   : > { %v267_v8 = vld [vmem:[%s1500_s23] sm:$0xff]  ;;  %v268_v9 = vld [vmem:[%s1500_s23 + $0x8] sm:$0xff]  ;;  %v269_v14 = vld [vmem:[%s1500_s23 + $0x10] sm:$0xff]  ;;  %s2297_s15 = smov (!%p248_p13, %s1202_s15), 127  ;;  %s2299_s18 = smov (!%p254_p0, %s1401_s18), 1 }
  0x1e   : > { %v283_v10 = vld [vmem:[%s1500_s23 + $0x80] sm:$0xff]  ;;  %v284_v11 = vld [vmem:[%s1500_s23 + $0x88] sm:$0xff]  ;;  %v331_v12 = vpack.c.bf16 %v268_v9, %v267_v8  ;;  %v270_v15 = vld [vmem:[%s1500_s23 + $0x18] sm:$0xff]  ;;  %s1203_s21 = sshll.u32 %s2297_s15, 2  ;;  %s2163_s30 = scalar_lea.vmem %s2285_s3, %s2299_s18 }
  0x1f   : > { %428 = vmatpush.bf16.msra.mxu0 %v1245_v1  ;;  %1250 = vmatpush.bf16.msra.mxu1 %v1245_v1  ;;  %v339_v13 = vpack.c.bf16 %v284_v11, %v283_v10  ;;  %v285_v16 = vld [vmem:[%s1500_s23 + $0x90] sm:$0xff]  ;;  %v286_v17 = vld [vmem:[%s1500_s23 + $0x98] sm:$0xff]  ;;  %v332_v18 = vpack.c.bf16 %v270_v15, %v269_v14  ;;  %v299_v20 = vld [vmem:[%s1500_s23 + $0x100] sm:$0xff]  ;;  %s1590_s28 = scalar_lea.vmem %s2284_s2, %s1203_s21  ;;  %s2173_s6 = scalar_lea.vmem %s2286_s4, %s2299_s18 }
  0x20   : > { %1251 = vmatpush.bf16.msra.mxu2 %v1245_v1  ;;  %1252 = vmatpush.bf16.msra.mxu3 %v1245_v1  ;;  %v340_v19 = vpack.c.bf16 %v286_v17, %v285_v16  ;;  %v300_v21 = vld [vmem:[%s1500_s23 + $0x108] sm:$0xff]  ;;  %v271_v23 = vld [vmem:[%s1500_s23 + $0x20] sm:$0xff]  ;;  %v301_v29 = vld [vmem:[%s1500_s23 + $0x110] sm:$0xff] }
  0x21   : > { %v347_v22 = vpack.c.bf16 %v300_v21, %v299_v20  ;;  %v272_v24 = vld [vmem:[%s1500_s23 + $0x28] sm:$0xff]  ;;  %v287_v25 = vld [vmem:[%s1500_s23 + $0xa0] sm:$0xff]  ;;  %v302_v30 = vld [vmem:[%s1500_s23 + $0x118] sm:$0xff] }
  0x22   : > { %v288_v26 = vld [vmem:[%s1500_s23 + $0xa8] sm:$0xff]  ;;  %v333_v27 = vpack.c.bf16 %v272_v24, %v271_v23  ;;  %v348_v31 = vpack.c.bf16 %v302_v30, %v301_v29  ;;  %v273_v32 = vld [vmem:[%s1500_s23 + $0x30] sm:$0xff]  ;;  %v274_v33 = vld [vmem:[%s1500_s23 + $0x38] sm:$0xff] }
  0x23   : > { %429 = vmatpush.bf16.msra.mxu0 %v1244_v2  ;;  %1253 = vmatpush.bf16.msra.mxu1 %v1244_v2  ;;  %v341_v28 = vpack.c.bf16 %v288_v26, %v287_v25  ;;  %v289_v34 = vld [vmem:[%s1500_s23 + $0xb0] sm:$0xff]  ;;  %v290_v35 = vld [vmem:[%s1500_s23 + $0xb8] sm:$0xff]  ;;  %v334_v36 = vpack.c.bf16 %v274_v33, %v273_v32  ;;  %v303_v38 = vld [vmem:[%s1500_s23 + $0x120] sm:$0xff] }
  0x24   : > { %1254 = vmatpush.bf16.msra.mxu2 %v1244_v2  ;;  %1255 = vmatpush.bf16.msra.mxu3 %v1244_v2  ;;  %v342_v37 = vpack.c.bf16 %v290_v35, %v289_v34  ;;  %v304_v39 = vld [vmem:[%s1500_s23 + $0x128] sm:$0xff]  ;;  %v315_v40 = vld [vmem:[%s1500_s23 + $0x180] sm:$0xff]  ;;  %v305_v50 = vld [vmem:[%s1500_s23 + $0x130] sm:$0xff] }
  0x25   : > { %v349_v41 = vpack.c.bf16 %v304_v39, %v303_v38  ;;  %v316_v42 = vld [vmem:[%s1500_s23 + $0x188] sm:$0xff]  ;;  %v275_v44 = vld [vmem:[%s1500_s23 + $0x40] sm:$0xff]  ;;  %v306_v51 = vld [vmem:[%s1500_s23 + $0x138] sm:$0xff] }
  0x26   : > { %v355_v43 = vpack.c.bf16 %v316_v42, %v315_v40  ;;  %v276_v45 = vld [vmem:[%s1500_s23 + $0x48] sm:$0xff]  ;;  %v291_v46 = vld [vmem:[%s1500_s23 + $0xc0] sm:$0xff]  ;;  %v317_v52 = vld [vmem:[%s1500_s23 + $0x190] sm:$0xff]  ;;  %v350_v53 = vpack.c.bf16 %v306_v51, %v305_v50 }
  0x27   : > { %430 = vmatpush.bf16.msra.mxu0 %v1243_v3  ;;  %1256 = vmatpush.bf16.msra.mxu1 %v1243_v3  ;;  %v292_v47 = vld [vmem:[%s1500_s23 + $0xc8] sm:$0xff]  ;;  %v335_v48 = vpack.c.bf16 %v276_v45, %v275_v44  ;;  %v318_v54 = vld [vmem:[%s1500_s23 + $0x198] sm:$0xff]  ;;  %v277_v56 = vld [vmem:[%s1500_s23 + $0x50] sm:$0xff] }
  0x28   : > { %1257 = vmatpush.bf16.msra.mxu2 %v1243_v3  ;;  %1258 = vmatpush.bf16.msra.mxu3 %v1243_v3  ;;  %v343_v49 = vpack.c.bf16 %v292_v47, %v291_v46  ;;  %v356_v55 = vpack.c.bf16 %v318_v54, %v317_v52  ;;  %v278_v57 = vld [vmem:[%s1500_s23 + $0x58] sm:$0xff]  ;;  %v293_v58 = vld [vmem:[%s1500_s23 + $0xd0] sm:$0xff]  ;;  %v307_v62 = vld [vmem:[%s1500_s23 + $0x140] sm:$0xff] }
  0x29   : > { %v294_v59 = vld [vmem:[%s1500_s23 + $0xd8] sm:$0xff]  ;;  %v336_v60 = vpack.c.bf16 %v278_v57, %v277_v56  ;;  %v308_v63 = vld [vmem:[%s1500_s23 + $0x148] sm:$0xff]  ;;  %v319_v0 = vld [vmem:[%s1500_s23 + $0x1a0] sm:$0xff] }
  0x2a   : > { %v344_v61 = vpack.c.bf16 %v294_v59, %v293_v58  ;;  %v351_v1 = vpack.c.bf16 %v308_v63, %v307_v62  ;;  %v320_v2 = vld [vmem:[%s1500_s23 + $0x1a8] sm:$0xff]  ;;  %v309_v10 = vld [vmem:[%s1500_s23 + $0x150] sm:$0xff]  ;;  %v310_v11 = vld [vmem:[%s1500_s23 + $0x158] sm:$0xff] }
  0x2b   : > { %431 = vmatpush.bf16.msra.mxu0 %v1242_v4  ;;  %1259 = vmatpush.bf16.msra.mxu1 %v1242_v4  ;;  %v357_v3 = vpack.c.bf16 %v320_v2, %v319_v0  ;;  %v322_v14 = vld [vmem:[%s1500_s23 + $0x1b8] sm:$0xff]  ;;  %v281_v16 = vld [vmem:[%s1500_s23 + $0x70] sm:$0xff]  ;;  %v312_v23 = vld [vmem:[%s1500_s23 + $0x168] sm:$0xff] }
  0x2c   : > { %1260 = vmatpush.bf16.msra.mxu2 %v1242_v4  ;;  %1261 = vmatpush.bf16.msra.mxu3 %v1242_v4  ;;  %v279_v4 = vld [vmem:[%s1500_s23 + $0x60] sm:$0xff]  ;;  %v282_v17 = vld [vmem:[%s1500_s23 + $0x78] sm:$0xff]  ;;  %v324_v26 = vld [vmem:[%s1500_s23 + $0x1c8] sm:$0xff] }
  0x2d   : > { %v338_v20 = vpack.c.bf16 %v282_v17, %v281_v16  ;;  %v323_v24 = vld [vmem:[%s1500_s23 + $0x1c0] sm:$0xff]  ;;  %v313_v32 = vld [vmem:[%s1500_s23 + $0x170] sm:$0xff]  ;;  %v314_v33 = vld [vmem:[%s1500_s23 + $0x178] sm:$0xff] }
  0x2e   : > { %v325_v34 = vld [vmem:[%s1500_s23 + $0x1d0] sm:$0xff]  ;;  %v354_v35 = vpack.c.bf16 %v314_v33, %v313_v32  ;;  %v327_v57 = vld [vmem:[%s1500_s23 + $0x1e0] sm:$0xff]  ;;  %v328_v58 = vld [vmem:[%s1500_s23 + $0x1e8] sm:$0xff] }
  0x2f   : > { %432 = vmatpush.bf16.msra.mxu0 %v1241_v5  ;;  %1262 = vmatpush.bf16.msra.mxu1 %v1241_v5 }
  0x30   : > { %1263 = vmatpush.bf16.msra.mxu2 %v1241_v5  ;;  %1264 = vmatpush.bf16.msra.mxu3 %v1241_v5  ;;  %v280_v5 = vld [vmem:[%s1500_s23 + $0x68] sm:$0xff] }
  0x31   : > { %v337_v8 = vpack.c.bf16 %v280_v5, %v279_v4 }
  0x33   : > { %433 = vmatpush.bf16.msra.mxu0 %v1240_v6  ;;  %1265 = vmatpush.bf16.msra.mxu1 %v1240_v6 }
  0x34   : > { %1266 = vmatpush.bf16.msra.mxu2 %v1240_v6  ;;  %1267 = vmatpush.bf16.msra.mxu3 %v1240_v6  ;;  %v295_v6 = vld [vmem:[%s1500_s23 + $0xe0] sm:$0xff] }
  0x37   : > { %434 = vmatpush.bf16.msra.mxu0 %v1239_v7  ;;  %1268 = vmatpush.bf16.msra.mxu1 %v1239_v7 }
  0x38   : > { %1269 = vmatpush.bf16.msra.mxu2 %v1239_v7  ;;  %1270 = vmatpush.bf16.msra.mxu3 %v1239_v7  ;;  %v296_v7 = vld [vmem:[%s1500_s23 + $0xe8] sm:$0xff] }
  0x39   : > { %v345_v9 = vpack.c.bf16 %v296_v7, %v295_v6 }
  0x3a   : > { %435 = vmatmul.bf16.vlgmr.msra.gmra.mxu0 %v331_v12  ;;  %475 = vmatmul.bf16.vlgmr.msra.gmra.mxu1 %v339_v13  ;;  %v321_v12 = vld [vmem:[%s1500_s23 + $0x1b0] sm:$0xff]  ;;  %v352_v13 = vpack.c.bf16 %v310_v11, %v309_v10 }
  0x3b   : > { %515 = vmatmul.bf16.vlgmr.msra.gmra.mxu2 %v347_v22  ;;  %555 = vmatmul.bf16.vlgmr.msra.gmra.mxu3 %v355_v43  ;;  %v358_v15 = vpack.c.bf16 %v322_v14, %v321_v12  ;;  %v311_v22 = vld [vmem:[%s1500_s23 + $0x160] sm:$0xff] }
  0x3c   : > { %v353_v25 = vpack.c.bf16 %v312_v23, %v311_v22 }
  0x4a   : > { %440 = vmatmul.bf16.gmra.mxu0 %v332_v18  ;;  %480 = vmatmul.bf16.gmra.mxu1 %v340_v19  ;;  %v297_v18 = vld [vmem:[%s1500_s23 + $0xf0] sm:$0xff]  ;;  %v298_v19 = vld [vmem:[%s1500_s23 + $0xf8] sm:$0xff] }
  0x4b   : > { %520 = vmatmul.bf16.gmra.mxu2 %v348_v31  ;;  %560 = vmatmul.bf16.gmra.mxu3 %v356_v55  ;;  %v346_v21 = vpack.c.bf16 %v298_v19, %v297_v18  ;;  %v329_v18 = vld [vmem:[%s1500_s23 + $0x1f0] sm:$0xff]  ;;  %v330_v19 = vld [vmem:[%s1500_s23 + $0x1f8] sm:$0xff] }
  0x5a   : > { %445 = vmatmul.bf16.gmra.mxu0 %v333_v27  ;;  %485 = vmatmul.bf16.gmra.mxu1 %v341_v28  ;;  %v359_v27 = vpack.c.bf16 %v324_v26, %v323_v24 }
  0x5b   : > { %525 = vmatmul.bf16.gmra.mxu2 %v349_v41  ;;  %565 = vmatmul.bf16.gmra.mxu3 %v357_v3 }
  0x6a   : > { %450 = vmatmul.bf16.gmra.mxu0 %v334_v36  ;;  %490 = vmatmul.bf16.gmra.mxu1 %v342_v37  ;;  %v326_v36 = vld [vmem:[%s1500_s23 + $0x1d8] sm:$0xff] }
  0x6b   : > { %530 = vmatmul.bf16.gmra.mxu2 %v350_v53  ;;  %570 = vmatmul.bf16.gmra.mxu3 %v358_v15  ;;  %v360_v37 = vpack.c.bf16 %v326_v36, %v325_v34 }
  0x7a   : > { %455 = vmatmul.bf16.gmra.mxu0 %v335_v48  ;;  %495 = vmatmul.bf16.gmra.mxu1 %v343_v49 }
  0x7b   : > { %535 = vmatmul.bf16.gmra.mxu2 %v351_v1  ;;  %575 = vmatmul.bf16.gmra.mxu3 %v359_v27 }
  0x8a   : > { %460 = vmatmul.bf16.gmra.mxu0 %v336_v60  ;;  %500 = vmatmul.bf16.gmra.mxu1 %v344_v61  ;;  %v361_v60 = vpack.c.bf16 %v328_v58, %v327_v57 }
  0x8b   : > { %540 = vmatmul.bf16.gmra.mxu2 %v352_v13  ;;  %580 = vmatmul.bf16.gmra.mxu3 %v360_v37 }
  0x9a   : > { %465 = vmatmul.bf16.gmra.mxu0 %v337_v8  ;;  %505 = vmatmul.bf16.gmra.mxu1 %v345_v9 }
  0x9b   : > { %545 = vmatmul.bf16.gmra.mxu2 %v353_v25  ;;  %585 = vmatmul.bf16.gmra.mxu3 %v361_v60 }
  0xaa   : > { %470 = vmatmul.bf16.gmra.mxu0 %v338_v20  ;;  %510 = vmatmul.bf16.gmra.mxu1 %v346_v21  ;;  %v362_v21 = vpack.c.bf16 %v330_v19, %v329_v18 }
  0xab   : > { %550 = vmatmul.bf16.gmra.mxu2 %v354_v35 }
  0xac   : > { %590 = vmatmul.bf16.gmra.mxu3 %v362_v21 }
  0xb7   : > { %v436_v28 = vpop.f32.mrf.mxu0  ;;  %v1592_v29 = vpop.f32.mrf.mxu1 }
  0xb8   : > { %v596_v30 = vpack.c.bf16 %v436_v28, %v436_v28  ;;  %v612_v31 = vpack.c.bf16 %v1592_v29, %v1592_v29  ;;  %v864_v38 = vmul.f32 %v436_v28, %v436_v28  ;;  %v727_v39 = vsel %vm726_vm1, %v436_v28, 0.0 }
  0xba   : > { %661 = vst.msk [vmem:[%s1590_s28] sm:$0xf] %vm660_vm0, %v596_v30  ;;  %v928_v47 = vsel %vm726_vm1, %v864_v38, 0.0 }
  0xbb   : > { %677 = vst.msk [vmem:[%s1590_s28 + $0x40] sm:$0xf] %vm660_vm0, %v612_v31 }
  0xbe   : > { %v1633_v4 = vpop.f32.mrf.mxu2 }
  0xbf   : > { %v438_v40 = vpop.f32.mrf.mxu0  ;;  %v1605_v41 = vpop.f32.mrf.mxu1  ;;  %v628_v8 = vpack.c.bf16 %v1633_v4, %v1633_v4 }
  0xc0   : > { %v597_v42 = vpack.c.bf16 %v438_v40, %v438_v40  ;;  %v728_v43 = vsel %vm726_vm1, %v438_v40, 0.0  ;;  %v865_v44 = vmul.f32 %v438_v40, %v438_v40  ;;  %v613_v45 = vpack.c.bf16 %v1605_v41, %v1605_v41 }
  0xc1   : > { %v729_v46 = vadd.f32 %v728_v43, %v727_v39  ;;  %693 = vst.msk [vmem:[%s1590_s28 + $0x80] sm:$0xf] %vm660_vm0, %v628_v8 }
  0xc2   : > { %662 = vst.msk [vmem:[%s1590_s28 + $0x4] sm:$0xf] %vm660_vm0, %v597_v42  ;;  %v929_v48 = vsel %vm726_vm1, %v865_v44, 0.0  ;;  %v1712_v42 = vpop.f32.mrf.mxu3 }
  0xc3   : > { %v930_v49 = vadd.f32 %v929_v48, %v928_v47  ;;  %678 = vst.msk [vmem:[%s1590_s28 + $0x44] sm:$0xf] %vm660_vm0, %v613_v45  ;;  %v644_v44 = vpack.c.bf16 %v1712_v42, %v1712_v42 }
  0xc5   : > { %709 = vst.msk [vmem:[%s1590_s28 + $0xc0] sm:$0xf] %vm660_vm0, %v644_v44 }
  0xc6   : > { %v1649_v15 = vpop.f32.mrf.mxu2 }
  0xc7   : > { %v441_v50 = vpop.f32.mrf.mxu0  ;;  %v1616_v51 = vpop.f32.mrf.mxu1  ;;  %v629_v17 = vpack.c.bf16 %v1649_v15, %v1649_v15 }
  0xc8   : > { %v598_v52 = vpack.c.bf16 %v441_v50, %v441_v50  ;;  %v730_v53 = vsel %vm726_vm1, %v441_v50, 0.0  ;;  %v866_v54 = vmul.f32 %v441_v50, %v441_v50  ;;  %v614_v55 = vpack.c.bf16 %v1616_v51, %v1616_v51 }
  0xc9   : > { %v731_v56 = vadd.f32 %v730_v53, %v729_v46  ;;  %694 = vst.msk [vmem:[%s1590_s28 + $0x84] sm:$0xf] %vm660_vm0, %v629_v17 }
  0xca   : > { %663 = vst.msk [vmem:[%s1590_s28 + $0x8] sm:$0xf] %vm660_vm0, %v598_v52  ;;  %v931_v59 = vsel %vm726_vm1, %v866_v54, 0.0  ;;  %v1736_v50 = vpop.f32.mrf.mxu3 }
  0xcb   : > { %v932_v61 = vadd.f32 %v931_v59, %v930_v49  ;;  %679 = vst.msk [vmem:[%s1590_s28 + $0x48] sm:$0xf] %vm660_vm0, %v614_v55  ;;  %v645_v53 = vpack.c.bf16 %v1736_v50, %v1736_v50 }
  0xcd   : > { %710 = vst.msk [vmem:[%s1590_s28 + $0xc4] sm:$0xf] %vm660_vm0, %v645_v53 }
  0xce   : > { %v1674_v27 = vpop.f32.mrf.mxu2 }
  0xcf   : > { %v443_v62 = vpop.f32.mrf.mxu0  ;;  %v1628_v63 = vpop.f32.mrf.mxu1  ;;  %v630_v28 = vpack.c.bf16 %v1674_v27, %v1674_v27 }
  0xd0   : > { %v599_v0 = vpack.c.bf16 %v443_v62, %v443_v62  ;;  %v732_v1 = vsel %vm726_vm1, %v443_v62, 0.0  ;;  %v867_v2 = vmul.f32 %v443_v62, %v443_v62  ;;  %v615_v3 = vpack.c.bf16 %v1628_v63, %v1628_v63 }
  0xd1   : > { %v733_v5 = vadd.f32 %v732_v1, %v731_v56  ;;  %695 = vst.msk [vmem:[%s1590_s28 + $0x88] sm:$0xf] %vm660_vm0, %v630_v28 }
  0xd2   : > { %664 = vst.msk [vmem:[%s1590_s28 + $0xc] sm:$0xf] %vm660_vm0, %v599_v0  ;;  %v933_v6 = vsel %vm726_vm1, %v867_v2, 0.0  ;;  %v1760_v59 = vpop.f32.mrf.mxu3 }
  0xd3   : > { %v934_v7 = vadd.f32 %v933_v6, %v932_v61  ;;  %680 = vst.msk [vmem:[%s1590_s28 + $0x4c] sm:$0xf] %vm660_vm0, %v615_v3  ;;  %v646_v61 = vpack.c.bf16 %v1760_v59, %v1760_v59 }
  0xd5   : > { %711 = vst.msk [vmem:[%s1590_s28 + $0xc8] sm:$0xf] %vm660_vm0, %v646_v61 }
  0xd6   : > { %v1692_v34 = vpop.f32.mrf.mxu2 }
  0xd7   : > { %v446_v9 = vpop.f32.mrf.mxu0  ;;  %v1644_v10 = vpop.f32.mrf.mxu1  ;;  %v631_v35 = vpack.c.bf16 %v1692_v34, %v1692_v34 }
  0xd8   : > { %v600_v11 = vpack.c.bf16 %v446_v9, %v446_v9  ;;  %v734_v12 = vsel %vm726_vm1, %v446_v9, 0.0  ;;  %v868_v13 = vmul.f32 %v446_v9, %v446_v9  ;;  %v616_v14 = vpack.c.bf16 %v1644_v10, %v1644_v10 }
  0xd9   : > { %v1651_v16 = vadd.f32 %v734_v12, %v733_v5  ;;  %696 = vst.msk [vmem:[%s1590_s28 + $0x8c] sm:$0xf] %vm660_vm0, %v631_v35 }
  0xda   : > { %665 = vst.msk [vmem:[%s1590_s28 + $0x10] sm:$0xf] %vm660_vm0, %v600_v11  ;;  %v935_v20 = vsel %vm726_vm1, %v868_v13, 0.0  ;;  %v1784_v5 = vpop.f32.mrf.mxu3 }
  0xdb   : > { %v1660_v22 = vadd.f32 %v935_v20, %v934_v7  ;;  %681 = vst.msk [vmem:[%s1590_s28 + $0x50] sm:$0xf] %vm660_vm0, %v616_v14  ;;  %v647_v7 = vpack.c.bf16 %v1784_v5, %v1784_v5 }
  0xdd   : > { %712 = vst.msk [vmem:[%s1590_s28 + $0xcc] sm:$0xf] %vm660_vm0, %v647_v7 }
  0xde   : > { %v1710_v40 = vpop.f32.mrf.mxu2 }
  0xdf   : > { %v1666_v23 = vpop.f32.mrf.mxu0  ;;  %v1668_v24 = vpop.f32.mrf.mxu1  ;;  %v632_v43 = vpack.c.bf16 %v1710_v40, %v1710_v40 }
  0xe0   : > { %v601_v25 = vpack.c.bf16 %v1666_v23, %v1666_v23  ;;  %v617_v26 = vpack.c.bf16 %v1668_v24, %v1668_v24  ;;  %v869_v19 = vmul.f32 %v1666_v23, %v1666_v23 }
  0xe1   : > { %697 = vst.msk [vmem:[%s1590_s28 + $0x90] sm:$0xf] %vm660_vm0, %v632_v43 }
  0xe2   : > { %666 = vst.msk [vmem:[%s1590_s28 + $0x14] sm:$0xf] %vm660_vm0, %v601_v25  ;;  %v1804_v14 = vpop.f32.mrf.mxu3 }
  0xe3   : > { %682 = vst.msk [vmem:[%s1590_s28 + $0x54] sm:$0xf] %vm660_vm0, %v617_v26  ;;  %v648_v35 = vpack.c.bf16 %v1804_v14, %v1804_v14 }
  0xe5   : > { %713 = vst.msk [vmem:[%s1590_s28 + $0xd0] sm:$0xf] %vm660_vm0, %v648_v35 }
  0xe6   : > { %v1734_v49 = vpop.f32.mrf.mxu2 }
  0xe7   : > { %v1684_v30 = vpop.f32.mrf.mxu0  ;;  %v1686_v31 = vpop.f32.mrf.mxu1  ;;  %v633_v52 = vpack.c.bf16 %v1734_v49, %v1734_v49 }
  0xe8   : > { %v602_v32 = vpack.c.bf16 %v1684_v30, %v1684_v30  ;;  %v618_v33 = vpack.c.bf16 %v1686_v31, %v1686_v31 }
  0xe9   : > { %698 = vst.msk [vmem:[%s1590_s28 + $0x94] sm:$0xf] %vm660_vm0, %v633_v52 }
  0xea   : > { %667 = vst.msk [vmem:[%s1590_s28 + $0x18] sm:$0xf] %vm660_vm0, %v602_v32  ;;  %v1818_v26 = vpop.f32.mrf.mxu3  ;;  %v736_v32 = vsel %vm726_vm1, %v1666_v23, 0.0  ;;  %v738_v23 = vsel %vm726_vm1, %v1684_v30, 0.0 }
  0xeb   : > { %683 = vst.msk [vmem:[%s1590_s28 + $0x58] sm:$0xf] %vm660_vm0, %v618_v33  ;;  %v870_v33 = vmul.f32 %v1684_v30, %v1684_v30  ;;  %v737_v44 = vadd.f32 %v736_v32, %v1651_v16 }
  0xee   : > { %v1758_v58 = vpop.f32.mrf.mxu2 }
  0xef   : > { %v1702_v36 = vpop.f32.mrf.mxu0  ;;  %v1704_v37 = vpop.f32.mrf.mxu1  ;;  %v634_v60 = vpack.c.bf16 %v1758_v58, %v1758_v58 }
  0xf0   : > { %v603_v38 = vpack.c.bf16 %v1702_v36, %v1702_v36  ;;  %v619_v39 = vpack.c.bf16 %v1704_v37, %v1704_v37  ;;  %v740_v52 = vsel %vm726_vm1, %v1702_v36, 0.0 }
  0xf1   : > { %699 = vst.msk [vmem:[%s1590_s28 + $0x98] sm:$0xf] %vm660_vm0, %v634_v60 }
  0xf2   : > { %668 = vst.msk [vmem:[%s1590_s28 + $0x1c] sm:$0xf] %vm660_vm0, %v603_v38  ;;  %v871_v38 = vmul.f32 %v1702_v36, %v1702_v36 }
  0xf3   : > { %684 = vst.msk [vmem:[%s1590_s28 + $0x5c] sm:$0xf] %vm660_vm0, %v619_v39  ;;  %v937_v39 = vsel %vm726_vm1, %v869_v19, 0.0 }
  0xf4   : > { %v938_v53 = vadd.f32 %v937_v39, %v1660_v22  ;;  %v941_v16 = vsel %vm726_vm1, %v871_v38, 0.0 }
  0xf6   : > { %v1782_v3 = vpop.f32.mrf.mxu2 }
  0xf7   : > { %v1726_v45 = vpop.f32.mrf.mxu0  ;;  %v1728_v46 = vpop.f32.mrf.mxu1  ;;  %v635_v6 = vpack.c.bf16 %v1782_v3, %v1782_v3 }
  0xf8   : > { %v604_v47 = vpack.c.bf16 %v1726_v45, %v1726_v45  ;;  %v620_v48 = vpack.c.bf16 %v1728_v46, %v1728_v46  ;;  %v872_v30 = vmul.f32 %v1726_v45, %v1726_v45  ;;  %v742_v36 = vsel %vm726_vm1, %v1726_v45, 0.0 }
  0xf9   : > { %700 = vst.msk [vmem:[%s1590_s28 + $0x9c] sm:$0xf] %vm660_vm0, %v635_v6  ;;  %v1867_v6 = vpop.f32.mrf.mxu3 }
  0xfa   : > { %669 = vst.msk [vmem:[%s1590_s28 + $0x20] sm:$0xf] %vm660_vm0, %v604_v47  ;;  %v649_v47 = vpack.c.bf16 %v1818_v26, %v1818_v26 }
  0xfb   : > { %685 = vst.msk [vmem:[%s1590_s28 + $0x60] sm:$0xf] %vm660_vm0, %v620_v48  ;;  %v939_v48 = vsel %vm726_vm1, %v870_v33, 0.0 }
  0xfc   : > { %714 = vst.msk [vmem:[%s1590_s28 + $0xd4] sm:$0xf] %vm660_vm0, %v649_v47  ;;  %v940_v7 = vadd.f32 %v939_v48, %v938_v53 }
  0xfe   : > { %v1802_v13 = vpop.f32.mrf.mxu2 }
  0xff   : > { %v1750_v54 = vpop.f32.mrf.mxu0  ;;  %v1752_v55 = vpop.f32.mrf.mxu1  ;;  %v636_v28 = vpack.c.bf16 %v1802_v13, %v1802_v13 }
 0x100   : > { %v605_v56 = vpack.c.bf16 %v1750_v54, %v1750_v54  ;;  %v621_v57 = vpack.c.bf16 %v1752_v55, %v1752_v55  ;;  %v873_v61 = vmul.f32 %v1750_v54, %v1750_v54  ;;  %v744_v19 = vsel %vm726_vm1, %v1750_v54, 0.0 }
 0x101   : > { %701 = vst.msk [vmem:[%s1590_s28 + $0xa0] sm:$0xf] %vm660_vm0, %v636_v28 }
 0x102   : > { %670 = vst.msk [vmem:[%s1590_s28 + $0x24] sm:$0xf] %vm660_vm0, %v605_v56  ;;  %v739_v56 = vadd.f32 %v738_v23, %v737_v44  ;;  %v945_v32 = vsel %vm726_vm1, %v873_v61, 0.0 }
 0x103   : > { %686 = vst.msk [vmem:[%s1590_s28 + $0x64] sm:$0xf] %vm660_vm0, %v621_v57 }
 0x106   : > { %v1816_v25 = vpop.f32.mrf.mxu2 }
 0x107   : > { %v1774_v62 = vpop.f32.mrf.mxu0  ;;  %v1776_v0 = vpop.f32.mrf.mxu1  ;;  %v637_v43 = vpack.c.bf16 %v1816_v25, %v1816_v25 }
 0x108   : > { %v606_v1 = vpack.c.bf16 %v1774_v62, %v1774_v62  ;;  %v622_v2 = vpack.c.bf16 %v1776_v0, %v1776_v0  ;;  %v874_v45 = vmul.f32 %v1774_v62, %v1774_v62  ;;  %v746_v33 = vsel %vm726_vm1, %v1774_v62, 0.0 }
 0x109   : > { %702 = vst.msk [vmem:[%s1590_s28 + $0xa4] sm:$0xf] %vm660_vm0, %v637_v43 }
 0x10a   : > { %671 = vst.msk [vmem:[%s1590_s28 + $0x28] sm:$0xf] %vm660_vm0, %v606_v1  ;;  %v947_v39 = vsel %vm726_vm1, %v874_v45, 0.0 }
 0x10b   : > { %687 = vst.msk [vmem:[%s1590_s28 + $0x68] sm:$0xf] %vm660_vm0, %v622_v2 }
 0x10e   : > { %v1865_v2 = vpop.f32.mrf.mxu2 }
 0x10f   : > { %v463_v8 = vpop.f32.mrf.mxu0  ;;  %v1798_v9 = vpop.f32.mrf.mxu1 }
 0x110   : > { %v607_v11 = vpack.c.bf16 %v463_v8, %v463_v8  ;;  %v623_v12 = vpack.c.bf16 %v1798_v9, %v1798_v9  ;;  %v875_v28 = vmul.f32 %v463_v8, %v463_v8  ;;  %v748_v54 = vsel %vm726_vm1, %v463_v8, 0.0  ;;  %v1891_v8 = vpop.f32.mrf.mxu3 }
 0x112   : > { %672 = vst.msk [vmem:[%s1590_s28 + $0x2c] sm:$0xf] %vm660_vm0, %v607_v11  ;;  %v741_v11 = vadd.f32 %v740_v52, %v739_v56  ;;  %v949_v47 = vsel %vm726_vm1, %v875_v28, 0.0 }
 0x113   : > { %688 = vst.msk [vmem:[%s1590_s28 + $0x6c] sm:$0xf] %vm660_vm0, %v623_v12  ;;  %v943_v12 = vsel %vm726_vm1, %v872_v30, 0.0 }
 0x117   : > { %v466_v17 = vpop.f32.mrf.mxu0  ;;  %v1810_v18 = vpop.f32.mrf.mxu1 }
 0x118   : > { %v608_v20 = vpack.c.bf16 %v466_v17, %v466_v17  ;;  %v624_v21 = vpack.c.bf16 %v1810_v18, %v1810_v18  ;;  %v876_v23 = vmul.f32 %v466_v17, %v466_v17  ;;  %v750_v30 = vsel %vm726_vm1, %v466_v17, 0.0 }
 0x11a   : > { %673 = vst.msk [vmem:[%s1590_s28 + $0x30] sm:$0xf] %vm660_vm0, %v608_v20  ;;  %v942_v20 = vadd.f32 %v941_v16, %v940_v7  ;;  %v1889_v16 = vpop.f32.mrf.mxu2 }
 0x11b   : > { %689 = vst.msk [vmem:[%s1590_s28 + $0x70] sm:$0xf] %vm660_vm0, %v624_v21  ;;  %v743_v21 = vadd.f32 %v742_v36, %v741_v11  ;;  %v650_v11 = vpack.c.bf16 %v1867_v6, %v1867_v6 }
 0x11c   : > { %v944_v35 = vadd.f32 %v943_v12, %v942_v20 }
 0x11d   : > { %v745_v38 = vadd.f32 %v744_v19, %v743_v21  ;;  %715 = vst.msk [vmem:[%s1590_s28 + $0xd8] sm:$0xf] %vm660_vm0, %v650_v11 }
 0x11e   : > { %v946_v43 = vadd.f32 %v945_v32, %v944_v35  ;;  %v651_v32 = vpack.c.bf16 %v1891_v8, %v1891_v8  ;;  %v880_v35 = vmul.f32 %v1592_v29, %v1592_v29 }
 0x11f   : > { %v468_v57 = vpop.f32.mrf.mxu0  ;;  %v1855_v60 = vpop.f32.mrf.mxu1  ;;  %v747_v44 = vadd.f32 %v746_v33, %v745_v38 }
 0x120   : > { %v609_v1 = vpack.c.bf16 %v468_v57, %v468_v57  ;;  %v625_v22 = vpack.c.bf16 %v1855_v60, %v1855_v60  ;;  %v877_v53 = vmul.f32 %v468_v57, %v468_v57  ;;  %v948_v36 = vadd.f32 %v947_v39, %v946_v43  ;;  %716 = vst.msk [vmem:[%s1590_s28 + $0xdc] sm:$0xf] %vm660_vm0, %v651_v32 }
 0x121   : > { %v749_v61 = vadd.f32 %v748_v54, %v747_v44  ;;  %v752_v17 = vsel %vm726_vm1, %v468_v57, 0.0  ;;  %v639_v57 = vpack.c.bf16 %v1889_v16, %v1889_v16  ;;  %v959_v11 = vsel %vm726_vm1, %v880_v35, 0.0 }
 0x122   : > { %674 = vst.msk [vmem:[%s1590_s28 + $0x34] sm:$0xf] %vm660_vm0, %v609_v1  ;;  %v638_v1 = vpack.c.bf16 %v1865_v2, %v1865_v2  ;;  %v950_v12 = vadd.f32 %v949_v47, %v948_v36  ;;  %v953_v45 = vsel %vm726_vm1, %v877_v53, 0.0  ;;  %v1927_v53 = vpop.f32.mrf.mxu3  ;;  %v758_v36 = vsel %vm726_vm1, %v1592_v29, 0.0 }
 0x123   : > { %690 = vst.msk [vmem:[%s1590_s28 + $0x74] sm:$0xf] %vm660_vm0, %v625_v22  ;;  %v951_v22 = vsel %vm726_vm1, %v876_v23, 0.0  ;;  %v751_v19 = vadd.f32 %v750_v30, %v749_v61  ;;  %v1925_v30 = vpop.f32.mrf.mxu2  ;;  %v881_v61 = vmul.f32 %v1605_v41, %v1605_v41 }
 0x124   : > { %703 = vst.msk [vmem:[%s1590_s28 + $0xa8] sm:$0xf] %vm660_vm0, %v638_v1  ;;  %v952_v21 = vadd.f32 %v951_v22, %v950_v12  ;;  %v882_v22 = vmul.f32 %v1616_v51, %v1616_v51  ;;  %v760_v12 = vsel %vm726_vm1, %v1605_v41, 0.0  ;;  %v884_v41 = vmul.f32 %v1644_v10, %v1644_v10 }
 0x125   : > { %v753_v28 = vadd.f32 %v752_v17, %v751_v19  ;;  %704 = vst.msk [vmem:[%s1590_s28 + $0xac] sm:$0xf] %vm660_vm0, %v639_v57  ;;  %v883_v57 = vmul.f32 %v1628_v63, %v1628_v63  ;;  %v640_v35 = vpack.c.bf16 %v1925_v30, %v1925_v30 }
 0x126   : > { %v954_v38 = vadd.f32 %v953_v45, %v952_v21  ;;  %v961_v45 = vsel %vm726_vm1, %v881_v61, 0.0  ;;  %v963_v21 = vsel %vm726_vm1, %v882_v22, 0.0  ;;  %v967_v61 = vsel %vm726_vm1, %v884_v41, 0.0 }
 0x127   : > { %v471_v48 = vpop.f32.mrf.mxu0  ;;  %v1884_v52 = vpop.f32.mrf.mxu1  ;;  %705 = vst.msk [vmem:[%s1590_s28 + $0xb0] sm:$0xf] %vm660_vm0, %v640_v35  ;;  %v889_v41 = vmul.f32 %v1752_v55, %v1752_v55 }
 0x128   : > { %v610_v62 = vpack.c.bf16 %v471_v48, %v471_v48  ;;  %v626_v56 = vpack.c.bf16 %v1884_v52, %v1884_v52  ;;  %v878_v7 = vmul.f32 %v471_v48, %v471_v48  ;;  %v754_v20 = vsel %vm726_vm1, %v471_v48, 0.0 }
 0x129   : > { %v755_v39 = vadd.f32 %v754_v20, %v753_v28  ;;  %v762_v20 = vsel %vm726_vm1, %v1616_v51, 0.0  ;;  %v652_v51 = vpack.c.bf16 %v1927_v53, %v1927_v53 }
 0x12a   : > { %675 = vst.msk [vmem:[%s1590_s28 + $0x38] sm:$0xf] %vm660_vm0, %v610_v62  ;;  %v955_v33 = vsel %vm726_vm1, %v878_v7, 0.0 }
 0x12b   : > { %691 = vst.msk [vmem:[%s1590_s28 + $0x78] sm:$0xf] %vm660_vm0, %v626_v56  ;;  %v956_v62 = vadd.f32 %v955_v33, %v954_v38  ;;  %v764_v33 = vsel %vm726_vm1, %v1628_v63, 0.0  ;;  %v1957_v38 = vpop.f32.mrf.mxu2  ;;  %v766_v63 = vsel %vm726_vm1, %v1644_v10, 0.0  ;;  %v768_v10 = vsel %vm726_vm1, %v1668_v24, 0.0 }
 0x12c   : > { %717 = vst.msk [vmem:[%s1590_s28 + $0xe0] sm:$0xf] %vm660_vm0, %v652_v51 }
 0x12f   : > { %v473_v54 = vpop.f32.mrf.mxu0  ;;  %v1918_v23 = vpop.f32.mrf.mxu1 }
 0x130   : > { %v611_v43 = vpack.c.bf16 %v473_v54, %v473_v54  ;;  %v756_v44 = vsel %vm726_vm1, %v473_v54, 0.0  ;;  %v879_v47 = vmul.f32 %v473_v54, %v473_v54  ;;  %v627_v48 = vpack.c.bf16 %v1918_v23, %v1918_v23 }
 0x131   : > { %v757_v56 = vadd.f32 %v756_v44, %v755_v39  ;;  %v1959_v39 = vpop.f32.mrf.mxu3  ;;  %v965_v44 = vsel %vm726_vm1, %v883_v57, 0.0 }
 0x132   : > { %676 = vst.msk [vmem:[%s1590_s28 + $0x3c] sm:$0xf] %vm660_vm0, %v611_v43  ;;  %v957_v1 = vsel %vm726_vm1, %v879_v47, 0.0  ;;  %v885_v47 = vmul.f32 %v1668_v24, %v1668_v24 }
 0x133   : > { %v759_v17 = vadd.f32 %v758_v36, %v757_v56  ;;  %v958_v7 = vadd.f32 %v957_v1, %v956_v62  ;;  %692 = vst.msk [vmem:[%s1590_s28 + $0x7c] sm:$0xf] %vm660_vm0, %v627_v48  ;;  %v641_v48 = vpack.c.bf16 %v1957_v38, %v1957_v38  ;;  %v653_v36 = vpack.c.bf16 %v1959_v39, %v1959_v39  ;;  %v1993_v57 = vpop.f32.mrf.mxu2 }
 0x134   : > { %v886_v1 = vmul.f32 %v1686_v31, %v1686_v31 }
 0x135   : > { %v761_v29 = vadd.f32 %v760_v12, %v759_v17  ;;  %v960_v19 = vadd.f32 %v959_v11, %v958_v7  ;;  %706 = vst.msk [vmem:[%s1590_s28 + $0xb4] sm:$0xf] %vm660_vm0, %v641_v48  ;;  %v969_v7 = vsel %vm726_vm1, %v885_v47, 0.0  ;;  %v770_v11 = vsel %vm726_vm1, %v1686_v31, 0.0 }
 0x136   : > { %718 = vst.msk [vmem:[%s1590_s28 + $0xe4] sm:$0xf] %vm660_vm0, %v653_v36  ;;  %v887_v12 = vmul.f32 %v1704_v37, %v1704_v37  ;;  %v971_v24 = vsel %vm726_vm1, %v886_v1, 0.0  ;;  %v977_v47 = vsel %vm726_vm1, %v889_v41, 0.0  ;;  %v891_v48 = vmul.f32 %v1798_v9, %v1798_v9 }
 0x137   : > { %v763_v28 = vadd.f32 %v762_v20, %v761_v29  ;;  %v962_v32 = vadd.f32 %v961_v45, %v960_v19  ;;  %v772_v45 = vsel %vm726_vm1, %v1704_v37, 0.0  ;;  %v888_v20 = vmul.f32 %v1728_v46, %v1728_v46 }
 0x138   : > { %v973_v31 = vsel %vm726_vm1, %v887_v12, 0.0  ;;  %v890_v37 = vmul.f32 %v1776_v0, %v1776_v0  ;;  %v893_v12 = vmul.f32 %v1855_v60, %v1855_v60  ;;  %v786_v41 = vsel %vm726_vm1, %v1884_v52, 0.0 }
 0x139   : > { %v765_v54 = vadd.f32 %v764_v33, %v763_v28  ;;  %v964_v43 = vadd.f32 %v963_v21, %v962_v32  ;;  %v1995_v21 = vpop.f32.mrf.mxu3  ;;  %v774_v33 = vsel %vm726_vm1, %v1728_v46, 0.0  ;;  %v778_v46 = vsel %vm726_vm1, %v1776_v0, 0.0 }
 0x13a   : > { %v654_v0 = vpack.c.bf16 %v1995_v21, %v1995_v21 }
 0x13b   : > { %v767_v62 = vadd.f32 %v766_v63, %v765_v54  ;;  %v966_v56 = vadd.f32 %v965_v44, %v964_v43  ;;  %v975_v54 = vsel %vm726_vm1, %v888_v20, 0.0  ;;  %v776_v43 = vsel %vm726_vm1, %v1752_v55, 0.0  ;;  %v2021_v1 = vpop.f32.mrf.mxu2 }
 0x13c   : > { %v892_v55 = vmul.f32 %v1810_v18, %v1810_v18  ;;  %719 = vst.msk [vmem:[%s1590_s28 + $0xe8] sm:$0xf] %vm660_vm0, %v654_v0 }
 0x13d   : > { %v769_v22 = vadd.f32 %v768_v10, %v767_v62  ;;  %v968_v17 = vadd.f32 %v967_v61, %v966_v56  ;;  %v979_v62 = vsel %vm726_vm1, %v890_v37, 0.0  ;;  %v780_v61 = vsel %vm726_vm1, %v1798_v9, 0.0 }
 0x13e   : > { %v642_v10 = vpack.c.bf16 %v1993_v57, %v1993_v57  ;;  %v782_v9 = vsel %vm726_vm1, %v1810_v18, 0.0  ;;  %v983_v20 = vsel %vm726_vm1, %v892_v55, 0.0  ;;  %v784_v18 = vsel %vm726_vm1, %v1855_v60, 0.0 }
 0x13f   : > { %v970_v29 = vadd.f32 %v969_v7, %v968_v17  ;;  %v771_v19 = vadd.f32 %v770_v11, %v769_v22  ;;  %v981_v11 = vsel %vm726_vm1, %v891_v48, 0.0  ;;  %v895_v37 = vmul.f32 %v1918_v23, %v1918_v23 }
 0x140   : > { %707 = vst.msk [vmem:[%s1590_s28 + $0xb8] sm:$0xf] %vm660_vm0, %v642_v10  ;;  %v896_v60 = vmul.f32 %v1633_v4, %v1633_v4 }
 0x141   : > { %v773_v28 = vadd.f32 %v772_v45, %v771_v19  ;;  %v972_v32 = vadd.f32 %v971_v24, %v970_v29  ;;  %v2023_v22 = vpop.f32.mrf.mxu3  ;;  %v643_v29 = vpack.c.bf16 %v2021_v1, %v2021_v1  ;;  %v989_v48 = vsel %vm726_vm1, %v895_v37, 0.0 }
 0x142   : > { %v655_v45 = vpack.c.bf16 %v2023_v22, %v2023_v22 }
 0x143   : > { %v775_v35 = vadd.f32 %v774_v33, %v773_v28  ;;  %v974_v51 = vadd.f32 %v973_v31, %v972_v32  ;;  %v894_v28 = vmul.f32 %v1884_v52, %v1884_v52  ;;  %708 = vst.msk [vmem:[%s1590_s28 + $0xbc] sm:$0xf] %vm660_vm0, %v643_v29  ;;  %v985_v33 = vsel %vm726_vm1, %v893_v12, 0.0 }
 0x144   : > { %720 = vst.msk [vmem:[%s1590_s28 + $0xec] sm:$0xf] %vm660_vm0, %v655_v45  ;;  %v790_v52 = vsel %vm726_vm1, %v1633_v4, 0.0  ;;  %v794_v4 = vsel %vm726_vm1, %v1674_v27, 0.0  ;;  %v900_v12 = vmul.f32 %v1710_v40, %v1710_v40 }
 0x145   : > { %v777_v44 = vadd.f32 %v776_v43, %v775_v35  ;;  %v976_v63 = vadd.f32 %v975_v54, %v974_v51  ;;  %v987_v54 = vsel %vm726_vm1, %v894_v28, 0.0  ;;  %v788_v43 = vsel %vm726_vm1, %v1918_v23, 0.0 }
 0x146   : > { %v898_v23 = vmul.f32 %v1674_v27, %v1674_v27 }
 0x147   : > { %v779_v56 = vadd.f32 %v778_v46, %v777_v44  ;;  %v978_v36 = vadd.f32 %v977_v47, %v976_v63  ;;  %v897_v46 = vmul.f32 %v1649_v15, %v1649_v15 }
 0x149   : > { %v781_v17 = vadd.f32 %v780_v61, %v779_v56  ;;  %v980_v7 = vadd.f32 %v979_v62, %v978_v36  ;;  %v2057_v44 = vpop.f32.mrf.mxu3  ;;  %v991_v36 = vsel %vm726_vm1, %v896_v60, 0.0  ;;  %v792_v61 = vsel %vm726_vm1, %v1649_v15, 0.0 }
 0x14a   : > { %v993_v0 = vsel %vm726_vm1, %v897_v46, 0.0  ;;  %v796_v15 = vsel %vm726_vm1, %v1692_v34, 0.0  ;;  %v656_v29 = vpack.c.bf16 %v2057_v44, %v2057_v44  ;;  %v903_v60 = vmul.f32 %v1782_v3, %v1782_v3 }
 0x14b   : > { %v783_v19 = vadd.f32 %v782_v9, %v781_v17  ;;  %v982_v24 = vadd.f32 %v981_v11, %v980_v7  ;;  %v899_v17 = vmul.f32 %v1692_v34, %v1692_v34  ;;  %v995_v9 = vsel %vm726_vm1, %v898_v23, 0.0 }
 0x14c   : > { %v901_v34 = vmul.f32 %v1734_v49, %v1734_v49  ;;  %721 = vst.msk [vmem:[%s1590_s28 + $0xf0] sm:$0xf] %vm660_vm0, %v656_v29  ;;  %v808_v23 = vsel %vm726_vm1, %v1816_v25, 0.0 }
 0x14d   : > { %v984_v32 = vadd.f32 %v983_v20, %v982_v24  ;;  %v785_v31 = vadd.f32 %v784_v18, %v783_v19  ;;  %v997_v20 = vsel %vm726_vm1, %v899_v17, 0.0  ;;  %v798_v18 = vsel %vm726_vm1, %v1710_v40, 0.0 }
 0x14e   : > { %v1001_v40 = vsel %vm726_vm1, %v901_v34, 0.0  ;;  %v907_v17 = vmul.f32 %v1889_v16, %v1889_v16 }
 0x14f   : > { %v986_v35 = vadd.f32 %v985_v33, %v984_v32  ;;  %v787_v51 = vadd.f32 %v786_v41, %v785_v31  ;;  %v999_v31 = vsel %vm726_vm1, %v900_v12, 0.0  ;;  %v800_v33 = vsel %vm726_vm1, %v1734_v49, 0.0 }
 0x150   : > { %v902_v41 = vmul.f32 %v1758_v58, %v1758_v58  ;;  %v804_v49 = vsel %vm726_vm1, %v1782_v3, 0.0 }
 0x151   : > { %v988_v63 = vadd.f32 %v987_v54, %v986_v35  ;;  %v789_v47 = vadd.f32 %v788_v43, %v787_v51  ;;  %v2081_v19 = vpop.f32.mrf.mxu3  ;;  %v802_v51 = vsel %vm726_vm1, %v1758_v58, 0.0  ;;  %v1005_v58 = vsel %vm726_vm1, %v903_v60, 0.0 }
 0x152   : > { %v657_v45 = vpack.c.bf16 %v2081_v19, %v2081_v19 }
 0x153   : > { %v791_v62 = vadd.f32 %v790_v52, %v789_v47  ;;  %v990_v56 = vadd.f32 %v989_v48, %v988_v63  ;;  %v1003_v63 = vsel %vm726_vm1, %v902_v41, 0.0  ;;  %v904_v47 = vmul.f32 %v1802_v13, %v1802_v13 }
 0x154   : > { %722 = vst.msk [vmem:[%s1590_s28 + $0xf4] sm:$0xf] %vm660_vm0, %v657_v45  ;;  %v1013_v45 = vsel %vm726_vm1, %v907_v17, 0.0 }
 0x155   : > { %v793_v55 = vadd.f32 %v792_v61, %v791_v62  ;;  %v992_v10 = vadd.f32 %v991_v36, %v990_v56  ;;  %v806_v62 = vsel %vm726_vm1, %v1802_v13, 0.0  ;;  %v905_v56 = vmul.f32 %v1816_v25, %v1816_v25 }
 0x156   : > { %v1007_v3 = vsel %vm726_vm1, %v904_v47, 0.0  ;;  %v810_v13 = vsel %vm726_vm1, %v1865_v2, 0.0 }
 0x157   : > { %v795_v7 = vadd.f32 %v794_v4, %v793_v55  ;;  %v994_v11 = vadd.f32 %v993_v0, %v992_v10  ;;  %v906_v55 = vmul.f32 %v1865_v2, %v1865_v2  ;;  %v1009_v4 = vsel %vm726_vm1, %v905_v56, 0.0 }
 0x159   : > { %v797_v27 = vadd.f32 %v796_v15, %v795_v7  ;;  %v996_v24 = vadd.f32 %v995_v9, %v994_v11  ;;  %v2109_v52 = vpop.f32.mrf.mxu3  ;;  %v1011_v25 = vsel %vm726_vm1, %v906_v55, 0.0  ;;  %v812_v9 = vsel %vm726_vm1, %v1889_v16, 0.0 }
 0x15a   : > { %v908_v15 = vmul.f32 %v1925_v30, %v1925_v30  ;;  %v658_v2 = vpack.c.bf16 %v2109_v52, %v2109_v52  ;;  %v909_v16 = vmul.f32 %v1957_v38, %v1957_v38 }
 0x15b   : > { %v799_v28 = vadd.f32 %v798_v18, %v797_v27  ;;  %v998_v32 = vadd.f32 %v997_v20, %v996_v24  ;;  %v814_v20 = vsel %vm726_vm1, %v1925_v30, 0.0 }
 0x15c   : > { %723 = vst.msk [vmem:[%s1590_s28 + $0xf8] sm:$0xf] %vm660_vm0, %v658_v2  ;;  %v1017_v41 = vsel %vm726_vm1, %v909_v16, 0.0  ;;  %v918_v2 = vmul.f32 %v1867_v6, %v1867_v6 }
 0x15d   : > { %v801_v37 = vadd.f32 %v800_v33, %v799_v28  ;;  %v1000_v35 = vadd.f32 %v999_v31, %v998_v32  ;;  %v1015_v28 = vsel %vm726_vm1, %v908_v15, 0.0  ;;  %v816_v32 = vsel %vm726_vm1, %v1957_v38, 0.0 }
 0x15e   : > { %v910_v31 = vmul.f32 %v1993_v57, %v1993_v57  ;;  %v912_v38 = vmul.f32 %v1712_v42, %v1712_v42 }
 0x15f   : > { %v1002_v54 = vadd.f32 %v1001_v40, %v1000_v35  ;;  %v803_v43 = vadd.f32 %v802_v51, %v801_v37  ;;  %v818_v37 = vsel %vm726_vm1, %v1993_v57, 0.0  ;;  %v911_v35 = vmul.f32 %v2021_v1, %v2021_v1 }
 0x160   : > { %v1019_v60 = vsel %vm726_vm1, %v910_v31, 0.0 }
 0x161   : > { %v805_v46 = vadd.f32 %v804_v49, %v803_v43  ;;  %v1004_v48 = vadd.f32 %v1003_v63, %v1002_v54  ;;  %v2134_v12 = vpop.f32.mrf.mxu3  ;;  %v820_v54 = vsel %vm726_vm1, %v2021_v1, 0.0  ;;  %v822_v63 = vsel %vm726_vm1, %v1712_v42, 0.0 }
 0x162   : > { %v659_v24 = vpack.c.bf16 %v2134_v12, %v2134_v12  ;;  %v913_v49 = vmul.f32 %v1736_v50, %v1736_v50  ;;  %v1021_v47 = vsel %vm726_vm1, %v911_v35, 0.0  ;;  %v914_v42 = vmul.f32 %v1760_v59, %v1760_v59 }
 0x163   : > { %v807_v36 = vadd.f32 %v806_v62, %v805_v46  ;;  %v1006_v61 = vadd.f32 %v1005_v58, %v1004_v48  ;;  %v1413_v46 = vmov 0.0   ;;  %v1023_v58 = vsel %vm726_vm1, %v912_v38, 0.0 }
 0x164   : > { %724 = vst.msk [vmem:[%s1590_s28 + $0xfc] sm:$0xf] %vm660_vm0, %v659_v24  ;;  %v824_v62 = vsel %vm726_vm1, %v1736_v50, 0.0  ;;  %v828_v50 = vsel %vm726_vm1, %v1784_v5, 0.0  ;;  %v922_v35 = vmul.f32 %v1995_v21, %v1995_v21 }
 0x165   : > { %v809_v10 = vadd.f32 %v808_v23, %v807_v36  ;;  %v1008_v0 = vadd.f32 %v1007_v3, %v1006_v61  ;;  %265 = vst.msk [vmem:[%s2163_s30] sm:$0x1] %vm264_vm2, %v1413_v46  ;;  %v1025_v61 = vsel %vm726_vm1, %v913_v49, 0.0  ;;  %v826_v3 = vsel %vm726_vm1, %v1760_v59, 0.0 }
 0x166   : > { %266 = vst.msk [vmem:[%s2173_s6] sm:$0x1] %vm264_vm2, %v1413_v46  ;;  %v915_v23 = vmul.f32 %v1784_v5, %v1784_v5  ;;  %v830_v59 = vsel %vm726_vm1, %v1804_v14, 0.0  ;;  %v832_v5 = vsel %vm726_vm1, %v1818_v26, 0.0 }
 0x167   : > { %v811_v7 = vadd.f32 %v810_v13, %v809_v10  ;;  %v1010_v11 = vadd.f32 %v1009_v4, %v1008_v0  ;;  %v1027_v0 = vsel %vm726_vm1, %v914_v42, 0.0  ;;  %v916_v4 = vmul.f32 %v1804_v14, %v1804_v14 }
 0x168   : > { %v834_v14 = vsel %vm726_vm1, %v1867_v6, 0.0  ;;  %v838_v6 = vsel %vm726_vm1, %v1927_v53, 0.0  ;;  %v926_v42 = vmul.f32 %v2109_v52, %v2109_v52 }
 0x169   : > { %v813_v29 = vadd.f32 %v812_v9, %v811_v7  ;;  %v1012_v27 = vadd.f32 %v1011_v25, %v1010_v11  ;;  %v1029_v7 = vsel %vm726_vm1, %v915_v23, 0.0  ;;  %v917_v11 = vmul.f32 %v1818_v26, %v1818_v26 }
 0x16a   : > { %v1031_v15 = vsel %vm726_vm1, %v916_v4, 0.0  ;;  %v836_v26 = vsel %vm726_vm1, %v1891_v8, 0.0 }
 0x16b   : > { %v1014_v18 = vadd.f32 %v1013_v45, %v1012_v27  ;;  %v815_v34 = vadd.f32 %v814_v20, %v813_v29  ;;  %v1033_v24 = vsel %vm726_vm1, %v917_v11, 0.0  ;;  %v919_v45 = vmul.f32 %v1891_v8, %v1891_v8 }
 0x16c   : > { %v840_v8 = vsel %vm726_vm1, %v1959_v39, 0.0 }
 0x16d   : > { %v1016_v30 = vadd.f32 %v1015_v28, %v1014_v18  ;;  %v817_v33 = vadd.f32 %v816_v32, %v815_v34  ;;  %v1035_v18 = vsel %vm726_vm1, %v918_v2, 0.0  ;;  %v920_v34 = vmul.f32 %v1927_v53, %v1927_v53  ;;  %v725_v2 = vld [vmem:[%s2163_s30] sm:$0x1] }
 0x16e   : > { %v1037_v31 = vsel %vm726_vm1, %v919_v45, 0.0  ;;  %v842_v53 = vsel %vm726_vm1, %v1995_v21, 0.0  ;;  %v846_v21 = vsel %vm726_vm1, %v2057_v44, 0.0 }
 0x16f   : > { %v1018_v40 = vadd.f32 %v1017_v41, %v1016_v30  ;;  %v819_v51 = vadd.f32 %v818_v37, %v817_v33  ;;  %v921_v30 = vmul.f32 %v1959_v39, %v1959_v39  ;;  %v1039_v37 = vsel %vm726_vm1, %v920_v34, 0.0 }
 0x170   : > { %v844_v39 = vsel %vm726_vm1, %v2023_v22, 0.0 }
 0x171   : > { %v1020_v57 = vadd.f32 %v1019_v60, %v1018_v40  ;;  %v821_v43 = vadd.f32 %v820_v54, %v819_v51  ;;  %v1041_v38 = vsel %vm726_vm1, %v921_v30, 0.0  ;;  %v923_v60 = vmul.f32 %v2023_v22, %v2023_v22 }
 0x172   : > { %v848_v22 = vsel %vm726_vm1, %v2081_v19, 0.0 }
 0x173   : > { %v823_v1 = vadd.f32 %v822_v63, %v821_v43  ;;  %v1022_v48 = vadd.f32 %v1021_v47, %v1020_v57  ;;  %v1043_v43 = vsel %vm726_vm1, %v922_v35, 0.0  ;;  %v924_v63 = vmul.f32 %v2057_v44, %v2057_v44 }
 0x174   : > { %v1045_v46 = vsel %vm726_vm1, %v923_v60, 0.0  ;;  %v850_v44 = vsel %vm726_vm1, %v2109_v52, 0.0 }
 0x175   : > { %v825_v56 = vadd.f32 %v824_v62, %v823_v1  ;;  %v1024_v36 = vadd.f32 %v1023_v58, %v1022_v48  ;;  %v925_v1 = vmul.f32 %v2081_v19, %v2081_v19  ;;  %v1047_v62 = vsel %vm726_vm1, %v924_v63, 0.0 }
 0x176   : > { %v852_v19 = vsel %vm726_vm1, %v2134_v12, 0.0 }
 0x177   : > { %v827_v55 = vadd.f32 %v826_v3, %v825_v56  ;;  %v1026_v10 = vadd.f32 %v1025_v61, %v1024_v36  ;;  %v1049_v61 = vsel %vm726_vm1, %v925_v1, 0.0  ;;  %v927_v3 = vmul.f32 %v2134_v12, %v2134_v12 }
 0x179   : > { %v829_v13 = vadd.f32 %v828_v50, %v827_v55  ;;  %v1028_v17 = vadd.f32 %v1027_v0, %v1026_v10  ;;  %v1051_v10 = vsel %vm726_vm1, %v926_v42, 0.0  ;;  %v1053_v4 = vsel %vm726_vm1, %v927_v3, 0.0 }
 0x17b   : > { %v831_v25 = vadd.f32 %v830_v59, %v829_v13  ;;  %v1030_v9 = vadd.f32 %v1029_v7, %v1028_v17 }
 0x17d   : > { %v833_v29 = vadd.f32 %v832_v5, %v831_v25  ;;  %v1032_v27 = vadd.f32 %v1031_v15, %v1030_v9 }
 0x17f   : > { %v1034_v20 = vadd.f32 %v1033_v24, %v1032_v27  ;;  %v835_v16 = vadd.f32 %v834_v14, %v833_v29  ;;  %v863_v27 = vld [vmem:[%s2173_s6] sm:$0x1] }
 0x181   : > { %v837_v28 = vadd.f32 %v836_v26, %v835_v16  ;;  %v1036_v32 = vadd.f32 %v1035_v18, %v1034_v20 }
 0x183   : > { %v839_v33 = vadd.f32 %v838_v6, %v837_v28  ;;  %v1038_v41 = vadd.f32 %v1037_v31, %v1036_v32 }
 0x185   : > { %v841_v40 = vadd.f32 %v840_v8, %v839_v33  ;;  %v1040_v51 = vadd.f32 %v1039_v37, %v1038_v41 }
 0x187   : > { %v843_v54 = vadd.f32 %v842_v53, %v841_v40  ;;  %v1042_v57 = vadd.f32 %v1041_v38, %v1040_v51 }
 0x189   : > { %v845_v49 = vadd.f32 %v844_v39, %v843_v54  ;;  %v1044_v47 = vadd.f32 %v1043_v43, %v1042_v57 }
 0x18b   : > { %v1046_v48 = vadd.f32 %v1045_v46, %v1044_v47  ;;  %v847_v58 = vadd.f32 %v846_v21, %v845_v49 }
 0x18d   : > { %v1048_v56 = vadd.f32 %v1047_v62, %v1046_v48  ;;  %v849_v36 = vadd.f32 %v848_v22, %v847_v58 }
 0x18f   : > { %v1050_v23 = vadd.f32 %v1049_v61, %v1048_v56  ;;  %v851_v55 = vadd.f32 %v850_v44, %v849_v36 }
 0x191   : > { %v1052_v0 = vadd.f32 %v1051_v10, %v1050_v23  ;;  %v853_v50 = vadd.f32 %v852_v19, %v851_v55 }
 0x193   : > { %v854_v13 = vrot.slane %v853_v50, 4  ;;  %v1054_v17 = vadd.f32 %v1053_v4, %v1052_v0 }
 0x195   : > { %v855_v52 = vadd.f32 %v854_v13, %v853_v50  ;;  %v1055_v7 = vrot.slane %v1054_v17, 4 }
 0x197   : > { %v856_v59 = vrot.slane %v855_v52, 2  ;;  %v1056_v11 = vadd.f32 %v1055_v7, %v1054_v17 }
 0x199   : > { %v857_v25 = vadd.f32 %v856_v59, %v855_v52  ;;  %v1057_v9 = vrot.slane %v1056_v11, 2 }
 0x19b   : > { %v858_v15 = vrot.slane %v857_v25, 1  ;;  %v1058_v5 = vadd.f32 %v1057_v9, %v1056_v11 }
 0x19d   : > { %v859_v29 = vadd.f32 %v858_v15, %v857_v25  ;;  %v1059_v12 = vrot.slane %v1058_v5, 1 }
 0x19f   : > { %v860_v24 = vadd.f32 %v859_v29, %v725_v2  ;;  %v1060_v14 = vadd.f32 %v1059_v12, %v1058_v5 }
 0x1a1   : > { %862 = vst.msk [vmem:[%s2163_s30] sm:$0x1] %vm264_vm2, %v860_v24  ;;  %v1061_v45 = vadd.f32 %v1060_v14, %v863_v27 }
 0x1a3   : > { %1062 = vst.msk [vmem:[%s2173_s6] sm:$0x1] %vm264_vm2, %v1061_v45 }
 0x1a4 PF: > { %s18_s20 = sadd.s32 1, %s1409_s20   ;;  %s2289_s15 = smov %s1393_s16 }
 0x1a5   : > { %p15_p1 = scmp.ge.s32.totalorder %s18_s20, 4   ;;  %s2290_s16 = smov %s1397_s17 }
 0x1a6   : > { %s2291_s17 = smov %s1488_s27  ;;  %s2292_s18 = smov %s1405_s19 }
 0x1a7   : > { %s2293_s19 = smov %s2295_s22  ;;  %17 = sbr.rel (!%p15_p1) target bundleno = 4 (0x4), region = 96 }
 0x1ac   :  { %1112 = vsyncpa [#allocation3], 1 }
 0x1ad   :  { %1114 = vsyncpa [#allocation3 + $0x1], 1 }

// kernel: bottleneck_forward.6
= control target key start
LH: loop header
LB: loop body
LE: loop exit
PB: predicated region body
PF: predicated region fallthrough
CT: control target
= control target key end

     0   :  { %s1895_s21 = smov 0   ;;  %s1897_s22 = smov 0   ;;  %s2494_s0 = inlined_call_operand.vmem [shape: bf16[1024,32], index: 0, kind: input, shape index: {}]   ;;  %s2495_s1 = inlined_call_operand.vmem [shape: f32[1,32], index: 1, kind: input, shape index: {}]   ;;  %s2496_s2 = inlined_call_operand.vmem [shape: f32[1,32], index: 2, kind: input, shape index: {}]   ;;  %s2497_s3 = inlined_call_operand.vmem [shape: bf16[32,128], index: 3, kind: input, shape index: {}]   ;;  %s2498_s4 = inlined_call_operand.vmem [shape: bf16[1024,128], index: 4, kind: output, shape index: {0}]   ;;  %s2499_s5 = inlined_call_operand.vmem [shape: f32[2,1,128], index: 5, kind: output, shape index: {1}]   ;;  %s2500_s6 = inlined_call_operand.vmem [shape: f32[2,1,128], index: 6, kind: output, shape index: {2}]  }
   0x1   :  { %s1899_s23 = smov 0  }
   0x2 LB: > { %s29_s24 = sadd.s32 1, %s1853_s22  ;;  %p1403_p0 = scmp.ge.s32.totalorder %s1857_s23, 1  ;;  %s1857_s23 = sphi %s1899_s23, %s17_s23   ;;  %s1853_s22 = sphi %s1897_s22, %s2502_s22   ;;  %s1849_s21 = sphi %s1895_s21, %s2501_s21  }
   0x3   : > { %p31_p1 = scmp.ge.s32.totalorder %s29_s24, 2  ;;  %p236_p2 = scmp.lt.s32.totalorder %s1857_s23, 3 }
   0x5   : > { %s2504_s24 = smov (%p31_p1, %s29_s24), 0  ;;  %p237_p3 = pnand %p1403_p0, %p236_p2 }
   0x6   : > { %s1404_s27 = sshll.u32 (!%p237_p3), %s1849_s21, 6  ;;  %p290_p5 = scmp.lt.s32.totalorder (!%p237_p3), %s1849_s21, 1 }
   0x7   : > { %240 = sbr.rel (%p237_p3) target bundleno = 387 (0x183), region = 36  ;;  %p276_p4 = scmp.lt.s32.totalorder (!%p237_p3), %s1404_s27, 127 }
   0xc   : > { %v1451_v0 = vld [vmem:[%s2497_s3 + $0x8] sm:$0xff]  ;;  %v1450_v1 = vld [vmem:[%s2497_s3] sm:$0xff]  ;;  %s2506_s27 = smov (!%p276_p4, %s1404_s27), 127  ;;  %vm679_vm0 = vcmask 261120   ;;  %s2508_s21 = smov (!%p290_p5, %s1849_s21), 1 }
   0xd   : > { %782 = vmatpush.bf16.msra.mxu0 %v1451_v0  ;;  %1802 = vmatpush.bf16.msra.mxu1 %v1451_v0  ;;  %s1405_s30 = sshll.u32 %s2506_s27, 2  ;;  %v1935_v2 = vld [vmem:[%s2495_s1] ss:$0 sm:$0xff]  ;;  %s2421_s19 = scalar_lea.vmem %s2499_s5, %s2508_s21 }
   0xe   : > { %1803 = vmatpush.bf16.msra.mxu2 %v1451_v0  ;;  %1804 = vmatpush.bf16.msra.mxu3 %v1451_v0  ;;  %s1930_s9 = scalar_lea.vmem %s2494_s0, %s1405_s30  ;;  %v1942_v7 = vld [vmem:[%s2496_s2] ss:$0 sm:$0xff]  ;;  %s2129_s16 = scalar_lea.vmem %s2498_s4, %s1405_s30 }
   0xf   : > { %v1453_v3 = vld [vmem:[%s1930_s9] sm:$0xff]   ;;  %v1740_v12 = vld [vmem:[%s1930_s9 + $0x8] sm:$0xff]   ;;  %v1741_v41 = vld [vmem:[%s1930_s9 + $0x10] sm:$0xff]   ;;  %s2426_s26 = scalar_lea.vmem %s2500_s6, %s2508_s21 }
  0x10   : > { %v1747_v4 = vld [vmem:[%s1930_s9 + $0x40] sm:$0xff]   ;;  %v1454_v5 = vunpack.c.l.bf16 %v1453_v3  ;;  %v1455_v6 = vunpack.c.h.bf16 %v1453_v3  ;;  %v1458_v21 = vunpack.c.l.bf16 %v1740_v12  ;;  %v1459_v22 = vunpack.c.h.bf16 %v1740_v12  ;;  %v1748_v25 = vld [vmem:[%s1930_s9 + $0x48] sm:$0xff]   ;;  %v1749_v54 = vld [vmem:[%s1930_s9 + $0x50] sm:$0xff]  }
  0x11   : > { %783 = vmatpush.bf16.msra.mxu0 %v1450_v1  ;;  %1805 = vmatpush.bf16.msra.mxu1 %v1450_v1  ;;  %v1486_v8 = vunpack.c.l.bf16 %v1747_v4  ;;  %v1487_v9 = vunpack.c.h.bf16 %v1747_v4  ;;  %v1490_v27 = vunpack.c.l.bf16 %v1748_v25  ;;  %v1491_v28 = vunpack.c.h.bf16 %v1748_v25  ;;  %v1755_v38 = vld [vmem:[%s1930_s9 + $0x80] sm:$0xff]  }
  0x12   : > { %1806 = vmatpush.bf16.msra.mxu2 %v1450_v1  ;;  %1807 = vmatpush.bf16.msra.mxu3 %v1450_v1  ;;  %v435_v10 = vmul.f32 %v1935_v2, %v1454_v5  ;;  %v436_v11 = vmul.f32 %v1935_v2, %v1455_v6  ;;  %v437_v30 = vmul.f32 %v1935_v2, %v1458_v21  ;;  %v1518_v42 = vunpack.c.l.bf16 %v1755_v38  ;;  %v1756_v5 = vld [vmem:[%s1930_s9 + $0x88] sm:$0xff]  }
  0x13   : > { %v451_v13 = vmul.f32 %v1935_v2, %v1486_v8  ;;  %v452_v14 = vmul.f32 %v1935_v2, %v1487_v9  ;;  %v438_v31 = vmul.f32 %v1935_v2, %v1459_v22  ;;  %v453_v32 = vmul.f32 %v1935_v2, %v1490_v27  ;;  %v1742_v9 = vld [vmem:[%s1930_s9 + $0x18] sm:$0xff]  }
  0x14   : > { %v503_v15 = vadd.f32 %v1942_v7, %v435_v10  ;;  %v504_v16 = vadd.f32 %v1942_v7, %v436_v11  ;;  %v454_v33 = vmul.f32 %v1935_v2, %v1491_v28  ;;  %v505_v34 = vadd.f32 %v1942_v7, %v437_v30  ;;  %v1750_v22 = vld [vmem:[%s1930_s9 + $0x58] sm:$0xff]  }
  0x15   : > { %v519_v17 = vadd.f32 %v1942_v7, %v451_v13  ;;  %v520_v18 = vadd.f32 %v1942_v7, %v452_v14  ;;  %v506_v35 = vadd.f32 %v1942_v7, %v438_v31  ;;  %v521_v36 = vadd.f32 %v1942_v7, %v453_v32 }
  0x16   : > { %v567_v19 = vmax.f32 %v503_v15, 0.0  ;;  %v568_v20 = vmax.f32 %v504_v16, 0.0  ;;  %v522_v37 = vadd.f32 %v1942_v7, %v454_v33  ;;  %v569_v39 = vmax.f32 %v505_v34, 0.0 }
  0x17   : > { %v583_v23 = vmax.f32 %v519_v17, 0.0  ;;  %v584_v24 = vmax.f32 %v520_v18, 0.0  ;;  %v570_v40 = vmax.f32 %v506_v35, 0.0  ;;  %v1519_v43 = vunpack.c.h.bf16 %v1755_v38  ;;  %v1757_v38 = vld [vmem:[%s1930_s9 + $0x90] sm:$0xff]  }
  0x18   : > { %v631_v26 = vpack.c.bf16 %v568_v20, %v567_v19  ;;  %v585_v44 = vmax.f32 %v521_v36, 0.0  ;;  %v586_v45 = vmax.f32 %v522_v37, 0.0  ;;  %v467_v46 = vmul.f32 %v1935_v2, %v1518_v42 }
  0x19   : > { %v639_v29 = vpack.c.bf16 %v584_v24, %v583_v23  ;;  %v468_v47 = vmul.f32 %v1935_v2, %v1519_v43  ;;  %v1462_v48 = vunpack.c.l.bf16 %v1741_v41  ;;  %v632_v49 = vpack.c.bf16 %v570_v40, %v569_v39  ;;  %v1763_v39 = vld [vmem:[%s1930_s9 + $0xc0] sm:$0xff]  }
  0x1a   : > { %1416 = vmatmul.msk.bf16.vlgmr.msra.gmra.mxu0 %vm679_vm0, %v631_v26  ;;  %v1463_v50 = vunpack.c.h.bf16 %v1741_v41  ;;  %v535_v51 = vadd.f32 %v1942_v7, %v467_v46  ;;  %v640_v53 = vpack.c.bf16 %v586_v45, %v585_v44  ;;  %v1494_v57 = vunpack.c.l.bf16 %v1749_v54  ;;  %v1743_v40 = vld [vmem:[%s1930_s9 + $0x20] sm:$0xff]  }
  0x1b   : > { %1424 = vmatmul.msk.bf16.vlgmr.msra.gmra.mxu1 %vm679_vm0, %v639_v29  ;;  %v536_v52 = vadd.f32 %v1942_v7, %v468_v47  ;;  %v1495_v58 = vunpack.c.h.bf16 %v1749_v54  ;;  %v439_v59 = vmul.f32 %v1935_v2, %v1462_v48  ;;  %v1522_v10 = vunpack.c.l.bf16 %v1756_v5 }
  0x1c   : > { %v599_v55 = vmax.f32 %v535_v51, 0.0  ;;  %v440_v60 = vmul.f32 %v1935_v2, %v1463_v50  ;;  %v455_v62 = vmul.f32 %v1935_v2, %v1494_v57  ;;  %v1523_v11 = vunpack.c.h.bf16 %v1756_v5 }
  0x1d   : > { %v600_v56 = vmax.f32 %v536_v52, 0.0  ;;  %v456_v63 = vmul.f32 %v1935_v2, %v1495_v58  ;;  %v507_v0 = vadd.f32 %v1942_v7, %v439_v59  ;;  %v469_v14 = vmul.f32 %v1935_v2, %v1522_v10  ;;  %v1751_v59 = vld [vmem:[%s1930_s9 + $0x60] sm:$0xff]  }
  0x1e   : > { %v508_v1 = vadd.f32 %v1942_v7, %v440_v60  ;;  %v523_v3 = vadd.f32 %v1942_v7, %v455_v62  ;;  %v470_v15 = vmul.f32 %v1935_v2, %v1523_v11  ;;  %v1466_v16 = vunpack.c.l.bf16 %v1742_v9 }
  0x1f   : > { %v647_v61 = vpack.c.bf16 %v600_v56, %v599_v55  ;;  %v524_v4 = vadd.f32 %v1942_v7, %v456_v63  ;;  %v571_v6 = vmax.f32 %v507_v0, 0.0  ;;  %v1467_v17 = vunpack.c.h.bf16 %v1742_v9 }
  0x20   : > { %v572_v8 = vmax.f32 %v508_v1, 0.0  ;;  %v587_v12 = vmax.f32 %v523_v3, 0.0  ;;  %v537_v19 = vadd.f32 %v1942_v7, %v469_v14  ;;  %v538_v20 = vadd.f32 %v1942_v7, %v470_v15 }
  0x21   : > { %1432 = vmatmul.msk.bf16.vlgmr.msra.gmra.mxu2 %vm679_vm0, %v647_v61  ;;  %v588_v13 = vmax.f32 %v524_v4, 0.0  ;;  %v1498_v25 = vunpack.c.l.bf16 %v1750_v22  ;;  %v1499_v26 = vunpack.c.h.bf16 %v1750_v22  ;;  %v441_v27 = vmul.f32 %v1935_v2, %v1466_v16  ;;  %v1758_v16 = vld [vmem:[%s1930_s9 + $0x98] sm:$0xff]  }
  0x22   : > { %v633_v18 = vpack.c.bf16 %v572_v8, %v571_v6  ;;  %v601_v23 = vmax.f32 %v537_v19, 0.0  ;;  %v602_v24 = vmax.f32 %v538_v20, 0.0  ;;  %v442_v28 = vmul.f32 %v1935_v2, %v1467_v17  ;;  %v1764_v17 = vld [vmem:[%s1930_s9 + $0xc8] sm:$0xff]  }
  0x23   : > { %v641_v21 = vpack.c.bf16 %v588_v13, %v587_v12  ;;  %v457_v30 = vmul.f32 %v1935_v2, %v1498_v25  ;;  %v458_v31 = vmul.f32 %v1935_v2, %v1499_v26  ;;  %v509_v32 = vadd.f32 %v1942_v7, %v441_v27 }
  0x24   : > { %v648_v29 = vpack.c.bf16 %v602_v24, %v601_v23  ;;  %v510_v33 = vadd.f32 %v1942_v7, %v442_v28  ;;  %v1526_v41 = vunpack.c.l.bf16 %v1757_v38  ;;  %v1527_v42 = vunpack.c.h.bf16 %v1757_v38 }
  0x25   : > { %v525_v34 = vadd.f32 %v1942_v7, %v457_v30  ;;  %v526_v35 = vadd.f32 %v1942_v7, %v458_v31  ;;  %v573_v36 = vmax.f32 %v509_v32, 0.0  ;;  %v1550_v43 = vunpack.c.l.bf16 %v1763_v39 }
  0x26   : > { %v574_v37 = vmax.f32 %v510_v33, 0.0  ;;  %v1551_v44 = vunpack.c.h.bf16 %v1763_v39  ;;  %v471_v47 = vmul.f32 %v1935_v2, %v1526_v41  ;;  %v472_v48 = vmul.f32 %v1935_v2, %v1527_v42 }
  0x27   : > { %v589_v45 = vmax.f32 %v525_v34, 0.0  ;;  %v590_v46 = vmax.f32 %v526_v35, 0.0  ;;  %v1470_v52 = vunpack.c.l.bf16 %v1743_v40  ;;  %v1502_v3 = vunpack.c.l.bf16 %v1751_v59 }
  0x28   : > { %v484_v50 = vmul.f32 %v1935_v2, %v1551_v44  ;;  %v634_v51 = vpack.c.bf16 %v574_v37, %v573_v36  ;;  %v539_v54 = vadd.f32 %v1942_v7, %v471_v47  ;;  %v540_v55 = vadd.f32 %v1942_v7, %v472_v48  ;;  %v1752_v37 = vld [vmem:[%s1930_s9 + $0x68] sm:$0xff]  }
  0x29   : > { %v642_v58 = vpack.c.bf16 %v590_v46, %v589_v45  ;;  %v443_v0 = vmul.f32 %v1935_v2, %v1470_v52  ;;  %v1503_v4 = vunpack.c.h.bf16 %v1751_v59  ;;  %v459_v8 = vmul.f32 %v1935_v2, %v1502_v3 }
  0x2a   : > { %1417 = vmatmul.msk.bf16.gmra.mxu0 %vm679_vm0, %v632_v49  ;;  %v483_v49 = vmul.f32 %v1935_v2, %v1550_v43  ;;  %v552_v57 = vadd.f32 %v1942_v7, %v484_v50  ;;  %v603_v60 = vmax.f32 %v539_v54, 0.0  ;;  %v604_v61 = vmax.f32 %v540_v55, 0.0 }
  0x2b   : > { %1425 = vmatmul.msk.bf16.gmra.mxu1 %vm679_vm0, %v640_v53  ;;  %v1471_v53 = vunpack.c.h.bf16 %v1743_v40  ;;  %v460_v9 = vmul.f32 %v1935_v2, %v1503_v4  ;;  %v511_v10 = vadd.f32 %v1942_v7, %v443_v0  ;;  %v527_v12 = vadd.f32 %v1942_v7, %v459_v8 }
  0x2c   : > { %v551_v56 = vadd.f32 %v1942_v7, %v483_v49  ;;  %v616_v63 = vmax.f32 %v552_v57, 0.0  ;;  %v649_v5 = vpack.c.bf16 %v604_v61, %v603_v60  ;;  %v1530_v19 = vunpack.c.l.bf16 %v1758_v16  ;;  %v1765_v57 = vld [vmem:[%s1930_s9 + $0xd0] sm:$0xff]  }
  0x2d   : > { %v444_v1 = vmul.f32 %v1935_v2, %v1471_v53  ;;  %v528_v13 = vadd.f32 %v1942_v7, %v460_v9  ;;  %v575_v14 = vmax.f32 %v511_v10, 0.0  ;;  %v1531_v20 = vunpack.c.h.bf16 %v1758_v16 }
  0x2e   : > { %v615_v62 = vmax.f32 %v551_v56, 0.0  ;;  %v1555_v22 = vunpack.c.h.bf16 %v1764_v17  ;;  %v591_v23 = vmax.f32 %v527_v12, 0.0  ;;  %v473_v25 = vmul.f32 %v1935_v2, %v1530_v19  ;;  %v1759_v56 = vld [vmem:[%s1930_s9 + $0xa0] sm:$0xff]  }
  0x2f   : > { %v512_v11 = vadd.f32 %v1942_v7, %v444_v1  ;;  %v592_v24 = vmax.f32 %v528_v13, 0.0  ;;  %v474_v26 = vmul.f32 %v1935_v2, %v1531_v20  ;;  %v1506_v44 = vunpack.c.l.bf16 %v1752_v37 }
  0x30   : > { %v655_v6 = vpack.c.bf16 %v616_v63, %v615_v62  ;;  %v486_v28 = vmul.f32 %v1935_v2, %v1555_v22  ;;  %v541_v32 = vadd.f32 %v1942_v7, %v473_v25  ;;  %v1507_v45 = vunpack.c.h.bf16 %v1752_v37 }
  0x31   : > { %1433 = vmatmul.msk.bf16.gmra.mxu2 %vm679_vm0, %v648_v29  ;;  %v576_v15 = vmax.f32 %v512_v11, 0.0  ;;  %v542_v33 = vadd.f32 %v1942_v7, %v474_v26  ;;  %v643_v36 = vpack.c.bf16 %v592_v24, %v591_v23  ;;  %v461_v48 = vmul.f32 %v1935_v2, %v1506_v44 }
  0x32   : > { %1440 = vmatmul.msk.bf16.vlgmr.msra.gmra.mxu3 %vm679_vm0, %v655_v6  ;;  %v554_v35 = vadd.f32 %v1942_v7, %v486_v28  ;;  %v605_v38 = vmax.f32 %v541_v32, 0.0  ;;  %v462_v49 = vmul.f32 %v1935_v2, %v1507_v45  ;;  %v1534_v59 = vunpack.c.l.bf16 %v1759_v56 }
  0x33   : > { %v635_v29 = vpack.c.bf16 %v576_v15, %v575_v14  ;;  %v606_v39 = vmax.f32 %v542_v33, 0.0  ;;  %v529_v52 = vadd.f32 %v1942_v7, %v461_v48  ;;  %v1535_v60 = vunpack.c.h.bf16 %v1759_v56  ;;  %v1753_v15 = vld [vmem:[%s1930_s9 + $0x70] sm:$0xff]  }
  0x34   : > { %v618_v41 = vmax.f32 %v554_v35, 0.0  ;;  %v530_v53 = vadd.f32 %v1942_v7, %v462_v49  ;;  %v1558_v61 = vunpack.c.l.bf16 %v1765_v57  ;;  %v1559_v62 = vunpack.c.h.bf16 %v1765_v57  ;;  %v1766_v35 = vld [vmem:[%s1930_s9 + $0xd8] sm:$0xff]  }
  0x35   : > { %v650_v46 = vpack.c.bf16 %v606_v39, %v605_v38  ;;  %v593_v63 = vmax.f32 %v529_v52, 0.0  ;;  %v475_v1 = vmul.f32 %v1935_v2, %v1534_v59  ;;  %v476_v3 = vmul.f32 %v1935_v2, %v1535_v60 }
  0x36   : > { %v594_v0 = vmax.f32 %v530_v53, 0.0  ;;  %v487_v4 = vmul.f32 %v1935_v2, %v1558_v61  ;;  %v1510_v22 = vunpack.c.l.bf16 %v1753_v15  ;;  %v1511_v23 = vunpack.c.h.bf16 %v1753_v15 }
  0x37   : > { %v543_v10 = vadd.f32 %v1942_v7, %v475_v1  ;;  %v544_v11 = vadd.f32 %v1942_v7, %v476_v3  ;;  %v1562_v39 = vunpack.c.l.bf16 %v1766_v35 }
  0x38   : > { %v555_v12 = vadd.f32 %v1942_v7, %v487_v4  ;;  %v644_v14 = vpack.c.bf16 %v594_v0, %v593_v63  ;;  %v463_v26 = vmul.f32 %v1935_v2, %v1510_v22 }
  0x39   : > { %v607_v16 = vmax.f32 %v543_v10, 0.0  ;;  %v489_v45 = vmul.f32 %v1935_v2, %v1562_v39 }
  0x3a   : > { %1418 = vmatmul.msk.bf16.gmra.mxu0 %vm679_vm0, %v633_v18  ;;  %v1744_v18 = vld [vmem:[%s1930_s9 + $0x28] sm:$0xff]  }
  0x3b   : > { %1426 = vmatmul.msk.bf16.gmra.mxu1 %vm679_vm0, %v641_v21  ;;  %v1554_v21 = vunpack.c.l.bf16 %v1764_v17  ;;  %v1474_v30 = vunpack.c.l.bf16 %v1744_v18  ;;  %v1475_v31 = vunpack.c.h.bf16 %v1744_v18  ;;  %v608_v17 = vmax.f32 %v544_v11, 0.0 }
  0x3c   : > { %v619_v18 = vmax.f32 %v555_v12, 0.0  ;;  %v557_v52 = vadd.f32 %v1942_v7, %v489_v45  ;;  %v1761_v12 = vld [vmem:[%s1930_s9 + $0xb0] sm:$0xff]  }
  0x3d   : > { %v485_v27 = vmul.f32 %v1935_v2, %v1554_v21  ;;  %v445_v42 = vmul.f32 %v1935_v2, %v1474_v30  ;;  %v446_v43 = vmul.f32 %v1935_v2, %v1475_v31  ;;  %v651_v24 = vpack.c.bf16 %v608_v17, %v607_v16 }
  0x3e   : > { %v531_v30 = vadd.f32 %v1942_v7, %v463_v26  ;;  %v1543_v15 = vunpack.c.h.bf16 %v1761_v12 }
  0x3f   : > { %v553_v34 = vadd.f32 %v1942_v7, %v485_v27  ;;  %v513_v50 = vadd.f32 %v1942_v7, %v445_v42  ;;  %v464_v27 = vmul.f32 %v1935_v2, %v1511_v23 }
  0x41   : > { %1434 = vmatmul.msk.bf16.gmra.mxu2 %vm679_vm0, %v649_v5  ;;  %v617_v40 = vmax.f32 %v553_v34, 0.0  ;;  %v577_v54 = vmax.f32 %v513_v50, 0.0  ;;  %v488_v5 = vmul.f32 %v1935_v2, %v1559_v62  ;;  %v532_v31 = vadd.f32 %v1942_v7, %v464_v27  ;;  %v1760_v34 = vld [vmem:[%s1930_s9 + $0xa8] sm:$0xff]  }
  0x42   : > { %v1538_v37 = vunpack.c.l.bf16 %v1760_v34  ;;  %v1539_v38 = vunpack.c.h.bf16 %v1760_v34 }
  0x43   : > { %v656_v47 = vpack.c.bf16 %v618_v41, %v617_v40  ;;  %v556_v13 = vadd.f32 %v1942_v7, %v488_v5  ;;  %v1563_v40 = vunpack.c.h.bf16 %v1766_v35  ;;  %v595_v41 = vmax.f32 %v531_v30, 0.0 }
  0x44   : > { %v596_v42 = vmax.f32 %v532_v31, 0.0  ;;  %v478_v44 = vmul.f32 %v1935_v2, %v1539_v38 }
  0x45   : > { %1441 = vmatmul.msk.bf16.gmra.mxu3 %vm679_vm0, %v656_v47  ;;  %v620_v19 = vmax.f32 %v556_v13, 0.0  ;;  %v1767_v13 = vld [vmem:[%s1930_s9 + $0xe0] sm:$0xff]  }
  0x46   : > { %v1566_v16 = vunpack.c.l.bf16 %v1767_v13  ;;  %v1567_v17 = vunpack.c.h.bf16 %v1767_v13 }
  0x47   : > { %v657_v25 = vpack.c.bf16 %v620_v19, %v619_v18 }
  0x48   : > { %v491_v22 = vmul.f32 %v1935_v2, %v1566_v16  ;;  %v492_v23 = vmul.f32 %v1935_v2, %v1567_v17 }
  0x4a   : > { %1419 = vmatmul.msk.bf16.gmra.mxu0 %vm679_vm0, %v634_v51  ;;  %v514_v51 = vadd.f32 %v1942_v7, %v446_v43  ;;  %v477_v43 = vmul.f32 %v1935_v2, %v1538_v37  ;;  %v559_v27 = vadd.f32 %v1942_v7, %v491_v22  ;;  %v1768_v37 = vld [vmem:[%s1930_s9 + $0xe8] sm:$0xff]  }
  0x4b   : > { %1427 = vmatmul.msk.bf16.gmra.mxu1 %vm679_vm0, %v642_v58  ;;  %v1745_v58 = vld [vmem:[%s1930_s9 + $0x30] sm:$0xff]  }
  0x4c   : > { %v578_v55 = vmax.f32 %v514_v51, 0.0  ;;  %v1478_v8 = vunpack.c.l.bf16 %v1745_v58  ;;  %v1479_v9 = vunpack.c.h.bf16 %v1745_v58  ;;  %v545_v50 = vadd.f32 %v1942_v7, %v477_v43 }
  0x4d   : > { %v546_v51 = vadd.f32 %v1942_v7, %v478_v44  ;;  %v621_v58 = vmax.f32 %v557_v52, 0.0 }
  0x4e   : > { %v636_v6 = vpack.c.bf16 %v578_v55, %v577_v54  ;;  %v447_v20 = vmul.f32 %v1935_v2, %v1478_v8  ;;  %v448_v21 = vmul.f32 %v1935_v2, %v1479_v9  ;;  %v645_v54 = vpack.c.bf16 %v596_v42, %v595_v41  ;;  %v1754_v55 = vld [vmem:[%s1930_s9 + $0x78] sm:$0xff]  }
  0x4f   : > { %v609_v56 = vmax.f32 %v545_v50, 0.0  ;;  %v610_v57 = vmax.f32 %v546_v51, 0.0  ;;  %v1514_v62 = vunpack.c.l.bf16 %v1754_v55  ;;  %v1515_v63 = vunpack.c.h.bf16 %v1754_v55 }
  0x50   : > { %v515_v28 = vadd.f32 %v1942_v7, %v447_v20  ;;  %v1571_v41 = vunpack.c.h.bf16 %v1768_v37 }
  0x51   : > { %1435 = vmatmul.msk.bf16.gmra.mxu2 %vm679_vm0, %v650_v46  ;;  %v490_v46 = vmul.f32 %v1935_v2, %v1563_v40  ;;  %v652_v0 = vpack.c.bf16 %v610_v57, %v609_v56  ;;  %v465_v3 = vmul.f32 %v1935_v2, %v1514_v62  ;;  %v466_v4 = vmul.f32 %v1935_v2, %v1515_v63 }
  0x52   : > { %v579_v32 = vmax.f32 %v515_v28, 0.0  ;;  %v560_v28 = vadd.f32 %v1942_v7, %v492_v23  ;;  %v1570_v40 = vunpack.c.l.bf16 %v1768_v37  ;;  %v494_v45 = vmul.f32 %v1935_v2, %v1571_v41 }
  0x53   : > { %v558_v53 = vadd.f32 %v1942_v7, %v490_v46  ;;  %v533_v8 = vadd.f32 %v1942_v7, %v465_v3  ;;  %v534_v9 = vadd.f32 %v1942_v7, %v466_v4 }
  0x54   : > { %v493_v44 = vmul.f32 %v1935_v2, %v1570_v40 }
  0x55   : > { %1442 = vmatmul.msk.bf16.gmra.mxu3 %vm679_vm0, %v657_v25  ;;  %v622_v59 = vmax.f32 %v558_v53, 0.0  ;;  %v597_v18 = vmax.f32 %v533_v8, 0.0  ;;  %v598_v19 = vmax.f32 %v534_v9, 0.0 }
  0x57   : > { %v658_v1 = vpack.c.bf16 %v622_v59, %v621_v58 }
  0x5a   : > { %1420 = vmatmul.msk.bf16.gmra.mxu0 %vm679_vm0, %v635_v29  ;;  %v516_v29 = vadd.f32 %v1942_v7, %v448_v21  ;;  %v480_v21 = vmul.f32 %v1935_v2, %v1543_v15 }
  0x5b   : > { %1428 = vmatmul.msk.bf16.gmra.mxu1 %vm679_vm0, %v643_v36  ;;  %v1746_v36 = vld [vmem:[%s1930_s9 + $0x38] sm:$0xff]  }
  0x5c   : > { %v580_v33 = vmax.f32 %v516_v29, 0.0  ;;  %v1482_v48 = vunpack.c.l.bf16 %v1746_v36  ;;  %v1483_v49 = vunpack.c.h.bf16 %v1746_v36  ;;  %v548_v26 = vadd.f32 %v1942_v7, %v480_v21  ;;  %v1762_v36 = vld [vmem:[%s1930_s9 + $0xb8] sm:$0xff]  }
  0x5d   : > { %v646_v29 = vpack.c.bf16 %v598_v19, %v597_v18  ;;  %v1546_v38 = vunpack.c.l.bf16 %v1762_v36  ;;  %v1547_v39 = vunpack.c.h.bf16 %v1762_v36 }
  0x5e   : > { %v637_v47 = vpack.c.bf16 %v580_v33, %v579_v32  ;;  %v449_v60 = vmul.f32 %v1935_v2, %v1482_v48  ;;  %v450_v61 = vmul.f32 %v1935_v2, %v1483_v49  ;;  %v612_v31 = vmax.f32 %v548_v26, 0.0  ;;  %v1770_v26 = vld [vmem:[%s1930_s9 + $0xf8] sm:$0xff]  }
  0x5f   : > { %v623_v32 = vmax.f32 %v559_v27, 0.0  ;;  %v624_v33 = vmax.f32 %v560_v28, 0.0  ;;  %v481_v42 = vmul.f32 %v1935_v2, %v1546_v38  ;;  %v482_v43 = vmul.f32 %v1935_v2, %v1547_v39 }
  0x60   : > { %v517_v5 = vadd.f32 %v1942_v7, %v449_v60  ;;  %v561_v48 = vadd.f32 %v1942_v7, %v493_v44  ;;  %v562_v49 = vadd.f32 %v1942_v7, %v494_v45  ;;  %v1578_v28 = vunpack.c.l.bf16 %v1770_v26 }
  0x61   : > { %1436 = vmatmul.msk.bf16.gmra.mxu2 %vm679_vm0, %v651_v24  ;;  %v659_v35 = vpack.c.bf16 %v624_v33, %v623_v32  ;;  %v549_v46 = vadd.f32 %v1942_v7, %v481_v42 }
  0x62   : > { %v581_v10 = vmax.f32 %v517_v5, 0.0  ;;  %v626_v55 = vmax.f32 %v562_v49, 0.0 }
  0x63   : > { %v613_v52 = vmax.f32 %v549_v46, 0.0 }
  0x65   : > { %1443 = vmatmul.msk.bf16.gmra.mxu3 %vm679_vm0, %v658_v1  ;;  %v1769_v1 = vld [vmem:[%s1930_s9 + $0xf0] sm:$0xff]  }
  0x66   : > { %v1574_v4 = vunpack.c.l.bf16 %v1769_v1  ;;  %v1575_v5 = vunpack.c.h.bf16 %v1769_v1 }
  0x68   : > { %v496_v8 = vmul.f32 %v1935_v2, %v1575_v5 }
  0x6a   : > { %1421 = vmatmul.msk.bf16.gmra.mxu0 %vm679_vm0, %v636_v6  ;;  %v518_v6 = vadd.f32 %v1942_v7, %v450_v61 }
  0x6b   : > { %1429 = vmatmul.msk.bf16.gmra.mxu1 %vm679_vm0, %v644_v14  ;;  %v1542_v14 = vunpack.c.l.bf16 %v1761_v12 }
  0x6c   : > { %v582_v11 = vmax.f32 %v518_v6, 0.0  ;;  %v495_v6 = vmul.f32 %v1935_v2, %v1574_v4 }
  0x6d   : > { %v479_v20 = vmul.f32 %v1935_v2, %v1542_v14 }
  0x6e   : > { %v638_v24 = vpack.c.bf16 %v582_v11, %v581_v10  ;;  %v563_v9 = vadd.f32 %v1942_v7, %v495_v6  ;;  %v564_v10 = vadd.f32 %v1942_v7, %v496_v8 }
  0x6f   : > { %v547_v25 = vadd.f32 %v1942_v7, %v479_v20 }
  0x70   : > { %v627_v15 = vmax.f32 %v563_v9, 0.0  ;;  %v628_v16 = vmax.f32 %v564_v10, 0.0 }
  0x71   : > { %1437 = vmatmul.msk.bf16.gmra.mxu2 %vm679_vm0, %v652_v0  ;;  %v611_v30 = vmax.f32 %v547_v25, 0.0 }
  0x72   : > { %v661_v18 = vpack.c.bf16 %v628_v16, %v627_v15 }
  0x73   : > { %v653_v34 = vpack.c.bf16 %v612_v31, %v611_v30  ;;  %v497_v30 = vmul.f32 %v1935_v2, %v1578_v28 }
  0x75   : > { %1444 = vmatmul.msk.bf16.gmra.mxu3 %vm679_vm0, %v659_v35  ;;  %v565_v32 = vadd.f32 %v1942_v7, %v497_v30 }
  0x77   : > { %v629_v40 = vmax.f32 %v565_v32, 0.0 }
  0x7a   : > { %1422 = vmatmul.msk.bf16.gmra.mxu0 %vm679_vm0, %v637_v47  ;;  %v550_v47 = vadd.f32 %v1942_v7, %v482_v43 }
  0x7b   : > { %1430 = vmatmul.msk.bf16.gmra.mxu1 %vm679_vm0, %v645_v54  ;;  %v625_v54 = vmax.f32 %v561_v48, 0.0 }
  0x7c   : > { %v614_v53 = vmax.f32 %v550_v47, 0.0 }
  0x7d   : > { %v660_v57 = vpack.c.bf16 %v626_v55, %v625_v54 }
  0x7e   : > { %v654_v56 = vpack.c.bf16 %v614_v53, %v613_v52 }
  0x81   : > { %1438 = vmatmul.msk.bf16.gmra.mxu2 %vm679_vm0, %v653_v34 }
  0x85   : > { %1445 = vmatmul.msk.bf16.gmra.mxu3 %vm679_vm0, %v660_v57 }
  0x8a   : > { %1423 = vmatmul.msk.bf16.gmra.mxu0 %vm679_vm0, %v638_v24 }
  0x8b   : > { %1431 = vmatmul.msk.bf16.gmra.mxu1 %vm679_vm0, %v646_v29  ;;  %v1579_v29 = vunpack.c.h.bf16 %v1770_v26 }
  0x8d   : > { %v498_v31 = vmul.f32 %v1935_v2, %v1579_v29 }
  0x8f   : > { %v566_v33 = vadd.f32 %v1942_v7, %v498_v31 }
  0x91   : > { %1439 = vmatmul.msk.bf16.gmra.mxu2 %vm679_vm0, %v654_v56  ;;  %v630_v41 = vmax.f32 %v566_v33, 0.0 }
  0x93   : > { %v662_v7 = vpack.c.bf16 %v630_v41, %v629_v40 }
  0x95   : > { %1446 = vmatmul.msk.bf16.gmra.mxu3 %vm679_vm0, %v661_v18 }
  0x97   : > { %v785_v50 = vpop.f32.mrf.mxu0 }
  0x98   : > { %v2120_v51 = vpop.f32.mrf.mxu1  ;;  %v1146_v59 = vmul.f32 %v785_v50, %v785_v50 }
  0x9f   : > { %v787_v58 = vpop.f32.mrf.mxu0 }
  0xa0   : > { %v1583_v60 = vpack.c.bf16 %v787_v58, %v785_v50  ;;  %v1074_v61 = vadd.f32 %v787_v58, %v785_v50  ;;  %v1147_v62 = vmul.f32 %v787_v58, %v787_v58  ;;  %v2131_v63 = vpop.f32.mrf.mxu1 }
  0xa1   : > { %v1623_v0 = vpack.c.bf16 %v2131_v63, %v2120_v51 }
  0xa2   : > { %1584 = vst [vmem:[%s2129_s16] sm:$0xff] %v1583_v60   ;;  %v1210_v3 = vadd.f32 %v1147_v62, %v1146_v59 }
  0xa3   : > { %1778 = vst [vmem:[%s2129_s16 + $0x40] sm:$0xff] %v1623_v0  }
  0xa4   : > { %v2145_v20 = vpop.f32.mrf.mxu2 }
  0xa5   : > { %1447 = vmatmul.msk.bf16.gmra.mxu3 %vm679_vm0, %v662_v7 }
  0xa7   : > { %v790_v11 = vpop.f32.mrf.mxu0 }
  0xa8   : > { %v1075_v12 = vadd.f32 %v1074_v61, %v790_v11  ;;  %v1148_v13 = vmul.f32 %v790_v11, %v790_v11  ;;  %v2142_v14 = vpop.f32.mrf.mxu1 }
  0xaa   : > { %v1211_v17 = vadd.f32 %v1210_v3, %v1148_v13 }
  0xac   : > { %v2158_v35 = vpop.f32.mrf.mxu2 }
  0xad   : > { %v1663_v39 = vpack.c.bf16 %v2158_v35, %v2145_v20 }
  0xaf   : > { %v792_v19 = vpop.f32.mrf.mxu0  ;;  %1786 = vst [vmem:[%s2129_s16 + $0x80] sm:$0xff] %v1663_v39  }
  0xb0   : > { %v1588_v21 = vpack.c.bf16 %v792_v19, %v790_v11  ;;  %v1076_v22 = vadd.f32 %v1075_v12, %v792_v19  ;;  %v1149_v23 = vmul.f32 %v792_v19, %v792_v19  ;;  %v2147_v24 = vpop.f32.mrf.mxu1 }
  0xb1   : > { %v1628_v25 = vpack.c.bf16 %v2147_v24, %v2142_v14 }
  0xb2   : > { %1771 = vst [vmem:[%s2129_s16 + $0x8] sm:$0xff] %v1588_v21   ;;  %v1212_v27 = vadd.f32 %v1211_v17, %v1149_v23 }
  0xb3   : > { %1779 = vst [vmem:[%s2129_s16 + $0x48] sm:$0xff] %v1628_v25  }
  0xb4   : > { %v2170_v43 = vpop.f32.mrf.mxu2 }
  0xb5   : > { %v2189_v56 = vpop.f32.mrf.mxu3 }
  0xb7   : > { %v795_v34 = vpop.f32.mrf.mxu0 }
  0xb8   : > { %v2160_v36 = vadd.f32 %v1076_v22, %v795_v34  ;;  %v1150_v37 = vmul.f32 %v795_v34, %v795_v34  ;;  %v2162_v38 = vpop.f32.mrf.mxu1 }
  0xba   : > { %v2166_v2 = vadd.f32 %v1212_v27, %v1150_v37 }
  0xbc   : > { %v2178_v48 = vpop.f32.mrf.mxu2 }
  0xbd   : > { %v1668_v50 = vpack.c.bf16 %v2178_v48, %v2170_v43  ;;  %v2201_v62 = vpop.f32.mrf.mxu3 }
  0xbe   : > { %v1703_v0 = vpack.c.bf16 %v2201_v62, %v2189_v56 }
  0xbf   : > { %v797_v42 = vpop.f32.mrf.mxu0  ;;  %1787 = vst [vmem:[%s2129_s16 + $0x88] sm:$0xff] %v1668_v50  }
  0xc0   : > { %v1593_v44 = vpack.c.bf16 %v797_v42, %v795_v34  ;;  %v2172_v45 = vpop.f32.mrf.mxu1  ;;  %1794 = vst [vmem:[%s2129_s16 + $0xc0] sm:$0xff] %v1703_v0   ;;  %v1151_v30 = vmul.f32 %v797_v42, %v797_v42  ;;  %v1078_v31 = vadd.f32 %v2160_v36, %v797_v42 }
  0xc1   : > { %v1633_v46 = vpack.c.bf16 %v2172_v45, %v2162_v38 }
  0xc2   : > { %1772 = vst [vmem:[%s2129_s16 + $0x10] sm:$0xff] %v1593_v44   ;;  %v1214_v33 = vadd.f32 %v2166_v2, %v1151_v30 }
  0xc3   : > { %1780 = vst [vmem:[%s2129_s16 + $0x50] sm:$0xff] %v1633_v46  }
  0xc4   : > { %v2185_v53 = vpop.f32.mrf.mxu2 }
  0xc7   : > { %v800_v47 = vpop.f32.mrf.mxu0 }
  0xc8   : > { %v2180_v49 = vpop.f32.mrf.mxu1  ;;  %v2211_v6 = vpop.f32.mrf.mxu3  ;;  %v1152_v32 = vmul.f32 %v800_v47, %v800_v47  ;;  %v1079_v34 = vadd.f32 %v1078_v31, %v800_v47 }
  0xca   : > { %v1215_v41 = vadd.f32 %v1214_v33, %v1152_v32 }
  0xcc   : > { %v2195_v59 = vpop.f32.mrf.mxu2 }
  0xcd   : > { %v1673_v61 = vpack.c.bf16 %v2195_v59, %v2185_v53 }
  0xcf   : > { %v802_v52 = vpop.f32.mrf.mxu0  ;;  %1788 = vst [vmem:[%s2129_s16 + $0x90] sm:$0xff] %v1673_v61  }
  0xd0   : > { %v1598_v54 = vpack.c.bf16 %v802_v52, %v800_v47  ;;  %v2187_v55 = vpop.f32.mrf.mxu1  ;;  %v2223_v13 = vpop.f32.mrf.mxu3  ;;  %v1153_v37 = vmul.f32 %v802_v52, %v802_v52  ;;  %v1080_v7 = vadd.f32 %v1079_v34, %v802_v52 }
  0xd1   : > { %v1638_v57 = vpack.c.bf16 %v2187_v55, %v2180_v49  ;;  %v1708_v15 = vpack.c.bf16 %v2223_v13, %v2211_v6 }
  0xd2   : > { %1773 = vst [vmem:[%s2129_s16 + $0x18] sm:$0xff] %v1598_v54   ;;  %v1216_v42 = vadd.f32 %v1215_v41, %v1153_v37 }
  0xd3   : > { %1781 = vst [vmem:[%s2129_s16 + $0x58] sm:$0xff] %v1638_v57  }
  0xd4   : > { %v2207_v3 = vpop.f32.mrf.mxu2  ;;  %1795 = vst [vmem:[%s2129_s16 + $0xc8] sm:$0xff] %v1708_v15  }
  0xd7   : > { %v805_v58 = vpop.f32.mrf.mxu0 }
  0xd8   : > { %v2197_v60 = vpop.f32.mrf.mxu1  ;;  %v2233_v21 = vpop.f32.mrf.mxu3  ;;  %v1154_v44 = vmul.f32 %v805_v58, %v805_v58  ;;  %v1081_v57 = vadd.f32 %v1080_v7, %v805_v58 }
  0xda   : > { %v1217_v47 = vadd.f32 %v1216_v42, %v1154_v44 }
  0xdc   : > { %v2217_v10 = vpop.f32.mrf.mxu2 }
  0xdd   : > { %v1678_v12 = vpack.c.bf16 %v2217_v10, %v2207_v3 }
  0xdf   : > { %v807_v1 = vpop.f32.mrf.mxu0  ;;  %1789 = vst [vmem:[%s2129_s16 + $0x98] sm:$0xff] %v1678_v12  }
  0xe0   : > { %v1603_v4 = vpack.c.bf16 %v807_v1, %v805_v58  ;;  %v2209_v5 = vpop.f32.mrf.mxu1  ;;  %v2243_v27 = vpop.f32.mrf.mxu3  ;;  %v1155_v2 = vmul.f32 %v807_v1, %v807_v1  ;;  %v1082_v61 = vadd.f32 %v1081_v57, %v807_v1 }
  0xe1   : > { %v1643_v8 = vpack.c.bf16 %v2209_v5, %v2197_v60  ;;  %v1713_v29 = vpack.c.bf16 %v2243_v27, %v2233_v21 }
  0xe2   : > { %1774 = vst [vmem:[%s2129_s16 + $0x20] sm:$0xff] %v1603_v4   ;;  %v1218_v4 = vadd.f32 %v1217_v47, %v1155_v2 }
  0xe3   : > { %1782 = vst [vmem:[%s2129_s16 + $0x60] sm:$0xff] %v1643_v8  }
  0xe4   : > { %v2229_v17 = vpop.f32.mrf.mxu2  ;;  %1796 = vst [vmem:[%s2129_s16 + $0xd0] sm:$0xff] %v1713_v29  }
  0xe7   : > { %v810_v9 = vpop.f32.mrf.mxu0 }
  0xe8   : > { %v2219_v11 = vpop.f32.mrf.mxu1  ;;  %v2257_v54 = vpop.f32.mrf.mxu3  ;;  %v1156_v0 = vmul.f32 %v810_v9, %v810_v9  ;;  %v1083_v52 = vadd.f32 %v1082_v61, %v810_v9 }
  0xec   : > { %v2239_v25 = vpop.f32.mrf.mxu2 }
  0xed   : > { %v1683_v28 = vpack.c.bf16 %v2239_v25, %v2229_v17 }
  0xef   : > { %v812_v16 = vpop.f32.mrf.mxu0  ;;  %1790 = vst [vmem:[%s2129_s16 + $0xa0] sm:$0xff] %v1683_v28  }
  0xf0   : > { %v1608_v18 = vpack.c.bf16 %v812_v16, %v810_v9  ;;  %v2231_v19 = vpop.f32.mrf.mxu1  ;;  %v1157_v8 = vmul.f32 %v812_v16, %v812_v16  ;;  %v2267_v58 = vpop.f32.mrf.mxu3 }
  0xf1   : > { %v1648_v22 = vpack.c.bf16 %v2231_v19, %v2219_v11  ;;  %v1718_v1 = vpack.c.bf16 %v2267_v58, %v2257_v54 }
  0xf2   : > { %1775 = vst [vmem:[%s2129_s16 + $0x28] sm:$0xff] %v1608_v18   ;;  %v1219_v18 = vadd.f32 %v1218_v4, %v1156_v0  ;;  %v1163_v4 = vmul.f32 %v2131_v63, %v2131_v63 }
  0xf3   : > { %1783 = vst [vmem:[%s2129_s16 + $0x68] sm:$0xff] %v1648_v22   ;;  %v1084_v22 = vadd.f32 %v1083_v52, %v812_v16 }
  0xf4   : > { %v2253_v40 = vpop.f32.mrf.mxu2  ;;  %v1220_v31 = vadd.f32 %v1219_v18, %v1157_v8  ;;  %1797 = vst [vmem:[%s2129_s16 + $0xd8] sm:$0xff] %v1718_v1  }
  0xf7   : > { %v815_v23 = vpop.f32.mrf.mxu0 }
  0xf8   : > { %v2241_v26 = vpop.f32.mrf.mxu1  ;;  %v1158_v28 = vmul.f32 %v815_v23, %v815_v23  ;;  %v1085_v9 = vadd.f32 %v1084_v22, %v815_v23 }
  0xfa   : > { %v1221_v33 = vadd.f32 %v1220_v31, %v1158_v28 }
  0xfc   : > { %v2263_v15 = vpop.f32.mrf.mxu2 }
  0xfd   : > { %v1688_v30 = vpack.c.bf16 %v2263_v15, %v2253_v40 }
  0xff   : > { %v817_v39 = vpop.f32.mrf.mxu0  ;;  %1791 = vst [vmem:[%s2129_s16 + $0xa8] sm:$0xff] %v1688_v30  }
 0x100   : > { %v1613_v46 = vpack.c.bf16 %v817_v39, %v815_v23  ;;  %v2255_v50 = vpop.f32.mrf.mxu1  ;;  %v1159_v32 = vmul.f32 %v817_v39, %v817_v39  ;;  %v1086_v34 = vadd.f32 %v1085_v9, %v817_v39  ;;  %v2279_v23 = vpop.f32.mrf.mxu3  ;;  %v1162_v39 = vmul.f32 %v2120_v51, %v2120_v51 }
 0x101   : > { %v1653_v36 = vpack.c.bf16 %v2255_v50, %v2241_v26 }
 0x102   : > { %1776 = vst [vmem:[%s2129_s16 + $0x30] sm:$0xff] %v1613_v46   ;;  %v1222_v16 = vadd.f32 %v1221_v33, %v1159_v32 }
 0x103   : > { %1784 = vst [vmem:[%s2129_s16 + $0x70] sm:$0xff] %v1653_v36  }
 0x104   : > { %v2275_v44 = vpop.f32.mrf.mxu2 }
 0x107   : > { %v820_v12 = vpop.f32.mrf.mxu0 }
 0x108   : > { %v2265_v29 = vpop.f32.mrf.mxu1  ;;  %v1160_v37 = vmul.f32 %v820_v12, %v820_v12  ;;  %v1087_v41 = vadd.f32 %v1086_v34, %v820_v12  ;;  %v2299_v31 = vpop.f32.mrf.mxu3  ;;  %v1167_v34 = vmul.f32 %v2172_v45, %v2172_v45 }
 0x109   : > { %v1723_v9 = vpack.c.bf16 %v2299_v31, %v2279_v23 }
 0x10a   : > { %v1223_v46 = vadd.f32 %v1222_v16, %v1160_v37  ;;  %v1168_v16 = vmul.f32 %v2180_v49, %v2180_v49 }
 0x10b   : > { %1798 = vst [vmem:[%s2129_s16 + $0xe0] sm:$0xff] %v1723_v9  }
 0x10c   : > { %v2294_v28 = vpop.f32.mrf.mxu2 }
 0x10f   : > { %v822_v7 = vpop.f32.mrf.mxu0 }
 0x110   : > { %v1618_v36 = vpack.c.bf16 %v822_v7, %v820_v12  ;;  %v1088_v42 = vadd.f32 %v1087_v41, %v822_v7  ;;  %v1161_v57 = vmul.f32 %v822_v7, %v822_v7  ;;  %v2277_v2 = vpop.f32.mrf.mxu1  ;;  %v1164_v12 = vmul.f32 %v2142_v14, %v2142_v14 }
 0x111   : > { %v1658_v47 = vpack.c.bf16 %v2277_v2, %v2265_v29 }
 0x112   : > { %1777 = vst [vmem:[%s2129_s16 + $0x38] sm:$0xff] %v1618_v36   ;;  %v1089_v61 = vadd.f32 %v1088_v42, %v2120_v51  ;;  %v1224_v0 = vadd.f32 %v1223_v46, %v1161_v57  ;;  %v1165_v51 = vmul.f32 %v2147_v24, %v2147_v24  ;;  %v2321_v57 = vpop.f32.mrf.mxu3 }
 0x113   : > { %1785 = vst [vmem:[%s2129_s16 + $0x78] sm:$0xff] %v1658_v47  }
 0x114   : > { %v1090_v52 = vadd.f32 %v1089_v61, %v2131_v63  ;;  %v1225_v8 = vadd.f32 %v1224_v0, %v1162_v39  ;;  %v1693_v63 = vpack.c.bf16 %v2294_v28, %v2275_v44  ;;  %v2316_v46 = vpop.f32.mrf.mxu2  ;;  %v1171_v61 = vmul.f32 %v2209_v5, %v2209_v5 }
 0x116   : > { %v1091_v18 = vadd.f32 %v1090_v52, %v2142_v14  ;;  %v1226_v22 = vadd.f32 %v1225_v8, %v1163_v4  ;;  %v1166_v14 = vmul.f32 %v2162_v38, %v2162_v38  ;;  %1792 = vst [vmem:[%s2129_s16 + $0xb0] sm:$0xff] %v1693_v63   ;;  %v1172_v4 = vmul.f32 %v2219_v11, %v2219_v11 }
 0x118   : > { %v1092_v30 = vadd.f32 %v1091_v18, %v2147_v24  ;;  %v1227_v1 = vadd.f32 %v1226_v22, %v1164_v12 }
 0x11a   : > { %v1093_v32 = vadd.f32 %v1092_v30, %v2162_v38  ;;  %v1228_v33 = vadd.f32 %v1227_v1, %v1165_v51  ;;  %v1169_v38 = vmul.f32 %v2187_v55, %v2187_v55  ;;  %v2337_v22 = vpop.f32.mrf.mxu3  ;;  %v1174_v30 = vmul.f32 %v2241_v26, %v2241_v26 }
 0x11b   : > { %v1728_v51 = vpack.c.bf16 %v2337_v22, %v2321_v57 }
 0x11c   : > { %v1094_v24 = vadd.f32 %v1093_v32, %v2172_v45  ;;  %v1229_v37 = vadd.f32 %v1228_v33, %v1166_v14  ;;  %v1170_v45 = vmul.f32 %v2197_v60, %v2197_v60  ;;  %v2332_v8 = vpop.f32.mrf.mxu2  ;;  %v1176_v33 = vmul.f32 %v2265_v29, %v2265_v29 }
 0x11d   : > { %1799 = vst [vmem:[%s2129_s16 + $0xe8] sm:$0xff] %v1728_v51   ;;  %v1186_v51 = vmul.f32 %v2229_v17, %v2229_v17 }
 0x11e   : > { %v1230_v41 = vadd.f32 %v1229_v37, %v1167_v34  ;;  %v1095_v7 = vadd.f32 %v1094_v24, %v2180_v49 }
 0x120   : > { %v1096_v36 = vadd.f32 %v1095_v7, %v2187_v55  ;;  %v1231_v42 = vadd.f32 %v1230_v41, %v1168_v16  ;;  %v1178_v16 = vmul.f32 %v2145_v20, %v2145_v20  ;;  %v1179_v7 = vmul.f32 %v2158_v35, %v2158_v35 }
 0x122   : > { %v1097_v47 = vadd.f32 %v1096_v36, %v2197_v60  ;;  %v1232_v39 = vadd.f32 %v1231_v42, %v1169_v38  ;;  %v1173_v60 = vmul.f32 %v2231_v19, %v2231_v19  ;;  %v2357_v37 = vpop.f32.mrf.mxu3  ;;  %v1180_v36 = vmul.f32 %v2170_v43, %v2170_v43 }
 0x124   : > { %v1098_v49 = vadd.f32 %v1097_v47, %v2209_v5  ;;  %v1233_v0 = vadd.f32 %v1232_v39, %v1170_v45  ;;  %v1698_v5 = vpack.c.bf16 %v2332_v8, %v2316_v46  ;;  %v1181_v45 = vmul.f32 %v2178_v48, %v2178_v48 }
 0x126   : > { %v1099_v55 = vadd.f32 %v1098_v49, %v2219_v11  ;;  %v1234_v52 = vadd.f32 %v1233_v0, %v1171_v61  ;;  %1793 = vst [vmem:[%s2129_s16 + $0xb8] sm:$0xff] %v1698_v5  }
 0x128   : > { %v1100_v12 = vadd.f32 %v1099_v55, %v2231_v19  ;;  %v1235_v18 = vadd.f32 %v1234_v52, %v1172_v4  ;;  %v1175_v19 = vmul.f32 %v2255_v50, %v2255_v50 }
 0x12a   : > { %v1101_v11 = vadd.f32 %v1100_v12, %v2241_v26  ;;  %v1236_v1 = vadd.f32 %v1235_v18, %v1173_v60  ;;  %v1177_v26 = vmul.f32 %v2277_v2, %v2277_v2  ;;  %v2371_v39 = vpop.f32.mrf.mxu3  ;;  %v1185_v12 = vmul.f32 %v2217_v10, %v2217_v10 }
 0x12b   : > { %v1733_v61 = vpack.c.bf16 %v2371_v39, %v2357_v37 }
 0x12c   : > { %v1237_v63 = vadd.f32 %v1236_v1, %v1174_v30  ;;  %v1102_v9 = vadd.f32 %v1101_v11, %v2255_v50  ;;  %v1187_v30 = vmul.f32 %v2239_v25, %v2239_v25 }
 0x12d   : > { %1800 = vst [vmem:[%s2129_s16 + $0xf0] sm:$0xff] %v1733_v61   ;;  %v1197_v61 = vmul.f32 %v2223_v13, %v2223_v13 }
 0x12e   : > { %v1238_v14 = vadd.f32 %v1237_v63, %v1175_v19  ;;  %v1103_v32 = vadd.f32 %v1102_v9, %v2265_v29 }
 0x130   : > { %v1239_v34 = vadd.f32 %v1238_v14, %v1176_v33  ;;  %v1104_v24 = vadd.f32 %v1103_v32, %v2277_v2 }
 0x132   : > { %v1105_v50 = vadd.f32 %v1104_v24, %v2145_v20  ;;  %v1240_v41 = vadd.f32 %v1239_v34, %v1177_v26  ;;  %v2388_v5 = vpop.f32.mrf.mxu3  ;;  %v1190_v24 = vmul.f32 %v2275_v44, %v2275_v44 }
 0x134   : > { %v1106_v29 = vadd.f32 %v1105_v50, %v2158_v35  ;;  %v1241_v38 = vadd.f32 %v1240_v41, %v1178_v16  ;;  %v1182_v35 = vmul.f32 %v2185_v53, %v2185_v53  ;;  %v1192_v41 = vmul.f32 %v2316_v46, %v2316_v46 }
 0x136   : > { %v1107_v2 = vadd.f32 %v1106_v29, %v2170_v43  ;;  %v1242_v42 = vadd.f32 %v1241_v38, %v1179_v7  ;;  %v1183_v43 = vmul.f32 %v2195_v59, %v2195_v59  ;;  %v1193_v7 = vmul.f32 %v2332_v8, %v2332_v8 }
 0x137   : > { %v1859_v29 = vmov 0.0  }
 0x138   : > { %v1108_v47 = vadd.f32 %v1107_v2, %v2178_v48  ;;  %v1243_v20 = vadd.f32 %v1242_v42, %v1180_v36  ;;  %v1184_v48 = vmul.f32 %v2207_v3, %v2207_v3  ;;  %301 = vst [vmem:[%s2421_s19] sm:$0x1] %v1859_v29  ;;  %v1195_v2 = vmul.f32 %v2201_v62, %v2201_v62 }
 0x139   : > { %302 = vst [vmem:[%s2426_s26] sm:$0x1] %v1859_v29 }
 0x13a   : > { %v1109_v49 = vadd.f32 %v1108_v47, %v2185_v53  ;;  %v1244_v0 = vadd.f32 %v1243_v20, %v1181_v45  ;;  %v2403_v32 = vpop.f32.mrf.mxu3  ;;  %v1196_v47 = vmul.f32 %v2211_v6, %v2211_v6 }
 0x13b   : > { %v1738_v33 = vpack.c.bf16 %v2403_v32, %v2388_v5 }
 0x13c   : > { %v1110_v4 = vadd.f32 %v1109_v49, %v2195_v59  ;;  %v1245_v55 = vadd.f32 %v1244_v0, %v1182_v35  ;;  %v1198_v49 = vmul.f32 %v2233_v21, %v2233_v21 }
 0x13d   : > { %1801 = vst [vmem:[%s2129_s16 + $0xf8] sm:$0xff] %v1738_v33  }
 0x13e   : > { %v1246_v52 = vadd.f32 %v1245_v55, %v1183_v43  ;;  %v1111_v60 = vadd.f32 %v1110_v4, %v2207_v3 }
 0x140   : > { %v1112_v53 = vadd.f32 %v1111_v60, %v2217_v10  ;;  %v1247_v18 = vadd.f32 %v1246_v52, %v1184_v48  ;;  %v1188_v10 = vmul.f32 %v2253_v40, %v2253_v40 }
 0x142   : > { %v1113_v59 = vadd.f32 %v1112_v53, %v2229_v17  ;;  %v1248_v11 = vadd.f32 %v1247_v18, %v1185_v12  ;;  %v1189_v17 = vmul.f32 %v2263_v15, %v2263_v15 }
 0x144   : > { %v1114_v3 = vadd.f32 %v1113_v59, %v2239_v25  ;;  %v1249_v1 = vadd.f32 %v1248_v11, %v1186_v51 }
 0x146   : > { %v1115_v63 = vadd.f32 %v1114_v3, %v2253_v40  ;;  %v1250_v9 = vadd.f32 %v1249_v1, %v1187_v30  ;;  %v1205_v3 = vmul.f32 %v2337_v22, %v2337_v22 }
 0x148   : > { %v1116_v19 = vadd.f32 %v1115_v63, %v2263_v15  ;;  %v1251_v14 = vadd.f32 %v1250_v9, %v1188_v10  ;;  %v1191_v15 = vmul.f32 %v2294_v28, %v2294_v28  ;;  %v1206_v63 = vmul.f32 %v2357_v37, %v2357_v37 }
 0x14a   : > { %v1252_v25 = vadd.f32 %v1251_v14, %v1189_v17  ;;  %v1117_v34 = vadd.f32 %v1116_v19, %v2275_v44  ;;  %v1207_v19 = vmul.f32 %v2371_v39, %v2371_v39 }
 0x14c   : > { %v1253_v40 = vadd.f32 %v1252_v25, %v1190_v24  ;;  %v1118_v26 = vadd.f32 %v1117_v34, %v2294_v28 }
 0x14e   : > { %v1254_v16 = vadd.f32 %v1253_v40, %v1191_v15  ;;  %v1119_v50 = vadd.f32 %v1118_v26, %v2316_v46  ;;  %v1194_v46 = vmul.f32 %v2189_v56, %v2189_v56 }
 0x150   : > { %v1255_v44 = vadd.f32 %v1254_v16, %v1192_v41  ;;  %v1120_v28 = vadd.f32 %v1119_v50, %v2332_v8 }
 0x152   : > { %v1121_v38 = vadd.f32 %v1120_v28, %v2189_v56  ;;  %v1256_v36 = vadd.f32 %v1255_v44, %v1193_v7  ;;  %v1145_v7 = vld [vmem:[%s2426_s26] sm:$0x1] }
 0x154   : > { %v1122_v42 = vadd.f32 %v1121_v38, %v2201_v62  ;;  %v1257_v45 = vadd.f32 %v1256_v36, %v1194_v46  ;;  %v1199_v62 = vmul.f32 %v2243_v27, %v2243_v27 }
 0x156   : > { %v1123_v8 = vadd.f32 %v1122_v42, %v2211_v6  ;;  %v1258_v20 = vadd.f32 %v1257_v45, %v1195_v2  ;;  %v1200_v6 = vmul.f32 %v2257_v54, %v2257_v54 }
 0x158   : > { %v1124_v35 = vadd.f32 %v1123_v8, %v2223_v13  ;;  %v1259_v56 = vadd.f32 %v1258_v20, %v1196_v47  ;;  %v1201_v13 = vmul.f32 %v2267_v58, %v2267_v58 }
 0x15a   : > { %v1125_v0 = vadd.f32 %v1124_v35, %v2233_v21  ;;  %v1260_v43 = vadd.f32 %v1259_v56, %v1197_v61  ;;  %v1202_v21 = vmul.f32 %v2279_v23, %v2279_v23 }
 0x15c   : > { %v1126_v4 = vadd.f32 %v1125_v0, %v2243_v27  ;;  %v1261_v55 = vadd.f32 %v1260_v43, %v1198_v49  ;;  %v1203_v27 = vmul.f32 %v2299_v31, %v2299_v31 }
 0x15e   : > { %v1262_v48 = vadd.f32 %v1261_v55, %v1199_v62  ;;  %v1127_v52 = vadd.f32 %v1126_v4, %v2257_v54  ;;  %v1204_v54 = vmul.f32 %v2321_v57, %v2321_v57 }
 0x160   : > { %v1128_v60 = vadd.f32 %v1127_v52, %v2267_v58  ;;  %v1263_v12 = vadd.f32 %v1262_v48, %v1200_v6 }
 0x162   : > { %v1129_v53 = vadd.f32 %v1128_v60, %v2279_v23  ;;  %v1264_v18 = vadd.f32 %v1263_v12, %v1201_v13 }
 0x164   : > { %v1130_v51 = vadd.f32 %v1129_v53, %v2299_v31  ;;  %v1265_v59 = vadd.f32 %v1264_v18, %v1202_v21 }
 0x166   : > { %v1131_v11 = vadd.f32 %v1130_v51, %v2321_v57  ;;  %v1266_v30 = vadd.f32 %v1265_v59, %v1203_v27 }
 0x168   : > { %v1132_v58 = vadd.f32 %v1131_v11, %v2337_v22  ;;  %v1267_v1 = vadd.f32 %v1266_v30, %v1204_v54  ;;  %v1208_v22 = vmul.f32 %v2388_v5, %v2388_v5 }
 0x16a   : > { %v1268_v23 = vadd.f32 %v1267_v1, %v1205_v3  ;;  %v1133_v10 = vadd.f32 %v1132_v58, %v2357_v37  ;;  %v1209_v37 = vmul.f32 %v2403_v32, %v2403_v32 }
 0x16c   : > { %v1269_v31 = vadd.f32 %v1268_v23, %v1206_v63  ;;  %v1134_v9 = vadd.f32 %v1133_v10, %v2371_v39 }
 0x16e   : > { %v1270_v57 = vadd.f32 %v1269_v31, %v1207_v19  ;;  %v1135_v17 = vadd.f32 %v1134_v9, %v2388_v5  ;;  %v1073_v5 = vld [vmem:[%s2421_s19] sm:$0x1] }
 0x170   : > { %v1271_v14 = vadd.f32 %v1270_v57, %v1208_v22  ;;  %v1136_v33 = vadd.f32 %v1135_v17, %v2403_v32 }
 0x172   : > { %v1137_v25 = vrot.slane %v1136_v33, 4  ;;  %v1272_v34 = vadd.f32 %v1271_v14, %v1209_v37 }
 0x174   : > { %v1138_v24 = vadd.f32 %v1137_v25, %v1136_v33  ;;  %v1273_v39 = vrot.slane %v1272_v34, 4 }
 0x176   : > { %v1139_v40 = vrot.slane %v1138_v24, 2  ;;  %v1274_v26 = vadd.f32 %v1273_v39, %v1272_v34 }
 0x178   : > { %v1140_v15 = vadd.f32 %v1139_v40, %v1138_v24  ;;  %v1275_v16 = vrot.slane %v1274_v26, 2 }
 0x17a   : > { %v1141_v50 = vrot.slane %v1140_v15, 1  ;;  %v1276_v41 = vadd.f32 %v1275_v16, %v1274_v26 }
 0x17c   : > { %v1142_v44 = vadd.f32 %v1141_v50, %v1140_v15  ;;  %v1277_v28 = vrot.slane %v1276_v41, 1 }
 0x17e   : > { %v1143_v29 = vadd.f32 %v1142_v44, %v1073_v5  ;;  %v1278_v46 = vadd.f32 %v1277_v28, %v1276_v41 }
 0x180   : > { %1144 = vst [vmem:[%s2421_s19] sm:$0x1] %v1143_v29  ;;  %v1279_v32 = vadd.f32 %v1278_v46, %v1145_v7 }
 0x182   : > { %1280 = vst [vmem:[%s2426_s26] sm:$0x1] %v1279_v32 }
 0x183 PF: > { %s17_s23 = sadd.s32 1, %s1857_s23   ;;  %s2501_s21 = smov %s1853_s22 }
 0x184   : > { %p14_p6 = scmp.ge.s32.totalorder %s17_s23, 4   ;;  %s2502_s22 = smov %s2504_s24 }
 0x186   :  { %16 = sbr.rel (!%p14_p6) target bundleno = 2 (0x2), region = 94 }

// kernel: bottleneck_forward.7
= control target key start
LH: loop header
LB: loop body
LE: loop exit
PB: predicated region body
PF: predicated region fallthrough
CT: control target
= control target key end

     0   :  { %9 = vsyncpa [#allocation3], 0  ;;  %s1538_s0 = inlined_call_operand.vmem [shape: bf16[1024,128], index: 0, kind: input, shape index: {}]   ;;  %s1539_s1 = inlined_call_operand.vmem [shape: f32[1,128], index: 1, kind: input, shape index: {}]   ;;  %s1540_s2 = inlined_call_operand.vmem [shape: f32[1,128], index: 2, kind: input, shape index: {}]   ;;  %s1541_s3 = inlined_call_operand.vmem [shape: f32[1024,128], index: 3, kind: input, shape index: {}]   ;;  %s1542_s4 = inlined_call_operand.hbm [shape: f32[1024,128], index: 4, kind: output, shape index: {}]  }
   0x1   :  { %11 = vsyncpa [#allocation3 + $0x1], 0  ;;  %s1139_s15 = smov 0   ;;  %s1141_s16 = smov 0  }
   0x2   :  { %s1143_s17 = smov 0   ;;  %s1145_s18 = smov 0  }
   0x3 LB: > { %s1160_s19 = sadd.s32 4294967295, %s1110_s18   ;;  %s831_s20 = sadd.s32 4294967294, %s1110_s18   ;;  %s1110_s18 = sphi %s1145_s18, %s1548_s18   ;;  %s1106_s17 = sphi %s1143_s17, %s1547_s17   ;;  %s1102_s16 = sphi %s1141_s16, %s1546_s16   ;;  %s1098_s15 = sphi %s1139_s15, %s1545_s15  }
   0x4   : > { %s1164_s21 = sadd.s32 1, %s1110_s18   ;;  %s118_s22 = sadd.s32 1, %s1106_s17 }
   0x5   : > { %s115_s23 = ssub.s32 %s1110_s18, %s1164_s21  ;;  %p128_p0 = scmp.ne.s32.totalorder %s1106_s17, %s1102_s16 }
   0x6   : > { %p116_p1 = scmp.eq.s32.totalorder %s115_s23, 0  ;;  %p129_p2 = scmp.eq.s32.totalorder %s1160_s19, 1 }
   0x7   : > { %p134_p3 = scmp.ne.s32.totalorder %s1102_s16, %s1098_s15  ;;  %p135_p4 = scmp.eq.s32.totalorder %s831_s20, 1 }
   0x8   : > { %s1175_s24 = scalar_select %p116_p1, %s1106_s17, %s118_s22  }
   0x9   : > { %p1177_p5 = por %p129_p2, %p128_p0  ;;  %p1181_p6 = por %p135_p4, %p134_p3 }
   0xa   : > { %p834_p7 = scmp.ge.s32.totalorder %s1110_s18, 1  ;;  %p177_p8 = scmp.lt.s32.totalorder %s1110_s18, 3 }
   0xc   : > { %p178_p9 = pnand %p834_p7, %p177_p8 }
   0xd   : > { %s836_s27 = sshll.u32 (!%p178_p9), %s1160_s19, 6  ;;  %s205_s14 = sand.u32 (!%p178_p9), 1, %s1102_s16  }
   0xe   : > { %181 = sbr.rel (%p178_p9) target bundleno = 113 (0x71), region = 36  ;;  %p209_p10 = scmp.lt.s32.totalorder (!%p178_p9), %s836_s27, 127 }
   0xf   : > { %s1221_s20 = sshll.u32 (!%p178_p9), %s205_s14, 9  ;;  %s845_s23 = sshll.u32 (!%p178_p9), %s1160_s19, 9 }
  0x10   : > { %s1245_s22 = scalar_lea.vmem (!%p178_p9), [#allocation2], %s1221_s20  ;;  %s742_s5 = scalar_lea.sflag (!%p178_p9), [#allocation3], %s205_s14 }
  0x11   : > { %s1068_s10 = scalar_lea.hbm (!%p178_p9), %s1542_s4, 1024 }
  0x13   : > { %s1550_s27 = smov (!%p209_p10, %s836_s27), 127  ;;  %v1196_v0 = vld [vmem:[%s1539_s1] ss:$0 sm:$0xff] }
  0x14   : > { %s837_s28 = sshll.u32 %s1550_s27, 2  ;;  %s839_s29 = sshll.u32 %s1550_s27, 3  ;;  %v1207_v3 = vld [vmem:[%s1540_s2] ss:$0 sm:$0xff] }
  0x15   : > { %s1191_s6 = scalar_lea.vmem %s1538_s0, %s837_s28  ;;  %s1202_s11 = scalar_lea.vmem %s1541_s3, %s839_s29 }
  0x16   : > { %v847_v1 = vld [vmem:[%s1191_s6] sm:$0xff]   ;;  %v974_v5 = vld [vmem:[%s1191_s6 + $0x8] sm:$0xff]   ;;  %v975_v8 = vld [vmem:[%s1191_s6 + $0x10] sm:$0xff]   ;;  %s753_s28 = scalar_lea.hbm %s1542_s4, %s845_s23  ;;  %s754_s29 = sshll.u32 %s1245_s22, 4  ;;  %s755_s29 = int_to_ptr.vmem [resolvable:$true] %s754_s29 }
  0x17   : > { %v848_v2 = vunpack.c.l.bf16 %v847_v1  ;;  %v849_v4 = vunpack.c.h.bf16 %v847_v1  ;;  %v852_v6 = vunpack.c.l.bf16 %v974_v5  ;;  %v853_v7 = vunpack.c.h.bf16 %v974_v5  ;;  %v976_v13 = vld [vmem:[%s1191_s6 + $0x18] sm:$0xff]   ;;  %v485_v14 = vld [vmem:[%s1202_s11] sm:$0xff]  ;;  %v486_v15 = vld [vmem:[%s1202_s11 + $0x8] sm:$0xff]  ;;  %s756_s30 = sshll.u32 %s753_s28, 4  ;;  %s757_s30 = int_to_ptr.hbm [resolvable:$true] %s756_s30 }
  0x18   : > { %v856_v11 = vunpack.c.l.bf16 %v975_v8  ;;  %v857_v12 = vunpack.c.h.bf16 %v975_v8  ;;  %v860_v18 = vunpack.c.l.bf16 %v976_v13  ;;  %v861_v19 = vunpack.c.h.bf16 %v976_v13  ;;  %v487_v22 = vld [vmem:[%s1202_s11 + $0x10] sm:$0xff]  ;;  %v488_v23 = vld [vmem:[%s1202_s11 + $0x18] sm:$0xff]  ;;  %v489_v28 = vld [vmem:[%s1202_s11 + $0x20] sm:$0xff] }
  0x19   : > { %v353_v9 = vmul.f32 %v1196_v0, %v848_v2  ;;  %v354_v10 = vmul.f32 %v1196_v0, %v849_v4  ;;  %v355_v16 = vmul.f32 %v1196_v0, %v852_v6  ;;  %v356_v17 = vmul.f32 %v1196_v0, %v853_v7  ;;  %v490_v29 = vld [vmem:[%s1202_s11 + $0x28] sm:$0xff]  ;;  %v491_v36 = vld [vmem:[%s1202_s11 + $0x30] sm:$0xff]  ;;  %v492_v37 = vld [vmem:[%s1202_s11 + $0x38] sm:$0xff] }
  0x1a   : > { %v357_v24 = vmul.f32 %v1196_v0, %v856_v11  ;;  %v358_v25 = vmul.f32 %v1196_v0, %v857_v12  ;;  %v359_v30 = vmul.f32 %v1196_v0, %v860_v18  ;;  %v360_v31 = vmul.f32 %v1196_v0, %v861_v19  ;;  %v977_v42 = vld [vmem:[%s1191_s6 + $0x20] sm:$0xff]   ;;  %v978_v47 = vld [vmem:[%s1191_s6 + $0x28] sm:$0xff]   ;;  %v979_v52 = vld [vmem:[%s1191_s6 + $0x30] sm:$0xff]  }
  0x1b   : > { %v421_v20 = vadd.f32 %v1207_v3, %v353_v9  ;;  %v422_v21 = vadd.f32 %v1207_v3, %v354_v10  ;;  %v423_v26 = vadd.f32 %v1207_v3, %v355_v16  ;;  %v424_v27 = vadd.f32 %v1207_v3, %v356_v17  ;;  %v980_v57 = vld [vmem:[%s1191_s6 + $0x38] sm:$0xff]   ;;  %v493_v4 = vld [vmem:[%s1202_s11 + $0x40] sm:$0xff]  ;;  %v494_v5 = vld [vmem:[%s1202_s11 + $0x48] sm:$0xff] }
  0x1c   : > { %v425_v34 = vadd.f32 %v1207_v3, %v357_v24  ;;  %v426_v35 = vadd.f32 %v1207_v3, %v358_v25  ;;  %v427_v40 = vadd.f32 %v1207_v3, %v359_v30  ;;  %v428_v41 = vadd.f32 %v1207_v3, %v360_v31  ;;  %v495_v12 = vld [vmem:[%s1202_s11 + $0x50] sm:$0xff]  ;;  %v496_v13 = vld [vmem:[%s1202_s11 + $0x58] sm:$0xff]  ;;  %v497_v18 = vld [vmem:[%s1202_s11 + $0x60] sm:$0xff] }
  0x1d   : > { %v549_v32 = vadd.f32 %v485_v14, %v421_v20  ;;  %v550_v33 = vadd.f32 %v486_v15, %v422_v21  ;;  %v551_v38 = vadd.f32 %v487_v22, %v423_v26  ;;  %v552_v39 = vadd.f32 %v488_v23, %v424_v27  ;;  %v498_v19 = vld [vmem:[%s1202_s11 + $0x68] sm:$0xff]  ;;  %v499_v26 = vld [vmem:[%s1202_s11 + $0x70] sm:$0xff]  ;;  %v500_v27 = vld [vmem:[%s1202_s11 + $0x78] sm:$0xff] }
  0x1e   : > { %v553_v45 = vadd.f32 %v489_v28, %v425_v34  ;;  %v554_v46 = vadd.f32 %v490_v29, %v426_v35  ;;  %v555_v50 = vadd.f32 %v491_v36, %v427_v40  ;;  %v556_v51 = vadd.f32 %v492_v37, %v428_v41  ;;  %v982_v37 = vld [vmem:[%s1191_s6 + $0x48] sm:$0xff]  }
  0x1f   : > { %v613_v43 = vmax.f32 %v549_v32, 0.0  ;;  %v614_v44 = vmax.f32 %v550_v33, 0.0  ;;  %v615_v48 = vmax.f32 %v551_v38, 0.0  ;;  %v616_v49 = vmax.f32 %v552_v39, 0.0  ;;  %v981_v32 = vld [vmem:[%s1191_s6 + $0x40] sm:$0xff]  }
  0x20   : > { %v617_v53 = vmax.f32 %v553_v45, 0.0  ;;  %v618_v54 = vmax.f32 %v554_v46, 0.0  ;;  %v864_v55 = vunpack.c.l.bf16 %v977_v42  ;;  %v865_v56 = vunpack.c.h.bf16 %v977_v42  ;;  %v983_v42 = vld [vmem:[%s1191_s6 + $0x50] sm:$0xff]  }
  0x21   : > { %677 = vst [vmem:[%s1245_s22] sm:$0xff] %v613_v43  ;;  %v619_v58 = vmax.f32 %v555_v50, 0.0  ;;  %v620_v59 = vmax.f32 %v556_v51, 0.0  ;;  %v868_v60 = vunpack.c.l.bf16 %v978_v47  ;;  %v869_v61 = vunpack.c.h.bf16 %v978_v47  ;;  %v984_v47 = vld [vmem:[%s1191_s6 + $0x58] sm:$0xff]  }
  0x22   : > { %678 = vst [vmem:[%s1245_s22 + $0x8] sm:$0xff] %v614_v44  ;;  %v361_v62 = vmul.f32 %v1196_v0, %v864_v55  ;;  %v362_v63 = vmul.f32 %v1196_v0, %v865_v56  ;;  %v872_v1 = vunpack.c.l.bf16 %v979_v52  ;;  %v873_v2 = vunpack.c.h.bf16 %v979_v52  ;;  %v501_v56 = vld [vmem:[%s1202_s11 + $0x80] sm:$0xff] }
  0x23   : > { %679 = vst [vmem:[%s1245_s22 + $0x10] sm:$0xff] %v615_v48  ;;  %v363_v6 = vmul.f32 %v1196_v0, %v868_v60  ;;  %v364_v7 = vmul.f32 %v1196_v0, %v869_v61  ;;  %v876_v8 = vunpack.c.l.bf16 %v980_v57  ;;  %v877_v9 = vunpack.c.h.bf16 %v980_v57  ;;  %v502_v57 = vld [vmem:[%s1202_s11 + $0x88] sm:$0xff] }
  0x24   : > { %680 = vst [vmem:[%s1245_s22 + $0x18] sm:$0xff] %v616_v49  ;;  %v429_v10 = vadd.f32 %v1207_v3, %v361_v62  ;;  %v430_v11 = vadd.f32 %v1207_v3, %v362_v63  ;;  %v365_v14 = vmul.f32 %v1196_v0, %v872_v1  ;;  %v366_v15 = vmul.f32 %v1196_v0, %v873_v2  ;;  %v503_v1 = vld [vmem:[%s1202_s11 + $0x90] sm:$0xff]  ;;  %v504_v2 = vld [vmem:[%s1202_s11 + $0x98] sm:$0xff] }
  0x25   : > { %681 = vst [vmem:[%s1245_s22 + $0x20] sm:$0xff] %v617_v53  ;;  %v431_v16 = vadd.f32 %v1207_v3, %v363_v6  ;;  %v432_v17 = vadd.f32 %v1207_v3, %v364_v7  ;;  %v367_v20 = vmul.f32 %v1196_v0, %v876_v8  ;;  %v368_v21 = vmul.f32 %v1196_v0, %v877_v9  ;;  %v505_v8 = vld [vmem:[%s1202_s11 + $0xa0] sm:$0xff]  ;;  %v506_v9 = vld [vmem:[%s1202_s11 + $0xa8] sm:$0xff] }
  0x26   : > { %682 = vst [vmem:[%s1245_s22 + $0x28] sm:$0xff] %v618_v54  ;;  %v557_v22 = vadd.f32 %v493_v4, %v429_v10  ;;  %v558_v23 = vadd.f32 %v494_v5, %v430_v11  ;;  %v433_v24 = vadd.f32 %v1207_v3, %v365_v14  ;;  %v434_v25 = vadd.f32 %v1207_v3, %v366_v15 }
  0x27   : > { %683 = vst [vmem:[%s1245_s22 + $0x30] sm:$0xff] %v619_v58  ;;  %v559_v28 = vadd.f32 %v495_v12, %v431_v16  ;;  %v560_v29 = vadd.f32 %v496_v13, %v432_v17  ;;  %v435_v30 = vadd.f32 %v1207_v3, %v367_v20  ;;  %v436_v31 = vadd.f32 %v1207_v3, %v368_v21  ;;  %v507_v16 = vld [vmem:[%s1202_s11 + $0xb0] sm:$0xff]  ;;  %v508_v17 = vld [vmem:[%s1202_s11 + $0xb8] sm:$0xff] }
  0x28   : > { %684 = vst [vmem:[%s1245_s22 + $0x38] sm:$0xff] %v620_v59  ;;  %v621_v33 = vmax.f32 %v557_v22, 0.0  ;;  %v622_v34 = vmax.f32 %v558_v23, 0.0  ;;  %v561_v35 = vadd.f32 %v497_v18, %v433_v24  ;;  %v562_v36 = vadd.f32 %v498_v19, %v434_v25  ;;  %v985_v22 = vld [vmem:[%s1191_s6 + $0x60] sm:$0xff]  }
  0x29   : > { %v623_v38 = vmax.f32 %v559_v28, 0.0  ;;  %v624_v39 = vmax.f32 %v560_v29, 0.0  ;;  %v563_v40 = vadd.f32 %v499_v26, %v435_v30  ;;  %v564_v41 = vadd.f32 %v500_v27, %v436_v31  ;;  %v986_v27 = vld [vmem:[%s1191_s6 + $0x68] sm:$0xff]  }
  0x2a   : > { %685 = vst [vmem:[%s1245_s22 + $0x40] sm:$0xff] %v621_v33  ;;  %v625_v43 = vmax.f32 %v561_v35, 0.0  ;;  %v626_v44 = vmax.f32 %v562_v36, 0.0  ;;  %v880_v45 = vunpack.c.l.bf16 %v981_v32  ;;  %v881_v46 = vunpack.c.h.bf16 %v981_v32  ;;  %v987_v32 = vld [vmem:[%s1191_s6 + $0x70] sm:$0xff]  }
  0x2b   : > { %686 = vst [vmem:[%s1245_s22 + $0x48] sm:$0xff] %v622_v34  ;;  %v627_v48 = vmax.f32 %v563_v40, 0.0  ;;  %v628_v49 = vmax.f32 %v564_v41, 0.0  ;;  %v884_v50 = vunpack.c.l.bf16 %v982_v37  ;;  %v885_v51 = vunpack.c.h.bf16 %v982_v37  ;;  %v988_v37 = vld [vmem:[%s1191_s6 + $0x78] sm:$0xff]  }
  0x2c   : > { %687 = vst [vmem:[%s1245_s22 + $0x50] sm:$0xff] %v623_v38  ;;  %v369_v52 = vmul.f32 %v1196_v0, %v880_v45  ;;  %v370_v53 = vmul.f32 %v1196_v0, %v881_v46  ;;  %v888_v54 = vunpack.c.l.bf16 %v983_v42  ;;  %v889_v55 = vunpack.c.h.bf16 %v983_v42  ;;  %v509_v46 = vld [vmem:[%s1202_s11 + $0xc0] sm:$0xff] }
  0x2d   : > { %688 = vst [vmem:[%s1245_s22 + $0x58] sm:$0xff] %v624_v39  ;;  %v371_v58 = vmul.f32 %v1196_v0, %v884_v50  ;;  %v372_v59 = vmul.f32 %v1196_v0, %v885_v51  ;;  %v892_v60 = vunpack.c.l.bf16 %v984_v47  ;;  %v893_v61 = vunpack.c.h.bf16 %v984_v47  ;;  %v510_v47 = vld [vmem:[%s1202_s11 + $0xc8] sm:$0xff] }
  0x2e   : > { %689 = vst [vmem:[%s1245_s22 + $0x60] sm:$0xff] %v625_v43  ;;  %v437_v62 = vadd.f32 %v1207_v3, %v369_v52  ;;  %v438_v63 = vadd.f32 %v1207_v3, %v370_v53  ;;  %v373_v4 = vmul.f32 %v1196_v0, %v888_v54  ;;  %v374_v5 = vmul.f32 %v1196_v0, %v889_v55  ;;  %v511_v54 = vld [vmem:[%s1202_s11 + $0xd0] sm:$0xff]  ;;  %v512_v55 = vld [vmem:[%s1202_s11 + $0xd8] sm:$0xff] }
  0x2f   : > { %690 = vst [vmem:[%s1245_s22 + $0x68] sm:$0xff] %v626_v44  ;;  %v439_v6 = vadd.f32 %v1207_v3, %v371_v58  ;;  %v440_v7 = vadd.f32 %v1207_v3, %v372_v59  ;;  %v375_v10 = vmul.f32 %v1196_v0, %v892_v60  ;;  %v376_v11 = vmul.f32 %v1196_v0, %v893_v61  ;;  %v513_v60 = vld [vmem:[%s1202_s11 + $0xe0] sm:$0xff]  ;;  %v514_v61 = vld [vmem:[%s1202_s11 + $0xe8] sm:$0xff] }
  0x30   : > { %691 = vst [vmem:[%s1245_s22 + $0x70] sm:$0xff] %v627_v48  ;;  %v565_v12 = vadd.f32 %v501_v56, %v437_v62  ;;  %v566_v13 = vadd.f32 %v502_v57, %v438_v63  ;;  %v441_v14 = vadd.f32 %v1207_v3, %v373_v4  ;;  %v442_v15 = vadd.f32 %v1207_v3, %v374_v5 }
  0x31   : > { %692 = vst [vmem:[%s1245_s22 + $0x78] sm:$0xff] %v628_v49  ;;  %v567_v18 = vadd.f32 %v503_v1, %v439_v6  ;;  %v568_v19 = vadd.f32 %v504_v2, %v440_v7  ;;  %v443_v20 = vadd.f32 %v1207_v3, %v375_v10  ;;  %v444_v21 = vadd.f32 %v1207_v3, %v376_v11  ;;  %v515_v6 = vld [vmem:[%s1202_s11 + $0xf0] sm:$0xff]  ;;  %v516_v7 = vld [vmem:[%s1202_s11 + $0xf8] sm:$0xff] }
  0x32   : > { %v629_v23 = vmax.f32 %v565_v12, 0.0  ;;  %v630_v24 = vmax.f32 %v566_v13, 0.0  ;;  %v569_v25 = vadd.f32 %v505_v8, %v441_v14  ;;  %v570_v26 = vadd.f32 %v506_v9, %v442_v15  ;;  %v989_v12 = vld [vmem:[%s1191_s6 + $0x80] sm:$0xff]  }
  0x33   : > { %v631_v28 = vmax.f32 %v567_v18, 0.0  ;;  %v632_v29 = vmax.f32 %v568_v19, 0.0  ;;  %v571_v30 = vadd.f32 %v507_v16, %v443_v20  ;;  %v572_v31 = vadd.f32 %v508_v17, %v444_v21  ;;  %v990_v17 = vld [vmem:[%s1191_s6 + $0x88] sm:$0xff]  }
  0x34   : > { %693 = vst [vmem:[%s1245_s22 + $0x80] sm:$0xff] %v629_v23  ;;  %v633_v33 = vmax.f32 %v569_v25, 0.0  ;;  %v634_v34 = vmax.f32 %v570_v26, 0.0  ;;  %v896_v35 = vunpack.c.l.bf16 %v985_v22  ;;  %v897_v36 = vunpack.c.h.bf16 %v985_v22  ;;  %v991_v22 = vld [vmem:[%s1191_s6 + $0x90] sm:$0xff]  }
  0x35   : > { %694 = vst [vmem:[%s1245_s22 + $0x88] sm:$0xff] %v630_v24  ;;  %v635_v38 = vmax.f32 %v571_v30, 0.0  ;;  %v636_v39 = vmax.f32 %v572_v31, 0.0  ;;  %v900_v40 = vunpack.c.l.bf16 %v986_v27  ;;  %v901_v41 = vunpack.c.h.bf16 %v986_v27  ;;  %v992_v27 = vld [vmem:[%s1191_s6 + $0x98] sm:$0xff]  }
  0x36   : > { %695 = vst [vmem:[%s1245_s22 + $0x90] sm:$0xff] %v631_v28  ;;  %v377_v42 = vmul.f32 %v1196_v0, %v896_v35  ;;  %v378_v43 = vmul.f32 %v1196_v0, %v897_v36  ;;  %v904_v44 = vunpack.c.l.bf16 %v987_v32  ;;  %v905_v45 = vunpack.c.h.bf16 %v987_v32  ;;  %v517_v36 = vld [vmem:[%s1202_s11 + $0x100] sm:$0xff] }
  0x37   : > { %696 = vst [vmem:[%s1245_s22 + $0x98] sm:$0xff] %v632_v29  ;;  %v379_v48 = vmul.f32 %v1196_v0, %v900_v40  ;;  %v380_v49 = vmul.f32 %v1196_v0, %v901_v41  ;;  %v908_v50 = vunpack.c.l.bf16 %v988_v37  ;;  %v909_v51 = vunpack.c.h.bf16 %v988_v37  ;;  %v518_v37 = vld [vmem:[%s1202_s11 + $0x108] sm:$0xff] }
  0x38   : > { %697 = vst [vmem:[%s1245_s22 + $0xa0] sm:$0xff] %v633_v33  ;;  %v445_v52 = vadd.f32 %v1207_v3, %v377_v42  ;;  %v446_v53 = vadd.f32 %v1207_v3, %v378_v43  ;;  %v381_v56 = vmul.f32 %v1196_v0, %v904_v44  ;;  %v382_v57 = vmul.f32 %v1196_v0, %v905_v45  ;;  %v519_v44 = vld [vmem:[%s1202_s11 + $0x110] sm:$0xff]  ;;  %v520_v45 = vld [vmem:[%s1202_s11 + $0x118] sm:$0xff] }
  0x39   : > { %698 = vst [vmem:[%s1245_s22 + $0xa8] sm:$0xff] %v634_v34  ;;  %v447_v58 = vadd.f32 %v1207_v3, %v379_v48  ;;  %v448_v59 = vadd.f32 %v1207_v3, %v380_v49  ;;  %v383_v62 = vmul.f32 %v1196_v0, %v908_v50  ;;  %v384_v63 = vmul.f32 %v1196_v0, %v909_v51  ;;  %v521_v50 = vld [vmem:[%s1202_s11 + $0x120] sm:$0xff]  ;;  %v522_v51 = vld [vmem:[%s1202_s11 + $0x128] sm:$0xff] }
  0x3a   : > { %699 = vst [vmem:[%s1245_s22 + $0xb0] sm:$0xff] %v635_v38  ;;  %v573_v1 = vadd.f32 %v509_v46, %v445_v52  ;;  %v574_v2 = vadd.f32 %v510_v47, %v446_v53  ;;  %v449_v4 = vadd.f32 %v1207_v3, %v381_v56  ;;  %v450_v5 = vadd.f32 %v1207_v3, %v382_v57 }
  0x3b   : > { %700 = vst [vmem:[%s1245_s22 + $0xb8] sm:$0xff] %v636_v39  ;;  %v575_v8 = vadd.f32 %v511_v54, %v447_v58  ;;  %v576_v9 = vadd.f32 %v512_v55, %v448_v59  ;;  %v451_v10 = vadd.f32 %v1207_v3, %v383_v62  ;;  %v452_v11 = vadd.f32 %v1207_v3, %v384_v63  ;;  %v523_v58 = vld [vmem:[%s1202_s11 + $0x130] sm:$0xff]  ;;  %v524_v59 = vld [vmem:[%s1202_s11 + $0x138] sm:$0xff] }
  0x3c   : > { %v637_v13 = vmax.f32 %v573_v1, 0.0  ;;  %v638_v14 = vmax.f32 %v574_v2, 0.0  ;;  %v577_v15 = vadd.f32 %v513_v60, %v449_v4  ;;  %v578_v16 = vadd.f32 %v514_v61, %v450_v5  ;;  %v993_v1 = vld [vmem:[%s1191_s6 + $0xa0] sm:$0xff]  }
  0x3d   : > { %v639_v18 = vmax.f32 %v575_v8, 0.0  ;;  %v640_v19 = vmax.f32 %v576_v9, 0.0  ;;  %v579_v20 = vadd.f32 %v515_v6, %v451_v10  ;;  %v580_v21 = vadd.f32 %v516_v7, %v452_v11  ;;  %v994_v7 = vld [vmem:[%s1191_s6 + $0xa8] sm:$0xff]  }
  0x3e   : > { %701 = vst [vmem:[%s1245_s22 + $0xc0] sm:$0xff] %v637_v13  ;;  %v641_v23 = vmax.f32 %v577_v15, 0.0  ;;  %v642_v24 = vmax.f32 %v578_v16, 0.0  ;;  %v912_v25 = vunpack.c.l.bf16 %v989_v12  ;;  %v913_v26 = vunpack.c.h.bf16 %v989_v12  ;;  %v995_v12 = vld [vmem:[%s1191_s6 + $0xb0] sm:$0xff]  }
  0x3f   : > { %702 = vst [vmem:[%s1245_s22 + $0xc8] sm:$0xff] %v638_v14  ;;  %v643_v28 = vmax.f32 %v579_v20, 0.0  ;;  %v644_v29 = vmax.f32 %v580_v21, 0.0  ;;  %v916_v30 = vunpack.c.l.bf16 %v990_v17  ;;  %v917_v31 = vunpack.c.h.bf16 %v990_v17  ;;  %v996_v17 = vld [vmem:[%s1191_s6 + $0xb8] sm:$0xff]  }
  0x40   : > { %703 = vst [vmem:[%s1245_s22 + $0xd0] sm:$0xff] %v639_v18  ;;  %v385_v32 = vmul.f32 %v1196_v0, %v912_v25  ;;  %v386_v33 = vmul.f32 %v1196_v0, %v913_v26  ;;  %v920_v34 = vunpack.c.l.bf16 %v991_v22  ;;  %v921_v35 = vunpack.c.h.bf16 %v991_v22  ;;  %v525_v26 = vld [vmem:[%s1202_s11 + $0x140] sm:$0xff] }
  0x41   : > { %704 = vst [vmem:[%s1245_s22 + $0xd8] sm:$0xff] %v640_v19  ;;  %v387_v38 = vmul.f32 %v1196_v0, %v916_v30  ;;  %v388_v39 = vmul.f32 %v1196_v0, %v917_v31  ;;  %v924_v40 = vunpack.c.l.bf16 %v992_v27  ;;  %v925_v41 = vunpack.c.h.bf16 %v992_v27  ;;  %v526_v27 = vld [vmem:[%s1202_s11 + $0x148] sm:$0xff] }
  0x42   : > { %705 = vst [vmem:[%s1245_s22 + $0xe0] sm:$0xff] %v641_v23  ;;  %v453_v42 = vadd.f32 %v1207_v3, %v385_v32  ;;  %v454_v43 = vadd.f32 %v1207_v3, %v386_v33  ;;  %v389_v46 = vmul.f32 %v1196_v0, %v920_v34  ;;  %v390_v47 = vmul.f32 %v1196_v0, %v921_v35  ;;  %v527_v34 = vld [vmem:[%s1202_s11 + $0x150] sm:$0xff]  ;;  %v528_v35 = vld [vmem:[%s1202_s11 + $0x158] sm:$0xff] }
  0x43   : > { %706 = vst [vmem:[%s1245_s22 + $0xe8] sm:$0xff] %v642_v24  ;;  %v455_v48 = vadd.f32 %v1207_v3, %v387_v38  ;;  %v456_v49 = vadd.f32 %v1207_v3, %v388_v39  ;;  %v391_v52 = vmul.f32 %v1196_v0, %v924_v40  ;;  %v392_v53 = vmul.f32 %v1196_v0, %v925_v41  ;;  %v529_v40 = vld [vmem:[%s1202_s11 + $0x160] sm:$0xff]  ;;  %v530_v41 = vld [vmem:[%s1202_s11 + $0x168] sm:$0xff] }
  0x44   : > { %707 = vst [vmem:[%s1245_s22 + $0xf0] sm:$0xff] %v643_v28  ;;  %v581_v54 = vadd.f32 %v517_v36, %v453_v42  ;;  %v582_v55 = vadd.f32 %v518_v37, %v454_v43  ;;  %v457_v56 = vadd.f32 %v1207_v3, %v389_v46  ;;  %v458_v57 = vadd.f32 %v1207_v3, %v390_v47 }
  0x45   : > { %708 = vst [vmem:[%s1245_s22 + $0xf8] sm:$0xff] %v644_v29  ;;  %v583_v60 = vadd.f32 %v519_v44, %v455_v48  ;;  %v584_v61 = vadd.f32 %v520_v45, %v456_v49  ;;  %v459_v62 = vadd.f32 %v1207_v3, %v391_v52  ;;  %v460_v63 = vadd.f32 %v1207_v3, %v392_v53  ;;  %v531_v48 = vld [vmem:[%s1202_s11 + $0x170] sm:$0xff]  ;;  %v532_v49 = vld [vmem:[%s1202_s11 + $0x178] sm:$0xff] }
  0x46   : > { %v645_v2 = vmax.f32 %v581_v54, 0.0  ;;  %v646_v4 = vmax.f32 %v582_v55, 0.0  ;;  %v585_v5 = vadd.f32 %v521_v50, %v457_v56  ;;  %v586_v6 = vadd.f32 %v522_v51, %v458_v57  ;;  %v997_v54 = vld [vmem:[%s1191_s6 + $0xc0] sm:$0xff]  }
  0x47   : > { %v647_v8 = vmax.f32 %v583_v60, 0.0  ;;  %v648_v9 = vmax.f32 %v584_v61, 0.0  ;;  %v587_v10 = vadd.f32 %v523_v58, %v459_v62  ;;  %v588_v11 = vadd.f32 %v524_v59, %v460_v63  ;;  %v998_v59 = vld [vmem:[%s1191_s6 + $0xc8] sm:$0xff]  }
  0x48   : > { %709 = vst [vmem:[%s1245_s22 + $0x100] sm:$0xff] %v645_v2  ;;  %v649_v13 = vmax.f32 %v585_v5, 0.0  ;;  %v650_v14 = vmax.f32 %v586_v6, 0.0  ;;  %v928_v15 = vunpack.c.l.bf16 %v993_v1  ;;  %v929_v16 = vunpack.c.h.bf16 %v993_v1  ;;  %v999_v1 = vld [vmem:[%s1191_s6 + $0xd0] sm:$0xff]  }
  0x49   : > { %710 = vst [vmem:[%s1245_s22 + $0x108] sm:$0xff] %v646_v4  ;;  %v651_v18 = vmax.f32 %v587_v10, 0.0  ;;  %v652_v19 = vmax.f32 %v588_v11, 0.0  ;;  %v932_v20 = vunpack.c.l.bf16 %v994_v7  ;;  %v933_v21 = vunpack.c.h.bf16 %v994_v7  ;;  %v1000_v7 = vld [vmem:[%s1191_s6 + $0xd8] sm:$0xff]  }
  0x4a   : > { %711 = vst [vmem:[%s1245_s22 + $0x110] sm:$0xff] %v647_v8  ;;  %v393_v22 = vmul.f32 %v1196_v0, %v928_v15  ;;  %v394_v23 = vmul.f32 %v1196_v0, %v929_v16  ;;  %v936_v24 = vunpack.c.l.bf16 %v995_v12  ;;  %v937_v25 = vunpack.c.h.bf16 %v995_v12  ;;  %v533_v16 = vld [vmem:[%s1202_s11 + $0x180] sm:$0xff] }
  0x4b   : > { %712 = vst [vmem:[%s1245_s22 + $0x118] sm:$0xff] %v648_v9  ;;  %v395_v28 = vmul.f32 %v1196_v0, %v932_v20  ;;  %v396_v29 = vmul.f32 %v1196_v0, %v933_v21  ;;  %v940_v30 = vunpack.c.l.bf16 %v996_v17  ;;  %v941_v31 = vunpack.c.h.bf16 %v996_v17  ;;  %v534_v17 = vld [vmem:[%s1202_s11 + $0x188] sm:$0xff] }
  0x4c   : > { %713 = vst [vmem:[%s1245_s22 + $0x120] sm:$0xff] %v649_v13  ;;  %v461_v32 = vadd.f32 %v1207_v3, %v393_v22  ;;  %v462_v33 = vadd.f32 %v1207_v3, %v394_v23  ;;  %v397_v36 = vmul.f32 %v1196_v0, %v936_v24  ;;  %v398_v37 = vmul.f32 %v1196_v0, %v937_v25  ;;  %v535_v24 = vld [vmem:[%s1202_s11 + $0x190] sm:$0xff]  ;;  %v536_v25 = vld [vmem:[%s1202_s11 + $0x198] sm:$0xff] }
  0x4d   : > { %714 = vst [vmem:[%s1245_s22 + $0x128] sm:$0xff] %v650_v14  ;;  %v463_v38 = vadd.f32 %v1207_v3, %v395_v28  ;;  %v464_v39 = vadd.f32 %v1207_v3, %v396_v29  ;;  %v399_v42 = vmul.f32 %v1196_v0, %v940_v30  ;;  %v400_v43 = vmul.f32 %v1196_v0, %v941_v31  ;;  %v537_v30 = vld [vmem:[%s1202_s11 + $0x1a0] sm:$0xff]  ;;  %v538_v31 = vld [vmem:[%s1202_s11 + $0x1a8] sm:$0xff] }
  0x4e   : > { %715 = vst [vmem:[%s1245_s22 + $0x130] sm:$0xff] %v651_v18  ;;  %v589_v44 = vadd.f32 %v525_v26, %v461_v32  ;;  %v590_v45 = vadd.f32 %v526_v27, %v462_v33  ;;  %v465_v46 = vadd.f32 %v1207_v3, %v397_v36  ;;  %v466_v47 = vadd.f32 %v1207_v3, %v398_v37 }
  0x4f   : > { %716 = vst [vmem:[%s1245_s22 + $0x138] sm:$0xff] %v652_v19  ;;  %v591_v50 = vadd.f32 %v527_v34, %v463_v38  ;;  %v592_v51 = vadd.f32 %v528_v35, %v464_v39  ;;  %v467_v52 = vadd.f32 %v1207_v3, %v399_v42  ;;  %v468_v53 = vadd.f32 %v1207_v3, %v400_v43  ;;  %v539_v38 = vld [vmem:[%s1202_s11 + $0x1b0] sm:$0xff]  ;;  %v540_v39 = vld [vmem:[%s1202_s11 + $0x1b8] sm:$0xff] }
  0x50   : > { %v653_v55 = vmax.f32 %v589_v44, 0.0  ;;  %v654_v56 = vmax.f32 %v590_v45, 0.0  ;;  %v593_v57 = vadd.f32 %v529_v40, %v465_v46  ;;  %v594_v58 = vadd.f32 %v530_v41, %v466_v47  ;;  %v1001_v44 = vld [vmem:[%s1191_s6 + $0xe0] sm:$0xff]  }
  0x51   : > { %v655_v60 = vmax.f32 %v591_v50, 0.0  ;;  %v656_v61 = vmax.f32 %v592_v51, 0.0  ;;  %v595_v62 = vadd.f32 %v531_v48, %v467_v52  ;;  %v596_v63 = vadd.f32 %v532_v49, %v468_v53  ;;  %v1002_v49 = vld [vmem:[%s1191_s6 + $0xe8] sm:$0xff]  }
  0x52   : > { %717 = vst [vmem:[%s1245_s22 + $0x140] sm:$0xff] %v653_v55  ;;  %v657_v2 = vmax.f32 %v593_v57, 0.0  ;;  %v658_v4 = vmax.f32 %v594_v58, 0.0  ;;  %v944_v5 = vunpack.c.l.bf16 %v997_v54  ;;  %v945_v6 = vunpack.c.h.bf16 %v997_v54  ;;  %v1003_v54 = vld [vmem:[%s1191_s6 + $0xf0] sm:$0xff]  }
  0x53   : > { %718 = vst [vmem:[%s1245_s22 + $0x148] sm:$0xff] %v654_v56  ;;  %v659_v8 = vmax.f32 %v595_v62, 0.0  ;;  %v660_v9 = vmax.f32 %v596_v63, 0.0  ;;  %v948_v10 = vunpack.c.l.bf16 %v998_v59  ;;  %v949_v11 = vunpack.c.h.bf16 %v998_v59  ;;  %v1004_v59 = vld [vmem:[%s1191_s6 + $0xf8] sm:$0xff]   ;;  %s1062_s6 = sshra.s32 %s757_s30, 4  ;;  %s1063_s6 = int_to_ptr.hbm [resolvable:$true] %s1062_s6 }
  0x54   : > { %719 = vst [vmem:[%s1245_s22 + $0x150] sm:$0xff] %v655_v60  ;;  %v401_v12 = vmul.f32 %v1196_v0, %v944_v5  ;;  %v402_v13 = vmul.f32 %v1196_v0, %v945_v6  ;;  %v952_v14 = vunpack.c.l.bf16 %v999_v1  ;;  %v953_v15 = vunpack.c.h.bf16 %v999_v1  ;;  %v541_v6 = vld [vmem:[%s1202_s11 + $0x1c0] sm:$0xff]  ;;  %s1064_s7 = scalar_lea.hbm %s1063_s6, 512  ;;  %p1069_p0 = scmp.lt.s32.totalorder %s1063_s6, %s1542_s4 }
  0x55   : > { %720 = vst [vmem:[%s1245_s22 + $0x158] sm:$0xff] %v656_v61  ;;  %v403_v18 = vmul.f32 %v1196_v0, %v948_v10  ;;  %v404_v19 = vmul.f32 %v1196_v0, %v949_v11  ;;  %v956_v20 = vunpack.c.l.bf16 %v1000_v7  ;;  %v957_v21 = vunpack.c.h.bf16 %v1000_v7  ;;  %v542_v7 = vld [vmem:[%s1202_s11 + $0x1c8] sm:$0xff]  ;;  %p1065_p11 = scmp.ne.s32.totalorder %s1063_s6, %s1064_s7  ;;  %p1070_p1 = scmp.lt.s32.totalorder %s1068_s10, %s1064_s7 }
  0x56   : > { %721 = vst [vmem:[%s1245_s22 + $0x160] sm:$0xff] %v657_v2  ;;  %v469_v22 = vadd.f32 %v1207_v3, %v401_v12  ;;  %v470_v23 = vadd.f32 %v1207_v3, %v402_v13  ;;  %v405_v26 = vmul.f32 %v1196_v0, %v952_v14  ;;  %v406_v27 = vmul.f32 %v1196_v0, %v953_v15  ;;  %v543_v14 = vld [vmem:[%s1202_s11 + $0x1d0] sm:$0xff]  ;;  %v544_v15 = vld [vmem:[%s1202_s11 + $0x1d8] sm:$0xff] }
  0x57   : > { %722 = vst [vmem:[%s1245_s22 + $0x168] sm:$0xff] %v658_v4  ;;  %v471_v28 = vadd.f32 %v1207_v3, %v403_v18  ;;  %v472_v29 = vadd.f32 %v1207_v3, %v404_v19  ;;  %v407_v32 = vmul.f32 %v1196_v0, %v956_v20  ;;  %v408_v33 = vmul.f32 %v1196_v0, %v957_v21  ;;  %v545_v20 = vld [vmem:[%s1202_s11 + $0x1e0] sm:$0xff]  ;;  %v546_v21 = vld [vmem:[%s1202_s11 + $0x1e8] sm:$0xff]  ;;  %p1066_p12 = pnand %p1065_p11, %p1177_p5  ;;  %p1071_p2 = por %p1070_p1, %p1069_p0 }
  0x58   : > { %723 = vst [vmem:[%s1245_s22 + $0x170] sm:$0xff] %v659_v8  ;;  %v597_v34 = vadd.f32 %v533_v16, %v469_v22  ;;  %v598_v35 = vadd.f32 %v534_v17, %v470_v23  ;;  %v473_v36 = vadd.f32 %v1207_v3, %v405_v26  ;;  %v474_v37 = vadd.f32 %v1207_v3, %v406_v27 }
  0x59   : > { %724 = vst [vmem:[%s1245_s22 + $0x178] sm:$0xff] %v660_v9  ;;  %v599_v40 = vadd.f32 %v535_v24, %v471_v28  ;;  %v600_v41 = vadd.f32 %v536_v25, %v472_v29  ;;  %v475_v42 = vadd.f32 %v1207_v3, %v407_v32  ;;  %v476_v43 = vadd.f32 %v1207_v3, %v408_v33  ;;  %v547_v28 = vld [vmem:[%s1202_s11 + $0x1f0] sm:$0xff]  ;;  %v548_v29 = vld [vmem:[%s1202_s11 + $0x1f8] sm:$0xff]  ;;  %p1067_p13 = pneg %p1066_p12 }
  0x5a   : > { %v661_v45 = vmax.f32 %v597_v34, 0.0  ;;  %v662_v46 = vmax.f32 %v598_v35, 0.0  ;;  %v601_v47 = vadd.f32 %v537_v30, %v473_v36  ;;  %v602_v48 = vadd.f32 %v538_v31, %v474_v37 }
  0x5b   : > { %v663_v50 = vmax.f32 %v599_v40, 0.0  ;;  %v664_v51 = vmax.f32 %v600_v41, 0.0  ;;  %v603_v52 = vadd.f32 %v539_v38, %v475_v42  ;;  %v604_v53 = vadd.f32 %v540_v39, %v476_v43  ;;  %p1072_p3 = pnand %p1071_p2, %p1067_p13 }
  0x5c   : > { %725 = vst [vmem:[%s1245_s22 + $0x180] sm:$0xff] %v661_v45  ;;  %v665_v55 = vmax.f32 %v601_v47, 0.0  ;;  %v666_v56 = vmax.f32 %v602_v48, 0.0  ;;  %v960_v57 = vunpack.c.l.bf16 %v1001_v44  ;;  %v961_v58 = vunpack.c.h.bf16 %v1001_v44 }
  0x5d   : > { %726 = vst [vmem:[%s1245_s22 + $0x188] sm:$0xff] %v662_v46  ;;  %v667_v60 = vmax.f32 %v603_v52, 0.0  ;;  %v668_v61 = vmax.f32 %v604_v53, 0.0  ;;  %v964_v62 = vunpack.c.l.bf16 %v1002_v49  ;;  %v965_v63 = vunpack.c.h.bf16 %v1002_v49 }
  0x5e   : > { %727 = vst [vmem:[%s1245_s22 + $0x190] sm:$0xff] %v663_v50  ;;  %v409_v1 = vmul.f32 %v1196_v0, %v960_v57  ;;  %v410_v2 = vmul.f32 %v1196_v0, %v961_v58  ;;  %v968_v4 = vunpack.c.l.bf16 %v1003_v54  ;;  %v969_v5 = vunpack.c.h.bf16 %v1003_v54 }
  0x5f   : > { %728 = vst [vmem:[%s1245_s22 + $0x198] sm:$0xff] %v664_v51  ;;  %v411_v8 = vmul.f32 %v1196_v0, %v964_v62  ;;  %v412_v9 = vmul.f32 %v1196_v0, %v965_v63  ;;  %v972_v10 = vunpack.c.l.bf16 %v1004_v59  ;;  %v973_v11 = vunpack.c.h.bf16 %v1004_v59 }
  0x60   : > { %729 = vst [vmem:[%s1245_s22 + $0x1a0] sm:$0xff] %v665_v55  ;;  %v477_v12 = vadd.f32 %v1207_v3, %v409_v1  ;;  %v478_v13 = vadd.f32 %v1207_v3, %v410_v2  ;;  %v413_v16 = vmul.f32 %v1196_v0, %v968_v4  ;;  %v414_v17 = vmul.f32 %v1196_v0, %v969_v5 }
  0x61   : > { %730 = vst [vmem:[%s1245_s22 + $0x1a8] sm:$0xff] %v666_v56  ;;  %v479_v18 = vadd.f32 %v1207_v3, %v411_v8  ;;  %v480_v19 = vadd.f32 %v1207_v3, %v412_v9  ;;  %v415_v22 = vmul.f32 %v1196_v0, %v972_v10  ;;  %v416_v23 = vmul.f32 %v1196_v0, %v973_v11 }
  0x62   : > { %731 = vst [vmem:[%s1245_s22 + $0x1b0] sm:$0xff] %v667_v60  ;;  %v605_v24 = vadd.f32 %v541_v6, %v477_v12  ;;  %v606_v25 = vadd.f32 %v542_v7, %v478_v13  ;;  %v481_v26 = vadd.f32 %v1207_v3, %v413_v16  ;;  %v482_v27 = vadd.f32 %v1207_v3, %v414_v17 }
  0x63   : > { %732 = vst [vmem:[%s1245_s22 + $0x1b8] sm:$0xff] %v668_v61  ;;  %v607_v30 = vadd.f32 %v543_v14, %v479_v18  ;;  %v608_v31 = vadd.f32 %v544_v15, %v480_v19  ;;  %v483_v32 = vadd.f32 %v1207_v3, %v415_v22  ;;  %v484_v0 = vadd.f32 %v1207_v3, %v416_v23 }
  0x64   : > { %v669_v33 = vmax.f32 %v605_v24, 0.0  ;;  %v670_v34 = vmax.f32 %v606_v25, 0.0  ;;  %v609_v35 = vadd.f32 %v545_v20, %v481_v26  ;;  %v610_v36 = vadd.f32 %v546_v21, %v482_v27 }
  0x65   : > { %v671_v37 = vmax.f32 %v607_v30, 0.0  ;;  %v672_v38 = vmax.f32 %v608_v31, 0.0  ;;  %v611_v39 = vadd.f32 %v547_v28, %v483_v32  ;;  %v612_v40 = vadd.f32 %v548_v29, %v484_v0 }
  0x66   : > { %733 = vst [vmem:[%s1245_s22 + $0x1c0] sm:$0xff] %v669_v33  ;;  %v673_v3 = vmax.f32 %v609_v35, 0.0  ;;  %v674_v41 = vmax.f32 %v610_v36, 0.0 }
  0x67   : > { %734 = vst [vmem:[%s1245_s22 + $0x1c8] sm:$0xff] %v670_v34  ;;  %v675_v42 = vmax.f32 %v611_v39, 0.0  ;;  %v676_v43 = vmax.f32 %v612_v40, 0.0 }
  0x68   : > { %735 = vst [vmem:[%s1245_s22 + $0x1d0] sm:$0xff] %v671_v37 }
  0x69   : > { %736 = vst [vmem:[%s1245_s22 + $0x1d8] sm:$0xff] %v672_v38 }
  0x6a   : > { %737 = vst [vmem:[%s1245_s22 + $0x1e0] sm:$0xff] %v673_v3 }
  0x6b   : > { %738 = vst [vmem:[%s1245_s22 + $0x1e8] sm:$0xff] %v674_v41 }
  0x6c   : > { %739 = vst [vmem:[%s1245_s22 + $0x1f0] sm:$0xff] %v675_v42 }
  0x6d   : > { %740 = vst [vmem:[%s1245_s22 + $0x1f8] sm:$0xff] %v676_v43 }
  0x6e   : > { %1075 = shalt.err (!%p1072_p3)
}
  0x6f   : > { %s1112_s13 = smov 128   ;;  %s1113_s14 = smov 8  }
  0x70   : > { %1005 = dma.vmem_to_hbm [thread:$0]  (%p1177_p5), %s755_s29, 8192, %s757_s30, %s742_s5, %s1112_s13, %s1112_s13, %s1113_s14  }
  0x71 PF: > { %p1011_p4 = scmp.ge.s32.totalorder %s1110_s18, 2  ;;  %s771_s20 = sand.u32 1, %s1098_s15  }
  0x72   : > { %s772_s22 = scalar_lea.sflag [#allocation3], %s771_s20 }
  0x73   : > { %p1008_p7 = pnand %p1011_p4, %p1181_p6 }
  0x75   : > { %p1009_p8 = pneg %p1008_p7 }
  0x77   : > { %1093 = dma.done.wait (%p1009_p8), %s772_s22, 8192  }
  0x78   : > { %1095 = vsyncadd (%p1009_p8), %s772_s22, 4294959104  ;;  %p14_p9 = scmp.ge.s32.totalorder %s1164_s21, 4   ;;  %s1545_s15 = smov %s1102_s16 }
  0x79   : > { %s1546_s16 = smov %s1106_s17  ;;  %s1547_s17 = smov %s1175_s24 }
  0x7a   : > { %s1548_s18 = smov %s1164_s21  ;;  %16 = sbr.rel (!%p14_p9) target bundleno = 3 (0x3), region = 74 }
  0x7f   :  { %778 = vsyncpa [#allocation3], 1 }
  0x80   :  { %780 = vsyncpa [#allocation3 + $0x1], 1 }

// kernel: bottleneck_forward.5
= control target key start
LH: loop header
LB: loop body
LE: loop exit
PB: predicated region body
PF: predicated region fallthrough
CT: control target
= control target key end

     0   :  { %s4382_s27 = smov 0   ;;  %s4384_s28 = smov 0   ;;  %s6210_s0 = inlined_call_operand.vmem [shape: bf16[2,10,10,10,32], index: 0, kind: input, shape index: {}, may-alias: {0,1,2}]   ;;  %s6211_s1 = inlined_call_operand.vmem [shape: bf16[2,10,10,10,32], index: 1, kind: input, shape index: {}, may-alias: {0,1,2}]   ;;  %s6212_s2 = inlined_call_operand.vmem [shape: bf16[2,10,10,10,32], index: 2, kind: input, shape index: {}, may-alias: {0,1,2}]   ;;  %s6213_s3 = inlined_call_operand.vmem [shape: bf16[27,32,32], index: 3, kind: input, shape index: {}]   ;;  %s6214_s4 = inlined_call_operand.vmem [shape: f32[1,32], index: 4, kind: input, shape index: {}]   ;;  %s6215_s5 = inlined_call_operand.vmem [shape: f32[1,32], index: 5, kind: input, shape index: {}]   ;;  %s6216_s6 = inlined_call_operand.vmem [shape: bf16[2,8,8,8,32], index: 6, kind: output, shape index: {0}]   ;;  %s6217_s7 = inlined_call_operand.vmem [shape: f32[2,1,32], index: 7, kind: output, shape index: {1}]   ;;  %s6218_s8 = inlined_call_operand.vmem [shape: f32[2,1,32], index: 8, kind: output, shape index: {2}]  }
   0x1   :  { %6235 = sst [smem:[#allocation8_spill]] %s6210_s0  ;;  %s4386_s29 = smov 0  }
   0x2   :  { %6236 = sst [smem:[#allocation9_spill]] %s6217_s7  ;;  %s4388_s30 = smov 0  }
   0x3   :  { %6237 = sst [smem:[#allocation10_spill]] %s6218_s8  ;;  %s4390_s9 = smov 0  }
   0x4 LB: > { %6238 = sst [smem:[#allocation2_spill]] %s4325_s29  ;;  %s28_s10 = sadd.s32 1, %s4325_s29  ;;  %s4333_s9 = sphi %s4390_s9, %s19_s9   ;;  %s4329_s30 = sphi %s4388_s30, %s6270_s30   ;;  %s4325_s29 = sphi %s4386_s29, %s6269_s29   ;;  %s4321_s28 = sphi %s4384_s28, %s6268_s28   ;;  %s4317_s27 = sphi %s4382_s27, %s6267_s27  }
   0x5   : > { %6239 = sst [smem:[#allocation3_spill]] %s4329_s30  ;;  %s31_s11 = sadd.s32 1, %s4329_s30 }
   0x6   : > { %6240 = sst [smem:[#allocation4_spill]] %s4333_s9  ;;  %p29_p0 = scmp.ge.s32.totalorder %s28_s10, 8 }
   0x7   : > { %p3710_p1 = scmp.ge.s32.totalorder %s4333_s9, 1  ;;  %p327_p2 = scmp.lt.s32.totalorder %s4333_s9, 17 }
   0x8   : > { %s6272_s10 = smov (%p29_p0, %s28_s10), 0  ;;  %s6274_s11 = smov (!%p29_p0, %s31_s11), %s4329_s30 }
   0x9   : > { %6241 = sst [smem:[#allocation5_spill]] %s6272_s10  ;;  %p328_p3 = pnand %p3710_p1, %p327_p2 }
   0xa   : > { %p33_p4 = scmp.ge.s32.totalorder %s6274_s11, 2 }
   0xb   : > { %331 = sbr.rel (%p328_p3) target bundleno = 669 (0x29d), region = 44 }
   0xc   : > { %s6276_s11 = smov (%p33_p4, %s6274_s11), 0 }
   0xd   : > { %6242 = sst [smem:[#allocation6_spill]] %s6276_s11 }
  0x10   : > { %p395_p5 = scmp.lt.s32.totalorder %s4321_s28, 1  ;;  %p397_p6 = scmp.lt.s32.totalorder %s4317_s27, 9 }
  0x11   : > { %s4416_s12 = sadd.s32 1, %s4317_s27  ;;  %s4419_s13 = sadd.s32 2, %s4317_s27 }
  0x12   : > { %6243 = sst [smem:[#allocation7_spill]] %s4416_s12  ;;  %s6278_s28 = smov (!%p395_p5, %s4321_s28), 1 }
  0x13   : > { %s398_s14 = scalar_select %p397_p6, %s4317_s27, 9 }
  0x14   : > { %s4244_s15 = smul.u32 200, %s6278_s28  ;;  %p407_p7 = scmp.lt.s32.totalorder %s4416_s12, 9 }
  0x15   : > { %s4243_s16 = smul.u32 20, %s398_s14  ;;  %p418_p8 = scmp.lt.s32.totalorder %s4419_s13, 9 }
  0x16   : > { %s408_s17 = scalar_select %p407_p7, %s4416_s12, 9 }
  0x17   : > { %s401_s18 = sadd.s32 %s4244_s15, %s4243_s16  ;;  %s6244_s0 = sld [smem:[#allocation8_spill]] }
  0x18   : > { %s3711_s19 = sshll.u32 %s401_s18, 2  ;;  %s4245_s20 = smul.u32 20, %s408_s17 }
  0x19   : > { %p428_p9 = scmp.lt.s32.totalorder %s4317_s27, 7  ;;  %s6245_s7 = sld [smem:[#allocation9_spill]] }
  0x1a   : > { %s411_s24 = sadd.s32 %s4245_s20, %s4244_s15  ;;  %s6246_s8 = sld [smem:[#allocation10_spill]] }
  0x1b   : > { %s3712_s10 = sshll.u32 %s411_s24, 2  ;;  %p3717_p10 = scmp.ne.s32.totalorder %s4317_s27, 0 }
  0x1c   : > { %s4448_s29 = scalar_lea.vmem %s6211_s1, %s3712_s10 }
  0x1d   : > { %s4432_s23 = scalar_lea.vmem %s6244_s0, %s3711_s19  ;;  %s3715_s19 = sshll.u32 %s6278_s28, 6 }
  0x1e   : > { %s419_s21 = scalar_select %p418_p8, %s4419_s13, 9 }
  0x1f   : > { %s4438_s11 = scalar_lea.vmem %s6245_s7, %s6278_s28 }
  0x20   : > { %s4443_s16 = scalar_lea.vmem %s6246_s8, %s6278_s28  ;;  %s4246_s22 = smul.u32 20, %s419_s21 }
  0x21   : > { %s429_s20 = scalar_select %p428_p9, %s4317_s27, 7 }
  0x22   : > { %s422_s25 = sadd.s32 %s4246_s22, %s4244_s15  ;;  %445 = sbr.rel (%p3717_p10) target bundleno = 42 (0x2a), region = 48 }
  0x23   : > { %s3714_s0 = sshll.u32 %s429_s20, 3  ;;  %s3713_s7 = sshll.u32 %s422_s25, 2 }
  0x24   : > { %s432_s26 = sadd.s32 %s3715_s19, %s3714_s0  ;;  %s4457_s30 = scalar_lea.vmem %s6212_s2, %s3713_s7 }
  0x25   : > { %s3716_s24 = sshll.u32 %s432_s26, 2 }
  0x26   : > { %s4462_s10 = scalar_lea.vmem %s6216_s6, %s3716_s24 }
  0x27   : > { %vm446_vm0 = vcmask 253952   ;;  %v4335_v0 = vmov 0.0  }
  0x28   : > { %447 = vst.msk [vmem:[%s4438_s11] sm:$0x1] %vm446_vm0, %v4335_v0 }
  0x29   : > { %448 = vst.msk [vmem:[%s4443_s16] sm:$0x1] %vm446_vm0, %v4335_v0 }
  0x2a PF: > { %v4470_v1 = vld [vmem:[%s6213_s3 + $0x28] sm:$0xff]  ;;  %v4186_v2 = vld [vmem:[%s6213_s3 + $0x18] sm:$0xff]  ;;  %v449_v4 = vlaneseq  ;;  %p472_p11 = scmp.ge.s32.totalorder %s4317_s27, 1  ;;  %v4482_v5 = vld [vmem:[%s6213_s3 + $0x20] sm:$0xff]  ;;  %vm918_vm2 = vcmask 1042432   ;;  %vm919_vm3 = vcmask 1046532  }
  0x2b   : > { %v4184_v3 = vld [vmem:[%s6213_s3 + $0x8] sm:$0xff]  ;;  %v482_v6 = vld [vmem:[%s4432_s23 + $0x10] sm:$0xf]  ;;  %4241 = vmatpush.bf16.msra.mxu2 %v4470_v1  ;;  %814 = vmatpush.bf16.msra.mxu0 %v4186_v2  ;;  %v483_v9 = vld [vmem:[%s4432_s23 + $0x14] sm:$0x1]  ;;  %v4336_v24 = vmov 0.0  }
  0x2c   : > { %v4185_v7 = vld [vmem:[%s6213_s3 + $0x10] sm:$0xff]  ;;  %v450_v8 = vshrl.u32 %v449_v4, 7  ;;  %p4491_p12 = pnand %p472_p11, %p397_p6  ;;  %v484_v10 = vld [vmem:[%s4432_s23 + $0x18] sm:$0xf]  ;;  %v502_v11 = vunpack.c.l.bf16 %v482_v6  ;;  %4237 = vmatpush.bf16.msra.mxu3 %v4186_v2  ;;  %4239 = vmatpush.bf16.msra.mxu1 %v4184_v3  ;;  %v485_v12 = vld [vmem:[%s4432_s23 + $0x1c] sm:$0x1]  ;;  %v503_v13 = vunpack.c.l.bf16 %v483_v9 }
  0x2d   : > { %v504_v14 = vunpack.c.l.bf16 %v484_v10  ;;  %v4501_v15 = vld [vmem:[%s6214_s4] ss:$0 sm:$0xff]  ;;  %v505_v17 = vunpack.c.l.bf16 %v485_v12  ;;  %v479_v27 = vld [vmem:[%s4432_s23 + $0x4] sm:$0x1]  ;;  %v480_v28 = vld [vmem:[%s4432_s23 + $0x8] sm:$0xf] }
  0x2e   : > { %v451_v16 = vadd.s32 8, %v450_v8  ;;  %vm452_vm1 = vcmp.ge.s32.totalorder %v450_v8, 1  ;;  %s3720_s27 = scalar_select %p4491_p12, 0, 1  ;;  %v526_v18 = vmul.f32 %v4501_v15, %v502_v11  ;;  %v527_v19 = vmul.f32 %v4501_v15, %v503_v13  ;;  %v4511_v21 = vld [vmem:[%s6215_s5] ss:$0 sm:$0xff]  ;;  %vm4563_vm5 = vmor %vm918_vm2, %vm919_vm3 }
  0x2f   : > { %v528_v20 = vmul.f32 %v4501_v15, %v504_v14  ;;  %v4183_v22 = vld [vmem:[%s6213_s3] sm:$0xff]  ;;  %4242 = vmatpush.bf16.msra.mxu2 %v4482_v5  ;;  %815 = vmatpush.bf16.msra.mxu0 %v4185_v7  ;;  %v4518_v25 = vsel %vm452_vm1, 1.0, %v4336_v24  ;;  %v529_v26 = vmul.f32 %v4501_v15, %v505_v17  ;;  %v481_v34 = vld [vmem:[%s4432_s23 + $0xc] sm:$0x1]  ;;  %v499_v37 = vunpack.c.l.bf16 %v479_v27  ;;  %v4190_v39 = vld [vmem:[%s6213_s3 + $0x38] sm:$0xff]  ;;  %s6252_s18 = sld [smem:[#allocation7_spill]] }
  0x30   : > { %v478_v23 = vld [vmem:[%s4432_s23] sm:$0xf]  ;;  %vm459_vm4 = vcmp.lt.s32.totalorder %v451_v16, 9  ;;  %s477_s0 = scvt.s32.f32 %s3720_s27  ;;  %4238 = vmatpush.bf16.msra.mxu3 %v4185_v7  ;;  %v550_v31 = vadd.f32 %v4511_v21, %v526_v18  ;;  %v551_v32 = vadd.f32 %v4511_v21, %v527_v19  ;;  %4240 = vmatpush.bf16.msra.mxu1 %v4183_v22  ;;  %v500_v38 = vunpack.c.l.bf16 %v480_v28  ;;  %v4196_v40 = vld [vmem:[%s6213_s3 + $0x68] sm:$0xff]  ;;  %v4194_v41 = vld [vmem:[%s6213_s3 + $0x58] sm:$0xff]  ;;  %p2454_p1 = scmp.ge.s32.totalorder %s4419_s13, 1 }
  0x31   : > { %v498_v29 = vunpack.c.l.bf16 %v478_v23  ;;  %v4523_v30 = vsel %vm459_vm4, 1.0, %v4336_v24  ;;  %v552_v33 = vadd.f32 %v4511_v21, %v528_v20  ;;  %v553_v35 = vadd.f32 %v4511_v21, %v529_v26 }
  0x32   : > { %v4530_v36 = vstv %s477_s0  ;;  %v570_v42 = vmax.f32 %v550_v31, 0.0  ;;  %v571_v43 = vmax.f32 %v551_v32, 0.0  ;;  %v501_v45 = vunpack.c.l.bf16 %v481_v34  ;;  %p5385_p2 = pnand %p2454_p1, %p418_p8 }
  0x33   : > { %887 = vmatpush.bf16.msrb.mxu0 %v4184_v3  ;;  %v572_v44 = vmax.f32 %v552_v33, 0.0  ;;  %v573_v46 = vmax.f32 %v553_v35, 0.0  ;;  %v522_v47 = vmul.f32 %v4501_v15, %v498_v29  ;;  %v523_v48 = vmul.f32 %v4501_v15, %v499_v37  ;;  %1293 = vmatpush.bf16.msrb.mxu2 %v4196_v40 }
  0x34   : > { %v524_v49 = vmul.f32 %v4501_v15, %v500_v38  ;;  %1072 = vmatpush.bf16.msrb.mxu3 %v4190_v39  ;;  %v590_v50 = vmul.f32 %v4518_v25, %v570_v42  ;;  %v591_v51 = vmul.f32 %v4523_v30, %v571_v43  ;;  %v525_v53 = vmul.f32 %v4501_v15, %v501_v45  ;;  %s4026_s13 = scalar_select %p5385_p2, 0, 1 }
  0x35   : > { %v592_v52 = vmul.f32 %v4518_v25, %v572_v44  ;;  %1233 = vmatpush.bf16.msrb.mxu1 %v4194_v41  ;;  %v593_v54 = vmul.f32 %v4523_v30, %v573_v46  ;;  %v546_v55 = vadd.f32 %v4511_v21, %v522_v47  ;;  %v547_v56 = vadd.f32 %v4511_v21, %v523_v48  ;;  %p1462_p13 = scmp.ge.s32.totalorder %s6252_s18, 1 }
  0x36   : > { %v548_v57 = vadd.f32 %v4511_v21, %v524_v49  ;;  %v611_v58 = vmul.f32 %v4530_v36, %v590_v50  ;;  %v612_v59 = vmul.f32 %v4530_v36, %v591_v51  ;;  %v549_v61 = vadd.f32 %v4511_v21, %v525_v53  ;;  %s2459_s7 = scvt.s32.f32 %s4026_s13 }
  0x37   : > { %888 = vmatpush.bf16.msrb.mxu0 %v4183_v22  ;;  %v613_v60 = vmul.f32 %v4530_v36, %v592_v52  ;;  %v614_v62 = vmul.f32 %v4530_v36, %v593_v54  ;;  %v566_v63 = vmax.f32 %v546_v55, 0.0  ;;  %v567_v0 = vmax.f32 %v547_v56, 0.0  ;;  %v486_v55 = vld [vmem:[%s4432_s23 + $0x20] sm:$0xf]  ;;  %p4889_p0 = pnand %p1462_p13, %p407_p7 }
  0x38   : > { %v568_v2 = vmax.f32 %v548_v57, 0.0  ;;  %v4557_v3 = vpack.c.bf16 %v611_v58, %v611_v58  ;;  %v632_v4 = vpack.c.bf16 %v612_v59, %v612_v59  ;;  %v569_v7 = vmax.f32 %v549_v61, 0.0  ;;  %v487_v61 = vld [vmem:[%s4432_s23 + $0x24] sm:$0x1] }
  0x39   : > { %v4559_v6 = vpack.c.bf16 %v613_v60, %v613_v60  ;;  %v634_v8 = vpack.c.bf16 %v614_v62, %v614_v62  ;;  %v586_v10 = vmul.f32 0.0, %v566_v63  ;;  %v587_v11 = vmul.f32 0.0, %v567_v0  ;;  %v488_v62 = vld [vmem:[%s4432_s23 + $0x28] sm:$0xf]  ;;  %s3871_s14 = scalar_select %p4889_p0, 0, 1 }
  0x3a   : > { %v588_v12 = vmul.f32 %v4518_v25, %v568_v2  ;;  %v3751_v13 = vrot.slane %v4557_v3, 9  ;;  %v931_v14 = vrot.slane %v632_v4, 5  ;;  %v589_v17 = vmul.f32 %v4523_v30, %v569_v7  ;;  %v4189_v7 = vld [vmem:[%s6213_s3 + $0x30] sm:$0xff] }
  0x3b   : > { %v3752_v16 = vrot.slane %v4559_v6, 9  ;;  %v935_v18 = vrot.slane %v634_v8, 5  ;;  %v607_v19 = vmul.f32 %v4530_v36, %v586_v10  ;;  %v608_v20 = vmul.f32 %v4530_v36, %v587_v11  ;;  %1073 = vmatpush.bf16.msrb.mxu3 %v4189_v7  ;;  %v4195_v7 = vld [vmem:[%s6213_s3 + $0x60] sm:$0xff]  ;;  %s1467_s0 = scvt.s32.f32 %s3871_s14 }
  0x3c   : > { %v609_v22 = vmul.f32 %v4530_v36, %v588_v12  ;;  %vm795_vm6 = vcmask 261120   ;;  %v4576_v23 = vsel %vm4563_vm5, %v3751_v13, %v931_v14  ;;  %v610_v24 = vmul.f32 %v4530_v36, %v589_v17  ;;  %v489_v14 = vld [vmem:[%s4432_s23 + $0x2c] sm:$0x1]  ;;  %1294 = vmatpush.bf16.msrb.mxu2 %v4195_v7 }
  0x3d   : > { %vm651_vm7 = vsmask.f32 3328  ;;  %v4581_v26 = vsel %vm4563_vm5, %v3752_v16, %v935_v18  ;;  %v960_v27 = vunpack.c.l.b16 %v4576_v23  ;;  %v4584_v28 = vpack.c.bf16 %v607_v19, %v607_v19 }
  0x3e   : > { %v4586_v29 = vpack.c.bf16 %v608_v20, %v608_v20  ;;  %v961_v31 = vunpack.c.l.b16 %v4581_v26  ;;  %v4589_v32 = vpack.c.bf16 %v609_v22, %v609_v22  ;;  %v4591_v33 = vpack.c.bf16 %v610_v24, %v610_v24 }
  0x3f   : > { %v683_v34 = vshrl.u32 %v4557_v3, 16  ;;  %vm652_vm8 = vsmask.f32 7440  ;;  %v655_v35 = vshrl.u32 %v4584_v28, 16  ;;  %v658_v37 = vshll.u32 %v4584_v28, 16 }
  0x40   : > { %v664_v38 = vshll.u32 %v4586_v29, 16  ;;  %v4601_v39 = vpack.c.b16 %v961_v31, %v960_v27  ;;  %v669_v40 = vshrl.u32 %v4589_v32, 16  ;;  %v672_v41 = vshll.u32 %v4589_v32, 16  ;;  %vm4614_vm9 = vmor %vm651_vm7, %vm652_vm8 }
  0x41   : > { %v678_v42 = vshll.u32 %v4591_v33, 16  ;;  %v657_v43 = vrot.slane %v655_v35, 4  ;;  %v660_v44 = vrot.slane %v658_v37, 5  ;;  %v923_v46 = vrot.slane %v4586_v29, 5 }
  0x42   : > { %v666_v45 = vrot.slane %v664_v38, 5  ;;  %3770 = vmatmul.msk.bf16.vlgmr.msra.gmra.mxu2 %vm795_vm6, %v4601_v39  ;;  %v671_v47 = vrot.slane %v669_v40, 4  ;;  %v674_v48 = vrot.slane %v672_v41, 5  ;;  %v685_v50 = vrot.slane %v683_v34, 4 }
  0x43   : > { %v680_v49 = vrot.slane %v678_v42, 5  ;;  %v661_v51 = vor.u32 %v660_v44, %v657_v43  ;;  %v686_v52 = vshll.u32 %v4557_v3, 16  ;;  %v692_v53 = vshll.u32 %v632_v4, 16 }
  0x44   : > { %v697_v54 = vshrl.u32 %v4559_v6, 16  ;;  %v675_v57 = vor.u32 %v674_v48, %v671_v47  ;;  %v700_v58 = vshll.u32 %v4559_v6, 16  ;;  %v706_v59 = vshll.u32 %v634_v8, 16 }
  0x45   : > { %v847_v60 = vunpack.c.l.b16 %v4557_v3  ;;  %v662_v63 = vrot.slane %v661_v51, 4  ;;  %v688_v0 = vrot.slane %v686_v52, 5  ;;  %v694_v2 = vrot.slane %v692_v53, 5  ;;  %v4199_v3 = vld [vmem:[%s6213_s3 + $0x80] sm:$0xff] }
  0x46   : > { %v699_v4 = vrot.slane %v697_v54, 4  ;;  %v676_v10 = vrot.slane %v675_v57, 4  ;;  %v702_v11 = vrot.slane %v700_v58, 5  ;;  %v708_v12 = vrot.slane %v706_v59, 5  ;;  %v491_v59 = vld [vmem:[%s4432_s23 + $0x34] sm:$0x1] }
  0x47   : > { %v848_v13 = vunpack.c.l.b16 %v4559_v6  ;;  %v667_v8 = vsel %vm4614_vm9, %v662_v63, %v666_v45  ;;  %v689_v16 = vor.u32 %v688_v0, %v685_v50  ;;  %v506_v17 = vunpack.c.l.bf16 %v486_v55 }
  0x48   : > { %v507_v18 = vunpack.c.l.bf16 %v487_v61  ;;  %v681_v19 = vsel %vm4614_vm9, %v676_v10, %v680_v49  ;;  %v771_v20 = vunpack.c.l.b16 %v667_v8  ;;  %v703_v22 = vor.u32 %v702_v11, %v699_v4  ;;  %v490_v49 = vld [vmem:[%s4432_s23 + $0x30] sm:$0xf]  ;;  %v492_v61 = vld [vmem:[%s4432_s23 + $0x38] sm:$0xf] }
  0x49   : > { %v4635_v24 = vpack.c.b16 %v848_v13, %v847_v60  ;;  %v4637_v34 = vunpack.c.l.b16 %v681_v19  ;;  %v690_v35 = vrot.slane %v689_v16, 4  ;;  %v508_v37 = vunpack.c.l.bf16 %v488_v62 }
  0x4a   : > { %v509_v38 = vunpack.c.l.bf16 %v489_v14  ;;  %v704_v40 = vrot.slane %v703_v22, 4  ;;  %v530_v41 = vmul.f32 %v4501_v15, %v506_v17  ;;  %v531_v42 = vmul.f32 %v4501_v15, %v507_v18 }
  0x4b   : > { %3746 = vmatmul.msk.bf16.vlgmr.msra.gmra.mxu1 %vm795_vm6, %v4635_v24  ;;  %v845_v43 = vunpack.c.l.b16 %v4584_v28  ;;  %v779_v44 = vpack.c.b16 %v4637_v34, %v771_v20  ;;  %v695_v45 = vsel %vm4614_vm9, %v690_v35, %v694_v2  ;;  %v532_v47 = vmul.f32 %v4501_v15, %v508_v37  ;;  %v493_v2 = vld [vmem:[%s4432_s23 + $0x3c] sm:$0x1] }
  0x4c   : > { %v533_v48 = vmul.f32 %v4501_v15, %v509_v38  ;;  %v709_v50 = vsel %vm4614_vm9, %v704_v40, %v708_v12  ;;  %v4652_v51 = vunpack.c.l.b16 %v695_v45  ;;  %v554_v52 = vadd.f32 %v4511_v21, %v530_v41 }
  0x4d   : > { %v555_v53 = vadd.f32 %v4511_v21, %v531_v42  ;;  %3733 = vmatmul.msk.bf16.vlgmr.msra.gmra.mxu0 %vm795_vm6, %v779_v44  ;;  %v4657_v54 = vunpack.c.l.b16 %v709_v50  ;;  %v556_v55 = vadd.f32 %v4511_v21, %v532_v47  ;;  %v846_v58 = vunpack.c.l.b16 %v4589_v32 }
  0x4e   : > { %v557_v57 = vadd.f32 %v4511_v21, %v533_v48  ;;  %v927_v62 = vrot.slane %v4591_v33, 5  ;;  %v574_v63 = vmax.f32 %v554_v52, 0.0  ;;  %1000 = vmatpush.bf16.msra.mxu0 %v4470_v1  ;;  %v510_v4 = vunpack.c.l.bf16 %v490_v49 }
  0x4f   : > { %v575_v0 = vmax.f32 %v555_v53, 0.0  ;;  %v4672_v10 = vpack.c.b16 %v4657_v54, %v4652_v51  ;;  %v576_v11 = vmax.f32 %v556_v55, 0.0  ;;  %v853_v14 = vpack.c.b16 %v846_v58, %v845_v43  ;;  %v4193_v55 = vld [vmem:[%s6213_s3 + $0x50] sm:$0xff] }
  0x50   : > { %v577_v12 = vmax.f32 %v557_v57, 0.0  ;;  %v594_v8 = vmul.f32 %v4518_v25, %v574_v63  ;;  %v511_v1 = vunpack.c.l.bf16 %v491_v59  ;;  %v512_v17 = vunpack.c.l.bf16 %v492_v61  ;;  %1234 = vmatpush.bf16.msrb.mxu1 %v4193_v55 }
  0x51   : > { %v595_v16 = vmul.f32 %v4523_v30, %v575_v0  ;;  %3734 = vmatmul.msk.bf16.vlgmr.msra.gmra.mxu3 %vm795_vm6, %v4672_v10  ;;  %v596_v18 = vmul.f32 %v4518_v25, %v576_v11  ;;  %v513_v20 = vunpack.c.l.bf16 %v493_v2  ;;  %v534_v22 = vmul.f32 %v4501_v15, %v510_v4 }
  0x52   : > { %v597_v19 = vmul.f32 %v4523_v30, %v577_v12  ;;  %v615_v35 = vmul.f32 %v4530_v36, %v594_v8  ;;  %1001 = vmatpush.bf16.msra.mxu0 %v4482_v5  ;;  %v535_v38 = vmul.f32 %v4501_v15, %v511_v1  ;;  %v536_v40 = vmul.f32 %v4501_v15, %v512_v17 }
  0x53   : > { %v616_v37 = vmul.f32 %v4530_v36, %v595_v16  ;;  %v617_v41 = vmul.f32 %v4530_v36, %v596_v18  ;;  %v537_v43 = vmul.f32 %v4501_v15, %v513_v20  ;;  %v558_v44 = vadd.f32 %v4511_v21, %v534_v22 }
  0x54   : > { %v618_v42 = vmul.f32 %v4530_v36, %v597_v19  ;;  %v4692_v45 = vpack.c.bf16 %v615_v35, %v615_v35  ;;  %v559_v48 = vadd.f32 %v4511_v21, %v535_v38  ;;  %v560_v49 = vadd.f32 %v4511_v21, %v536_v40  ;;  %v4192_v38 = vld [vmem:[%s6213_s3 + $0x48] sm:$0xff] }
  0x55   : > { %v636_v47 = vpack.c.bf16 %v616_v37, %v616_v37  ;;  %v4696_v5 = vpack.c.bf16 %v617_v41, %v617_v41  ;;  %v561_v52 = vadd.f32 %v4511_v21, %v537_v43  ;;  %v578_v53 = vmax.f32 %v558_v44, 0.0 }
  0x56   : > { %v638_v50 = vpack.c.bf16 %v618_v42, %v618_v42  ;;  %v3753_v57 = vrot.slane %v4692_v45, 9  ;;  %v711_v61 = vshrl.u32 %v4692_v45, 16  ;;  %v714_v63 = vshll.u32 %v4692_v45, 16 }
  0x57   : > { %v939_v59 = vrot.slane %v636_v47, 5  ;;  %v3754_v0 = vrot.slane %v4696_v5, 9  ;;  %v720_v4 = vshll.u32 %v636_v47, 16  ;;  %v725_v7 = vshrl.u32 %v4696_v5, 16 }
  0x58   : > { %v943_v2 = vrot.slane %v638_v50, 5  ;;  %v713_v12 = vrot.slane %v711_v61, 4  ;;  %v716_v8 = vrot.slane %v714_v63, 5  ;;  %v728_v16 = vshll.u32 %v4696_v5, 16 }
  0x59   : > { %v4709_v11 = vsel %vm4563_vm5, %v3753_v57, %v939_v59  ;;  %v722_v18 = vrot.slane %v720_v4, 5  ;;  %v727_v19 = vrot.slane %v725_v7, 4  ;;  %v734_v37 = vshll.u32 %v638_v50, 16 }
  0x5a   : > { %v4714_v1 = vsel %vm4563_vm5, %v3754_v0, %v943_v2  ;;  %v962_v17 = vunpack.c.l.b16 %v4709_v11  ;;  %v717_v22 = vor.u32 %v716_v8, %v713_v12  ;;  %v730_v35 = vrot.slane %v728_v16, 5 }
  0x5b   : > { %v963_v20 = vunpack.c.l.b16 %v4714_v1  ;;  %v849_v40 = vunpack.c.l.b16 %v4692_v45  ;;  %v850_v41 = vunpack.c.l.b16 %v4696_v5  ;;  %v579_v42 = vmax.f32 %v559_v48, 0.0 }
  0x5c   : > { %v580_v43 = vmax.f32 %v560_v49, 0.0  ;;  %v718_v47 = vrot.slane %v717_v22, 4  ;;  %v731_v55 = vor.u32 %v730_v35, %v727_v19  ;;  %v736_v57 = vrot.slane %v734_v37, 5 }
  0x5d   : > { %v4727_v44 = vpack.c.b16 %v963_v20, %v962_v17  ;;  %3745 = vmatmul.msk.bf16.vlgmr.msrb.gmra.mxu0 %vm795_vm6, %v853_v14  ;;  %v4734_v50 = vpack.c.b16 %v850_v41, %v849_v40  ;;  %v581_v59 = vmax.f32 %v561_v52, 0.0  ;;  %v598_v48 = vmul.f32 %v4518_v25, %v578_v53  ;;  %v4191_v52 = vld [vmem:[%s6213_s3 + $0x40] sm:$0xff] }
  0x5e   : > { %v599_v49 = vmul.f32 %v4523_v30, %v579_v42  ;;  %v723_v61 = vsel %vm4614_vm9, %v718_v47, %v722_v18  ;;  %v732_v63 = vrot.slane %v731_v55, 4  ;;  %v600_v14 = vmul.f32 %v4518_v25, %v580_v43  ;;  %1157 = vmatpush.bf16.msrb.mxu0 %v4192_v38 }
  0x5f   : > { %3771 = vmatmul.msk.bf16.gmra.mxu2 %vm795_vm6, %v4727_v44  ;;  %v3749_v0 = vrot.slane %v4584_v28, 9  ;;  %v4747_v2 = vunpack.c.l.b16 %v723_v61  ;;  %3747 = vmatmul.msk.bf16.gmra.mxu1 %vm795_vm6, %v4734_v50  ;;  %v601_v53 = vmul.f32 %v4523_v30, %v581_v59  ;;  %v619_v4 = vmul.f32 %v4530_v36, %v598_v48 }
  0x60   : > { %v620_v7 = vmul.f32 %v4530_v36, %v599_v49  ;;  %v737_v12 = vsel %vm4614_vm9, %v732_v63, %v736_v57  ;;  %v621_v28 = vmul.f32 %v4530_v36, %v600_v14  ;;  %v3750_v16 = vrot.slane %v4589_v32, 9  ;;  %v4198_v63 = vld [vmem:[%s6213_s3 + $0x78] sm:$0xff]  ;;  %v4204_v14 = vld [vmem:[%s6213_s3 + $0xa8] sm:$0xff]  ;;  %v4203_v32 = vld [vmem:[%s6213_s3 + $0xa0] sm:$0xff] }
  0x61   : > { %v924_v8 = vsel %vm4563_vm5, %v3749_v0, %v923_v46  ;;  %v4762_v18 = vunpack.c.l.b16 %v737_v12  ;;  %v622_v19 = vmul.f32 %v4530_v36, %v601_v53  ;;  %v4765_v22 = vpack.c.bf16 %v619_v4, %v619_v4  ;;  %1366 = vmatpush.bf16.msra.mxu3 %v4198_v63  ;;  %1874 = vmatpush.bf16.msra.mxu2 %v4204_v14 }
  0x62   : > { %v640_v35 = vpack.c.bf16 %v620_v7, %v620_v7  ;;  %v4767_v37 = vpack.c.bf16 %v621_v28, %v621_v28  ;;  %v928_v38 = vsel %vm4563_vm5, %v3750_v16, %v927_v62  ;;  %v958_v29 = vunpack.c.l.b16 %v924_v8  ;;  %1158 = vmatpush.bf16.msrb.mxu0 %v4191_v52  ;;  %v4202_v7 = vld [vmem:[%s6213_s3 + $0x98] sm:$0xff] }
  0x63   : > { %v4775_v46 = vpack.c.b16 %v4762_v18, %v4747_v2  ;;  %v642_v42 = vpack.c.bf16 %v622_v19, %v622_v19  ;;  %v3755_v43 = vrot.slane %v4765_v22, 9  ;;  %v739_v57 = vshrl.u32 %v4765_v22, 16  ;;  %1684 = vmatpush.bf16.msra.mxu1 %v4202_v7  ;;  %v494_v7 = vld [vmem:[%s4432_s23 + $0x40] sm:$0xf] }
  0x64   : > { %v947_v47 = vrot.slane %v640_v35, 5  ;;  %v3756_v55 = vrot.slane %v4767_v37, 9  ;;  %v742_v59 = vshll.u32 %v4765_v22, 16  ;;  %v748_v33 = vshll.u32 %v640_v35, 16 }
  0x65   : > { %3735 = vmatmul.msk.bf16.gmra.mxu3 %vm795_vm6, %v4775_v46  ;;  %v951_v48 = vrot.slane %v642_v42, 5  ;;  %v753_v49 = vshrl.u32 %v4767_v37, 16  ;;  %v756_v61 = vshll.u32 %v4767_v37, 16  ;;  %v741_v52 = vrot.slane %v739_v57, 4  ;;  %1875 = vmatpush.bf16.msra.mxu2 %v4203_v32 }
  0x66   : > { %v4785_v62 = vsel %vm4563_vm5, %v3755_v43, %v947_v47  ;;  %v744_v53 = vrot.slane %v742_v59, 5  ;;  %v750_v4 = vrot.slane %v748_v33, 5  ;;  %v762_v16 = vshll.u32 %v642_v42, 16 }
  0x67   : > { %v964_v0 = vunpack.c.l.b16 %v4785_v62  ;;  %v4801_v12 = vsel %vm4563_vm5, %v3756_v55, %v951_v48  ;;  %v755_v28 = vrot.slane %v753_v49, 4  ;;  %v758_v8 = vrot.slane %v756_v61, 5 }
  0x68   : > { %v965_v19 = vunpack.c.l.b16 %v4801_v12  ;;  %v745_v35 = vor.u32 %v744_v53, %v741_v52  ;;  %v959_v43 = vunpack.c.l.b16 %v928_v38  ;;  %v851_v47 = vunpack.c.l.b16 %v4765_v22  ;;  %v4200_v38 = vld [vmem:[%s6213_s3 + $0x88] sm:$0xff] }
  0x69   : > { %v759_v57 = vor.u32 %v758_v8, %v755_v28  ;;  %v764_v59 = vrot.slane %v762_v16, 5  ;;  %v852_v33 = vunpack.c.l.b16 %v4767_v37  ;;  %v514_v28 = vunpack.c.l.bf16 %v494_v7 }
  0x6a   : > { %v4810_v55 = vpack.c.b16 %v965_v19, %v964_v0  ;;  %v746_v42 = vrot.slane %v745_v35, 4  ;;  %v966_v48 = vpack.c.b16 %v959_v43, %v958_v29  ;;  %v1199_v8 = vpack.c.b16 %v960_v27, %v959_v43  ;;  %v495_v35 = vld [vmem:[%s4432_s23 + $0x44] sm:$0x1]  ;;  %v496_v43 = vld [vmem:[%s4432_s23 + $0x48] sm:$0xf] }
  0x6b   : > { %v760_v49 = vrot.slane %v759_v57, 4  ;;  %v4819_v61 = vpack.c.b16 %v852_v33, %v851_v47  ;;  %v538_v16 = vmul.f32 %v4501_v15, %v514_v28  ;;  %v1038_v23 = vpack.c.b16 %v847_v60, %v846_v58  ;;  %v4201_v60 = vld [vmem:[%s6213_s3 + $0x90] sm:$0xff] }
  0x6c   : > { %v751_v63 = vsel %vm4614_vm9, %v746_v42, %v750_v4  ;;  %v1123_v4 = vpack.c.b16 %v4652_v51, %v4637_v34  ;;  %v4197_v42 = vld [vmem:[%s6213_s3 + $0x70] sm:$0xff]  ;;  %1685 = vmatpush.bf16.msra.mxu1 %v4201_v60  ;;  %v1200_v28 = vpack.c.b16 %v962_v17, %v961_v31  ;;  %vm3453_vm10 = vcmask 257024  }
  0x6d   : > { %v765_v14 = vsel %vm4614_vm9, %v760_v49, %v764_v59  ;;  %v4825_v52 = vunpack.c.l.b16 %v751_v63  ;;  %3769 = vmatmul.msk.bf16.vlgmr.msra.gmra.mxu0 %vm795_vm6, %v966_v48  ;;  %v562_v57 = vadd.f32 %v4511_v21, %v538_v16  ;;  %v515_v59 = vunpack.c.l.bf16 %v495_v35  ;;  %1367 = vmatpush.bf16.msra.mxu3 %v4197_v42  ;;  %v1468_v49 = vld [vmem:[%s4448_s29] sm:$0xf]  ;;  %v1470_v63 = vld [vmem:[%s4448_s29 + $0x8] sm:$0xf]  ;;  %v1471_v35 = vld [vmem:[%s4448_s29 + $0xc] sm:$0x1] }
  0x6e   : > { %v4830_v29 = vunpack.c.l.b16 %v765_v14  ;;  %1430 = vmatpush.bf16.msra.mxu0 %v4200_v38  ;;  %v516_v48 = vunpack.c.l.bf16 %v496_v43  ;;  %v1124_v14 = vpack.c.b16 %v4747_v2, %v4657_v54  ;;  %v1490_v7 = vunpack.c.l.bf16 %v1470_v63  ;;  %v1469_v2 = vld [vmem:[%s4448_s29 + $0x4] sm:$0x1] }
  0x6f   : > { %3772 = vmatmul.msk.bf16.gmra.mxu2 %vm795_vm6, %v4810_v55  ;;  %3748 = vmatmul.msk.bf16.gmra.mxu1 %vm795_vm6, %v4819_v61  ;;  %v582_v34 = vmax.f32 %v562_v57, 0.0  ;;  %v539_v51 = vmul.f32 %v4501_v15, %v515_v59  ;;  %v1489_v31 = vunpack.c.l.bf16 %v1469_v2  ;;  %v1491_v17 = vunpack.c.l.bf16 %v1471_v35 }
  0x70   : > { %v4836_v53 = vpack.c.b16 %v4830_v29, %v4825_v52  ;;  %v540_v16 = vmul.f32 %v4501_v15, %v516_v48  ;;  %v1510_v11 = vmul.f32 %v4501_v15, %v1490_v7  ;;  %v1474_v7 = vld [vmem:[%s4448_s29 + $0x18] sm:$0xf]  ;;  %vm3485_vm11 = vcmask 253952  }
  0x71   : > { %v602_v27 = vmul.f32 %v4518_v25, %v582_v34  ;;  %v1511_v43 = vmul.f32 %v4501_v15, %v1491_v17 }
  0x72   : > { %1431 = vmatpush.bf16.msra.mxu0 %v4199_v3 }
  0x73   : > { %v623_v58 = vmul.f32 %v4530_v36, %v602_v27  ;;  %v1531_v6 = vadd.f32 %v4511_v21, %v1511_v43 }
  0x75   : > { %3736 = vmatmul.msk.bf16.gmra.mxu3 %vm795_vm6, %v4836_v53  ;;  %v1551_v2 = vmax.f32 %v1531_v6, 0.0 }
  0x7d   : > { %3801 = vmatmul.msk.bf16.vlgmr.msrb.gmra.mxu0 %vm795_vm6, %v1123_v4  ;;  %v1488_v4 = vunpack.c.l.bf16 %v1468_v49 }
  0x7f   : > { %3834 = vmatmul.msk.bf16.vlgmr.msrb.gmra.mxu2 %vm795_vm6, %v4635_v24  ;;  %3818 = vmatmul.msk.bf16.vlgmr.msrb.gmra.mxu1 %vm795_vm6, %v1199_v8  ;;  %v563_v24 = vadd.f32 %v4511_v21, %v539_v51  ;;  %v4883_v8 = vpack.c.bf16 %v623_v58, %v623_v58  ;;  %v1508_v26 = vmul.f32 %v4501_v15, %v1488_v4  ;;  %v1472_v4 = vld [vmem:[%s4448_s29 + $0x10] sm:$0xf] }
  0x80   : > { %v1530_v51 = vadd.f32 %v4511_v21, %v1510_v11  ;;  %v1201_v11 = vpack.c.b16 %v964_v0, %v963_v20  ;;  %v1571_v20 = vmul.f32 %v4523_v30, %v1551_v2 }
  0x81   : > { %v583_v38 = vmax.f32 %v563_v24, 0.0  ;;  %v1528_v57 = vadd.f32 %v4511_v21, %v1508_v26  ;;  %v1104_v59 = vshrl.u32 %v4883_v8, 16  ;;  %v1107_v34 = vshll.u32 %v4883_v8, 16 }
  0x82   : > { %v1509_v24 = vmul.f32 %v4501_v15, %v1489_v31  ;;  %v1550_v60 = vmax.f32 %v1530_v51, 0.0  ;;  %v1494_v26 = vunpack.c.l.bf16 %v1474_v7  ;;  %v3805_v51 = vrot.slane %v4883_v8, 9 }
  0x83   : > { %v603_v54 = vmul.f32 %v4523_v30, %v583_v38  ;;  %v1548_v42 = vmax.f32 %v1528_v57, 0.0  ;;  %v1106_v32 = vrot.slane %v1104_v59, 4  ;;  %v1109_v3 = vrot.slane %v1107_v34, 5 }
  0x84   : > { %v1529_v38 = vadd.f32 %v4511_v21, %v1509_v24 }
  0x85   : > { %3785 = vmatmul.msk.bf16.vlgmr.msrb.gmra.mxu3 %vm795_vm6, %v1038_v23  ;;  %v564_v23 = vadd.f32 %v4511_v21, %v540_v16  ;;  %v624_v27 = vmul.f32 %v4530_v36, %v603_v54  ;;  %v1568_v49 = vmul.f32 0.0, %v1548_v42  ;;  %v1110_v45 = vor.u32 %v1109_v3, %v1106_v32 }
  0x86   : > { %v1492_v16 = vunpack.c.l.bf16 %v1472_v4  ;;  %v1125_v54 = vpack.c.b16 %v4825_v52, %v4762_v18  ;;  %v1473_v18 = vld [vmem:[%s4448_s29 + $0x14] sm:$0x1]  ;;  %v1475_v52 = vld [vmem:[%s4448_s29 + $0x1c] sm:$0x1]  ;;  %v1037_v4 = vunpack.c.l.b16 %v4883_v8 }
  0x87   : > { %v584_v58 = vmax.f32 %v564_v23, 0.0  ;;  %v644_v48 = vpack.c.bf16 %v624_v27, %v624_v27  ;;  %v1111_v31 = vrot.slane %v1110_v45, 4  ;;  %v1514_v23 = vmul.f32 %v4501_v15, %v1494_v26  ;;  %v4206_v8 = vld [vmem:[%s6213_s3 + $0xb8] sm:$0xff] }
  0x88   : > { %v1512_v57 = vmul.f32 %v4501_v15, %v1492_v16  ;;  %v1493_v1 = vunpack.c.l.bf16 %v1473_v18  ;;  %1992 = vmatpush.bf16.msrb.mxu3 %v4206_v8 }
  0x89   : > { %v604_v63 = vmul.f32 0.0, %v584_v58  ;;  %v1191_v27 = vrot.slane %v644_v48, 5  ;;  %v1534_v43 = vadd.f32 %v4511_v21, %v1514_v23  ;;  %v1040_v58 = vpack.c.b16 %v851_v47, %v850_v41  ;;  %v1476_v23 = vld [vmem:[%s4448_s29 + $0x20] sm:$0xf] }
  0x8a   : > { %v1532_v0 = vadd.f32 %v4511_v21, %v1512_v57  ;;  %v1513_v32 = vmul.f32 %v4501_v15, %v1493_v1 }
  0x8b   : > { %v625_v59 = vmul.f32 %v4530_v36, %v604_v63  ;;  %v4962_v6 = vsel %vm4563_vm5, %v3805_v51, %v1191_v27  ;;  %v1478_v27 = vld [vmem:[%s4448_s29 + $0x28] sm:$0xf] }
  0x8c   : > { %v1533_v47 = vadd.f32 %v4511_v21, %v1513_v32  ;;  %v1498_v32 = vunpack.c.l.bf16 %v1478_v27 }
  0x8d   : > { %3802 = vmatmul.msk.bf16.gmra.mxu0 %vm795_vm6, %v1124_v14  ;;  %v1113_v14 = vshll.u32 %v644_v48, 16  ;;  %v4956_v48 = vpack.c.bf16 %v625_v59, %v625_v59 }
  0x8e   : > { %v1553_v51 = vmax.f32 %v1533_v47, 0.0 }
  0x8f   : > { %3835 = vmatmul.msk.bf16.gmra.mxu2 %vm795_vm6, %v4734_v50  ;;  %3819 = vmatmul.msk.bf16.gmra.mxu1 %vm795_vm6, %v1200_v28  ;;  %v1039_v50 = vpack.c.b16 %v849_v40, %v848_v13  ;;  %v1570_v13 = vmul.f32 %v4518_v25, %v1550_v60  ;;  %v4921_v40 = vstv %s1467_s0  ;;  %v1549_v28 = vmax.f32 %v1529_v38, 0.0 }
  0x90   : > { %v1589_v35 = vmul.f32 %v4921_v40, %v1568_v49  ;;  %v1115_v34 = vrot.slane %v1113_v14, 5  ;;  %v1552_v60 = vmax.f32 %v1532_v0, 0.0  ;;  %v1592_v45 = vmul.f32 %v4921_v40, %v1571_v20 }
  0x91   : > { %v1591_v17 = vmul.f32 %v4921_v40, %v1570_v13  ;;  %v1569_v24 = vmul.f32 0.0, %v1549_v28  ;;  %v1270_v7 = vunpack.c.l.b16 %v4956_v48 }
  0x92   : > { %v4941_v62 = vpack.c.bf16 %v1589_v35, %v1589_v35  ;;  %v1116_v38 = vsel %vm4614_vm9, %v1111_v31, %v1115_v34  ;;  %v1572_v14 = vmul.f32 %v4518_v25, %v1552_v60  ;;  %v4982_v35 = vpack.c.bf16 %v1592_v45, %v1592_v45  ;;  %v4208_v31 = vld [vmem:[%s6213_s3 + $0xc8] sm:$0xff]  ;;  %v4210_v34 = vld [vmem:[%s6213_s3 + $0xd8] sm:$0xff] }
  0x93   : > { %v4947_v42 = vpack.c.bf16 %v1591_v17, %v1591_v17  ;;  %v1590_v49 = vmul.f32 %v4921_v40, %v1569_v24  ;;  %v4975_v28 = vunpack.c.l.b16 %v1116_v38  ;;  %v1271_v24 = vpack.c.b16 %v1270_v7, %v1037_v4  ;;  %2064 = vmatpush.bf16.msrb.mxu0 %v4208_v31  ;;  %2149 = vmatpush.bf16.msrb.mxu1 %v4210_v34  ;;  %v1479_v45 = vld [vmem:[%s4448_s29 + $0x2c] sm:$0x1] }
  0x94   : > { %v1716_v13 = vshrl.u32 %v4941_v62, 16  ;;  %v1719_v5 = vshll.u32 %v4941_v62, 16  ;;  %v1573_v38 = vmul.f32 %v4523_v30, %v1553_v51  ;;  %v1041_v51 = vpack.c.b16 %v1037_v4, %v852_v33 }
  0x95   : > { %3786 = vmatmul.msk.bf16.gmra.mxu3 %vm795_vm6, %v1039_v50  ;;  %v1495_v50 = vunpack.c.l.bf16 %v1475_v52  ;;  %v1730_v41 = vshrl.u32 %v4947_v42, 16  ;;  %v1733_v22 = vshll.u32 %v4947_v42, 16  ;;  %v4980_v2 = vpack.c.bf16 %v1590_v49, %v1590_v49  ;;  %v1477_v49 = vld [vmem:[%s4448_s29 + $0x24] sm:$0x1] }
  0x96   : > { %v1718_v26 = vrot.slane %v1716_v13, 4  ;;  %v1721_v17 = vrot.slane %v1719_v5, 5  ;;  %v1593_v52 = vmul.f32 %v4921_v40, %v1572_v14  ;;  %v1126_v1 = vpack.c.b16 %v4975_v28, %v4830_v29 }
  0x97   : > { %v1515_v3 = vmul.f32 %v4501_v15, %v1495_v50  ;;  %v1732_v57 = vrot.slane %v1730_v41, 4  ;;  %v1735_v59 = vrot.slane %v1733_v22, 5  ;;  %v1725_v0 = vshll.u32 %v4980_v2, 16 }
  0x98   : > { %v1497_v5 = vunpack.c.l.bf16 %v1477_v49  ;;  %v1499_v41 = vunpack.c.l.bf16 %v1479_v45  ;;  %v1482_v49 = vld [vmem:[%s4448_s29 + $0x38] sm:$0xf] }
  0x99   : > { %v1535_v63 = vadd.f32 %v4511_v21, %v1515_v3  ;;  %v1722_v3 = vor.u32 %v1721_v17, %v1718_v26  ;;  %v1736_v60 = vor.u32 %v1735_v59, %v1732_v57  ;;  %v1727_v14 = vrot.slane %v1725_v0, 5 }
  0x9a   : > { %v1594_v26 = vmul.f32 %v4921_v40, %v1573_v38  ;;  %v1517_v59 = vmul.f32 %v4501_v15, %v1497_v5  ;;  %v1519_v34 = vmul.f32 %v4501_v15, %v1499_v41 }
  0x9b   : > { %v1555_v18 = vmax.f32 %v1535_v63, 0.0  ;;  %v1723_v63 = vrot.slane %v1722_v3, 4  ;;  %v1737_v7 = vrot.slane %v1736_v60, 4  ;;  %v1642_v60 = vunpack.c.l.b16 %v4941_v62 }
  0x9c   : > { %v1537_v37 = vadd.f32 %v4511_v21, %v1517_v59  ;;  %v1539_v33 = vadd.f32 %v4511_v21, %v1519_v34 }
  0x9d   : > { %3803 = vmatmul.msk.bf16.gmra.mxu0 %vm795_vm6, %v1125_v54  ;;  %v1198_v54 = vunpack.c.l.b16 %v4962_v6  ;;  %v1575_v29 = vmul.f32 %v4523_v30, %v1555_v18  ;;  %v4220_v6 = vld [vmem:[%s6213_s3 + $0x128] sm:$0xff] }
  0x9e   : > { %v1559_v5 = vmax.f32 %v1539_v33, 0.0 }
  0x9f   : > { %3836 = vmatmul.msk.bf16.gmra.mxu2 %vm795_vm6, %v4819_v61  ;;  %3820 = vmatmul.msk.bf16.gmra.mxu1 %vm795_vm6, %v1201_v11  ;;  %v1554_v61 = vmax.f32 %v1534_v43, 0.0  ;;  %v4212_v11 = vld [vmem:[%s6213_s3 + $0xe8] sm:$0xff]  ;;  %v1202_v20 = vpack.c.b16 %v1198_v54, %v965_v19  ;;  %v1496_v43 = vunpack.c.l.bf16 %v1476_v23  ;;  %v1518_v19 = vmul.f32 %v4501_v15, %v1498_v32 }
  0xa0   : > { %2225 = vmatpush.bf16.msrb.mxu2 %v4212_v11  ;;  %v1596_v8 = vmul.f32 %v4921_v40, %v1575_v29  ;;  %v1728_v23 = vsel %vm4614_vm9, %v1723_v63, %v1727_v14  ;;  %v1502_v63 = vunpack.c.l.bf16 %v1482_v49 }
  0xa1   : > { %v1574_v16 = vmul.f32 %v4518_v25, %v1554_v61  ;;  %v5010_v61 = vpack.c.bf16 %v1593_v52, %v1593_v52  ;;  %v1516_v12 = vmul.f32 %v4501_v15, %v1496_v43  ;;  %v1538_v47 = vadd.f32 %v4511_v21, %v1518_v19 }
  0xa2   : > { %v1832_v32 = vunpack.c.l.b16 %v1728_v23  ;;  %v1557_v19 = vmax.f32 %v1537_v37, 0.0 }
  0xa3   : > { %v1595_v50 = vmul.f32 %v4921_v40, %v1574_v16  ;;  %v1536_v22 = vadd.f32 %v4511_v21, %v1516_v12  ;;  %v1744_v11 = vshrl.u32 %v5010_v61, 16  ;;  %v1747_v31 = vshll.u32 %v5010_v61, 16  ;;  %v1480_v21 = vld [vmem:[%s4448_s29 + $0x30] sm:$0xf] }
  0xa4   : > { %v1558_v52 = vmax.f32 %v1538_v47, 0.0  ;;  %v1500_v47 = vunpack.c.l.bf16 %v1480_v21 }
  0xa5   : > { %3787 = vmatmul.msk.bf16.gmra.mxu3 %vm795_vm6, %v1040_v58  ;;  %v1739_v58 = vshll.u32 %v4982_v35, 16  ;;  %v5016_v13 = vpack.c.bf16 %v1595_v50, %v1595_v50  ;;  %v1556_v18 = vmax.f32 %v1536_v22, 0.0  ;;  %v1746_v50 = vrot.slane %v1744_v11, 4  ;;  %v5064_v11 = vld [vmem:[%s6214_s4] ss:$0 sm:$0xff] }
  0xa6   : > { %v1578_v43 = vmul.f32 %v4518_v25, %v1558_v52 }
  0xa7   : > { %v1741_v16 = vrot.slane %v1739_v58, 5  ;;  %v1758_v17 = vshrl.u32 %v5016_v13, 16  ;;  %v1761_v57 = vshll.u32 %v5016_v13, 16  ;;  %v1576_v4 = vmul.f32 %v4518_v25, %v1556_v18 }
  0xa8   : > { %v6228_v58 = vunpack.c.l.b16 %v4947_v42  ;;  %v1599_v22 = vmul.f32 %v4921_v40, %v1578_v43  ;;  %v1579_v18 = vmul.f32 %v4523_v30, %v1559_v5 }
  0xa9   : > { %v1742_v27 = vsel %vm4614_vm9, %v1737_v7, %v1741_v16  ;;  %v1760_v15 = vrot.slane %v1758_v17, 4  ;;  %v1763_v0 = vrot.slane %v1761_v57, 5  ;;  %v1597_v41 = vmul.f32 %v4921_v40, %v1576_v4 }
  0xaa   : > { %v5046_v3 = vunpack.c.l.b16 %v1742_v27  ;;  %v1650_v7 = vpack.c.b16 %v6228_v58, %v1642_v60  ;;  %v1522_v17 = vmul.f32 %v5064_v11, %v1502_v63  ;;  %v5074_v23 = vpack.c.bf16 %v1599_v22, %v1599_v22 }
  0xab   : > { %v1764_v12 = vor.u32 %v1763_v0, %v1760_v15  ;;  %v5072_v52 = vpack.c.bf16 %v1597_v41, %v1597_v41  ;;  %v1600_v4 = vmul.f32 %v4921_v40, %v1579_v18  ;;  %v3854_v58 = vrot.slane %v4956_v48, 9 }
  0xac   : > { %v1840_v14 = vpack.c.b16 %v5046_v3, %v1832_v32  ;;  %v1786_v60 = vshrl.u32 %v5074_v23, 16 }
  0xad   : > { %3804 = vmatmul.msk.bf16.gmra.mxu0 %vm795_vm6, %v1126_v1  ;;  %v5039_v1 = vpack.c.bf16 %v1596_v8, %v1596_v8  ;;  %v1483_v8 = vld [vmem:[%s4448_s29 + $0x3c] sm:$0x1]  ;;  %v1765_v59 = vrot.slane %v1764_v12, 4  ;;  %v1772_v43 = vshrl.u32 %v5072_v52, 16  ;;  %v1775_v32 = vshll.u32 %v5072_v52, 16 }
  0xaf   : > { %3837 = vmatmul.msk.bf16.gmra.mxu2 %vm795_vm6, %v1271_v24  ;;  %3821 = vmatmul.msk.bf16.gmra.mxu1 %vm795_vm6, %v1202_v20  ;;  %v5037_v24 = vpack.c.bf16 %v1594_v26, %v1594_v26  ;;  %v1749_v20 = vrot.slane %v1747_v31, 5  ;;  %v1767_v29 = vshll.u32 %v5039_v1, 16  ;;  %v1481_v26 = vld [vmem:[%s4448_s29 + $0x34] sm:$0x1]  ;;  %v1520_v31 = vmul.f32 %v5064_v11, %v1500_v47 }
  0xb0   : > { %v1501_v27 = vunpack.c.l.bf16 %v1481_v26  ;;  %v5106_v47 = vpack.c.bf16 %v1600_v4, %v1600_v4  ;;  %v1774_v63 = vrot.slane %v1772_v43, 4 }
  0xb1   : > { %v1753_v38 = vshll.u32 %v5037_v24, 16  ;;  %v1750_v45 = vor.u32 %v1749_v20, %v1746_v50  ;;  %v1769_v34 = vrot.slane %v1767_v29, 5  ;;  %v1503_v50 = vunpack.c.l.bf16 %v1483_v8  ;;  %v5080_v20 = vld [vmem:[%s6215_s5] ss:$0 sm:$0xff] }
  0xb2   : > { %v1540_v15 = vadd.f32 %v5080_v20, %v1520_v31  ;;  %v1789_v29 = vshll.u32 %v5074_v23, 16  ;;  %v1521_v21 = vmul.f32 %v5064_v11, %v1501_v27 }
  0xb3   : > { %v1755_v16 = vrot.slane %v1753_v38, 5  ;;  %v1751_v57 = vrot.slane %v1750_v45, 4  ;;  %v1770_v37 = vsel %vm4614_vm9, %v1765_v59, %v1769_v34  ;;  %v497_v38 = vld [vmem:[%s4432_s23 + $0x4c] sm:$0x1]  ;;  %v1523_v49 = vmul.f32 %v5064_v11, %v1503_v50 }
  0xb4   : > { %v1560_v45 = vmax.f32 %v1540_v15, 0.0  ;;  %v5100_v5 = vunpack.c.l.b16 %v1770_v37  ;;  %v517_v22 = vunpack.c.l.bf16 %v497_v38  ;;  %v1791_v26 = vrot.slane %v1789_v29, 5  ;;  %v4209_v37 = vld [vmem:[%s6213_s3 + $0xd0] sm:$0xff] }
  0xb5   : > { %3788 = vmatmul.msk.bf16.gmra.mxu3 %vm795_vm6, %v1041_v51  ;;  %v1577_v51 = vmul.f32 %v4523_v30, %v1557_v19  ;;  %v1756_v0 = vsel %vm4614_vm9, %v1751_v57, %v1755_v16  ;;  %v4205_v16 = vld [vmem:[%s6213_s3 + $0xb0] sm:$0xff]  ;;  %v1541_v8 = vadd.f32 %v5080_v20, %v1521_v21  ;;  %v1543_v31 = vadd.f32 %v5080_v20, %v1523_v49 }
  0xb6   : > { %v5098_v19 = vunpack.c.l.b16 %v1756_v0  ;;  %v6225_v57 = vunpack.c.l.b16 %v5010_v61  ;;  %1993 = vmatpush.bf16.msrb.mxu3 %v4205_v16  ;;  %v1795_v15 = vshll.u32 %v5106_v47, 16  ;;  %v4207_v0 = vld [vmem:[%s6213_s3 + $0xc0] sm:$0xff]  ;;  %2150 = vmatpush.bf16.msrb.mxu1 %v4209_v37 }
  0xb7   : > { %v1598_v33 = vmul.f32 %v4921_v40, %v1577_v51  ;;  %v541_v51 = vmul.f32 %v5064_v11, %v517_v22  ;;  %v1561_v43 = vmax.f32 %v1541_v8, 0.0  ;;  %2065 = vmatpush.bf16.msrb.mxu0 %v4207_v0 }
  0xb8   : > { %v5120_v18 = vpack.c.b16 %v5100_v5, %v5098_v19  ;;  %v1797_v22 = vrot.slane %v1795_v15, 5 }
  0xb9   : > { %v5102_v41 = vpack.c.bf16 %v1598_v33, %v1598_v33  ;;  %v565_v21 = vadd.f32 %v5080_v20, %v541_v51 }
  0xbb   : > { %v1781_v50 = vshll.u32 %v5102_v41, 16 }
  0xbd   : > { %3867 = vmatmul.msk.bf16.vlgmr.msra.gmra.mxu0 %vm795_vm6, %v4601_v39  ;;  %v1542_v39 = vadd.f32 %v5080_v20, %v1522_v17  ;;  %v1580_v17 = vmul.f32 %v4518_v25, %v1560_v45 }
  0xbf   : > { %3900 = vmatmul.msk.bf16.vlgmr.msra.gmra.mxu2 %vm795_vm6, %v1840_v14  ;;  %3884 = vmatmul.msk.bf16.vlgmr.msra.gmra.mxu1 %vm795_vm6, %v1650_v7  ;;  %v1562_v12 = vmax.f32 %v1542_v39, 0.0  ;;  %v1777_v14 = vrot.slane %v1775_v32, 5  ;;  %v1788_v7 = vrot.slane %v1786_v60, 4  ;;  %v4211_v39 = vld [vmem:[%s6213_s3 + $0xe0] sm:$0xff]  ;;  %v1563_v32 = vmax.f32 %v1543_v31, 0.0 }
  0xc0   : > { %v1601_v60 = vmul.f32 %v4921_v40, %v1580_v17  ;;  %2226 = vmatpush.bf16.msrb.mxu2 %v4211_v39 }
  0xc1   : > { %v1582_v59 = vmul.f32 %v4518_v25, %v1562_v12  ;;  %v1778_v27 = vor.u32 %v1777_v14, %v1774_v63  ;;  %v1792_v4 = vor.u32 %v1791_v26, %v1788_v7  ;;  %v1783_v12 = vrot.slane %v1781_v50, 5 }
  0xc2   : > { %v1581_v14 = vmul.f32 %v4523_v30, %v1561_v43  ;;  %v1583_v7 = vmul.f32 %v4523_v30, %v1563_v32  ;;  %v5148_v16 = vpack.c.bf16 %v1601_v60, %v1601_v60 }
  0xc3   : > { %v1603_v29 = vmul.f32 %v4921_v40, %v1582_v59  ;;  %v1779_v45 = vrot.slane %v1778_v27, 4  ;;  %v1793_v63 = vrot.slane %v1792_v4, 4 }
  0xc4   : > { %v1602_v51 = vmul.f32 %v4921_v40, %v1581_v14  ;;  %v1604_v27 = vmul.f32 %v4921_v40, %v1583_v7  ;;  %v1800_v50 = vshrl.u32 %v5148_v16, 16  ;;  %v1803_v15 = vshll.u32 %v5148_v16, 16  ;;  %2676 = vmatpush.bf16.msra.mxu2 %v4220_v6 }
  0xc5   : > { %3850 = vmatmul.msk.bf16.vlgmr.msra.gmra.mxu3 %vm795_vm6, %v4672_v10  ;;  %v6224_v10 = vunpack.c.l.b16 %v5016_v13  ;;  %v1008_v49 = vpop.f32.mrf.mxu2  ;;  %v5152_v26 = vpack.c.bf16 %v1603_v29, %v1603_v29  ;;  %v1784_v8 = vsel %vm4614_vm9, %v1779_v45, %v1783_v12  ;;  %v1798_v59 = vsel %vm4614_vm9, %v1793_v63, %v1797_v22 }
  0xc6   : > { %v5166_v32 = vunpack.c.l.b16 %v1784_v8  ;;  %v5168_v60 = vunpack.c.l.b16 %v1798_v59  ;;  %v6227_v29 = vunpack.c.l.b16 %v5072_v52  ;;  %v5172_v45 = vpack.c.bf16 %v1602_v51, %v1602_v51 }
  0xc7   : > { %v5138_v38 = vpack.c.b16 %v6224_v10, %v6225_v57  ;;  %v1814_v39 = vshrl.u32 %v5152_v26, 16  ;;  %v1817_v0 = vshll.u32 %v5152_v26, 16  ;;  %v5174_v12 = vpack.c.bf16 %v1604_v27, %v1604_v27 }
  0xc8   : > { %v895_v34 = vpop.f32.mrf.mxu1  ;;  %v1802_v22 = vrot.slane %v1800_v50, 4  ;;  %v1805_v14 = vrot.slane %v1803_v15, 5  ;;  %v5182_v59 = vpack.c.b16 %v5168_v60, %v5166_v32  ;;  %v1809_v27 = vshll.u32 %v5172_v45, 16 }
  0xc9   : > { %v1816_v7 = vrot.slane %v1814_v39, 4  ;;  %v1823_v39 = vshll.u32 %v5174_v12, 16 }
  0xca   : > { %v817_v33 = vpop.f32.mrf.mxu0  ;;  %v1806_v15 = vor.u32 %v1805_v14, %v1802_v22 }
  0xcc   : > { %v1807_v22 = vrot.slane %v1806_v15, 4 }
  0xcd   : > { %3868 = vmatmul.msk.bf16.gmra.mxu0 %vm795_vm6, %v4727_v44  ;;  %v585_v44 = vmax.f32 %v565_v21, 0.0  ;;  %v6226_v21 = vunpack.c.l.b16 %v5074_v23  ;;  %v1010_v63 = vpop.f32.mrf.mxu2 }
  0xcf   : > { %3901 = vmatmul.msk.bf16.gmra.mxu2 %vm795_vm6, %v5120_v18  ;;  %3885 = vmatmul.msk.bf16.gmra.mxu1 %vm795_vm6, %v5138_v38  ;;  %v605_v4 = vmul.f32 0.0, %v585_v44  ;;  %v1819_v44 = vrot.slane %v1817_v0, 5  ;;  %v5188_v51 = vpack.c.b16 %v6226_v21, %v6227_v29  ;;  %v1811_v21 = vrot.slane %v1809_v27, 5 }
  0xd0   : > { %v897_v17 = vpop.f32.mrf.mxu1 }
  0xd2   : > { %v819_v31 = vpop.f32.mrf.mxu0 }
  0xd4   : > { %v822_v37 = vpop.f32.mrf.mxu3 }
  0xd5   : > { %3851 = vmatmul.msk.bf16.gmra.mxu3 %vm795_vm6, %v4775_v46  ;;  %v896_v43 = vadd.f32 %v895_v34, %v822_v37  ;;  %v626_v46 = vmul.f32 %v4530_v36, %v605_v4  ;;  %v1325_v34 = vshrl.u32 %v4956_v48, 16  ;;  %v1820_v36 = vor.u32 %v1819_v44, %v1816_v7 }
  0xd6   : > { %v1825_v7 = vrot.slane %v1823_v39, 5 }
  0xd7   : > { %v5176_v10 = vadd.f32 %v1008_v49, %v896_v43  ;;  %v1328_v49 = vshll.u32 %v4956_v48, 16  ;;  %v646_v4 = vpack.c.bf16 %v626_v46, %v626_v46  ;;  %v1327_v57 = vrot.slane %v1325_v34, 4 }
  0xd8   : > { %v1821_v14 = vrot.slane %v1820_v36, 4  ;;  %v1812_v48 = vsel %vm4614_vm9, %v1807_v22, %v1811_v21  ;;  %v1648_v21 = vunpack.c.l.b16 %v5148_v16  ;;  %v1649_v36 = vunpack.c.l.b16 %v5152_v26 }
  0xd9   : > { %v1330_v29 = vrot.slane %v1328_v49, 5  ;;  %v1334_v34 = vshll.u32 %v646_v4, 16 }
  0xda   : > { %v890_v8 = vpop.f32.mrf.mxu0  ;;  %v1826_v49 = vsel %vm4614_vm9, %v1821_v14, %v1825_v7 }
  0xdb   : > { %v891_v50 = vadd.f32 %v890_v8, %v817_v33  ;;  %v1400_v33 = vrot.slane %v646_v4, 5  ;;  %v5215_v15 = vunpack.c.l.b16 %v1826_v49  ;;  %v3906_v49 = vrot.slane %v5010_v61, 9 }
  0xdc   : > { %v824_v0 = vpop.f32.mrf.mxu3  ;;  %v900_v37 = vpop.f32.mrf.mxu1 }
  0xdd   : > { %v898_v43 = vadd.f32 %v897_v17, %v824_v0  ;;  %3869 = vmatmul.msk.bf16.gmra.mxu0 %vm795_vm6, %v4810_v55  ;;  %v1331_v55 = vor.u32 %v1330_v29, %v1327_v57  ;;  %v1401_v8 = vsel %vm4563_vm5, %v3854_v58, %v1400_v33  ;;  %v4214_v57 = vld [vmem:[%s6213_s3 + $0xf8] sm:$0xff]  ;;  %v5213_v29 = vunpack.c.l.b16 %v1812_v48 }
  0xde   : > { %2285 = vmatpush.bf16.msra.mxu3 %v4214_v57  ;;  %v1919_v48 = vrot.slane %v4982_v35, 5 }
  0xdf   : > { %3902 = vmatmul.msk.bf16.gmra.mxu2 %vm795_vm6, %v5182_v59  ;;  %3886 = vmatmul.msk.bf16.gmra.mxu1 %vm795_vm6, %v5188_v51  ;;  %v5200_v44 = vadd.f32 %v1010_v63, %v898_v43  ;;  %v1407_v63 = vunpack.c.l.b16 %v1401_v8  ;;  %v1332_v58 = vrot.slane %v1331_v55, 4  ;;  %v5223_v22 = vpack.c.b16 %v5215_v15, %v5213_v29 }
  0xe0   : > { %v1923_v8 = vrot.slane %v5037_v24, 5 }
  0xe2   : > { %v1013_v17 = vpop.f32.mrf.mxu2  ;;  %v892_v46 = vpop.f32.mrf.mxu0 }
  0xe3   : > { %v893_v27 = vadd.f32 %v892_v46, %v819_v31  ;;  %v1336_v31 = vrot.slane %v1334_v34, 5  ;;  %v5233_v46 = vpack.c.b16 %v1649_v36, %v1648_v21 }
  0xe4   : > { %v902_v0 = vpop.f32.mrf.mxu1 }
  0xe5   : > { %3852 = vmatmul.msk.bf16.gmra.mxu3 %vm795_vm6, %v4836_v53  ;;  %v1408_v53 = vpack.c.b16 %v1407_v63, %v1198_v54  ;;  %v1337_v14 = vsel %vm4614_vm9, %v1332_v58, %v1336_v31  ;;  %v4216_v54 = vld [vmem:[%s6213_s3 + $0x108] sm:$0xff] }
  0xe6   : > { %v1343_v34 = vunpack.c.l.b16 %v1337_v14  ;;  %2358 = vmatpush.bf16.msra.mxu0 %v4216_v54  ;;  %v3904_v14 = vrot.slane %v4941_v62, 9  ;;  %v6254_v54 = vunpack.c.l.b16 %v4947_v42  ;;  %v2115_v62 = vpack.c.b16 %v5098_v19, %v5046_v3  ;;  %v1485_v19 = vld [vmem:[%s4448_s29 + $0x44] sm:$0x1] }
  0xe7   : > { %v1931_v3 = vrot.slane %v5102_v41, 5 }
  0xe8   : > { %v827_v39 = vpop.f32.mrf.mxu3  ;;  %v1344_v58 = vpack.c.b16 %v1343_v34, %v4975_v28 }
  0xe9   : > { %v901_v4 = vadd.f32 %v900_v37, %v827_v39 }
  0xea   : > { %v1015_v43 = vpop.f32.mrf.mxu2  ;;  %v1003_v33 = vpop.f32.mrf.mxu0 }
  0xeb   : > { %v5227_v7 = vadd.f32 %v1003_v33, %v891_v50  ;;  %v5241_v37 = vadd.f32 %v1013_v17, %v901_v4  ;;  %v4218_v50 = vld [vmem:[%s6213_s3 + $0x118] sm:$0xff]  ;;  %v3905_v17 = vrot.slane %v4947_v42, 9 }
  0xec   : > { %v905_v55 = vpop.f32.mrf.mxu1  ;;  %2422 = vmatpush.bf16.msra.mxu1 %v4218_v50  ;;  %v6255_v50 = vunpack.c.l.b16 %v5010_v61 }
  0xed   : > { %3870 = vmatmul.msk.bf16.gmra.mxu0 %vm795_vm6, %v1408_v53  ;;  %v1920_v24 = vsel %vm4563_vm5, %v3905_v17, %v1919_v48  ;;  %v5262_v53 = vsel %vm4563_vm5, %v3906_v49, %v1923_v8 }
  0xee   : > { %v1952_v28 = vunpack.c.l.b16 %v5262_v53  ;;  %v2030_v34 = vpack.c.b16 %v6255_v50, %v6254_v54 }
  0xef   : > { %3903 = vmatmul.msk.bf16.gmra.mxu2 %vm795_vm6, %v5223_v22  ;;  %3887 = vmatmul.msk.bf16.gmra.mxu1 %vm795_vm6, %v5233_v46 }
  0xf0   : > { %v829_v63 = vpop.f32.mrf.mxu3 }
  0xf1   : > { %v903_v57 = vadd.f32 %v902_v0, %v829_v63  ;;  %v1951_v0 = vunpack.c.l.b16 %v1920_v24 }
  0xf2   : > { %v1018_v31 = vpop.f32.mrf.mxu2  ;;  %v1005_v39 = vpop.f32.mrf.mxu0 }
  0xf3   : > { %v5256_v4 = vadd.f32 %v1005_v39, %v893_v27  ;;  %v5264_v35 = vadd.f32 %v1015_v43, %v903_v57  ;;  %v1915_v27 = vrot.slane %v4980_v2, 5  ;;  %v2191_v48 = vpack.c.b16 %v1952_v28, %v1951_v0  ;;  %v1484_v2 = vld [vmem:[%s4448_s29 + $0x40] sm:$0xf] }
  0xf4   : > { %v907_v33 = vpop.f32.mrf.mxu1  ;;  %v1504_v61 = vunpack.c.l.bf16 %v1484_v2  ;;  %v3908_v39 = vrot.slane %v5072_v52, 9 }
  0xf5   : > { %3853 = vmatmul.msk.bf16.gmra.mxu3 %vm795_vm6, %v1344_v58  ;;  %v1916_v49 = vsel %vm4563_vm5, %v3904_v14, %v1915_v27  ;;  %v1927_v58 = vrot.slane %v5039_v1, 5 }
  0xf6   : > { %v1950_v57 = vunpack.c.l.b16 %v1916_v49  ;;  %v5297_v1 = vsel %vm4563_vm5, %v3908_v39, %v1931_v3  ;;  %v6257_v39 = vunpack.c.l.b16 %v5072_v52 }
  0xf8   : > { %v832_v6 = vpop.f32.mrf.mxu3  ;;  %v1958_v27 = vpack.c.b16 %v1951_v0, %v1950_v57 }
  0xf9   : > { %v906_v8 = vadd.f32 %v905_v55, %v832_v6  ;;  %v3907_v55 = vrot.slane %v5016_v13, 9 }
  0xfa   : > { %v1020_v17 = vpop.f32.mrf.mxu2  ;;  %v1160_v43 = vpop.f32.mrf.mxu0 }
  0xfb   : > { %v5281_v63 = vadd.f32 %v1018_v31, %v906_v8  ;;  %v1524_v31 = vmul.f32 %v5064_v11, %v1504_v61  ;;  %v1928_v8 = vsel %vm4563_vm5, %v3907_v55, %v1927_v58  ;;  %v6256_v58 = vunpack.c.l.b16 %v5016_v13  ;;  %v4215_v13 = vld [vmem:[%s6213_s3 + $0x100] sm:$0xff] }
  0xfc   : > { %v1236_v42 = vpop.f32.mrf.mxu1  ;;  %v1953_v0 = vunpack.c.l.b16 %v1928_v8  ;;  %2359 = vmatpush.bf16.msra.mxu0 %v4215_v13  ;;  %v1935_v8 = vrot.slane %v5106_v47, 5 }
  0xfd   : > { %3940 = vmatmul.msk.bf16.vlgmr.msrb.gmra.mxu0 %vm795_vm6, %v2030_v34  ;;  %v1544_v54 = vadd.f32 %v5080_v20, %v1524_v31  ;;  %v1505_v34 = vunpack.c.l.bf16 %v1485_v19  ;;  %v2031_v3 = vpack.c.b16 %v6257_v39, %v6256_v58 }
  0xff   : > { %3973 = vmatmul.msk.bf16.vlgmr.msrb.gmra.mxu2 %vm795_vm6, %v2191_v48  ;;  %3956 = vmatmul.msk.bf16.vlgmr.msrb.gmra.mxu1 %vm795_vm6, %v2115_v62  ;;  %v1564_v49 = vmax.f32 %v1544_v54, 0.0  ;;  %v1954_v62 = vunpack.c.l.b16 %v5297_v1  ;;  %v1525_v2 = vmul.f32 %v5064_v11, %v1505_v34  ;;  %v4217_v54 = vld [vmem:[%s6213_s3 + $0x110] sm:$0xff] }
 0x100   : > { %v834_v24 = vpop.f32.mrf.mxu3  ;;  %2423 = vmatpush.bf16.msra.mxu1 %v4217_v54 }
 0x101   : > { %v908_v14 = vadd.f32 %v907_v33, %v834_v24  ;;  %v4213_v33 = vld [vmem:[%s6213_s3 + $0xf0] sm:$0xff]  ;;  %v1584_v61 = vmul.f32 %v4518_v25, %v1564_v49  ;;  %v2192_v31 = vpack.c.b16 %v1954_v62, %v1953_v0  ;;  %v1545_v24 = vadd.f32 %v5080_v20, %v1525_v2 }
 0x102   : > { %v1296_v6 = vpop.f32.mrf.mxu2  ;;  %v1162_v50 = vpop.f32.mrf.mxu0  ;;  %2286 = vmatpush.bf16.msra.mxu3 %v4213_v33  ;;  %v3910_v49 = vrot.slane %v5148_v16, 9  ;;  %v1939_v33 = vrot.slane %v5172_v45, 5 }
 0x103   : > { %v5299_v48 = vadd.f32 %v1020_v17, %v908_v14  ;;  %v1605_v34 = vmul.f32 %v4921_v40, %v1584_v61 }
 0x104   : > { %v1238_v41 = vpop.f32.mrf.mxu1 }
 0x105   : > { %3924 = vmatmul.msk.bf16.vlgmr.msrb.gmra.mxu3 %vm795_vm6, %v1958_v27  ;;  %v2116_v27 = vpack.c.b16 %v5166_v32, %v5100_v5  ;;  %v3909_v5 = vrot.slane %v5074_v23, 9  ;;  %v1565_v32 = vmax.f32 %v1545_v24, 0.0  ;;  %v5337_v61 = vpack.c.bf16 %v1605_v34, %v1605_v34 }
 0x107   : > { %v1585_v39 = vmul.f32 %v4523_v30, %v1565_v32  ;;  %v1936_v45 = vsel %vm4563_vm5, %v3909_v5, %v1935_v8  ;;  %v2099_v53 = vshll.u32 %v5337_v61, 16  ;;  %v6258_v32 = vunpack.c.l.b16 %v5074_v23 }
 0x108   : > { %v1075_v57 = vpop.f32.mrf.mxu3 }
 0x109   : > { %v1095_v17 = vadd.f32 %v1075_v57, %v5227_v7  ;;  %v4219_v7 = vld [vmem:[%s6213_s3 + $0x120] sm:$0xff]  ;;  %v2101_v34 = vrot.slane %v2099_v53, 5 }
 0x10a   : > { %v1298_v55 = vpop.f32.mrf.mxu2  ;;  %v1165_v19 = vpop.f32.mrf.mxu0  ;;  %2677 = vmatpush.bf16.msra.mxu2 %v4219_v7 }
 0x10b   : > { %v1180_v14 = vadd.f32 %v1160_v43, %v1095_v17  ;;  %v5342_v17 = vpack.c.b16 %v1953_v0, %v1952_v28  ;;  %v1955_v0 = vunpack.c.l.b16 %v1936_v45 }
 0x10c   : > { %v1241_v52 = vpop.f32.mrf.mxu1 }
 0x10d   : > { %3941 = vmatmul.msk.bf16.gmra.mxu0 %vm795_vm6, %v2031_v3  ;;  %v1256_v43 = vadd.f32 %v1236_v42, %v1180_v14  ;;  %v2460_v14 = vld [vmem:[%s4457_s30] sm:$0xf] }
 0x10f   : > { %3974 = vmatmul.msk.bf16.gmra.mxu2 %vm795_vm6, %v2192_v31  ;;  %3957 = vmatmul.msk.bf16.gmra.mxu1 %vm795_vm6, %v2116_v27  ;;  %v5335_v2 = vadd.f32 %v1296_v6, %v1256_v43  ;;  %v5349_v6 = vsel %vm4563_vm5, %v3910_v49, %v1939_v33  ;;  %v2462_v27 = vld [vmem:[%s4457_s30 + $0x8] sm:$0xf] }
 0x110   : > { %v1077_v57 = vpop.f32.mrf.mxu3  ;;  %v1956_v24 = vunpack.c.l.b16 %v5349_v6 }
 0x111   : > { %v1096_v42 = vadd.f32 %v1077_v57, %v5256_v4  ;;  %v2096_v4 = vshrl.u32 %v5337_v61, 16  ;;  %v2480_v57 = vunpack.c.l.bf16 %v2460_v14 }
 0x112   : > { %v1301_v58 = vpop.f32.mrf.mxu2  ;;  %v1167_v47 = vpop.f32.mrf.mxu0  ;;  %v2193_v49 = vpack.c.b16 %v1956_v24, %v1955_v0 }
 0x113   : > { %v1181_v3 = vadd.f32 %v1162_v50, %v1096_v42  ;;  %v1606_v50 = vmul.f32 %v4921_v40, %v1585_v39  ;;  %v2098_v54 = vrot.slane %v2096_v4, 4  ;;  %v2482_v42 = vunpack.c.l.bf16 %v2462_v27 }
 0x114   : > { %v1243_v31 = vpop.f32.mrf.mxu1  ;;  %v2117_v39 = vpack.c.b16 %v5213_v29, %v5168_v60  ;;  %v2500_v45 = vmul.f32 %v5064_v11, %v2480_v57  ;;  %v1943_v60 = vrot.slane %v5174_v12, 5  ;;  %v3960_v29 = vrot.slane %v5337_v61, 9 }
 0x115   : > { %3925 = vmatmul.msk.bf16.gmra.mxu3 %vm795_vm6, %v5342_v17  ;;  %v1257_v28 = vadd.f32 %v1238_v41, %v1181_v3  ;;  %v2032_v41 = vpack.c.b16 %v1648_v21, %v6258_v32  ;;  %v1626_v33 = vpack.c.bf16 %v1606_v50, %v1606_v50  ;;  %v2102_v23 = vor.u32 %v2101_v34, %v2098_v54 }
 0x116   : > { %v3911_v21 = vrot.slane %v5152_v26, 9  ;;  %v5394_v12 = vpack.c.b16 %v1955_v0, %v1954_v62  ;;  %v2520_v54 = vadd.f32 %v5080_v20, %v2500_v45  ;;  %v2029_v62 = vunpack.c.l.b16 %v5337_v61  ;;  %v4228_v26 = vld [vmem:[%s6213_s3 + $0x168] sm:$0xff] }
 0x117   : > { %v5359_v7 = vadd.f32 %v1298_v55, %v1257_v28  ;;  %v2105_v3 = vshll.u32 %v1626_v33, 16  ;;  %v2183_v4 = vrot.slane %v1626_v33, 5  ;;  %v2103_v28 = vrot.slane %v2102_v23, 4  ;;  %3141 = vmatpush.bf16.msrb.mxu2 %v4228_v26  ;;  %v1486_v26 = vld [vmem:[%s4448_s29 + $0x48] sm:$0xf] }
 0x118   : > { %v1080_v13 = vpop.f32.mrf.mxu3  ;;  %v2540_v33 = vmax.f32 %v2520_v54, 0.0 }
 0x119   : > { %v1097_v43 = vadd.f32 %v1080_v13, %v5176_v10  ;;  %v2107_v50 = vrot.slane %v2105_v3, 5  ;;  %v5402_v32 = vsel %vm4563_vm5, %v3960_v29, %v2183_v4 }
 0x11a   : > { %v1303_v5 = vpop.f32.mrf.mxu2  ;;  %v1170_v8 = vpop.f32.mrf.mxu0  ;;  %v2560_v4 = vmul.f32 0.0, %v2540_v33 }
 0x11b   : > { %v1182_v55 = vadd.f32 %v1165_v19, %v1097_v43  ;;  %v2502_v19 = vmul.f32 %v5064_v11, %v2482_v42  ;;  %v2108_v1 = vsel %vm4614_vm9, %v2103_v28, %v2107_v50  ;;  %v2464_v42 = vld [vmem:[%s4457_s30 + $0x10] sm:$0xf] }
 0x11c   : > { %v5371_v10 = vpop.f32.mrf.mxu1  ;;  %v2484_v45 = vunpack.c.l.bf16 %v2464_v42 }
 0x11d   : > { %3942 = vmatmul.msk.bf16.gmra.mxu0 %vm795_vm6, %v2032_v41  ;;  %v1258_v16 = vadd.f32 %v1241_v52, %v1182_v55  ;;  %v2522_v34 = vadd.f32 %v5080_v20, %v2502_v19  ;;  %v2466_v55 = vld [vmem:[%s4457_s30 + $0x18] sm:$0xf] }
 0x11e   : > { %v2486_v19 = vunpack.c.l.bf16 %v2466_v55 }
 0x11f   : > { %3975 = vmatmul.msk.bf16.gmra.mxu2 %vm795_vm6, %v2193_v49  ;;  %3958 = vmatmul.msk.bf16.gmra.mxu1 %vm795_vm6, %v2117_v39  ;;  %v5389_v52 = vadd.f32 %v1301_v58, %v1258_v16  ;;  %v1944_v58 = vsel %vm4563_vm5, %v3911_v21, %v1943_v60  ;;  %v2190_v49 = vunpack.c.l.b16 %v5402_v32  ;;  %v2542_v57 = vmax.f32 %v2522_v34, 0.0  ;;  %v4236_v32 = vld [vmem:[%s6213_s3 + $0x1a8] sm:$0xff] }
 0x120   : > { %v1082_v53 = vpop.f32.mrf.mxu3  ;;  %v1957_v41 = vunpack.c.l.b16 %v1944_v58  ;;  %v5417_v39 = vunpack.c.l.b16 %v2108_v1 }
 0x121   : > { %v1098_v14 = vadd.f32 %v1082_v53, %v5200_v44  ;;  %v2562_v53 = vmul.f32 %v4518_v25, %v2542_v57 }
 0x122   : > { %v1306_v27 = vpop.f32.mrf.mxu2  ;;  %v1172_v13 = vpop.f32.mrf.mxu0  ;;  %v2194_v29 = vpack.c.b16 %v2190_v49, %v1957_v41  ;;  %v2118_v28 = vpack.c.b16 %v5417_v39, %v5215_v15  ;;  %v2504_v15 = vmul.f32 %v5064_v11, %v2484_v45  ;;  %v2468_v45 = vld [vmem:[%s4457_s30 + $0x20] sm:$0xf] }
 0x123   : > { %v1183_v43 = vadd.f32 %v1167_v47, %v1098_v14  ;;  %v4222_v47 = vld [vmem:[%s6213_s3 + $0x138] sm:$0xff] }
 0x124   : > { %v1248_v44 = vpop.f32.mrf.mxu1  ;;  %2866 = vmatpush.bf16.msrb.mxu3 %v4222_v47  ;;  %v4226_v14 = vld [vmem:[%s6213_s3 + $0x158] sm:$0xff]  ;;  %v2524_v33 = vadd.f32 %v5080_v20, %v2504_v15 }
 0x125   : > { %3926 = vmatmul.msk.bf16.gmra.mxu3 %vm795_vm6, %v5394_v12  ;;  %v1259_v0 = vadd.f32 %v1243_v31, %v1183_v43  ;;  %v2033_v31 = vpack.c.b16 %v2029_v62, %v1649_v36  ;;  %v4224_v36 = vld [vmem:[%s6213_s3 + $0x148] sm:$0xff]  ;;  %3056 = vmatpush.bf16.msrb.mxu1 %v4226_v14  ;;  %v2488_v14 = vunpack.c.l.bf16 %v2468_v45 }
 0x126   : > { %2984 = vmatpush.bf16.msrb.mxu0 %v4224_v36 }
 0x127   : > { %v5419_v23 = vadd.f32 %v1303_v5, %v1259_v0  ;;  %v5455_v0 = vpack.c.b16 %v1957_v41, %v1956_v24 }
 0x128   : > { %v1085_v3 = vpop.f32.mrf.mxu3 }
 0x129   : > { %v1099_v16 = vadd.f32 %v1085_v3, %v5241_v37  ;;  %v5431_v37 = vstv %s2459_s7 }
 0x12a   : > { %v1308_v21 = vpop.f32.mrf.mxu2  ;;  %v1175_v60 = vpop.f32.mrf.mxu0  ;;  %v2581_v34 = vmul.f32 %v5431_v37, %v2560_v4  ;;  %v2583_v43 = vmul.f32 %v5431_v37, %v2562_v53 }
 0x12b   : > { %v1184_v5 = vadd.f32 %v1170_v8, %v1099_v16  ;;  %v2506_v8 = vmul.f32 %v5064_v11, %v2486_v19  ;;  %v2470_v19 = vld [vmem:[%s4457_s30 + $0x28] sm:$0xf] }
 0x12c   : > { %v1251_v50 = vpop.f32.mrf.mxu1  ;;  %v5459_v55 = vpack.c.bf16 %v2581_v34, %v2581_v34  ;;  %v2490_v15 = vunpack.c.l.bf16 %v2470_v19 }
 0x12d   : > { %3943 = vmatmul.msk.bf16.gmra.mxu0 %vm795_vm6, %v2033_v31  ;;  %v1260_v54 = vadd.f32 %v5371_v10, %v1184_v5  ;;  %v2526_v57 = vadd.f32 %v5080_v20, %v2506_v8  ;;  %v1506_v8 = vunpack.c.l.bf16 %v1486_v26 }
 0x12e   : > { %v2634_v41 = vunpack.c.l.b16 %v5459_v55 }
 0x12f   : > { %3976 = vmatmul.msk.bf16.gmra.mxu2 %vm795_vm6, %v2194_v29  ;;  %3959 = vmatmul.msk.bf16.gmra.mxu1 %vm795_vm6, %v2118_v28  ;;  %v5450_v58 = vadd.f32 %v1306_v27, %v1260_v54  ;;  %v5461_v27 = vpack.c.bf16 %v2583_v43, %v2583_v43  ;;  %v2546_v6 = vmax.f32 %v2526_v57, 0.0 }
 0x130   : > { %v1087_v1 = vpop.f32.mrf.mxu3 }
 0x131   : > { %v1100_v47 = vadd.f32 %v1087_v1, %v5264_v35  ;;  %v2544_v35 = vmax.f32 %v2524_v33, 0.0  ;;  %v2635_v31 = vunpack.c.l.b16 %v5461_v27  ;;  %v2566_v28 = vmul.f32 %v4518_v25, %v2546_v6  ;;  %v1487_v1 = vld [vmem:[%s4448_s29 + $0x4c] sm:$0x1]  ;;  %v2472_v6 = vld [vmem:[%s4457_s30 + $0x30] sm:$0xf] }
 0x132   : > { %v1311_v10 = vpop.f32.mrf.mxu2  ;;  %v1177_v42 = vpop.f32.mrf.mxu0  ;;  %v2508_v33 = vmul.f32 %v5064_v11, %v2488_v14 }
 0x133   : > { %v1185_v3 = vadd.f32 %v1172_v13, %v1100_v47  ;;  %v2564_v5 = vmul.f32 %v4518_v25, %v2544_v35  ;;  %v2587_v43 = vmul.f32 %v5431_v37, %v2566_v28  ;;  %v2492_v28 = vunpack.c.l.bf16 %v2472_v6 }
 0x134   : > { %v1253_v16 = vpop.f32.mrf.mxu1 }
 0x135   : > { %3927 = vmatmul.msk.bf16.gmra.mxu3 %vm795_vm6, %v5455_v0  ;;  %v1261_v24 = vadd.f32 %v1248_v44, %v1185_v3  ;;  %v2642_v44 = vpack.c.b16 %v2635_v31, %v2634_v41  ;;  %v2585_v34 = vmul.f32 %v5431_v37, %v2564_v5  ;;  %v1507_v3 = vunpack.c.l.bf16 %v1487_v1 }
 0x136   : > { %v2512_v1 = vmul.f32 %v5064_v11, %v2492_v28 }
 0x137   : > { %v5469_v29 = vadd.f32 %v1308_v21, %v1261_v24 }
 0x138   : > { %v1090_v4 = vpop.f32.mrf.mxu3 }
 0x139   : > { %v1101_v53 = vadd.f32 %v1090_v4, %v5281_v63  ;;  %v1526_v63 = vmul.f32 %v5064_v11, %v1506_v8  ;;  %v5500_v4 = vpack.c.bf16 %v2585_v34, %v2585_v34 }
 0x13a   : > { %v1313_v13 = vpop.f32.mrf.mxu2  ;;  %v1433_v36 = vpop.f32.mrf.mxu0 }
 0x13b   : > { %v1186_v54 = vadd.f32 %v1175_v60, %v1101_v53  ;;  %v2510_v60 = vmul.f32 %v5064_v11, %v2490_v15  ;;  %v1546_v57 = vadd.f32 %v5080_v20, %v1526_v63  ;;  %v5502_v53 = vpack.c.bf16 %v2587_v43, %v2587_v43  ;;  %v4221_v15 = vld [vmem:[%s6213_s3 + $0x130] sm:$0xff] }
 0x13c   : > { %v5477_v21 = vpop.f32.mrf.mxu1  ;;  %2867 = vmatpush.bf16.msrb.mxu3 %v4221_v15 }
 0x13d   : > { %4005 = vmatmul.msk.bf16.vlgmr.msra.gmra.mxu0 %vm795_vm6, %v5120_v18  ;;  %v1262_v47 = vadd.f32 %v1251_v50, %v1186_v54  ;;  %v1566_v24 = vmax.f32 %v1546_v57, 0.0  ;;  %v1527_v50 = vmul.f32 %v5064_v11, %v1507_v3  ;;  %v6234_v54 = vunpack.c.l.b16 %v5500_v4 }
 0x13e   : > { %v6231_v63 = vunpack.c.l.b16 %v5502_v53 }
 0x13f   : > { %4039 = vmatmul.msk.bf16.vlgmr.msra.gmra.mxu2 %vm795_vm6, %v2642_v44  ;;  %4022 = vmatmul.msk.bf16.vlgmr.msra.gmra.mxu1 %vm795_vm6, %v5342_v17  ;;  %v5491_v18 = vadd.f32 %v1311_v10, %v1262_v47  ;;  %v2528_v17 = vadd.f32 %v5080_v20, %v2508_v33  ;;  %v2530_v10 = vadd.f32 %v5080_v20, %v2510_v60  ;;  %v2474_v44 = vld [vmem:[%s4457_s30 + $0x38] sm:$0xf]  ;;  %v1586_v14 = vmul.f32 0.0, %v1566_v24 }
 0x140   : > { %v1092_v35 = vpop.f32.mrf.mxu3  ;;  %v2494_v43 = vunpack.c.l.bf16 %v2474_v44  ;;  %v2463_v44 = vld [vmem:[%s4457_s30 + $0xc] sm:$0x1] }
 0x141   : > { %v1102_v41 = vadd.f32 %v1092_v35, %v5299_v48  ;;  %v1547_v48 = vadd.f32 %v5080_v20, %v1527_v50  ;;  %v2550_v34 = vmax.f32 %v2530_v10, 0.0  ;;  %v5528_v35 = vpack.c.b16 %v6231_v63, %v6234_v54  ;;  %v4227_v50 = vld [vmem:[%s6213_s3 + $0x160] sm:$0xff] }
 0x142   : > { %v5496_v45 = vpop.f32.mrf.mxu2  ;;  %v5498_v19 = vpop.f32.mrf.mxu0  ;;  %3142 = vmatpush.bf16.msrb.mxu2 %v4227_v50 }
 0x143   : > { %v1187_v5 = vadd.f32 %v1177_v42, %v1102_v41  ;;  %v2548_v42 = vmax.f32 %v2528_v17, 0.0  ;;  %v1567_v60 = vmax.f32 %v1547_v48, 0.0  ;;  %v2570_v6 = vmul.f32 %v4518_v25, %v2550_v34  ;;  %v2461_v34 = vld [vmem:[%s4457_s30 + $0x4] sm:$0x1] }
 0x144   : > { %v5506_v26 = vpop.f32.mrf.mxu1  ;;  %v2514_v41 = vmul.f32 %v5064_v11, %v2494_v43  ;;  %v2532_v17 = vadd.f32 %v5080_v20, %v2512_v1  ;;  %v2483_v48 = vunpack.c.l.bf16 %v2463_v44 }
 0x145   : > { %3989 = vmatmul.msk.bf16.vlgmr.msra.gmra.mxu3 %vm795_vm6, %v5138_v38  ;;  %v1263_v8 = vadd.f32 %v1253_v16, %v1187_v5  ;;  %v1607_v38 = vmul.f32 %v4921_v40, %v1586_v14  ;;  %v4225_v5 = vld [vmem:[%s6213_s3 + $0x150] sm:$0xff]  ;;  %v1587_v28 = vmul.f32 0.0, %v1567_v60 }
 0x146   : > { %v2465_v14 = vld [vmem:[%s4457_s30 + $0x14] sm:$0x1]  ;;  %v2534_v1 = vadd.f32 %v5080_v20, %v2514_v41  ;;  %3057 = vmatpush.bf16.msrb.mxu1 %v4225_v5  ;;  %v2503_v50 = vmul.f32 %v5064_v11, %v2483_v48  ;;  %3414 = vmatpush.bf16.msra.mxu2 %v4236_v32 }
 0x147   : > { %v5518_v47 = vadd.f32 %v1313_v13, %v1263_v8  ;;  %v2568_v13 = vmul.f32 %v4518_v25, %v2548_v42  ;;  %v2591_v8 = vmul.f32 %v5431_v37, %v2570_v6  ;;  %v2485_v42 = vunpack.c.l.bf16 %v2465_v14  ;;  %v2473_v32 = vld [vmem:[%s4457_s30 + $0x34] sm:$0x1] }
 0x148   : > { %v1369_v33 = vpop.f32.mrf.mxu3 }
 0x149   : > { %v1389_v57 = vadd.f32 %v1369_v33, %v5335_v2  ;;  %v4223_v2 = vld [vmem:[%s6213_s3 + $0x140] sm:$0xff]  ;;  %v2589_v15 = vmul.f32 %v5431_v37, %v2568_v13  ;;  %v2505_v41 = vmul.f32 %v5064_v11, %v2485_v42 }
 0x14a   : > { %v1879_v16 = vpop.f32.mrf.mxu2  ;;  %v5522_v3 = vpop.f32.mrf.mxu0  ;;  %2985 = vmatpush.bf16.msrb.mxu0 %v4223_v2  ;;  %v5569_v2 = vpack.c.bf16 %v2591_v8, %v2591_v8 }
 0x14b   : > { %v1453_v24 = vadd.f32 %v1433_v36, %v1389_v57  ;;  %v5545_v36 = vpack.c.bf16 %v1607_v38, %v1607_v38  ;;  %v1608_v38 = vmul.f32 %v4921_v40, %v1587_v28 }
 0x14c   : > { %v5540_v10 = vpop.f32.mrf.mxu1 }
 0x14d   : > { %4006 = vmatmul.msk.bf16.gmra.mxu0 %vm795_vm6, %v5182_v59  ;;  %v1707_v43 = vadd.f32 %v5477_v21, %v1453_v24  ;;  %v2552_v59 = vmax.f32 %v2532_v17, 0.0  ;;  %v2317_v60 = vshrl.u32 %v5545_v36, 16  ;;  %v2320_v57 = vshll.u32 %v5545_v36, 16 }
 0x14e   : > { %v2481_v21 = vunpack.c.l.bf16 %v2461_v34  ;;  %v2554_v17 = vmax.f32 %v2534_v1, 0.0  ;;  %v6229_v34 = vunpack.c.l.b16 %v5569_v2  ;;  %v2525_v1 = vadd.f32 %v5080_v20, %v2505_v41 }
 0x14f   : > { %4040 = vmatmul.msk.bf16.gmra.mxu2 %vm795_vm6, %v5528_v35  ;;  %4023 = vmatmul.msk.bf16.gmra.mxu1 %vm795_vm6, %v5394_v12  ;;  %v5567_v12 = vpack.c.bf16 %v2589_v15, %v2589_v15  ;;  %v2572_v5 = vmul.f32 %v4518_v25, %v2552_v59  ;;  %v2319_v44 = vrot.slane %v2317_v60, 4  ;;  %v2322_v14 = vrot.slane %v2320_v57, 5 }
 0x150   : > { %v1371_v33 = vpop.f32.mrf.mxu3  ;;  %v5577_v48 = vadd.f32 %v5496_v45, %v1707_v43  ;;  %v2523_v15 = vadd.f32 %v5080_v20, %v2503_v50  ;;  %v2501_v8 = vmul.f32 %v5064_v11, %v2481_v21  ;;  %v2574_v59 = vmul.f32 %v4518_v25, %v2554_v17 }
 0x151   : > { %v1390_v13 = vadd.f32 %v1371_v33, %v5359_v7  ;;  %v1628_v7 = vpack.c.bf16 %v1608_v38, %v1608_v38  ;;  %v6230_v42 = vunpack.c.l.b16 %v5567_v12  ;;  %v2593_v43 = vmul.f32 %v5431_v37, %v2572_v5 }
 0x152   : > { %v1882_v6 = vpop.f32.mrf.mxu2  ;;  %v5565_v24 = vpop.f32.mrf.mxu0  ;;  %v2521_v57 = vadd.f32 %v5080_v20, %v2501_v8  ;;  %v2545_v50 = vmax.f32 %v2525_v1, 0.0  ;;  %v2736_v21 = vshrl.u32 %v5500_v4, 16  ;;  %v2739_v41 = vshll.u32 %v5500_v4, 16 }
 0x153   : > { %v1454_v40 = vadd.f32 %v5498_v19, %v1390_v13  ;;  %v2326_v38 = vshll.u32 %v1628_v7, 16  ;;  %v5609_v20 = vpack.c.bf16 %v2593_v43, %v2593_v43 }
 0x154   : > { %v5574_v28 = vpop.f32.mrf.mxu1  ;;  %v2565_v1 = vmul.f32 %v4523_v30, %v2545_v50 }
 0x155   : > { %3990 = vmatmul.msk.bf16.gmra.mxu3 %vm795_vm6, %v5188_v51  ;;  %v1708_v19 = vadd.f32 %v5506_v26, %v1454_v40  ;;  %v2323_v51 = vor.u32 %v2322_v14, %v2319_v44  ;;  %v2543_v26 = vmax.f32 %v2523_v15, 0.0  ;;  %v2595_v40 = vmul.f32 %v5431_v37, %v2574_v59 }
 0x156   : > { %v2328_v44 = vrot.slane %v2326_v38, 5  ;;  %v4009_v14 = vrot.slane %v5545_v36, 9  ;;  %v2392_v15 = vrot.slane %v1628_v7, 5  ;;  %v5619_v59 = vrot.slane %v2736_v21, 4 }
 0x157   : > { %v5588_v33 = vadd.f32 %v1879_v16, %v1708_v19  ;;  %v5601_v16 = vpack.c.b16 %v6229_v34, %v6230_v42  ;;  %v2324_v5 = vrot.slane %v2323_v51, 4  ;;  %v2563_v8 = vmul.f32 %v4523_v30, %v2543_v26  ;;  %v2469_v26 = vld [vmem:[%s4457_s30 + $0x24] sm:$0x1] }
 0x158   : > { %v1374_v45 = vpop.f32.mrf.mxu3  ;;  %v2541_v19 = vmax.f32 %v2521_v57, 0.0  ;;  %v2725_v7 = vshll.u32 %v5461_v27, 16  ;;  %v5627_v51 = vpack.c.bf16 %v2595_v40, %v2595_v40  ;;  %v2586_v34 = vmul.f32 %v5431_v37, %v2565_v1 }
 0x159   : > { %v1391_v60 = vadd.f32 %v1374_v45, %v5389_v52  ;;  %v5621_v45 = vrot.slane %v2739_v41, 5  ;;  %v2329_v38 = vsel %vm4614_vm9, %v2324_v5, %v2328_v44  ;;  %v2584_v41 = vmul.f32 %v5431_v37, %v2563_v8 }
 0x15a   : > { %v5592_v11 = vpop.f32.mrf.mxu2  ;;  %v5595_v13 = vpop.f32.mrf.mxu0  ;;  %v2708_v5 = vshrl.u32 %v5459_v55, 16  ;;  %v2711_v44 = vshll.u32 %v5459_v55, 16  ;;  %v2489_v42 = vunpack.c.l.bf16 %v2469_v26  ;;  %v5667_v26 = vpack.c.bf16 %v2586_v34, %v2586_v34 }
 0x15b   : > { %v1455_v52 = vadd.f32 %v5522_v3, %v1391_v60  ;;  %v2467_v60 = vld [vmem:[%s4457_s30 + $0x1c] sm:$0x1] }
 0x15c   : > { %v5607_v17 = vpop.f32.mrf.mxu1 }
 0x15d   : > { %4007 = vmatmul.msk.bf16.gmra.mxu0 %vm795_vm6, %v5223_v22  ;;  %v1709_v3 = vadd.f32 %v5540_v10, %v1455_v52  ;;  %v2722_v22 = vshrl.u32 %v5461_v27, 16  ;;  %v6233_v10 = vunpack.c.l.b16 %v5609_v20  ;;  %v2561_v52 = vmul.f32 0.0, %v2541_v19  ;;  %v5654_v19 = vld [vmem:[%s6214_s4] ss:$0 sm:$0xff] }
 0x15f   : > { %4041 = vmatmul.msk.bf16.gmra.mxu2 %vm795_vm6, %v5601_v16  ;;  %4024 = vmatmul.msk.bf16.gmra.mxu1 %vm795_vm6, %v5455_v0  ;;  %v5634_v57 = vadd.f32 %v1882_v6, %v1709_v3  ;;  %v2393_v0 = vsel %vm4563_vm5, %v4009_v14, %v2392_v15  ;;  %v2487_v6 = vunpack.c.l.bf16 %v2467_v60  ;;  %v6232_v14 = vunpack.c.l.b16 %v5627_v51 }
 0x160   : > { %v1376_v43 = vpop.f32.mrf.mxu3  ;;  %v2335_v15 = vunpack.c.l.b16 %v2329_v38  ;;  %v2399_v8 = vunpack.c.l.b16 %v2393_v0  ;;  %v2509_v38 = vmul.f32 %v5654_v19, %v2489_v42  ;;  %v2713_v0 = vrot.slane %v2711_v44, 5 }
 0x161   : > { %v1392_v50 = vadd.f32 %v1376_v43, %v5419_v23  ;;  %v2724_v23 = vrot.slane %v2722_v22, 4  ;;  %v2727_v43 = vrot.slane %v2725_v7, 5  ;;  %v2507_v1 = vmul.f32 %v5654_v19, %v2487_v6  ;;  %v4230_v7 = vld [vmem:[%s6213_s3 + $0x178] sm:$0xff] }
 0x162   : > { %v5637_v21 = vpop.f32.mrf.mxu2  ;;  %v5642_v40 = vpop.f32.mrf.mxu0  ;;  %v2582_v22 = vmul.f32 %v5431_v37, %v2561_v52  ;;  %v2742_v6 = vor.u32 %v5621_v45, %v5619_v59  ;;  %3217 = vmatpush.bf16.msra.mxu3 %v4230_v7  ;;  %v2262_v44 = vunpack.c.l.b16 %v5545_v36 }
 0x163   : > { %v1456_v3 = vadd.f32 %v5565_v24, %v1392_v50  ;;  %v5659_v24 = vpack.c.bf16 %v2584_v41, %v2584_v41  ;;  %v2710_v50 = vrot.slane %v2708_v5, 4  ;;  %v2728_v52 = vor.u32 %v2727_v43, %v2724_v23 }
 0x164   : > { %v5648_v63 = vpop.f32.mrf.mxu1  ;;  %v5685_v5 = vpack.c.b16 %v6232_v14, %v6233_v10  ;;  %v2602_v43 = vpack.c.bf16 %v2582_v22, %v2582_v22 }
 0x165   : > { %3991 = vmatmul.msk.bf16.gmra.mxu3 %vm795_vm6, %v5233_v46  ;;  %v1710_v60 = vadd.f32 %v5574_v28, %v1456_v3  ;;  %v5672_v46 = vld [vmem:[%s6215_s5] ss:$0 sm:$0xff]  ;;  %v2336_v3 = vpack.c.b16 %v2335_v15, %v5417_v39  ;;  %v2714_v14 = vor.u32 %v2713_v0, %v2710_v50  ;;  %v2729_v15 = vrot.slane %v2728_v52, 4 }
 0x166   : > { %v2527_v41 = vadd.f32 %v5672_v46, %v2507_v1  ;;  %v2529_v42 = vadd.f32 %v5672_v46, %v2509_v38  ;;  %v2731_v38 = vshll.u32 %v5659_v24, 16  ;;  %v4059_v50 = vrot.slane %v5459_v55, 9 }
 0x167   : > { %v5679_v28 = vadd.f32 %v5592_v11, %v1710_v60  ;;  %v2400_v11 = vpack.c.b16 %v2399_v8, %v2190_v49  ;;  %v2745_v60 = vshll.u32 %v5667_v26, 16  ;;  %v4232_v49 = vld [vmem:[%s6213_s3 + $0x188] sm:$0xff]  ;;  %v2907_v0 = vrot.slane %v2602_v43, 5 }
 0x168   : > { %v1379_v34 = vpop.f32.mrf.mxu3  ;;  %v2547_v23 = vmax.f32 %v2527_v41, 0.0  ;;  %v2549_v1 = vmax.f32 %v2529_v42, 0.0  ;;  %v2750_v41 = vshrl.u32 %v5502_v53, 16  ;;  %v2753_v52 = vshll.u32 %v5502_v53, 16  ;;  %3277 = vmatpush.bf16.msra.mxu0 %v4232_v49 }
 0x169   : > { %v1393_v59 = vadd.f32 %v1379_v34, %v5450_v58  ;;  %v2743_v58 = vrot.slane %v2742_v6, 4  ;;  %v4060_v6 = vrot.slane %v5461_v27, 9  ;;  %v2911_v42 = vrot.slane %v5659_v24, 5 }
 0x16a   : > { %v5690_v45 = vpop.f32.mrf.mxu2  ;;  %v5694_v7 = vpop.f32.mrf.mxu0  ;;  %v2567_v36 = vmul.f32 %v4523_v30, %v2547_v23  ;;  %v2569_v8 = vmul.f32 %v4523_v30, %v2549_v1  ;;  %v2733_v23 = vrot.slane %v2731_v38, 5  ;;  %v2715_v1 = vrot.slane %v2714_v14, 4 }
 0x16b   : > { %v1457_v39 = vadd.f32 %v5595_v13, %v1393_v59  ;;  %v4234_v13 = vld [vmem:[%s6213_s3 + $0x198] sm:$0xff]  ;;  %v2747_v59 = vrot.slane %v2745_v60, 5  ;;  %v2717_v10 = vshll.u32 %v2602_v43, 16  ;;  %v2764_v24 = vshrl.u32 %v5567_v12, 16 }
 0x16c   : > { %v5707_v22 = vpop.f32.mrf.mxu1  ;;  %v2588_v34 = vmul.f32 %v5431_v37, %v2567_v36  ;;  %v2767_v36 = vshll.u32 %v5567_v12, 16  ;;  %v2263_v38 = vpack.c.b16 %v2262_v44, %v2029_v62  ;;  %v2908_v14 = vsel %vm4563_vm5, %v4059_v50, %v2907_v0  ;;  %3350 = vmatpush.bf16.msra.mxu1 %v4234_v13 }
 0x16d   : > { %4008 = vmatmul.msk.bf16.gmra.mxu0 %vm795_vm6, %v2336_v3  ;;  %v1711_v55 = vadd.f32 %v5607_v17, %v1457_v39  ;;  %v2590_v3 = vmul.f32 %v5431_v37, %v2569_v8  ;;  %v2752_v43 = vrot.slane %v2750_v41, 4  ;;  %v2755_v60 = vrot.slane %v2753_v52, 5 }
 0x16e   : > { %v2734_v44 = vsel %vm4614_vm9, %v2729_v15, %v2733_v23  ;;  %v2748_v50 = vsel %vm4614_vm9, %v2743_v58, %v2747_v59  ;;  %v2719_v0 = vrot.slane %v2717_v10, 5  ;;  %v2493_v13 = vunpack.c.l.bf16 %v2473_v32 }
 0x16f   : > { %4042 = vmatmul.msk.bf16.gmra.mxu2 %vm795_vm6, %v5685_v5  ;;  %4025 = vmatmul.msk.bf16.gmra.mxu1 %vm795_vm6, %v2400_v11  ;;  %v5727_v17 = vadd.f32 %v5637_v21, %v1711_v55  ;;  %v2471_v11 = vld [vmem:[%s4457_s30 + $0x2c] sm:$0x1]  ;;  %v5740_v21 = vsel %vm4563_vm5, %v4060_v6, %v2911_v42  ;;  %v5742_v55 = vpack.c.bf16 %v2588_v34, %v2588_v34  ;;  %v2766_v52 = vrot.slane %v2764_v24, 4 }
 0x170   : > { %v1381_v39 = vpop.f32.mrf.mxu3  ;;  %v2491_v61 = vunpack.c.l.bf16 %v2471_v11  ;;  %v5751_v41 = vpack.c.bf16 %v2590_v3, %v2590_v3  ;;  %v2769_v6 = vrot.slane %v2767_v36, 5  ;;  %v2942_v34 = vunpack.c.l.b16 %v2908_v14 }
 0x171   : > { %v1394_v49 = vadd.f32 %v1381_v39, %v5469_v29  ;;  %v2943_v39 = vunpack.c.l.b16 %v5740_v21  ;;  %v2756_v11 = vor.u32 %v2755_v60, %v2752_v43  ;;  %v2759_v15 = vshll.u32 %v5742_v55, 16 }
 0x172   : > { %v5736_v8 = vpop.f32.mrf.mxu2  ;;  %v5744_v62 = vpop.f32.mrf.mxu0  ;;  %v2511_v54 = vmul.f32 %v5654_v19, %v2491_v61  ;;  %v5759_v10 = vunpack.c.l.b16 %v2734_v44  ;;  %v5761_v58 = vunpack.c.l.b16 %v2748_v50  ;;  %v2770_v23 = vor.u32 %v2769_v6, %v2766_v52 }
 0x173   : > { %v1458_v29 = vadd.f32 %v5642_v40, %v1394_v49  ;;  %v2513_v40 = vmul.f32 %v5654_v19, %v2493_v13  ;;  %v2773_v59 = vshll.u32 %v5751_v41, 16  ;;  %v2720_v14 = vsel %vm4614_vm9, %v2715_v1, %v2719_v0 }
 0x174   : > { %v5753_v42 = vpop.f32.mrf.mxu1  ;;  %v2531_v3 = vadd.f32 %v5672_v46, %v2511_v54  ;;  %v2757_v43 = vrot.slane %v2756_v11, 4  ;;  %v2761_v61 = vrot.slane %v2759_v15, 5  ;;  %v3107_v0 = vpack.c.b16 %v5761_v58, %v5759_v10  ;;  %v2476_v11 = vld [vmem:[%s4457_s30 + $0x40] sm:$0xf] }
 0x175   : > { %3992 = vmatmul.msk.bf16.gmra.mxu3 %vm795_vm6, %v2263_v38  ;;  %v1712_v24 = vadd.f32 %v5648_v63, %v1458_v29  ;;  %v2950_v38 = vpack.c.b16 %v2943_v39, %v2942_v34  ;;  %v2533_v60 = vadd.f32 %v5672_v46, %v2513_v40  ;;  %v6260_v63 = vunpack.c.l.b16 %v5500_v4 }
 0x176   : > { %v2551_v44 = vmax.f32 %v2531_v3, 0.0  ;;  %v2824_v29 = vunpack.c.l.b16 %v2720_v14  ;;  %v2771_v52 = vrot.slane %v2770_v23, 4  ;;  %v2775_v6 = vrot.slane %v2773_v59, 5 }
 0x177   : > { %v5776_v54 = vadd.f32 %v5690_v45, %v1712_v24  ;;  %v3022_v1 = vpack.c.b16 %v6260_v63, %v2635_v31  ;;  %v2553_v13 = vmax.f32 %v2533_v60, 0.0  ;;  %v4061_v45 = vrot.slane %v5500_v4, 9  ;;  %v2477_v60 = vld [vmem:[%s4457_s30 + $0x44] sm:$0x1] }
 0x178   : > { %v1384_v36 = vpop.f32.mrf.mxu3  ;;  %v2762_v27 = vsel %vm4614_vm9, %v2757_v43, %v2761_v61  ;;  %v2915_v31 = vrot.slane %v5667_v26, 5  ;;  %v2571_v15 = vmul.f32 %v4523_v30, %v2551_v44  ;;  %v4062_v40 = vrot.slane %v5502_v53, 9  ;;  %v2475_v43 = vld [vmem:[%s4457_s30 + $0x3c] sm:$0x1] }
 0x179   : > { %v1395_v32 = vadd.f32 %v1384_v36, %v5491_v18  ;;  %v2919_v23 = vrot.slane %v5742_v55, 5  ;;  %v2573_v4 = vmul.f32 %v4523_v30, %v2553_v13  ;;  %v2832_v3 = vpack.c.b16 %v5759_v10, %v2824_v29 }
 0x17a   : > { %v5773_v49 = vpop.f32.mrf.mxu2  ;;  %v5782_v50 = vpop.f32.mrf.mxu0  ;;  %v2776_v26 = vsel %vm4614_vm9, %v2771_v52, %v2775_v6  ;;  %v2778_v24 = vshrl.u32 %v5569_v2, 16  ;;  %v2781_v36 = vshll.u32 %v5569_v2, 16  ;;  %v2795_v55 = vshll.u32 %v5609_v20, 16 }
 0x17b   : > { %v1459_v18 = vadd.f32 %v5694_v7, %v1395_v32  ;;  %v2496_v7 = vunpack.c.l.bf16 %v2476_v11  ;;  %v5818_v44 = vunpack.c.l.b16 %v2762_v27  ;;  %v2592_v63 = vmul.f32 %v5431_v37, %v2571_v15 }
 0x17c   : > { %v5787_v34 = vpop.f32.mrf.mxu1  ;;  %v5825_v13 = vsel %vm4563_vm5, %v4061_v45, %v2915_v31  ;;  %v5833_v52 = vunpack.c.l.b16 %v2776_v26  ;;  %v2780_v6 = vrot.slane %v2778_v24, 4  ;;  %v2783_v11 = vrot.slane %v2781_v36, 5 }
 0x17d   : > { %4079 = vmatmul.msk.bf16.vlgmr.msrb.gmra.mxu0 %vm795_vm6, %v2950_v38  ;;  %v1713_v59 = vadd.f32 %v5707_v22, %v1459_v18  ;;  %v2792_v38 = vshrl.u32 %v5609_v20, 16  ;;  %v2516_v22 = vmul.f32 %v5654_v19, %v2496_v7  ;;  %v5829_v18 = vsel %vm4563_vm5, %v4062_v40, %v2919_v23 }
 0x17e   : > { %v2797_v7 = vrot.slane %v2795_v55, 5  ;;  %v2944_v40 = vunpack.c.l.b16 %v5825_v13  ;;  %v2945_v23 = vunpack.c.l.b16 %v5829_v18 }
 0x17f   : > { %4111 = vmatmul.msk.bf16.vlgmr.msrb.gmra.mxu2 %vm795_vm6, %v3107_v0  ;;  %4095 = vmatmul.msk.bf16.vlgmr.msrb.gmra.mxu1 %vm795_vm6, %v3022_v1  ;;  %v5813_v10 = vadd.f32 %v5736_v8, %v1713_v59  ;;  %v2495_v1 = vunpack.c.l.bf16 %v2475_v43  ;;  %v2594_v8 = vmul.f32 %v5431_v37, %v2573_v4  ;;  %v2794_v15 = vrot.slane %v2792_v38, 4 }
 0x180   : > { %v1386_v14 = vpop.f32.mrf.mxu3  ;;  %v2536_v31 = vadd.f32 %v5672_v46, %v2516_v22  ;;  %v2612_v4 = vpack.c.bf16 %v2592_v63, %v2592_v63  ;;  %v5860_v63 = vpack.c.b16 %v2945_v23, %v2944_v40 }
 0x181   : > { %v1396_v32 = vadd.f32 %v1386_v14, %v5518_v47  ;;  %v2497_v47 = vunpack.c.l.bf16 %v2477_v60  ;;  %v2515_v45 = vmul.f32 %v5654_v19, %v2495_v1  ;;  %v5846_v26 = vpack.c.bf16 %v2594_v8, %v2594_v8 }
 0x182   : > { %v5816_v61 = vpop.f32.mrf.mxu2  ;;  %v5821_v0 = vpop.f32.mrf.mxu0  ;;  %v2798_v38 = vor.u32 %v2797_v7, %v2794_v15  ;;  %v2556_v55 = vmax.f32 %v2536_v31, 0.0  ;;  %v2787_v1 = vshll.u32 %v2612_v4, 16  ;;  %v6262_v15 = vunpack.c.l.b16 %v5567_v12  ;;  %v4231_v31 = vld [vmem:[%s6213_s3 + $0x180] sm:$0xff] }
 0x183   : > { %v1460_v29 = vadd.f32 %v5744_v62, %v1396_v32  ;;  %v4229_v62 = vld [vmem:[%s6213_s3 + $0x170] sm:$0xff]  ;;  %v2517_v59 = vmul.f32 %v5654_v19, %v2497_v47  ;;  %v2535_v24 = vadd.f32 %v5672_v46, %v2515_v45  ;;  %v3108_v32 = vpack.c.b16 %v5833_v52, %v5818_v44  ;;  %v4235_v45 = vld [vmem:[%s6213_s3 + $0x1a0] sm:$0xff]  ;;  %3278 = vmatpush.bf16.msra.mxu0 %v4231_v31 }
 0x184   : > { %v5835_v27 = vpop.f32.mrf.mxu1  ;;  %3218 = vmatpush.bf16.msra.mxu3 %v4229_v62  ;;  %v2801_v47 = vshll.u32 %v5846_v26, 16  ;;  %3415 = vmatpush.bf16.msra.mxu2 %v4235_v45 }
 0x185   : > { %4055 = vmatmul.msk.bf16.vlgmr.msrb.gmra.mxu3 %vm795_vm6, %v2832_v3  ;;  %v2537_v36 = vadd.f32 %v5672_v46, %v2517_v59  ;;  %v2784_v3 = vor.u32 %v2783_v11, %v2780_v6  ;;  %v1714_v43 = vadd.f32 %v5753_v42, %v1460_v29  ;;  %v2555_v6 = vmax.f32 %v2535_v24, 0.0 }
 0x186   : > { %v2576_v42 = vmul.f32 %v4518_v25, %v2556_v55  ;;  %v6261_v11 = vunpack.c.l.b16 %v5502_v53  ;;  %v2799_v59 = vrot.slane %v2798_v38, 4  ;;  %v4233_v53 = vld [vmem:[%s6213_s3 + $0x190] sm:$0xff]  ;;  %v2789_v24 = vrot.slane %v2787_v1, 5 }
 0x187   : > { %v2557_v62 = vmax.f32 %v2537_v36, 0.0  ;;  %v2923_v55 = vrot.slane %v5751_v41, 5  ;;  %v4064_v38 = vrot.slane %v5569_v2, 9  ;;  %3351 = vmatpush.bf16.msra.mxu1 %v4233_v53 }
 0x188   : > { %v1995_v14 = vpop.f32.mrf.mxu3  ;;  %v3023_v7 = vpack.c.b16 %v6262_v15, %v6261_v11 }
 0x189   : > { %v2015_v60 = vadd.f32 %v1995_v14, %v5577_v48  ;;  %v5867_v48 = vadd.f32 %v5773_v49, %v1714_v43  ;;  %v2785_v49 = vrot.slane %v2784_v3, 4  ;;  %v4063_v14 = vrot.slane %v5567_v12, 9 }
 0x18a   : > { %v5852_v22 = vpop.f32.mrf.mxu2  ;;  %v5862_v8 = vpop.f32.mrf.mxu0  ;;  %v2803_v3 = vrot.slane %v2801_v47, 5  ;;  %v2927_v43 = vrot.slane %v2612_v4, 5  ;;  %v2577_v1 = vmul.f32 %v4523_v30, %v2557_v62 }
 0x18b   : > { %v2087_v29 = vadd.f32 %v5782_v50, %v2015_v60  ;;  %v2597_v50 = vmul.f32 %v5431_v37, %v2576_v42  ;;  %v2575_v60 = vmul.f32 %v4523_v30, %v2555_v6  ;;  %v5908_v47 = vsel %vm4563_vm5, %v4063_v14, %v2923_v55 }
 0x18c   : > { %v5880_v25 = vpop.f32.mrf.mxu1  ;;  %v2806_v30 = vshrl.u32 %v5627_v51, 16  ;;  %v2809_v6 = vshll.u32 %v5627_v51, 16  ;;  %v2598_v15 = vmul.f32 %v5431_v37, %v2577_v1  ;;  %v2946_v62 = vunpack.c.l.b16 %v5908_v47 }
 0x18d   : > { %4080 = vmatmul.msk.bf16.gmra.mxu0 %vm795_vm6, %v5860_v63  ;;  %v2172_v36 = vadd.f32 %v5787_v34, %v2087_v29  ;;  %v5896_v42 = vpack.c.bf16 %v2597_v50, %v2597_v50  ;;  %v5903_v34 = vpack.c.b16 %v5818_v44, %v5761_v58  ;;  %v2804_v58 = vsel %vm4614_vm9, %v2799_v59, %v2803_v3 }
 0x18e   : > { %v5918_v44 = vsel %vm4563_vm5, %v4064_v38, %v2927_v43  ;;  %v2808_v59 = vrot.slane %v2806_v30, 4  ;;  %v2811_v53 = vrot.slane %v2809_v6, 5  ;;  %v5932_v55 = vpack.c.bf16 %v2598_v15, %v2598_v15 }
 0x18f   : > { %4112 = vmatmul.msk.bf16.gmra.mxu2 %vm795_vm6, %v3108_v32  ;;  %4096 = vmatmul.msk.bf16.gmra.mxu1 %vm795_vm6, %v3023_v7  ;;  %v5899_v12 = vadd.f32 %v5816_v61, %v2172_v36  ;;  %v2790_v61 = vsel %vm4614_vm9, %v2785_v49, %v2789_v24  ;;  %v3088_v7 = vshrl.u32 %v5896_v42, 16  ;;  %v3091_v45 = vshll.u32 %v5896_v42, 16 }
 0x190   : > { %v1997_v41 = vpop.f32.mrf.mxu3  ;;  %v2947_v49 = vunpack.c.l.b16 %v5918_v44  ;;  %v2829_v24 = vunpack.c.l.b16 %v2790_v61  ;;  %v6263_v6 = vunpack.c.l.b16 %v5569_v2  ;;  %v6264_v61 = vunpack.c.l.b16 %v5609_v20 }
 0x191   : > { %v2016_v4 = vadd.f32 %v1997_v41, %v5588_v33  ;;  %v2596_v33 = vmul.f32 %v5431_v37, %v2575_v60  ;;  %v3090_v36 = vrot.slane %v3088_v7, 4  ;;  %v3093_v3 = vrot.slane %v3091_v45, 5 }
 0x192   : > { %v2233_v32 = vpop.f32.mrf.mxu2  ;;  %v2074_v29 = vpop.f32.mrf.mxu0  ;;  %v2812_v41 = vor.u32 %v2811_v53, %v2808_v59  ;;  %v4065_v2 = vrot.slane %v5609_v20, 9  ;;  %v2931_v59 = vrot.slane %v5846_v26, 5  ;;  %v4066_v53 = vrot.slane %v5627_v51, 9 }
 0x193   : > { %v2088_v11 = vadd.f32 %v5821_v0, %v2016_v4  ;;  %v5930_v0 = vunpack.c.l.b16 %v2804_v58  ;;  %v2616_v14 = vpack.c.bf16 %v2596_v33, %v2596_v33 }
 0x194   : > { %v2159_v31 = vpop.f32.mrf.mxu1  ;;  %v2813_v7 = vrot.slane %v2812_v41, 4  ;;  %v5967_v26 = vsel %vm4563_vm5, %v4065_v2, %v2931_v59 }
 0x195   : > { %4056 = vmatmul.msk.bf16.gmra.mxu3 %vm795_vm6, %v5903_v34  ;;  %v2173_v50 = vadd.f32 %v5835_v27, %v2088_v11  ;;  %v5942_v27 = vpack.c.b16 %v2947_v49, %v2946_v62  ;;  %v3109_v30 = vpack.c.b16 %v5930_v0, %v2829_v24  ;;  %v2815_v33 = vshll.u32 %v2616_v14, 16 }
 0x196   : > { %v3097_v11 = vshll.u32 %v5932_v55, 16 }
 0x197   : > { %v5935_v38 = vadd.f32 %v5852_v22, %v2173_v50  ;;  %v3024_v22 = vpack.c.b16 %v6264_v61, %v6263_v6  ;;  %v2817_v50 = vrot.slane %v2815_v33, 5 }
 0x198   : > { %v2000_v43 = vpop.f32.mrf.mxu3 }
 0x199   : > { %v2017_v60 = vadd.f32 %v2000_v43, %v5634_v57  ;;  %v3094_v57 = vor.u32 %v3093_v3, %v3090_v36  ;;  %v3099_v3 = vrot.slane %v3097_v11, 5 }
 0x19a   : > { %v2235_v1 = vpop.f32.mrf.mxu2  ;;  %v2077_v4 = vpop.f32.mrf.mxu0 }
 0x19b   : > { %v2089_v58 = vadd.f32 %v5862_v8, %v2017_v60  ;;  %v2935_v8 = vrot.slane %v2616_v14, 5  ;;  %v3095_v36 = vrot.slane %v3094_v57, 4 }
 0x19c   : > { %v2162_v15 = vpop.f32.mrf.mxu1 }
 0x19d   : > { %4081 = vmatmul.msk.bf16.gmra.mxu0 %vm795_vm6, %v5942_v27  ;;  %v2174_v45 = vadd.f32 %v5880_v25, %v2089_v58  ;;  %v5963_v25 = vpack.c.b16 %v2829_v24, %v5833_v52  ;;  %v5971_v14 = vsel %vm4563_vm5, %v4066_v53, %v2935_v8  ;;  %v2948_v52 = vunpack.c.l.b16 %v5967_v26 }
 0x19e   : > { %v2949_v24 = vunpack.c.l.b16 %v5971_v14  ;;  %v6265_v8 = vunpack.c.l.b16 %v5627_v51 }
 0x19f   : > { %4113 = vmatmul.msk.bf16.gmra.mxu2 %vm795_vm6, %v3109_v30  ;;  %4097 = vmatmul.msk.bf16.gmra.mxu1 %vm795_vm6, %v3024_v22  ;;  %v5959_v43 = vadd.f32 %v2233_v32, %v2174_v45  ;;  %v2818_v32 = vsel %vm4614_vm9, %v2813_v7, %v2817_v50 }
 0x1a0   : > { %v2002_v60 = vpop.f32.mrf.mxu3  ;;  %v2831_v58 = vunpack.c.l.b16 %v2818_v32  ;;  %v5991_v2 = vpack.c.b16 %v2949_v24, %v2948_v52 }
 0x1a1   : > { %v2018_v41 = vadd.f32 %v2002_v60, %v5679_v28  ;;  %v3100_v28 = vsel %vm4614_vm9, %v3095_v36, %v3099_v3 }
 0x1a2   : > { %v2238_v30 = vpop.f32.mrf.mxu2  ;;  %v2079_v20 = vpop.f32.mrf.mxu0  ;;  %v5981_v33 = vunpack.c.l.b16 %v3100_v28 }
 0x1a3   : > { %v2090_v6 = vadd.f32 %v2074_v29, %v2018_v41  ;;  %v3021_v29 = vunpack.c.l.b16 %v5896_v42 }
 0x1a4   : > { %v2164_v61 = vpop.f32.mrf.mxu1 }
 0x1a5   : > { %4057 = vmatmul.msk.bf16.gmra.mxu3 %vm795_vm6, %v5963_v25  ;;  %v2175_v22 = vadd.f32 %v2159_v31, %v2090_v6  ;;  %v3110_v31 = vpack.c.b16 %v5981_v33, %v2831_v58 }
 0x1a7   : > { %v5984_v57 = vadd.f32 %v2235_v1, %v2175_v22  ;;  %v3025_v1 = vpack.c.b16 %v3021_v29, %v6265_v8  ;;  %v2479_v8 = vld [vmem:[%s4457_s30 + $0x4c] sm:$0x1] }
 0x1a8   : > { %v2005_v11 = vpop.f32.mrf.mxu3 }
 0x1a9   : > { %v2019_v7 = vadd.f32 %v2005_v11, %v5727_v17 }
 0x1aa   : > { %v2240_v45 = vpop.f32.mrf.mxu2  ;;  %v2082_v59 = vpop.f32.mrf.mxu0 }
 0x1ab   : > { %v2091_v53 = vadd.f32 %v2077_v4, %v2019_v7  ;;  %v6006_v4 = vpack.c.b16 %v2831_v58, %v5930_v0 }
 0x1ac   : > { %v2167_v50 = vpop.f32.mrf.mxu1 }
 0x1ad   : > { %4082 = vmatmul.msk.bf16.gmra.mxu0 %vm795_vm6, %v5991_v2  ;;  %v2176_v17 = vadd.f32 %v2162_v15, %v2091_v53 }
 0x1af   : > { %4114 = vmatmul.msk.bf16.gmra.mxu2 %vm795_vm6, %v3110_v31  ;;  %4098 = vmatmul.msk.bf16.gmra.mxu1 %vm795_vm6, %v3025_v1  ;;  %v6002_v36 = vadd.f32 %v2238_v30, %v2176_v17 }
 0x1b0   : > { %v2007_v3 = vpop.f32.mrf.mxu3 }
 0x1b1   : > { %v2020_v60 = vadd.f32 %v2007_v3, %v5776_v54 }
 0x1b2   : > { %v2243_v51 = vpop.f32.mrf.mxu2  ;;  %v2084_v41 = vpop.f32.mrf.mxu0 }
 0x1b3   : > { %v2092_v6 = vadd.f32 %v2079_v20, %v2020_v60 }
 0x1b4   : > { %v2169_v32 = vpop.f32.mrf.mxu1 }
 0x1b5   : > { %4058 = vmatmul.msk.bf16.gmra.mxu3 %vm795_vm6, %v6006_v4  ;;  %v2177_v15 = vadd.f32 %v2164_v61, %v2092_v6 }
 0x1b7   : > { %v6010_v28 = vadd.f32 %v2240_v45, %v2177_v15  ;;  %v2478_v45 = vld [vmem:[%s4457_s30 + $0x48] sm:$0xf] }
 0x1b8   : > { %v2010_v22 = vpop.f32.mrf.mxu3 }
 0x1b9   : > { %v2021_v30 = vadd.f32 %v2010_v22, %v5813_v10  ;;  %v3183_v10 = vpack.c.b16 %v2944_v40, %v2943_v39 }
 0x1ba   : > { %v2245_v11 = vpop.f32.mrf.mxu2  ;;  %v2361_v54 = vpop.f32.mrf.mxu0 }
 0x1bb   : > { %v2093_v7 = vadd.f32 %v2082_v59, %v2021_v30 }
 0x1bc   : > { %v2425_v0 = vpop.f32.mrf.mxu1 }
 0x1bd   : > { %4144 = vmatmul.msk.bf16.vlgmr.msra.gmra.mxu0 %vm795_vm6, %v5528_v35  ;;  %v2178_v20 = vadd.f32 %v2167_v50, %v2093_v7  ;;  %v2498_v35 = vunpack.c.l.bf16 %v2478_v45 }
 0x1bf   : > { %4177 = vmatmul.msk.bf16.vlgmr.msra.gmra.mxu2 %vm795_vm6, %v5860_v63  ;;  %4160 = vmatmul.msk.bf16.vlgmr.msra.gmra.mxu1 %vm795_vm6, %v5903_v34  ;;  %v6019_v61 = vadd.f32 %v2243_v51, %v2178_v20  ;;  %v2499_v63 = vunpack.c.l.bf16 %v2479_v8  ;;  %v2518_v50 = vmul.f32 %v5654_v19, %v2498_v35 }
 0x1c0   : > { %v2012_v58 = vpop.f32.mrf.mxu3 }
 0x1c1   : > { %v2022_v59 = vadd.f32 %v2012_v58, %v5867_v48  ;;  %v2538_v17 = vadd.f32 %v5672_v46, %v2518_v50  ;;  %v2519_v21 = vmul.f32 %v5654_v19, %v2499_v63 }
 0x1c2   : > { %v2679_v31 = vpop.f32.mrf.mxu2  ;;  %v2363_v53 = vpop.f32.mrf.mxu0 }
 0x1c3   : > { %v2094_v1 = vadd.f32 %v2084_v41, %v2022_v59  ;;  %v2558_v13 = vmax.f32 %v2538_v17, 0.0  ;;  %v2539_v6 = vadd.f32 %v5672_v46, %v2519_v21 }
 0x1c4   : > { %v2427_v34 = vpop.f32.mrf.mxu1 }
 0x1c5   : > { %4128 = vmatmul.msk.bf16.vlgmr.msra.gmra.mxu3 %vm795_vm6, %v3183_v10  ;;  %v2179_v3 = vadd.f32 %v2169_v32, %v2094_v1  ;;  %v2578_v51 = vmul.f32 0.0, %v2558_v13  ;;  %v2559_v19 = vmax.f32 %v2539_v6, 0.0 }
 0x1c7   : > { %v6032_v39 = vadd.f32 %v2245_v11, %v2179_v3  ;;  %v2599_v30 = vmul.f32 %v5431_v37, %v2578_v51  ;;  %v2579_v58 = vmul.f32 0.0, %v2559_v19 }
 0x1c8   : > { %v2288_v40 = vpop.f32.mrf.mxu3 }
 0x1c9   : > { %v2308_v48 = vadd.f32 %v2288_v40, %v5899_v12  ;;  %v2619_v7 = vpack.c.bf16 %v2599_v30, %v2599_v30 }
 0x1ca   : > { %v2681_v60 = vpop.f32.mrf.mxu2  ;;  %v2366_v41 = vpop.f32.mrf.mxu0 }
 0x1cb   : > { %v2381_v15 = vadd.f32 %v2361_v54, %v2308_v48  ;;  %v3184_v54 = vpack.c.b16 %v2946_v62, %v2945_v23  ;;  %v2600_v23 = vmul.f32 %v5431_v37, %v2579_v58  ;;  %v4164_v14 = vrot.slane %v2619_v7, 9 }
 0x1cc   : > { %v2430_v22 = vpop.f32.mrf.mxu1 }
 0x1cd   : > { %4145 = vmatmul.msk.bf16.gmra.mxu0 %vm795_vm6, %v5601_v16  ;;  %v2445_v32 = vadd.f32 %v2425_v0, %v2381_v15  ;;  %v4115_v0 = vrot.slane %v5896_v42, 9  ;;  %v2620_v50 = vpack.c.bf16 %v2600_v23, %v2600_v23 }
 0x1cf   : > { %4178 = vmatmul.msk.bf16.gmra.mxu2 %vm795_vm6, %v5942_v27  ;;  %4161 = vmatmul.msk.bf16.gmra.mxu1 %vm795_vm6, %v5963_v25  ;;  %v6043_v12 = vadd.f32 %v2679_v31, %v2445_v32  ;;  %v3175_v27 = vrot.slane %v5932_v55, 5  ;;  %v3309_v31 = vshrl.u32 %v2619_v7, 16  ;;  %v3318_v13 = vshll.u32 %v2620_v50, 16 }
 0x1d0   : > { %v2290_v11 = vpop.f32.mrf.mxu3 }
 0x1d1   : > { %v2309_v46 = vadd.f32 %v2290_v11, %v5935_v38  ;;  %v3176_v25 = vsel %vm4563_vm5, %v4115_v0, %v3175_v27  ;;  %v3312_v38 = vshll.u32 %v2619_v7, 16  ;;  %v3311_v35 = vrot.slane %v3309_v31, 4 }
 0x1d2   : > { %v2684_v16 = vpop.f32.mrf.mxu2  ;;  %v2368_v20 = vpop.f32.mrf.mxu0  ;;  %v3182_v59 = vunpack.c.l.b16 %v3176_v25  ;;  %v3320_v48 = vrot.slane %v3318_v13, 5 }
 0x1d3   : > { %v2382_v45 = vadd.f32 %v2363_v53, %v2309_v46  ;;  %v3314_v53 = vrot.slane %v3312_v38, 5 }
 0x1d4   : > { %v2432_v10 = vpop.f32.mrf.mxu1  ;;  %v3186_v47 = vpack.c.b16 %v3182_v59, %v2949_v24  ;;  %v3384_v24 = vrot.slane %v2620_v50, 5 }
 0x1d5   : > { %4129 = vmatmul.msk.bf16.gmra.mxu3 %vm795_vm6, %v3184_v54  ;;  %v2446_v18 = vadd.f32 %v2427_v34, %v2382_v45  ;;  %v3315_v21 = vor.u32 %v3314_v53, %v3311_v35 }
 0x1d7   : > { %v6058_v62 = vadd.f32 %v2681_v60, %v2446_v18  ;;  %v3316_v40 = vrot.slane %v3315_v21, 4 }
 0x1d8   : > { %v2293_v55 = vpop.f32.mrf.mxu3 }
 0x1d9   : > { %v2310_v8 = vadd.f32 %v2293_v55, %v5959_v43  ;;  %v3321_v15 = vsel %vm4614_vm9, %v3316_v40, %v3320_v48 }
 0x1da   : > { %v2686_v1 = vpop.f32.mrf.mxu2  ;;  %v2371_v63 = vpop.f32.mrf.mxu0  ;;  %v3327_v32 = vunpack.c.l.b16 %v3321_v15 }
 0x1db   : > { %v2383_v17 = vadd.f32 %v2366_v41, %v2310_v8 }
 0x1dc   : > { %v2435_v3 = vpop.f32.mrf.mxu1  ;;  %v3328_v56 = vpack.c.b16 %v3327_v32, %v5981_v33 }
 0x1dd   : > { %4146 = vmatmul.msk.bf16.gmra.mxu0 %vm795_vm6, %v5685_v5  ;;  %v2447_v37 = vadd.f32 %v2430_v22, %v2383_v17  ;;  %v3185_v5 = vpack.c.b16 %v2948_v52, %v2947_v49  ;;  %v3254_v22 = vunpack.c.l.b16 %v2619_v7 }
 0x1df   : > { %4179 = vmatmul.msk.bf16.gmra.mxu2 %vm795_vm6, %v5991_v2  ;;  %4162 = vmatmul.msk.bf16.gmra.mxu1 %vm795_vm6, %v6006_v4  ;;  %v6067_v43 = vadd.f32 %v2684_v16, %v2447_v37  ;;  %v3385_v4 = vsel %vm4563_vm5, %v4164_v14, %v3384_v24  ;;  %v3255_v9 = vpack.c.b16 %v3254_v22, %v3021_v29 }
 0x1e0   : > { %v2295_v34 = vpop.f32.mrf.mxu3 }
 0x1e1   : > { %v2311_v60 = vadd.f32 %v2295_v34, %v5984_v57  ;;  %v3391_v57 = vunpack.c.l.b16 %v3385_v4 }
 0x1e2   : > { %v2689_v51 = vpop.f32.mrf.mxu2  ;;  %v2373_v41 = vpop.f32.mrf.mxu0 }
 0x1e3   : > { %v2384_v2 = vadd.f32 %v2368_v20, %v2311_v60  ;;  %v3392_v11 = vpack.c.b16 %v3391_v57, %v3182_v59 }
 0x1e4   : > { %v2437_v6 = vpop.f32.mrf.mxu1 }
 0x1e5   : > { %4130 = vmatmul.msk.bf16.gmra.mxu3 %vm795_vm6, %v3185_v5  ;;  %v2448_v30 = vadd.f32 %v2432_v10, %v2384_v2 }
 0x1e7   : > { %v6079_v44 = vadd.f32 %v2686_v1, %v2448_v30 }
 0x1e8   : > { %v2298_v26 = vpop.f32.mrf.mxu3 }
 0x1e9   : > { %v2312_v49 = vadd.f32 %v2298_v26, %v6002_v36 }
 0x1ea   : > { %v2691_v52 = vpop.f32.mrf.mxu2  ;;  %v2376_v19 = vpop.f32.mrf.mxu0 }
 0x1eb   : > { %v2385_v46 = vadd.f32 %v2371_v63, %v2312_v49 }
 0x1ec   : > { %v2440_v54 = vpop.f32.mrf.mxu1 }
 0x1ed   : > { %4147 = vmatmul.msk.bf16.gmra.mxu0 %vm795_vm6, %v3255_v9  ;;  %v2449_v7 = vadd.f32 %v2435_v3, %v2385_v46 }
 0x1ef   : > { %4180 = vmatmul.msk.bf16.gmra.mxu2 %vm795_vm6, %v3392_v11  ;;  %4163 = vmatmul.msk.bf16.gmra.mxu1 %vm795_vm6, %v3328_v56  ;;  %v6088_v16 = vadd.f32 %v2689_v51, %v2449_v7 }
 0x1f0   : > { %v2300_v36 = vpop.f32.mrf.mxu3 }
 0x1f1   : > { %v2313_v0 = vadd.f32 %v2300_v36, %v6010_v28 }
 0x1f2   : > { %v2694_v42 = vpop.f32.mrf.mxu2  ;;  %v2378_v29 = vpop.f32.mrf.mxu0 }
 0x1f3   : > { %v2386_v27 = vadd.f32 %v2373_v41, %v2313_v0 }
 0x1f4   : > { %v2442_v20 = vpop.f32.mrf.mxu1 }
 0x1f5   : > { %4131 = vmatmul.msk.bf16.gmra.mxu3 %vm795_vm6, %v3186_v47  ;;  %v2450_v33 = vadd.f32 %v2437_v6, %v2386_v27 }
 0x1f7   : > { %v6092_v58 = vadd.f32 %v2691_v52, %v2450_v33 }
 0x1f8   : > { %v2303_v45 = vpop.f32.mrf.mxu3 }
 0x1f9   : > { %v2314_v25 = vadd.f32 %v2303_v45, %v6019_v61 }
 0x1fa   : > { %v2696_v10 = vpop.f32.mrf.mxu2  ;;  %v2987_v59 = vpop.f32.mrf.mxu0 }
 0x1fb   : > { %v2387_v31 = vadd.f32 %v2376_v19, %v2314_v25 }
 0x1fc   : > { %v3059_v38 = vpop.f32.mrf.mxu1 }
 0x1fd   : > { %v2451_v18 = vadd.f32 %v2440_v54, %v2387_v31 }
 0x1ff   : > { %v6095_v23 = vadd.f32 %v2694_v42, %v2451_v18 }
 0x200   : > { %v2305_v28 = vpop.f32.mrf.mxu3 }
 0x201   : > { %v2315_v55 = vadd.f32 %v2305_v28, %v6032_v39 }
 0x202   : > { %v3144_v35 = vpop.f32.mrf.mxu2  ;;  %v2989_v53 = vpop.f32.mrf.mxu0 }
 0x203   : > { %v2388_v8 = vadd.f32 %v2378_v29, %v2315_v55 }
 0x204   : > { %v3061_v47 = vpop.f32.mrf.mxu1 }
 0x205   : > { %v2452_v1 = vadd.f32 %v2442_v20, %v2388_v8 }
 0x207   : > { %v6098_v63 = vadd.f32 %v2696_v10, %v2452_v1 }
 0x208   : > { %v2869_v50 = vpop.f32.mrf.mxu3 }
 0x209   : > { %v2889_v49 = vadd.f32 %v2869_v50, %v6043_v12 }
 0x20a   : > { %v3146_v17 = vpop.f32.mrf.mxu2  ;;  %v2992_v61 = vpop.f32.mrf.mxu0 }
 0x20b   : > { %v3007_v19 = vadd.f32 %v2987_v59, %v2889_v49 }
 0x20c   : > { %v3064_v3 = vpop.f32.mrf.mxu1 }
 0x20d   : > { %v3079_v54 = vadd.f32 %v3059_v38, %v3007_v19 }
 0x20f   : > { %v3164_v0 = vadd.f32 %v3144_v35, %v3079_v54 }
 0x210   : > { %v2871_v21 = vpop.f32.mrf.mxu3 }
 0x211   : > { %v2890_v56 = vadd.f32 %v2871_v21, %v6058_v62 }
 0x212   : > { %v3149_v13 = vpop.f32.mrf.mxu2  ;;  %v2994_v37 = vpop.f32.mrf.mxu0 }
 0x213   : > { %v3008_v36 = vadd.f32 %v2989_v53, %v2890_v56 }
 0x214   : > { %v6100_v14 = vpop.f32.mrf.mxu1 }
 0x215   : > { %v3080_v45 = vadd.f32 %v3061_v47, %v3008_v36 }
 0x217   : > { %v3165_v31 = vadd.f32 %v3146_v17, %v3080_v45 }
 0x218   : > { %v2874_v24 = vpop.f32.mrf.mxu3 }
 0x219   : > { %v2891_v33 = vadd.f32 %v2874_v24, %v6067_v43 }
 0x21a   : > { %v6102_v34 = vpop.f32.mrf.mxu2  ;;  %v6104_v39 = vpop.f32.mrf.mxu0 }
 0x21b   : > { %v3009_v10 = vadd.f32 %v2992_v61, %v2891_v33 }
 0x21c   : > { %v6106_v40 = vpop.f32.mrf.mxu1 }
 0x21d   : > { %v3081_v8 = vadd.f32 %v3064_v3, %v3009_v10 }
 0x21f   : > { %v3166_v21 = vadd.f32 %v3149_v13, %v3081_v8 }
 0x220   : > { %v2876_v48 = vpop.f32.mrf.mxu3 }
 0x221   : > { %v2892_v55 = vadd.f32 %v2876_v48, %v6079_v44 }
 0x222   : > { %v6108_v60 = vpop.f32.mrf.mxu2  ;;  %v6110_v5 = vpop.f32.mrf.mxu0 }
 0x223   : > { %v3010_v47 = vadd.f32 %v2994_v37, %v2892_v55 }
 0x224   : > { %v6112_v51 = vpop.f32.mrf.mxu1 }
 0x228   : > { %v2879_v41 = vpop.f32.mrf.mxu3 }
 0x229   : > { %v2893_v3 = vadd.f32 %v2879_v41, %v6088_v16 }
 0x22a   : > { %v6114_v2 = vpop.f32.mrf.mxu2  ;;  %v6116_v4 = vpop.f32.mrf.mxu0 }
 0x22c   : > { %v6118_v6 = vpop.f32.mrf.mxu1 }
 0x230   : > { %v6120_v15 = vpop.f32.mrf.mxu3 }
 0x231   : > { %v2894_v45 = vadd.f32 %v6120_v15, %v6092_v58 }
 0x232   : > { %v6122_v22 = vpop.f32.mrf.mxu2  ;;  %v6124_v30 = vpop.f32.mrf.mxu0 }
 0x234   : > { %v6126_v57 = vpop.f32.mrf.mxu1 }
 0x238   : > { %v6128_v32 = vpop.f32.mrf.mxu3 }
 0x23a   : > { %v6130_v26 = vpop.f32.mrf.mxu2  ;;  %v3280_v52 = vpop.f32.mrf.mxu0 }
 0x23c   : > { %v3353_v9 = vpop.f32.mrf.mxu1 }
 0x240   : > { %v6133_v11 = vpop.f32.mrf.mxu3 }
 0x242   : > { %v3417_v46 = vpop.f32.mrf.mxu2  ;;  %v3282_v7 = vpop.f32.mrf.mxu0 }
 0x244   : > { %v3355_v29 = vpop.f32.mrf.mxu1 }
 0x248   : > { %v3220_v42 = vpop.f32.mrf.mxu3 }
 0x249   : > { %v3240_v27 = vadd.f32 %v3220_v42, %v3164_v0  ;;  %v3011_v42 = vadd.f32 %v6104_v39, %v2893_v3 }
 0x24a   : > { %v3419_v20 = vpop.f32.mrf.mxu2  ;;  %v3285_v62 = vpop.f32.mrf.mxu0 }
 0x24b   : > { %v3300_v12 = vadd.f32 %v3280_v52, %v3240_v27  ;;  %v3083_v39 = vadd.f32 %v6106_v40, %v3011_v42  ;;  %v2895_v40 = vadd.f32 %v6128_v32, %v6095_v23 }
 0x24c   : > { %v3358_v35 = vpop.f32.mrf.mxu1 }
 0x24d   : > { %v3373_v25 = vadd.f32 %v3353_v9, %v3300_v12 }
 0x24f   : > { %v3437_v59 = vadd.f32 %v3417_v46, %v3373_v25  ;;  %v3082_v46 = vadd.f32 %v6100_v14, %v3010_v47 }
 0x250   : > { %v3222_v18 = vpop.f32.mrf.mxu3 }
 0x251   : > { %v3445_v38 = vpack.c.bf16 %v3437_v59, %v3437_v59  ;;  %v3241_v28 = vadd.f32 %v3222_v18, %v3165_v31  ;;  %v3488_v50 = vmul.f32 %v3437_v59, %v3437_v59  ;;  %v3463_v17 = vsel %vm795_vm6, %v3437_v59, 0.0 }
 0x252   : > { %v3422_v1 = vpop.f32.mrf.mxu2  ;;  %v3287_v19 = vpop.f32.mrf.mxu0  ;;  %v3167_v27 = vadd.f32 %v6102_v34, %v3082_v46 }
 0x253   : > { %3454 = vst.msk [vmem:[%s4462_s10] sm:$0xf] %vm3453_vm10, %v3445_v38  ;;  %v3301_v53 = vadd.f32 %v3282_v7, %v3241_v28  ;;  %v3496_v56 = vsel %vm795_vm6, %v3488_v50, 0.0  ;;  %v3168_v28 = vadd.f32 %v6108_v60, %v3083_v39 }
 0x254   : > { %v3360_v7 = vpop.f32.mrf.mxu1 }
 0x255   : > { %v3374_v43 = vadd.f32 %v3355_v29, %v3301_v53 }
 0x257   : > { %v3438_v61 = vadd.f32 %v3419_v20, %v3374_v43 }
 0x258   : > { %v3225_v24 = vpop.f32.mrf.mxu3 }
 0x259   : > { %v3446_v49 = vpack.c.bf16 %v3438_v61, %v3438_v61  ;;  %v3464_v52 = vsel %vm795_vm6, %v3438_v61, 0.0  ;;  %v3489_v9 = vmul.f32 %v3438_v61, %v3438_v61  ;;  %v3242_v44 = vadd.f32 %v3225_v24, %v3166_v21 }
 0x25a   : > { %v3465_v48 = vadd.f32 %v3464_v52, %v3463_v17  ;;  %v3424_v0 = vpop.f32.mrf.mxu2  ;;  %v3290_v34 = vpop.f32.mrf.mxu0  ;;  %v3013_v21 = vadd.f32 %v6116_v4, %v2895_v40 }
 0x25b   : > { %3455 = vst.msk [vmem:[%s4462_s10 + $0x4] sm:$0xf] %vm3453_vm10, %v3446_v49  ;;  %v3497_v13 = vsel %vm795_vm6, %v3489_v9, 0.0  ;;  %v3302_v37 = vadd.f32 %v3285_v62, %v3242_v44  ;;  %v3012_v62 = vadd.f32 %v6110_v5, %v2894_v45 }
 0x25c   : > { %v3498_v54 = vadd.f32 %v3497_v13, %v3496_v56  ;;  %v3363_v18 = vpop.f32.mrf.mxu1 }
 0x25d   : > { %v3375_v36 = vadd.f32 %v3358_v35, %v3302_v37  ;;  %v3084_v5 = vadd.f32 %v6112_v51, %v3012_v62  ;;  %v2896_v51 = vadd.f32 %v6133_v11, %v6098_v63 }
 0x25f   : > { %v3439_v29 = vadd.f32 %v3422_v1, %v3375_v36  ;;  %v3169_v24 = vadd.f32 %v6114_v2, %v3084_v5  ;;  %v3085_v2 = vadd.f32 %v6118_v6, %v3013_v21  ;;  %v3014_v13 = vadd.f32 %v6124_v30, %v2896_v51 }
 0x260   : > { %v3227_v14 = vpop.f32.mrf.mxu3 }
 0x261   : > { %v3447_v20 = vpack.c.bf16 %v3439_v29, %v3439_v29  ;;  %v3466_v16 = vsel %vm795_vm6, %v3439_v29, 0.0  ;;  %v3490_v41 = vmul.f32 %v3439_v29, %v3439_v29  ;;  %v3243_v33 = vadd.f32 %v3227_v14, %v3167_v27 }
 0x262   : > { %v3467_v12 = vadd.f32 %v3466_v16, %v3465_v48  ;;  %v3427_v55 = vpop.f32.mrf.mxu2  ;;  %v3292_v61 = vpop.f32.mrf.mxu0  ;;  %v3086_v30 = vadd.f32 %v6126_v57, %v3014_v13 }
 0x263   : > { %3456 = vst.msk [vmem:[%s4462_s10 + $0x8] sm:$0xf] %vm3453_vm10, %v3447_v20  ;;  %v3499_v25 = vsel %vm795_vm6, %v3490_v41, 0.0  ;;  %v3303_v10 = vadd.f32 %v3287_v19, %v3243_v33 }
 0x264   : > { %v3500_v59 = vadd.f32 %v3499_v25, %v3498_v54  ;;  %v3365_v49 = vpop.f32.mrf.mxu1  ;;  %v3170_v54 = vadd.f32 %v6122_v22, %v3085_v2  ;;  %v3171_v33 = vadd.f32 %v6130_v26, %v3086_v30 }
 0x265   : > { %v3376_v31 = vadd.f32 %v3360_v7, %v3303_v10 }
 0x267   : > { %v3440_v38 = vadd.f32 %v3424_v0, %v3376_v31 }
 0x268   : > { %v3230_v35 = vpop.f32.mrf.mxu3 }
 0x269   : > { %v3448_v58 = vpack.c.bf16 %v3440_v38, %v3440_v38  ;;  %v3468_v15 = vsel %vm795_vm6, %v3440_v38, 0.0  ;;  %v3491_v53 = vmul.f32 %v3440_v38, %v3440_v38  ;;  %v3244_v8 = vadd.f32 %v3230_v35, %v3168_v28 }
 0x26a   : > { %v3469_v1 = vadd.f32 %v3468_v15, %v3467_v12  ;;  %v3429_v19 = vpop.f32.mrf.mxu2  ;;  %v3295_v7 = vpop.f32.mrf.mxu0 }
 0x26b   : > { %3457 = vst.msk [vmem:[%s4462_s10 + $0xc] sm:$0xf] %vm3453_vm10, %v3448_v58  ;;  %v3501_v43 = vsel %vm795_vm6, %v3491_v53, 0.0  ;;  %v3304_v47 = vadd.f32 %v3290_v34, %v3244_v8 }
 0x26c   : > { %v3502_v60 = vadd.f32 %v3501_v43, %v3500_v59  ;;  %v3368_v27 = vpop.f32.mrf.mxu1 }
 0x26d   : > { %v3377_v50 = vadd.f32 %v3363_v18, %v3304_v47 }
 0x26f   : > { %v3441_v17 = vadd.f32 %v3427_v55, %v3377_v50 }
 0x270   : > { %v3232_v52 = vpop.f32.mrf.mxu3 }
 0x271   : > { %v3449_v9 = vpack.c.bf16 %v3441_v17, %v3441_v17  ;;  %v3470_v23 = vsel %vm795_vm6, %v3441_v17, 0.0  ;;  %v3492_v32 = vmul.f32 %v3441_v17, %v3441_v17  ;;  %v3245_v44 = vadd.f32 %v3232_v52, %v3169_v24  ;;  %v3462_v17 = vld [vmem:[%s4438_s11] sm:$0x1] }
 0x272   : > { %v3471_v48 = vadd.f32 %v3470_v23, %v3469_v1  ;;  %v3432_v16 = vpop.f32.mrf.mxu2  ;;  %v3297_v34 = vpop.f32.mrf.mxu0  ;;  %v3487_v52 = vld [vmem:[%s4443_s16] sm:$0x1] }
 0x273   : > { %3458 = vst.msk [vmem:[%s4462_s10 + $0x10] sm:$0xf] %vm3453_vm10, %v3449_v9  ;;  %v3503_v46 = vsel %vm795_vm6, %v3492_v32, 0.0  ;;  %v3305_v4 = vadd.f32 %v3292_v61, %v3245_v44 }
 0x274   : > { %v3504_v3 = vadd.f32 %v3503_v46, %v3502_v60  ;;  %v3370_v62 = vpop.f32.mrf.mxu1 }
 0x275   : > { %v3378_v56 = vadd.f32 %v3365_v49, %v3305_v4 }
 0x277   : > { %v3442_v37 = vadd.f32 %v3429_v19, %v3378_v56 }
 0x278   : > { %v3235_v36 = vpop.f32.mrf.mxu3 }
 0x279   : > { %v3450_v0 = vpack.c.bf16 %v3442_v37, %v3442_v37  ;;  %v3472_v63 = vsel %vm795_vm6, %v3442_v37, 0.0  ;;  %v3493_v11 = vmul.f32 %v3442_v37, %v3442_v37  ;;  %v3246_v42 = vadd.f32 %v3235_v36, %v3170_v54 }
 0x27a   : > { %v3473_v29 = vadd.f32 %v3472_v63, %v3471_v48  ;;  %v3434_v28 = vpop.f32.mrf.mxu2 }
 0x27b   : > { %3459 = vst.msk [vmem:[%s4462_s10 + $0x14] sm:$0xf] %vm3453_vm10, %v3450_v0  ;;  %v3505_v6 = vsel %vm795_vm6, %v3493_v11, 0.0  ;;  %v3306_v14 = vadd.f32 %v3295_v7, %v3246_v42 }
 0x27c   : > { %v3506_v20 = vadd.f32 %v3505_v6, %v3504_v3 }
 0x27d   : > { %v3379_v22 = vadd.f32 %v3368_v27, %v3306_v14 }
 0x27f   : > { %v3443_v41 = vadd.f32 %v3432_v16, %v3379_v22 }
 0x280   : > { %v3237_v12 = vpop.f32.mrf.mxu3 }
 0x281   : > { %v3451_v45 = vpack.c.bf16 %v3443_v41, %v3443_v41  ;;  %v3474_v25 = vsel %vm795_vm6, %v3443_v41, 0.0  ;;  %v3494_v10 = vmul.f32 %v3443_v41, %v3443_v41  ;;  %v3247_v39 = vadd.f32 %v3237_v12, %v3171_v33 }
 0x282   : > { %v3475_v59 = vadd.f32 %v3474_v25, %v3473_v29 }
 0x283   : > { %3460 = vst.msk [vmem:[%s4462_s10 + $0x18] sm:$0xf] %vm3453_vm10, %v3451_v45  ;;  %v3507_v31 = vsel %vm795_vm6, %v3494_v10, 0.0  ;;  %v3307_v57 = vadd.f32 %v3297_v34, %v3247_v39 }
 0x284   : > { %v3508_v18 = vadd.f32 %v3507_v31, %v3506_v20 }
 0x285   : > { %v3380_v38 = vadd.f32 %v3370_v62, %v3307_v57 }
 0x287   : > { %v3444_v55 = vadd.f32 %v3434_v28, %v3380_v38 }
 0x289   : > { %v3452_v26 = vpack.c.bf16 %v3444_v55, %v3444_v55  ;;  %v3476_v35 = vsel %vm795_vm6, %v3444_v55, 0.0  ;;  %v3495_v58 = vmul.f32 %v3444_v55, %v3444_v55 }
 0x28a   : > { %v3477_v15 = vadd.f32 %v3476_v35, %v3475_v59 }
 0x28b   : > { %3461 = vst.msk [vmem:[%s4462_s10 + $0x1c] sm:$0xf] %vm3453_vm10, %v3452_v26  ;;  %v3509_v53 = vsel %vm795_vm6, %v3495_v58, 0.0 }
 0x28c   : > { %v3478_v8 = vrot.slane %v3477_v15, 4  ;;  %v3510_v1 = vadd.f32 %v3509_v53, %v3508_v18 }
 0x28e   : > { %v3479_v40 = vadd.f32 %v3478_v8, %v3477_v15  ;;  %v3511_v43 = vrot.slane %v3510_v1, 4 }
 0x290   : > { %v3480_v47 = vrot.slane %v3479_v40, 2  ;;  %v3512_v5 = vadd.f32 %v3511_v43, %v3510_v1 }
 0x292   : > { %v3481_v60 = vadd.f32 %v3480_v47, %v3479_v40  ;;  %v3513_v50 = vrot.slane %v3512_v5, 2 }
 0x294   : > { %v3482_v61 = vrot.slane %v3481_v60, 1  ;;  %v3514_v21 = vadd.f32 %v3513_v50, %v3512_v5 }
 0x296   : > { %v3483_v24 = vadd.f32 %v3482_v61, %v3481_v60  ;;  %v3515_v49 = vrot.slane %v3514_v21, 1 }
 0x298   : > { %v3484_v9 = vadd.f32 %v3483_v24, %v3462_v17  ;;  %v3516_v23 = vadd.f32 %v3515_v49, %v3514_v21 }
 0x29a   : > { %3486 = vst.msk [vmem:[%s4438_s11] sm:$0x1] %vm3485_vm11, %v3484_v9  ;;  %v3517_v32 = vadd.f32 %v3516_v23, %v3487_v52 }
 0x29c   : > { %3518 = vst.msk [vmem:[%s4443_s16] sm:$0x1] %vm3485_vm11, %v3517_v32 }
 0x29d PF: > { %s6266_s30 = sld [smem:[#allocation4_spill]] }
 0x29e   : > { %s6267_s27 = sld [smem:[#allocation2_spill]] }
 0x29f   : > { %s6268_s28 = sld [smem:[#allocation3_spill]] }
 0x2a0   : > { %s6269_s29 = sld [smem:[#allocation5_spill]] }
 0x2a3   : > { %s19_s9 = sadd.s32 1, %s6266_s30   ;;  %s6270_s30 = sld [smem:[#allocation6_spill]] }
 0x2a4   : > { %p16_p3 = scmp.ge.s32.totalorder %s19_s9, 18  }
 0x2a6   :  { %18 = sbr.rel (!%p16_p3) target bundleno = 4 (0x4), region = 134 }

</bundles_post_ra>
